<compile_context>
chip_gen: v5e
topology: v5e:2x2
jax: 0.10.0
libtpu: 0.0.40
codegen_flags: <defaults>
</compile_context>

<pallas_src>
import functools
import math

import jax
import jax.numpy as jnp
from jax.experimental import pallas as pl
from jax.experimental.pallas import tpu as pltpu


# ----------------------------------------------------------------------------
# Shared math helpers (used inside the kernel and in the pure-JAX reference)
# ----------------------------------------------------------------------------
def _layer_norm(v, g, b, eps=1e-6):
    mu = jnp.mean(v, axis=-1, keepdims=True)
    c = v - mu
    var = jnp.mean(c * c, axis=-1, keepdims=True)
    return c * jax.lax.rsqrt(var + eps) * g + b


def _layer_mode(i):
    # Matches Encoder.__init__: layers i<3 or i>8 -> 'sa', else 'mba'.
    return "sa" if (i < 3 or i > 8) else "mba"


# ----------------------------------------------------------------------------
# Fused encoder kernel. grid = (batch_blocks [parallel], layers [arbitrary]).
# ----------------------------------------------------------------------------
def _encoder_kernel(mode_ref, mba_ref,                       # SMEM
                    x_ref, y_ref,                            # (R, D) activations
                    ln_ref, qkvw_ref, qkvb_ref, outw_ref, outb_ref,
                    w1_ref, b1_ref, w2_ref, b2_ref, fln_ref,
                    xo_ref, yo_ref,
                    x_scr, y_scr, sx_scr, sy_scr, ctx_scr,
                    *, num_heads, seq_len):
    l = pl.program_id(1)
    num_layers = pl.num_programs(1)

    R, D = x_scr.shape                  # R = Bt * S rows of the batch block
    S = seq_len
    Bt = R // S
    H = num_heads
    dh = D // H
    scale = 1.0 / math.sqrt(dh)
    mxu_dtype = qkvw_ref.dtype          # bf16 (production) or f32

    # Small per-layer params, kept f32.
    ln = ln_ref[...].astype(jnp.float32)        # (8, D)
    qkvb = qkvb_ref[...].astype(jnp.float32)    # (2, 3D)
    outb = outb_ref[...].astype(jnp.float32)    # (2, D)
    b1 = b1_ref[...].astype(jnp.float32)        # (2, M)
    b2 = b2_ref[...].astype(jnp.float32)        # (2, D)

    # Bring activations into the resident f32 carry (once per batch block).
    @pl.when(l == 0)
    def _():
        x_scr[...] = x_ref[...].astype(jnp.float32)
        y_scr[...] = y_ref[...].astype(jnp.float32)

    x = x_scr[...]
    y = y_scr[...]

    def matmul(a_f32, w, bias_row):
        # a_f32: (R, K) f32; w: (K, N) weight-dtype; bias_row: (1, N) f32.
        return jnp.dot(a_f32.astype(mxu_dtype), w,
                       preferred_element_type=jnp.float32) + bias_row

    def mha(q, k, v):
        # q, k, v: (R, D) f32.  Attention per (batch element, head); the
        # per-head contexts are written into ctx_scr (no concatenate).
        qc = q.astype(mxu_dtype)
        kc = k.astype(mxu_dtype)
        vc = v.astype(mxu_dtype)
        for bb in range(Bt):
            r0 = bb * S
            for h in range(H):
                c0 = h * dh
                qh = qc[r0:r0 + S, c0:c0 + dh]
                kh = kc[r0:r0 + S, c0:c0 + dh]
                vh = vc[r0:r0 + S, c0:c0 + dh]
                s = jax.lax.dot_general(
                    qh, kh, (((1,), (1,)), ((), ())),
                    preferred_element_type=jnp.float32) * scale
                p = jax.nn.softmax(s, axis=-1)
                ctx_scr[r0:r0 + S, c0:c0 + dh] = jnp.dot(
                    p.astype(mxu_dtype), vh,
                    preferred_element_type=jnp.float32)
        return ctx_scr[...]

    def out_proj(ctx, i):
        return matmul(ctx, outw_ref[i], outb[i:i + 1])

    # ---------------- attention sub-block --------------------------------
    xn = _layer_norm(x, ln[0:1], ln[1:2])       # attention_norm
    yn = _layer_norm(y, ln[2:3], ln[3:4])       # attention_normd

    qkv_x = matmul(xn, qkvw_ref[0], qkvb[0:1])  # fused [Wq|Wk|Wv]
    qkv_y = matmul(yn, qkvw_ref[1], qkvb[1:2])  # fused [Wqd|Wkd|Wvd]
    q, k, v = qkv_x[:, 0:D], qkv_x[:, D:2 * D], qkv_x[:, 2 * D:3 * D]
    qd, kd, vd = qkv_y[:, 0:D], qkv_y[:, D:2 * D], qkv_y[:, 2 * D:3 * D]

    sx_scr[...] = out_proj(mha(q, k, v), 0)     # self.out(self-attn of x)
    sy_scr[...] = out_proj(mha(qd, kd, vd), 1)  # self.outd(self-attn of y)

    @pl.when(mode_ref[l] != 0)                  # 'mba' layers only
    def _():
        # Note: the out-proj bias rides in both the self and cross paths,
        # exactly as in the PyTorch module (bias scaled by w11+w12 / w21+w22).
        cx = out_proj(mha(q, kd, vd), 0)
        cy = out_proj(mha(qd, k, v), 1)
        w11 = mba_ref[l, 0]
        w12 = mba_ref[l, 1]
        w21 = mba_ref[l, 2]
        w22 = mba_ref[l, 3]
        sx_scr[...] = w11 * sx_scr[...] + w12 * cx
        sy_scr[...] = w21 * sy_scr[...] + w22 * cy

    # attn_dropout / proj_dropout are identity at inference.
    x = x + sx_scr[...]
    y = y + sy_scr[...]

    # ---------------- MLP sub-block ---------------------------------------
    def mlp(v_in, i):
        h = matmul(v_in, w1_ref[i], b1[i:i + 1])
        # TODO(synk): torch.nn.functional.gelu defaults to exact erf GELU; the
        # tanh approximation is used here for robust Mosaic lowering.
        h = jax.nn.gelu(h, approximate=True)
        return matmul(h, w2_ref[i], b2[i:i + 1])

    x = x + mlp(_layer_norm(x, ln[4:5], ln[5:6]), 0)
    y = y + mlp(_layer_norm(y, ln[6:7], ln[7:8]), 1)

    x_scr[...] = x
    y_scr[...] = y

    # -------- final encoder LayerNorm, folded into the last layer step ----
    @pl.when(l == num_layers - 1)
    def _():
        fln = fln_ref[...].astype(jnp.float32)          # (4, D)
        xo_ref[...] = _layer_norm(x, fln[0:1], fln[1:2]).astype(xo_ref.dtype)
        yo_ref[...] = _layer_norm(y, fln[2:3], fln[3:4]).astype(yo_ref.dtype)


# ----------------------------------------------------------------------------
# Wrapper
# ----------------------------------------------------------------------------
def _per_layer_spec(tail):
    zeros = (0,) * len(tail)
    return pl.BlockSpec((None,) + tuple(tail),
                        lambda b, l, _z=zeros: (l,) + _z)


def _vmem_limit_bytes(params, r_rows, act_itemsize):
    per_layer = 0
    for name in ("ln", "qkv_w", "qkv_b", "out_w", "out_b",
                 "mlp_w1", "mlp_b1", "mlp_w2", "mlp_b2"):
        a = params[name]
        per_layer += int(a.size // a.shape[0]) * a.dtype.itemsize
    d = params["ln"].shape[-1]
    act = r_rows * d
    need = 2 * per_layer                    # double-buffered per-layer weights
    need += 4 * 2 * act * act_itemsize      # x/y in + out (double-buffered)
    need += 5 * act * 4                     # f32 VMEM scratch buffers
    need += int(params["final_ln"].size) * params["final_ln"].dtype.itemsize
    # Headroom; clamp to sane bounds.  NOTE: v7x only has 64 MiB VMEM — at
    # production D/M re-derive the weight tiling if this exceeds ~48 MiB.
    return int(min(max(int(need * 1.5), 32 * 1024 * 1024), 128 * 1024 * 1024))


def encoder_pallas(hidden_statesx, hidden_statesy, params, *, num_heads,
                   batch_block=None):
    B, S, D = hidden_statesx.shape
    L = params["ln"].shape[0]
    M = params["mlp_w1"].shape[-1]

    if batch_block is None:
        # Aim for ~128 rows per MXU call.  On v7x consider batch_block=B//2 so
        # both TensorCores get a parallel grid step.
        batch_block = max(1, min(B, max(1, 128 // S)))
        while B % batch_block:
            batch_block -= 1
    Bt = batch_block
    nb = B // Bt
    R = Bt * S

    xf = hidden_statesx.reshape(B * S, D)
    yf = hidden_statesy.reshape(B * S, D)

    kernel = functools.partial(_encoder_kernel, num_heads=num_heads,
                               seq_len=S)

    act_spec = pl.BlockSpec((R, D), lambda b, l: (b, 0))
    smem_spec = pl.BlockSpec(memory_space=pltpu.MemorySpace.SMEM)

    in_specs = [
        smem_spec,                         # mode flags (L,)
        smem_spec,                         # mba scalars (L, 4)
        act_spec, act_spec,                # x, y (flattened rows)
        _per_layer_spec((8, D)),           # stacked LN gamma/beta
        _per_layer_spec((2, D, 3 * D)),    # fused qkv weights (x, y streams)
        _per_layer_spec((2, 3 * D)),       # fused qkv biases
        _per_layer_spec((2, D, D)),        # out-proj weights
        _per_layer_spec((2, D)),           # out-proj biases
        _per_layer_spec((2, D, M)),        # MLP fc1 weights
        _per_layer_spec((2, M)),           # MLP fc1 biases
        _per_layer_spec((2, M, D)),        # MLP fc2 weights
        _per_layer_spec((2, D)),           # MLP fc2 biases
        pl.BlockSpec((4, D), lambda b, l: (0, 0)),   # final encoder LN params
    ]
    out_specs = (act_spec, act_spec)

    scratch_shapes = [pltpu.VMEM((R, D), jnp.float32) for _ in range(5)]

    xof, yof = pl.pallas_call(
        kernel,
        out_shape=(jax.ShapeDtypeStruct((B * S, D), hidden_statesx.dtype),
                   jax.ShapeDtypeStruct((B * S, D), hidden_statesy.dtype)),
        grid=(nb, L),
        in_specs=in_specs,
        out_specs=out_specs,
        scratch_shapes=scratch_shapes,
        compiler_params=pltpu.CompilerParams(
            dimension_semantics=("parallel", "arbitrary"),
            vmem_limit_bytes=_vmem_limit_bytes(
                params, R, jnp.dtype(hidden_statesx.dtype).itemsize)),
    )(params["mode"], params["mba"], xf, yf,
      params["ln"], params["qkv_w"], params["qkv_b"],
      params["out_w"], params["out_b"],
      params["mlp_w1"], params["mlp_b1"], params["mlp_w2"], params["mlp_b2"],
      params["final_ln"])

    return (xof.reshape(B, S, D), yof.reshape(B, S, D), [])


@functools.partial(jax.jit, static_argnames=("num_heads", "batch_block"))
def encoder_forward(hidden_statesx, hidden_statesy, params, *, num_heads,
                    batch_block=None):
    # vis=False -> empty attention-weights list, like the PyTorch Encoder.
    return encoder_pallas(hidden_statesx, hidden_statesy, params,
                          num_heads=num_heads, batch_block=batch_block)


# ----------------------------------------------------------------------------
# Parameter construction (stacked, layer-major)
# ----------------------------------------------------------------------------
def init_params(key, *, num_layers, hidden, mlp_dim,
                weight_dtype=jnp.bfloat16):
    L, D, M = num_layers, hidden, mlp_dim

    def wnorm(k, shape, scl):
        # Weight values are snapped to bf16-representable numbers so the f32
        # reference and the bf16-stored weights are numerically identical.
        w = scl * jax.random.normal(k, shape, jnp.float32)
        return w.astype(jnp.bfloat16).astype(weight_dtype)

    k = jax.random.split(key, 12)
    g = 1.0 + 0.1 * jax.random.normal(k[0], (L, 4, D), jnp.float32)
    b = 0.1 * jax.random.normal(k[1], (L, 4, D), jnp.float32)
    # Rows per layer: [g_att_x, b_att_x, g_att_y, b_att_y,
    #                  g_ffn_x, b_ffn_x, g_ffn_y, b_ffn_y]
    ln = jnp.stack([g, b], axis=2).reshape(L, 8, D)

    gf = 1.0 + 0.1 * jax.random.normal(k[10], (2, D), jnp.float32)
    bf = 0.1 * jax.random.normal(k[11], (2, D), jnp.float32)
    final_ln = jnp.stack([gf[0], bf[0], gf[1], bf[1]], axis=0)   # (4, D)

    return {
        "mode": jnp.array([0 if _layer_mode(i) == "sa" else 1
                           for i in range(L)], jnp.int32),
        "mba": jnp.full((L, 4), 0.5, jnp.float32),   # w11, w12, w21, w22
        "ln": ln,
        "qkv_w": wnorm(k[2], (L, 2, D, 3 * D), D ** -0.5),   # [Wq|Wk|Wv] per stream
        "qkv_b": 0.02 * jax.random.normal(k[3], (L, 2, 3 * D), jnp.float32),
        "out_w": wnorm(k[4], (L, 2, D, D), D ** -0.5),
        "out_b": 0.02 * jax.random.normal(k[5], (L, 2, D), jnp.float32),
        "mlp_w1": wnorm(k[6], (L, 2, D, M), D ** -0.5),
        "mlp_b1": 1e-2 * jax.random.normal(k[7], (L, 2, M), jnp.float32),
        "mlp_w2": wnorm(k[8], (L, 2, M, D), M ** -0.5),
        "mlp_b2": 1e-2 * jax.random.normal(k[9], (L, 2, D), jnp.float32),
        "final_ln": final_ln,
    }


# ----------------------------------------------------------------------------
# Pure-JAX reference (mirrors the PyTorch Encoder forward, inference mode).
# mxu_dtype=float32 -> f32 model math; mxu_dtype=bfloat16 -> emulates the
# kernel's mixed-precision policy (bf16 matmul inputs, f32 accumulate).
# ----------------------------------------------------------------------------
def _ref_mha(q, k, v, num_heads, mxu_dtype):
    B, S, D = q.shape
    dh = D // num_heads
    scale = 1.0 / math.sqrt(dh)

    def split(t):
        return t.astype(mxu_dtype).reshape(B, S, num_heads, dh) \
                .transpose(0, 2, 1, 3)

    qh, kh, vh = split(q), split(k), split(v)
    s = jnp.einsum("bhqd,bhkd->bhqk", qh, kh,
                   preferred_element_type=jnp.float32) * scale
    p = jax.nn.softmax(s, axis=-1)
    c = jnp.einsum("bhqk,bhkd->bhqd", p.astype(mxu_dtype), vh,
                   preferred_element_type=jnp.float32)
    return c.transpose(0, 2, 1, 3).reshape(B, S, D)


def reference_encoder(x, y, params, num_heads, *, mxu_dtype=jnp.float32):
    f32 = jnp.float32
    D = x.shape[-1]
    L = params["ln"].shape[0]
    ln_all = params["ln"].astype(f32)
    qkvw = params["qkv_w"].astype(f32)
    qkvb = params["qkv_b"].astype(f32)
    outw = params["out_w"].astype(f32)
    outb = params["out_b"].astype(f32)
    w1 = params["mlp_w1"].astype(f32)
    b1 = params["mlp_b1"].astype(f32)
    w2 = params["mlp_w2"].astype(f32)
    b2 = params["mlp_b2"].astype(f32)
    mba = params["mba"].astype(f32)

    def mm(a, w):
        return jnp.dot(a.astype(mxu_dtype), w.astype(mxu_dtype),
                       preferred_element_type=f32)

    x = x.astype(f32)
    y = y.astype(f32)
    for i in range(L):
        ln = ln_all[i]
        xn = _layer_norm(x, ln[0], ln[1])
        yn = _layer_norm(y, ln[2], ln[3])
        px = mm(xn, qkvw[i, 0]) + qkvb[i, 0]
        py = mm(yn, qkvw[i, 1]) + qkvb[i, 1]
        q, k, v = px[..., :D], px[..., D:2 * D], px[..., 2 * D:]
        qd, kd, vd = py[..., :D], py[..., D:2 * D], py[..., 2 * D:]

        sx = mm(_ref_mha(q, k, v, num_heads, mxu_dtype), outw[i, 0]) + outb[i, 0]
        sy = mm(_ref_mha(qd, kd, vd, num_heads, mxu_dtype), outw[i, 1]) + outb[i, 1]
        if _layer_mode(i) == "mba":
            cx = mm(_ref_mha(q, kd, vd, num_heads, mxu_dtype), outw[i, 0]) + outb[i, 0]
            cy = mm(_ref_mha(qd, k, v, num_heads, mxu_dtype), outw[i, 1]) + outb[i, 1]
            sx = mba[i, 0] * sx + mba[i, 1] * cx
            sy = mba[i, 2] * sy + mba[i, 3] * cy
        x = x + sx
        y = y + sy

        def mlp(t, j):
            h = jax.nn.gelu(mm(t, w1[i, j]) + b1[i, j], approximate=True)
            return mm(h, w2[i, j]) + b2[i, j]

        x = x + mlp(_layer_norm(x, ln[4], ln[5]), 0)
        y = y + mlp(_layer_norm(y, ln[6], ln[7]), 1)

    fl = params["final_ln"].astype(f32)
    return _layer_norm(x, fl[0], fl[1]), _layer_norm(y, fl[2], fl[3])


# ----------------------------------------------------------------------------
if __name__ == "__main__":
    key = jax.random.PRNGKey(0)
    kx, ky, kp = jax.random.split(key, 3)

    # Small, lane-dense config (hidden is a multiple of 128).  4 layers
    # exercise both 'sa' (layers 0-2) and 'mba' (layer 3) modes.
    B, S, D = 2, 16, 128
    num_heads = 4
    mlp_dim = 256
    num_layers = 4

    hidden_statesx = jax.random.normal(kx, (B, S, D), jnp.float32)
    hidden_statesy = jax.random.normal(ky, (B, S, D), jnp.float32)

    # Production config per the perf review: big matmul weights in bf16.
    params = init_params(kp, num_layers=num_layers, hidden=D,
                         mlp_dim=mlp_dim, weight_dtype=jnp.bfloat16)

    encx, ency, attn_weights = encoder_forward(
        hidden_statesx, hidden_statesy, params, num_heads=num_heads)
    encx, ency = jax.block_until_ready((encx, ency))
    assert encx.shape == (B, S, D) and ency.shape == (B, S, D)
    assert attn_weights == []

    # Tight check against a reference that applies the kernel's documented
    # mixed-precision policy (bf16 matmul inputs, f32 accumulate/elementwise).
    rx_m, ry_m = reference_encoder(hidden_statesx, hidden_statesy, params,
                                   num_heads, mxu_dtype=jnp.bfloat16)
    err_mixed = max(float(jnp.max(jnp.abs(encx - rx_m))),
                    float(jnp.max(jnp.abs(ency - ry_m))))
    assert err_mixed < 5e-3, f"mixed-precision mismatch: {err_mixed}"

    # Sanity bound against the full-f32 reference (PyTorch-equivalent math).
    rx_f, ry_f = reference_encoder(hidden_statesx, hidden_statesy, params,
                                   num_heads, mxu_dtype=jnp.float32)
    err_f32 = max(float(jnp.max(jnp.abs(encx - rx_f))),
                  float(jnp.max(jnp.abs(ency - ry_f))))
    assert err_f32 < 1.5e-1, f"deviation from f32 reference too large: {err_f32}"

    print("KERNEL_OK")
</pallas_src>

<mosaic_0001>
module attributes {stable_mosaic.version = 11 : i64} {
  func.func @_encoder_kernel(%arg0: i32, %arg1: i32, %arg2: memref<4xi32, #tpu.memory_space<smem>>, %arg3: memref<4x4xf32, #tpu.memory_space<smem>>, %arg4: memref<32x128xf32, #tpu.memory_space<vmem>>, %arg5: memref<32x128xf32, #tpu.memory_space<vmem>>, %arg6: memref<1x8x128xf32, #tpu.memory_space<vmem>>, %arg7: memref<1x2x128x384xbf16, #tpu.memory_space<vmem>>, %arg8: memref<1x2x384xf32, #tpu.memory_space<vmem>>, %arg9: memref<1x2x128x128xbf16, #tpu.memory_space<vmem>>, %arg10: memref<1x2x128xf32, #tpu.memory_space<vmem>>, %arg11: memref<1x2x128x256xbf16, #tpu.memory_space<vmem>>, %arg12: memref<1x2x256xf32, #tpu.memory_space<vmem>>, %arg13: memref<1x2x256x128xbf16, #tpu.memory_space<vmem>>, %arg14: memref<1x2x128xf32, #tpu.memory_space<vmem>>, %arg15: memref<4x128xf32, #tpu.memory_space<vmem>>, %arg16: memref<32x128xf32, #tpu.memory_space<vmem>>, %arg17: memref<32x128xf32, #tpu.memory_space<vmem>>, %arg18: memref<32x128xf32, #tpu.memory_space<vmem>>, %arg19: memref<32x128xf32, #tpu.memory_space<vmem>>, %arg20: memref<32x128xf32, #tpu.memory_space<vmem>>, %arg21: memref<32x128xf32, #tpu.memory_space<vmem>>, %arg22: memref<32x128xf32, #tpu.memory_space<vmem>>) attributes {dimension_semantics = [#tpu.dimension_semantics<parallel>, #tpu.dimension_semantics<arbitrary>], iteration_bounds = array<i64: 1, 4>, scalar_prefetch = 0 : i64, scratch_operands = 5 : i64, tpu.core_type = #tpu.core_type<tc>, window_params = [{transform_indices = @transform_0, window_bounds = array<i64: 4>}, {transform_indices = @transform_1, window_bounds = array<i64: 4, 4>}, {transform_indices = @transform_2, window_bounds = array<i64: 32, 128>}, {transform_indices = @transform_3, window_bounds = array<i64: 32, 128>}, {transform_indices = @transform_4, window_bounds = array<i64: 1, 8, 128>}, {transform_indices = @transform_5, window_bounds = array<i64: 1, 2, 128, 384>}, {transform_indices = @transform_6, window_bounds = array<i64: 1, 2, 384>}, {transform_indices = @transform_7, window_bounds = array<i64: 1, 2, 128, 128>}, {transform_indices = @transform_8, window_bounds = array<i64: 1, 2, 128>}, {transform_indices = @transform_9, window_bounds = array<i64: 1, 2, 128, 256>}, {transform_indices = @transform_10, window_bounds = array<i64: 1, 2, 256>}, {transform_indices = @transform_11, window_bounds = array<i64: 1, 2, 256, 128>}, {transform_indices = @transform_12, window_bounds = array<i64: 1, 2, 128>}, {pipeline_mode = #tpu.pipeline_mode<synchronous>, transform_indices = @transform_13, window_bounds = array<i64: 4, 128>}, {transform_indices = @transform_14, window_bounds = array<i64: 32, 128>}, {transform_indices = @transform_15, window_bounds = array<i64: 32, 128>}]} {
    %c0 = arith.constant 0 : index
    %c0_0 = arith.constant 0 : index
    %c0_1 = arith.constant 0 : index
    %0 = vector.load %arg6[%c0, %c0_0, %c0_1] : memref<1x8x128xf32, #tpu.memory_space<vmem>>, vector<1x8x128xf32>
    %1 = vector.shape_cast %0 : vector<1x8x128xf32> to vector<8x128xf32>
    %c0_2 = arith.constant 0 : index
    %c0_3 = arith.constant 0 : index
    %c0_4 = arith.constant 0 : index
    %2 = vector.load %arg8[%c0_2, %c0_3, %c0_4] : memref<1x2x384xf32, #tpu.memory_space<vmem>>, vector<1x2x384xf32>
    %3 = vector.shape_cast %2 : vector<1x2x384xf32> to vector<2x384xf32>
    %c0_5 = arith.constant 0 : index
    %c0_6 = arith.constant 0 : index
    %c0_7 = arith.constant 0 : index
    %4 = vector.load %arg10[%c0_5, %c0_6, %c0_7] : memref<1x2x128xf32, #tpu.memory_space<vmem>>, vector<1x2x128xf32>
    %5 = vector.shape_cast %4 : vector<1x2x128xf32> to vector<2x128xf32>
    %c0_8 = arith.constant 0 : index
    %c0_9 = arith.constant 0 : index
    %c0_10 = arith.constant 0 : index
    %6 = vector.load %arg12[%c0_8, %c0_9, %c0_10] : memref<1x2x256xf32, #tpu.memory_space<vmem>>, vector<1x2x256xf32>
    %7 = vector.shape_cast %6 : vector<1x2x256xf32> to vector<2x256xf32>
    %c0_11 = arith.constant 0 : index
    %c0_12 = arith.constant 0 : index
    %c0_13 = arith.constant 0 : index
    %8 = vector.load %arg14[%c0_11, %c0_12, %c0_13] : memref<1x2x128xf32, #tpu.memory_space<vmem>>, vector<1x2x128xf32>
    %9 = vector.shape_cast %8 : vector<1x2x128xf32> to vector<2x128xf32>
    %c0_i32 = arith.constant 0 : i32
    %10 = arith.cmpi eq, %arg1, %c0_i32 : i32
    %11 = arith.extui %10 : i1 to i32
    %c0_i32_14 = arith.constant 0 : i32
    %12 = arith.cmpi ne, %11, %c0_i32_14 : i32
    scf.if %12 {
      %c0_228 = arith.constant 0 : index
      %c0_229 = arith.constant 0 : index
      %537 = vector.load %arg4[%c0_228, %c0_229] : memref<32x128xf32, #tpu.memory_space<vmem>>, vector<32x128xf32>
      %c0_230 = arith.constant 0 : index
      %c0_231 = arith.constant 0 : index
      %538 = vector.load %arg18[%c0_230, %c0_231] : memref<32x128xf32, #tpu.memory_space<vmem>>, vector<32x128xf32>
      tpu.vector_store %arg18[%c0_230, %c0_231], %537 {strides = array<i32>} : memref<32x128xf32, #tpu.memory_space<vmem>>, vector<32x128xf32>,
      %c0_232 = arith.constant 0 : index
      %c0_233 = arith.constant 0 : index
      %539 = vector.load %arg5[%c0_232, %c0_233] : memref<32x128xf32, #tpu.memory_space<vmem>>, vector<32x128xf32>
      %c0_234 = arith.constant 0 : index
      %c0_235 = arith.constant 0 : index
      %540 = vector.load %arg19[%c0_234, %c0_235] : memref<32x128xf32, #tpu.memory_space<vmem>>, vector<32x128xf32>
      tpu.vector_store %arg19[%c0_234, %c0_235], %539 {strides = array<i32>} : memref<32x128xf32, #tpu.memory_space<vmem>>, vector<32x128xf32>,
    } else {
    }
    %c0_15 = arith.constant 0 : index
    %c0_16 = arith.constant 0 : index
    %13 = vector.load %arg18[%c0_15, %c0_16] : memref<32x128xf32, #tpu.memory_space<vmem>>, vector<32x128xf32>
    %c0_17 = arith.constant 0 : index
    %c0_18 = arith.constant 0 : index
    %14 = vector.load %arg19[%c0_17, %c0_18] : memref<32x128xf32, #tpu.memory_space<vmem>>, vector<32x128xf32>
    %15 = vector.extract_strided_slice %1 {offsets = [0, 0], sizes = [1, 128], strides = [1, 1]} : vector<8x128xf32> to vector<1x128xf32>
    %16 = vector.extract_strided_slice %1 {offsets = [1, 0], sizes = [1, 128], strides = [1, 1]} : vector<8x128xf32> to vector<1x128xf32>
    %cst = arith.constant dense<0.000000e+00> : vector<32xf32>
    %17 = vector.multi_reduction <add>, %13, %cst [1] : vector<32x128xf32> to vector<32xf32>
    %18 = vector.shape_cast %17 : vector<32xf32> to vector<32x1xf32>
    %cst_19 = arith.constant 1.280000e+02 : f32
    %19 = vector.broadcast %cst_19 : f32 to vector<32x1xf32>
    %20 = arith.divf %18, %19 : vector<32x1xf32>
    %21 = vector.broadcast %20 : vector<32x1xf32> to vector<32x128xf32>
    %22 = arith.subf %13, %21 : vector<32x128xf32>
    %23 = arith.mulf %22, %22 : vector<32x128xf32>
    %cst_20 = arith.constant dense<0.000000e+00> : vector<32xf32>
    %24 = vector.multi_reduction <add>, %23, %cst_20 [1] : vector<32x128xf32> to vector<32xf32>
    %25 = vector.shape_cast %24 : vector<32xf32> to vector<32x1xf32>
    %cst_21 = arith.constant 1.280000e+02 : f32
    %26 = vector.broadcast %cst_21 : f32 to vector<32x1xf32>
    %27 = arith.divf %25, %26 : vector<32x1xf32>
    %cst_22 = arith.constant 9.99999997E-7 : f32
    %28 = vector.broadcast %cst_22 : f32 to vector<32x1xf32>
    %29 = arith.addf %27, %28 : vector<32x1xf32>
    %30 = math.rsqrt %29 : vector<32x1xf32>
    %31 = vector.broadcast %30 : vector<32x1xf32> to vector<32x128xf32>
    %32 = arith.mulf %22, %31 : vector<32x128xf32>
    %33 = vector.broadcast %15 : vector<1x128xf32> to vector<32x128xf32>
    %34 = arith.mulf %32, %33 : vector<32x128xf32>
    %35 = vector.broadcast %16 : vector<1x128xf32> to vector<32x128xf32>
    %36 = arith.addf %34, %35 : vector<32x128xf32>
    %37 = vector.extract_strided_slice %1 {offsets = [2, 0], sizes = [1, 128], strides = [1, 1]} : vector<8x128xf32> to vector<1x128xf32>
    %38 = vector.extract_strided_slice %1 {offsets = [3, 0], sizes = [1, 128], strides = [1, 1]} : vector<8x128xf32> to vector<1x128xf32>
    %cst_23 = arith.constant dense<0.000000e+00> : vector<32xf32>
    %39 = vector.multi_reduction <add>, %14, %cst_23 [1] : vector<32x128xf32> to vector<32xf32>
    %40 = vector.shape_cast %39 : vector<32xf32> to vector<32x1xf32>
    %cst_24 = arith.constant 1.280000e+02 : f32
    %41 = vector.broadcast %cst_24 : f32 to vector<32x1xf32>
    %42 = arith.divf %40, %41 : vector<32x1xf32>
    %43 = vector.broadcast %42 : vector<32x1xf32> to vector<32x128xf32>
    %44 = arith.subf %14, %43 : vector<32x128xf32>
    %45 = arith.mulf %44, %44 : vector<32x128xf32>
    %cst_25 = arith.constant dense<0.000000e+00> : vector<32xf32>
    %46 = vector.multi_reduction <add>, %45, %cst_25 [1] : vector<32x128xf32> to vector<32xf32>
    %47 = vector.shape_cast %46 : vector<32xf32> to vector<32x1xf32>
    %cst_26 = arith.constant 1.280000e+02 : f32
    %48 = vector.broadcast %cst_26 : f32 to vector<32x1xf32>
    %49 = arith.divf %47, %48 : vector<32x1xf32>
    %cst_27 = arith.constant 9.99999997E-7 : f32
    %50 = vector.broadcast %cst_27 : f32 to vector<32x1xf32>
    %51 = arith.addf %49, %50 : vector<32x1xf32>
    %52 = math.rsqrt %51 : vector<32x1xf32>
    %53 = vector.broadcast %52 : vector<32x1xf32> to vector<32x128xf32>
    %54 = arith.mulf %44, %53 : vector<32x128xf32>
    %55 = vector.broadcast %37 : vector<1x128xf32> to vector<32x128xf32>
    %56 = arith.mulf %54, %55 : vector<32x128xf32>
    %57 = vector.broadcast %38 : vector<1x128xf32> to vector<32x128xf32>
    %58 = arith.addf %56, %57 : vector<32x128xf32>
    %c0_28 = arith.constant 0 : index
    %c0_29 = arith.constant 0 : index
    %c0_30 = arith.constant 0 : index
    %c0_31 = arith.constant 0 : index
    %59 = vector.load %arg7[%c0_28, %c0_29, %c0_30, %c0_31] : memref<1x2x128x384xbf16, #tpu.memory_space<vmem>>, vector<1x1x128x384xbf16>
    %60 = vector.shape_cast %59 : vector<1x1x128x384xbf16> to vector<128x384xbf16>
    %61 = vector.extract_strided_slice %3 {offsets = [0, 0], sizes = [1, 384], strides = [1, 1]} : vector<2x384xf32> to vector<1x384xf32>
    %62 = arith.truncf %36 : vector<32x128xf32> to vector<32x128xbf16>
    %cst_32 = arith.constant dense<0.000000e+00> : vector<32x384xf32>
    %63 = tpu.matmul %62, %60, %cst_32 {dimension_numbers = #tpu.dot_dimension_numbers<[1], [0], [0], [1], [0, 0, 1, 1], [], []>} : vector<32x128xbf16>, vector<128x384xbf16>, vector<32x384xf32> -> vector<32x384xf32>
    %64 = vector.broadcast %61 : vector<1x384xf32> to vector<32x384xf32>
    %65 = arith.addf %63, %64 : vector<32x384xf32>
    %c0_33 = arith.constant 0 : index
    %c1 = arith.constant 1 : index
    %c0_34 = arith.constant 0 : index
    %c0_35 = arith.constant 0 : index
    %66 = vector.load %arg7[%c0_33, %c1, %c0_34, %c0_35] : memref<1x2x128x384xbf16, #tpu.memory_space<vmem>>, vector<1x1x128x384xbf16>
    %67 = vector.shape_cast %66 : vector<1x1x128x384xbf16> to vector<128x384xbf16>
    %68 = vector.extract_strided_slice %3 {offsets = [1, 0], sizes = [1, 384], strides = [1, 1]} : vector<2x384xf32> to vector<1x384xf32>
    %69 = arith.truncf %58 : vector<32x128xf32> to vector<32x128xbf16>
    %cst_36 = arith.constant dense<0.000000e+00> : vector<32x384xf32>
    %70 = tpu.matmul %69, %67, %cst_36 {dimension_numbers = #tpu.dot_dimension_numbers<[1], [0], [0], [1], [0, 0, 1, 1], [], []>} : vector<32x128xbf16>, vector<128x384xbf16>, vector<32x384xf32> -> vector<32x384xf32>
    %71 = vector.broadcast %68 : vector<1x384xf32> to vector<32x384xf32>
    %72 = arith.addf %70, %71 : vector<32x384xf32>
    %73 = vector.extract_strided_slice %65 {offsets = [0, 0], sizes = [32, 128], strides = [1, 1]} : vector<32x384xf32> to vector<32x128xf32>
    %74 = vector.extract_strided_slice %65 {offsets = [0, 128], sizes = [32, 128], strides = [1, 1]} : vector<32x384xf32> to vector<32x128xf32>
    %75 = vector.extract_strided_slice %65 {offsets = [0, 256], sizes = [32, 128], strides = [1, 1]} : vector<32x384xf32> to vector<32x128xf32>
    %76 = vector.extract_strided_slice %72 {offsets = [0, 0], sizes = [32, 128], strides = [1, 1]} : vector<32x384xf32> to vector<32x128xf32>
    %77 = vector.extract_strided_slice %72 {offsets = [0, 128], sizes = [32, 128], strides = [1, 1]} : vector<32x384xf32> to vector<32x128xf32>
    %78 = vector.extract_strided_slice %72 {offsets = [0, 256], sizes = [32, 128], strides = [1, 1]} : vector<32x384xf32> to vector<32x128xf32>
    %79 = arith.truncf %73 : vector<32x128xf32> to vector<32x128xbf16>
    %80 = arith.truncf %74 : vector<32x128xf32> to vector<32x128xbf16>
    %81 = arith.truncf %75 : vector<32x128xf32> to vector<32x128xbf16>
    %82 = vector.extract_strided_slice %79 {offsets = [0, 0], sizes = [16, 32], strides = [1, 1]} : vector<32x128xbf16> to vector<16x32xbf16>
    %83 = vector.extract_strided_slice %80 {offsets = [0, 0], sizes = [16, 32], strides = [1, 1]} : vector<32x128xbf16> to vector<16x32xbf16>
    %84 = vector.extract_strided_slice %81 {offsets = [0, 0], sizes = [16, 32], strides = [1, 1]} : vector<32x128xbf16> to vector<16x32xbf16>
    %cst_37 = arith.constant dense<0.000000e+00> : vector<16x16xf32>
    %85 = tpu.matmul %82, %83, %cst_37 {dimension_numbers = #tpu.dot_dimension_numbers<[1], [1], [0], [0], [0, 0, 1, 0], [], []>} : vector<16x32xbf16>, vector<16x32xbf16>, vector<16x16xf32> -> vector<16x16xf32>
    %cst_38 = arith.constant 0.176776692 : f32
    %86 = vector.broadcast %cst_38 : f32 to vector<16x16xf32>
    %87 = arith.mulf %85, %86 : vector<16x16xf32>
    %cst_39 = arith.constant dense<0xFF800000> : vector<16xf32>
    %88 = vector.multi_reduction <maximumf>, %87, %cst_39 [1] : vector<16x16xf32> to vector<16xf32>
    %cst_40 = arith.constant 0xFF800000 : f32
    %89 = vector.broadcast %cst_40 : f32 to vector<16xf32>
    %90 = arith.maximumf %89, %88 : vector<16xf32>
    %91 = vector.shape_cast %90 : vector<16xf32> to vector<16x1xf32>
    %92 = vector.broadcast %91 : vector<16x1xf32> to vector<16x16xf32>
    %93 = arith.subf %87, %92 : vector<16x16xf32>
    %94 = math.exp %93 : vector<16x16xf32>
    %cst_41 = arith.constant dense<0.000000e+00> : vector<16xf32>
    %95 = vector.multi_reduction <add>, %94, %cst_41 [1] : vector<16x16xf32> to vector<16xf32>
    %96 = vector.shape_cast %95 : vector<16xf32> to vector<16x1xf32>
    %97 = vector.broadcast %96 : vector<16x1xf32> to vector<16x16xf32>
    %98 = arith.divf %94, %97 : vector<16x16xf32>
    %99 = arith.truncf %98 : vector<16x16xf32> to vector<16x16xbf16>
    %cst_42 = arith.constant dense<0.000000e+00> : vector<16x32xf32>
    %100 = tpu.matmul %99, %84, %cst_42 {dimension_numbers = #tpu.dot_dimension_numbers<[1], [0], [0], [1], [0, 0, 1, 1], [], []>} : vector<16x16xbf16>, vector<16x32xbf16>, vector<16x32xf32> -> vector<16x32xf32>
    %c0_43 = arith.constant 0 : index
    %c0_44 = arith.constant 0 : index
    %101 = vector.load %arg22[%c0_43, %c0_44] : memref<32x128xf32, #tpu.memory_space<vmem>>, vector<16x32xf32>
    tpu.vector_store %arg22[%c0_43, %c0_44], %100 {strides = array<i32>} : memref<32x128xf32, #tpu.memory_space<vmem>>, vector<16x32xf32>,
    %102 = vector.extract_strided_slice %79 {offsets = [0, 32], sizes = [16, 32], strides = [1, 1]} : vector<32x128xbf16> to vector<16x32xbf16>
    %103 = vector.extract_strided_slice %80 {offsets = [0, 32], sizes = [16, 32], strides = [1, 1]} : vector<32x128xbf16> to vector<16x32xbf16>
    %104 = vector.extract_strided_slice %81 {offsets = [0, 32], sizes = [16, 32], strides = [1, 1]} : vector<32x128xbf16> to vector<16x32xbf16>
    %cst_45 = arith.constant dense<0.000000e+00> : vector<16x16xf32>
    %105 = tpu.matmul %102, %103, %cst_45 {dimension_numbers = #tpu.dot_dimension_numbers<[1], [1], [0], [0], [0, 0, 1, 0], [], []>} : vector<16x32xbf16>, vector<16x32xbf16>, vector<16x16xf32> -> vector<16x16xf32>
    %cst_46 = arith.constant 0.176776692 : f32
    %106 = vector.broadcast %cst_46 : f32 to vector<16x16xf32>
    %107 = arith.mulf %105, %106 : vector<16x16xf32>
    %cst_47 = arith.constant dense<0xFF800000> : vector<16xf32>
    %108 = vector.multi_reduction <maximumf>, %107, %cst_47 [1] : vector<16x16xf32> to vector<16xf32>
    %cst_48 = arith.constant 0xFF800000 : f32
    %109 = vector.broadcast %cst_48 : f32 to vector<16xf32>
    %110 = arith.maximumf %109, %108 : vector<16xf32>
    %111 = vector.shape_cast %110 : vector<16xf32> to vector<16x1xf32>
    %112 = vector.broadcast %111 : vector<16x1xf32> to vector<16x16xf32>
    %113 = arith.subf %107, %112 : vector<16x16xf32>
    %114 = math.exp %113 : vector<16x16xf32>
    %cst_49 = arith.constant dense<0.000000e+00> : vector<16xf32>
    %115 = vector.multi_reduction <add>, %114, %cst_49 [1] : vector<16x16xf32> to vector<16xf32>
    %116 = vector.shape_cast %115 : vector<16xf32> to vector<16x1xf32>
    %117 = vector.broadcast %116 : vector<16x1xf32> to vector<16x16xf32>
    %118 = arith.divf %114, %117 : vector<16x16xf32>
    %119 = arith.truncf %118 : vector<16x16xf32> to vector<16x16xbf16>
    %cst_50 = arith.constant dense<0.000000e+00> : vector<16x32xf32>
    %120 = tpu.matmul %119, %104, %cst_50 {dimension_numbers = #tpu.dot_dimension_numbers<[1], [0], [0], [1], [0, 0, 1, 1], [], []>} : vector<16x16xbf16>, vector<16x32xbf16>, vector<16x32xf32> -> vector<16x32xf32>
    %c0_51 = arith.constant 0 : index
    %c32 = arith.constant 32 : index
    %121 = vector.load %arg22[%c0_51, %c32] : memref<32x128xf32, #tpu.memory_space<vmem>>, vector<16x32xf32>
    tpu.vector_store %arg22[%c0_51, %c32], %120 {strides = array<i32>} : memref<32x128xf32, #tpu.memory_space<vmem>>, vector<16x32xf32>,
    %122 = vector.extract_strided_slice %79 {offsets = [0, 64], sizes = [16, 32], strides = [1, 1]} : vector<32x128xbf16> to vector<16x32xbf16>
    %123 = vector.extract_strided_slice %80 {offsets = [0, 64], sizes = [16, 32], strides = [1, 1]} : vector<32x128xbf16> to vector<16x32xbf16>
    %124 = vector.extract_strided_slice %81 {offsets = [0, 64], sizes = [16, 32], strides = [1, 1]} : vector<32x128xbf16> to vector<16x32xbf16>
    %cst_52 = arith.constant dense<0.000000e+00> : vector<16x16xf32>
    %125 = tpu.matmul %122, %123, %cst_52 {dimension_numbers = #tpu.dot_dimension_numbers<[1], [1], [0], [0], [0, 0, 1, 0], [], []>} : vector<16x32xbf16>, vector<16x32xbf16>, vector<16x16xf32> -> vector<16x16xf32>
    %cst_53 = arith.constant 0.176776692 : f32
    %126 = vector.broadcast %cst_53 : f32 to vector<16x16xf32>
    %127 = arith.mulf %125, %126 : vector<16x16xf32>
    %cst_54 = arith.constant dense<0xFF800000> : vector<16xf32>
    %128 = vector.multi_reduction <maximumf>, %127, %cst_54 [1] : vector<16x16xf32> to vector<16xf32>
    %cst_55 = arith.constant 0xFF800000 : f32
    %129 = vector.broadcast %cst_55 : f32 to vector<16xf32>
    %130 = arith.maximumf %129, %128 : vector<16xf32>
    %131 = vector.shape_cast %130 : vector<16xf32> to vector<16x1xf32>
    %132 = vector.broadcast %131 : vector<16x1xf32> to vector<16x16xf32>
    %133 = arith.subf %127, %132 : vector<16x16xf32>
    %134 = math.exp %133 : vector<16x16xf32>
    %cst_56 = arith.constant dense<0.000000e+00> : vector<16xf32>
    %135 = vector.multi_reduction <add>, %134, %cst_56 [1] : vector<16x16xf32> to vector<16xf32>
    %136 = vector.shape_cast %135 : vector<16xf32> to vector<16x1xf32>
    %137 = vector.broadcast %136 : vector<16x1xf32> to vector<16x16xf32>
    %138 = arith.divf %134, %137 : vector<16x16xf32>
    %139 = arith.truncf %138 : vector<16x16xf32> to vector<16x16xbf16>
    %cst_57 = arith.constant dense<0.000000e+00> : vector<16x32xf32>
    %140 = tpu.matmul %139, %124, %cst_57 {dimension_numbers = #tpu.dot_dimension_numbers<[1], [0], [0], [1], [0, 0, 1, 1], [], []>} : vector<16x16xbf16>, vector<16x32xbf16>, vector<16x32xf32> -> vector<16x32xf32>
    %c0_58 = arith.constant 0 : index
    %c64 = arith.constant 64 : index
    %141 = vector.load %arg22[%c0_58, %c64] : memref<32x128xf32, #tpu.memory_space<vmem>>, vector<16x32xf32>
    tpu.vector_store %arg22[%c0_58, %c64], %140 {strides = array<i32>} : memref<32x128xf32, #tpu.memory_space<vmem>>, vector<16x32xf32>,
    %142 = vector.extract_strided_slice %79 {offsets = [0, 96], sizes = [16, 32], strides = [1, 1]} : vector<32x128xbf16> to vector<16x32xbf16>
    %143 = vector.extract_strided_slice %80 {offsets = [0, 96], sizes = [16, 32], strides = [1, 1]} : vector<32x128xbf16> to vector<16x32xbf16>
    %144 = vector.extract_strided_slice %81 {offsets = [0, 96], sizes = [16, 32], strides = [1, 1]} : vector<32x128xbf16> to vector<16x32xbf16>
    %cst_59 = arith.constant dense<0.000000e+00> : vector<16x16xf32>
    %145 = tpu.matmul %142, %143, %cst_59 {dimension_numbers = #tpu.dot_dimension_numbers<[1], [1], [0], [0], [0, 0, 1, 0], [], []>} : vector<16x32xbf16>, vector<16x32xbf16>, vector<16x16xf32> -> vector<16x16xf32>
    %cst_60 = arith.constant 0.176776692 : f32
    %146 = vector.broadcast %cst_60 : f32 to vector<16x16xf32>
    %147 = arith.mulf %145, %146 : vector<16x16xf32>
    %cst_61 = arith.constant dense<0xFF800000> : vector<16xf32>
    %148 = vector.multi_reduction <maximumf>, %147, %cst_61 [1] : vector<16x16xf32> to vector<16xf32>
    %cst_62 = arith.constant 0xFF800000 : f32
    %149 = vector.broadcast %cst_62 : f32 to vector<16xf32>
    %150 = arith.maximumf %149, %148 : vector<16xf32>
    %151 = vector.shape_cast %150 : vector<16xf32> to vector<16x1xf32>
    %152 = vector.broadcast %151 : vector<16x1xf32> to vector<16x16xf32>
    %153 = arith.subf %147, %152 : vector<16x16xf32>
    %154 = math.exp %153 : vector<16x16xf32>
    %cst_63 = arith.constant dense<0.000000e+00> : vector<16xf32>
    %155 = vector.multi_reduction <add>, %154, %cst_63 [1] : vector<16x16xf32> to vector<16xf32>
    %156 = vector.shape_cast %155 : vector<16xf32> to vector<16x1xf32>
    %157 = vector.broadcast %156 : vector<16x1xf32> to vector<16x16xf32>
    %158 = arith.divf %154, %157 : vector<16x16xf32>
    %159 = arith.truncf %158 : vector<16x16xf32> to vector<16x16xbf16>
    %cst_64 = arith.constant dense<0.000000e+00> : vector<16x32xf32>
    %160 = tpu.matmul %159, %144, %cst_64 {dimension_numbers = #tpu.dot_dimension_numbers<[1], [0], [0], [1], [0, 0, 1, 1], [], []>} : vector<16x16xbf16>, vector<16x32xbf16>, vector<16x32xf32> -> vector<16x32xf32>
    %c0_65 = arith.constant 0 : index
    %c96 = arith.constant 96 : index
    %161 = vector.load %arg22[%c0_65, %c96] : memref<32x128xf32, #tpu.memory_space<vmem>>, vector<16x32xf32>
    tpu.vector_store %arg22[%c0_65, %c96], %160 {strides = array<i32>} : memref<32x128xf32, #tpu.memory_space<vmem>>, vector<16x32xf32>,
    %162 = vector.extract_strided_slice %79 {offsets = [16, 0], sizes = [16, 32], strides = [1, 1]} : vector<32x128xbf16> to vector<16x32xbf16>
    %163 = vector.extract_strided_slice %80 {offsets = [16, 0], sizes = [16, 32], strides = [1, 1]} : vector<32x128xbf16> to vector<16x32xbf16>
    %164 = vector.extract_strided_slice %81 {offsets = [16, 0], sizes = [16, 32], strides = [1, 1]} : vector<32x128xbf16> to vector<16x32xbf16>
    %cst_66 = arith.constant dense<0.000000e+00> : vector<16x16xf32>
    %165 = tpu.matmul %162, %163, %cst_66 {dimension_numbers = #tpu.dot_dimension_numbers<[1], [1], [0], [0], [0, 0, 1, 0], [], []>} : vector<16x32xbf16>, vector<16x32xbf16>, vector<16x16xf32> -> vector<16x16xf32>
    %cst_67 = arith.constant 0.176776692 : f32
    %166 = vector.broadcast %cst_67 : f32 to vector<16x16xf32>
    %167 = arith.mulf %165, %166 : vector<16x16xf32>
    %cst_68 = arith.constant dense<0xFF800000> : vector<16xf32>
    %168 = vector.multi_reduction <maximumf>, %167, %cst_68 [1] : vector<16x16xf32> to vector<16xf32>
    %cst_69 = arith.constant 0xFF800000 : f32
    %169 = vector.broadcast %cst_69 : f32 to vector<16xf32>
    %170 = arith.maximumf %169, %168 : vector<16xf32>
    %171 = vector.shape_cast %170 : vector<16xf32> to vector<16x1xf32>
    %172 = vector.broadcast %171 : vector<16x1xf32> to vector<16x16xf32>
    %173 = arith.subf %167, %172 : vector<16x16xf32>
    %174 = math.exp %173 : vector<16x16xf32>
    %cst_70 = arith.constant dense<0.000000e+00> : vector<16xf32>
    %175 = vector.multi_reduction <add>, %174, %cst_70 [1] : vector<16x16xf32> to vector<16xf32>
    %176 = vector.shape_cast %175 : vector<16xf32> to vector<16x1xf32>
    %177 = vector.broadcast %176 : vector<16x1xf32> to vector<16x16xf32>
    %178 = arith.divf %174, %177 : vector<16x16xf32>
    %179 = arith.truncf %178 : vector<16x16xf32> to vector<16x16xbf16>
    %cst_71 = arith.constant dense<0.000000e+00> : vector<16x32xf32>
    %180 = tpu.matmul %179, %164, %cst_71 {dimension_numbers = #tpu.dot_dimension_numbers<[1], [0], [0], [1], [0, 0, 1, 1], [], []>} : vector<16x16xbf16>, vector<16x32xbf16>, vector<16x32xf32> -> vector<16x32xf32>
    %c16 = arith.constant 16 : index
    %c0_72 = arith.constant 0 : index
    %181 = vector.load %arg22[%c16, %c0_72] : memref<32x128xf32, #tpu.memory_space<vmem>>, vector<16x32xf32>
    tpu.vector_store %arg22[%c16, %c0_72], %180 {strides = array<i32>} : memref<32x128xf32, #tpu.memory_space<vmem>>, vector<16x32xf32>,
    %182 = vector.extract_strided_slice %79 {offsets = [16, 32], sizes = [16, 32], strides = [1, 1]} : vector<32x128xbf16> to vector<16x32xbf16>
    %183 = vector.extract_strided_slice %80 {offsets = [16, 32], sizes = [16, 32], strides = [1, 1]} : vector<32x128xbf16> to vector<16x32xbf16>
    %184 = vector.extract_strided_slice %81 {offsets = [16, 32], sizes = [16, 32], strides = [1, 1]} : vector<32x128xbf16> to vector<16x32xbf16>
    %cst_73 = arith.constant dense<0.000000e+00> : vector<16x16xf32>
    %185 = tpu.matmul %182, %183, %cst_73 {dimension_numbers = #tpu.dot_dimension_numbers<[1], [1], [0], [0], [0, 0, 1, 0], [], []>} : vector<16x32xbf16>, vector<16x32xbf16>, vector<16x16xf32> -> vector<16x16xf32>
    %cst_74 = arith.constant 0.176776692 : f32
    %186 = vector.broadcast %cst_74 : f32 to vector<16x16xf32>
    %187 = arith.mulf %185, %186 : vector<16x16xf32>
    %cst_75 = arith.constant dense<0xFF800000> : vector<16xf32>
    %188 = vector.multi_reduction <maximumf>, %187, %cst_75 [1] : vector<16x16xf32> to vector<16xf32>
    %cst_76 = arith.constant 0xFF800000 : f32
    %189 = vector.broadcast %cst_76 : f32 to vector<16xf32>
    %190 = arith.maximumf %189, %188 : vector<16xf32>
    %191 = vector.shape_cast %190 : vector<16xf32> to vector<16x1xf32>
    %192 = vector.broadcast %191 : vector<16x1xf32> to vector<16x16xf32>
    %193 = arith.subf %187, %192 : vector<16x16xf32>
    %194 = math.exp %193 : vector<16x16xf32>
    %cst_77 = arith.constant dense<0.000000e+00> : vector<16xf32>
    %195 = vector.multi_reduction <add>, %194, %cst_77 [1] : vector<16x16xf32> to vector<16xf32>
    %196 = vector.shape_cast %195 : vector<16xf32> to vector<16x1xf32>
    %197 = vector.broadcast %196 : vector<16x1xf32> to vector<16x16xf32>
    %198 = arith.divf %194, %197 : vector<16x16xf32>
    %199 = arith.truncf %198 : vector<16x16xf32> to vector<16x16xbf16>
    %cst_78 = arith.constant dense<0.000000e+00> : vector<16x32xf32>
    %200 = tpu.matmul %199, %184, %cst_78 {dimension_numbers = #tpu.dot_dimension_numbers<[1], [0], [0], [1], [0, 0, 1, 1], [], []>} : vector<16x16xbf16>, vector<16x32xbf16>, vector<16x32xf32> -> vector<16x32xf32>
    %c16_79 = arith.constant 16 : index
    %c32_80 = arith.constant 32 : index
    %201 = vector.load %arg22[%c16_79, %c32_80] : memref<32x128xf32, #tpu.memory_space<vmem>>, vector<16x32xf32>
    tpu.vector_store %arg22[%c16_79, %c32_80], %200 {strides = array<i32>} : memref<32x128xf32, #tpu.memory_space<vmem>>, vector<16x32xf32>,
    %202 = vector.extract_strided_slice %79 {offsets = [16, 64], sizes = [16, 32], strides = [1, 1]} : vector<32x128xbf16> to vector<16x32xbf16>
    %203 = vector.extract_strided_slice %80 {offsets = [16, 64], sizes = [16, 32], strides = [1, 1]} : vector<32x128xbf16> to vector<16x32xbf16>
    %204 = vector.extract_strided_slice %81 {offsets = [16, 64], sizes = [16, 32], strides = [1, 1]} : vector<32x128xbf16> to vector<16x32xbf16>
    %cst_81 = arith.constant dense<0.000000e+00> : vector<16x16xf32>
    %205 = tpu.matmul %202, %203, %cst_81 {dimension_numbers = #tpu.dot_dimension_numbers<[1], [1], [0], [0], [0, 0, 1, 0], [], []>} : vector<16x32xbf16>, vector<16x32xbf16>, vector<16x16xf32> -> vector<16x16xf32>
    %cst_82 = arith.constant 0.176776692 : f32
    %206 = vector.broadcast %cst_82 : f32 to vector<16x16xf32>
    %207 = arith.mulf %205, %206 : vector<16x16xf32>
    %cst_83 = arith.constant dense<0xFF800000> : vector<16xf32>
    %208 = vector.multi_reduction <maximumf>, %207, %cst_83 [1] : vector<16x16xf32> to vector<16xf32>
    %cst_84 = arith.constant 0xFF800000 : f32
    %209 = vector.broadcast %cst_84 : f32 to vector<16xf32>
    %210 = arith.maximumf %209, %208 : vector<16xf32>
    %211 = vector.shape_cast %210 : vector<16xf32> to vector<16x1xf32>
    %212 = vector.broadcast %211 : vector<16x1xf32> to vector<16x16xf32>
    %213 = arith.subf %207, %212 : vector<16x16xf32>
    %214 = math.exp %213 : vector<16x16xf32>
    %cst_85 = arith.constant dense<0.000000e+00> : vector<16xf32>
    %215 = vector.multi_reduction <add>, %214, %cst_85 [1] : vector<16x16xf32> to vector<16xf32>
    %216 = vector.shape_cast %215 : vector<16xf32> to vector<16x1xf32>
    %217 = vector.broadcast %216 : vector<16x1xf32> to vector<16x16xf32>
    %218 = arith.divf %214, %217 : vector<16x16xf32>
    %219 = arith.truncf %218 : vector<16x16xf32> to vector<16x16xbf16>
    %cst_86 = arith.constant dense<0.000000e+00> : vector<16x32xf32>
    %220 = tpu.matmul %219, %204, %cst_86 {dimension_numbers = #tpu.dot_dimension_numbers<[1], [0], [0], [1], [0, 0, 1, 1], [], []>} : vector<16x16xbf16>, vector<16x32xbf16>, vector<16x32xf32> -> vector<16x32xf32>
    %c16_87 = arith.constant 16 : index
    %c64_88 = arith.constant 64 : index
    %221 = vector.load %arg22[%c16_87, %c64_88] : memref<32x128xf32, #tpu.memory_space<vmem>>, vector<16x32xf32>
    tpu.vector_store %arg22[%c16_87, %c64_88], %220 {strides = array<i32>} : memref<32x128xf32, #tpu.memory_space<vmem>>, vector<16x32xf32>,
    %222 = vector.extract_strided_slice %79 {offsets = [16, 96], sizes = [16, 32], strides = [1, 1]} : vector<32x128xbf16> to vector<16x32xbf16>
    %223 = vector.extract_strided_slice %80 {offsets = [16, 96], sizes = [16, 32], strides = [1, 1]} : vector<32x128xbf16> to vector<16x32xbf16>
    %224 = vector.extract_strided_slice %81 {offsets = [16, 96], sizes = [16, 32], strides = [1, 1]} : vector<32x128xbf16> to vector<16x32xbf16>
    %cst_89 = arith.constant dense<0.000000e+00> : vector<16x16xf32>
    %225 = tpu.matmul %222, %223, %cst_89 {dimension_numbers = #tpu.dot_dimension_numbers<[1], [1], [0], [0], [0, 0, 1, 0], [], []>} : vector<16x32xbf16>, vector<16x32xbf16>, vector<16x16xf32> -> vector<16x16xf32>
    %cst_90 = arith.constant 0.176776692 : f32
    %226 = vector.broadcast %cst_90 : f32 to vector<16x16xf32>
    %227 = arith.mulf %225, %226 : vector<16x16xf32>
    %cst_91 = arith.constant dense<0xFF800000> : vector<16xf32>
    %228 = vector.multi_reduction <maximumf>, %227, %cst_91 [1] : vector<16x16xf32> to vector<16xf32>
    %cst_92 = arith.constant 0xFF800000 : f32
    %229 = vector.broadcast %cst_92 : f32 to vector<16xf32>
    %230 = arith.maximumf %229, %228 : vector<16xf32>
    %231 = vector.shape_cast %230 : vector<16xf32> to vector<16x1xf32>
    %232 = vector.broadcast %231 : vector<16x1xf32> to vector<16x16xf32>
    %233 = arith.subf %227, %232 : vector<16x16xf32>
    %234 = math.exp %233 : vector<16x16xf32>
    %cst_93 = arith.constant dense<0.000000e+00> : vector<16xf32>
    %235 = vector.multi_reduction <add>, %234, %cst_93 [1] : vector<16x16xf32> to vector<16xf32>
    %236 = vector.shape_cast %235 : vector<16xf32> to vector<16x1xf32>
    %237 = vector.broadcast %236 : vector<16x1xf32> to vector<16x16xf32>
    %238 = arith.divf %234, %237 : vector<16x16xf32>
    %239 = arith.truncf %238 : vector<16x16xf32> to vector<16x16xbf16>
    %cst_94 = arith.constant dense<0.000000e+00> : vector<16x32xf32>
    %240 = tpu.matmul %239, %224, %cst_94 {dimension_numbers = #tpu.dot_dimension_numbers<[1], [0], [0], [1], [0, 0, 1, 1], [], []>} : vector<16x16xbf16>, vector<16x32xbf16>, vector<16x32xf32> -> vector<16x32xf32>
    %c16_95 = arith.constant 16 : index
    %c96_96 = arith.constant 96 : index
    %241 = vector.load %arg22[%c16_95, %c96_96] : memref<32x128xf32, #tpu.memory_space<vmem>>, vector<16x32xf32>
    tpu.vector_store %arg22[%c16_95, %c96_96], %240 {strides = array<i32>} : memref<32x128xf32, #tpu.memory_space<vmem>>, vector<16x32xf32>,
    %c0_97 = arith.constant 0 : index
    %c0_98 = arith.constant 0 : index
    %242 = vector.load %arg22[%c0_97, %c0_98] : memref<32x128xf32, #tpu.memory_space<vmem>>, vector<32x128xf32>
    %c0_99 = arith.constant 0 : index
    %c0_100 = arith.constant 0 : index
    %c0_101 = arith.constant 0 : index
    %c0_102 = arith.constant 0 : index
    %243 = vector.load %arg9[%c0_99, %c0_100, %c0_101, %c0_102] : memref<1x2x128x128xbf16, #tpu.memory_space<vmem>>, vector<1x1x128x128xbf16>
    %244 = vector.shape_cast %243 : vector<1x1x128x128xbf16> to vector<128x128xbf16>
    %245 = vector.extract_strided_slice %5 {offsets = [0, 0], sizes = [1, 128], strides = [1, 1]} : vector<2x128xf32> to vector<1x128xf32>
    %246 = arith.truncf %242 : vector<32x128xf32> to vector<32x128xbf16>
    %cst_103 = arith.constant dense<0.000000e+00> : vector<32x128xf32>
    %247 = tpu.matmul %246, %244, %cst_103 {dimension_numbers = #tpu.dot_dimension_numbers<[1], [0], [0], [1], [0, 0, 1, 1], [], []>} : vector<32x128xbf16>, vector<128x128xbf16>, vector<32x128xf32> -> vector<32x128xf32>
    %248 = vector.broadcast %245 : vector<1x128xf32> to vector<32x128xf32>
    %249 = arith.addf %247, %248 : vector<32x128xf32>
    %c0_104 = arith.constant 0 : index
    %c0_105 = arith.constant 0 : index
    %250 = vector.load %arg20[%c0_104, %c0_105] : memref<32x128xf32, #tpu.memory_space<vmem>>, vector<32x128xf32>
    tpu.vector_store %arg20[%c0_104, %c0_105], %249 {strides = array<i32>} : memref<32x128xf32, #tpu.memory_space<vmem>>, vector<32x128xf32>,
    %251 = arith.truncf %76 : vector<32x128xf32> to vector<32x128xbf16>
    %252 = arith.truncf %77 : vector<32x128xf32> to vector<32x128xbf16>
    %253 = arith.truncf %78 : vector<32x128xf32> to vector<32x128xbf16>
    %254 = vector.extract_strided_slice %251 {offsets = [0, 0], sizes = [16, 32], strides = [1, 1]} : vector<32x128xbf16> to vector<16x32xbf16>
    %255 = vector.extract_strided_slice %252 {offsets = [0, 0], sizes = [16, 32], strides = [1, 1]} : vector<32x128xbf16> to vector<16x32xbf16>
    %256 = vector.extract_strided_slice %253 {offsets = [0, 0], sizes = [16, 32], strides = [1, 1]} : vector<32x128xbf16> to vector<16x32xbf16>
    %cst_106 = arith.constant dense<0.000000e+00> : vector<16x16xf32>
    %257 = tpu.matmul %254, %255, %cst_106 {dimension_numbers = #tpu.dot_dimension_numbers<[1], [1], [0], [0], [0, 0, 1, 0], [], []>} : vector<16x32xbf16>, vector<16x32xbf16>, vector<16x16xf32> -> vector<16x16xf32>
    %cst_107 = arith.constant 0.176776692 : f32
    %258 = vector.broadcast %cst_107 : f32 to vector<16x16xf32>
    %259 = arith.mulf %257, %258 : vector<16x16xf32>
    %cst_108 = arith.constant dense<0xFF800000> : vector<16xf32>
    %260 = vector.multi_reduction <maximumf>, %259, %cst_108 [1] : vector<16x16xf32> to vector<16xf32>
    %cst_109 = arith.constant 0xFF800000 : f32
    %261 = vector.broadcast %cst_109 : f32 to vector<16xf32>
    %262 = arith.maximumf %261, %260 : vector<16xf32>
    %263 = vector.shape_cast %262 : vector<16xf32> to vector<16x1xf32>
    %264 = vector.broadcast %263 : vector<16x1xf32> to vector<16x16xf32>
    %265 = arith.subf %259, %264 : vector<16x16xf32>
    %266 = math.exp %265 : vector<16x16xf32>
    %cst_110 = arith.constant dense<0.000000e+00> : vector<16xf32>
    %267 = vector.multi_reduction <add>, %266, %cst_110 [1] : vector<16x16xf32> to vector<16xf32>
    %268 = vector.shape_cast %267 : vector<16xf32> to vector<16x1xf32>
    %269 = vector.broadcast %268 : vector<16x1xf32> to vector<16x16xf32>
    %270 = arith.divf %266, %269 : vector<16x16xf32>
    %271 = arith.truncf %270 : vector<16x16xf32> to vector<16x16xbf16>
    %cst_111 = arith.constant dense<0.000000e+00> : vector<16x32xf32>
    %272 = tpu.matmul %271, %256, %cst_111 {dimension_numbers = #tpu.dot_dimension_numbers<[1], [0], [0], [1], [0, 0, 1, 1], [], []>} : vector<16x16xbf16>, vector<16x32xbf16>, vector<16x32xf32> -> vector<16x32xf32>
    %c0_112 = arith.constant 0 : index
    %c0_113 = arith.constant 0 : index
    %273 = vector.load %arg22[%c0_112, %c0_113] : memref<32x128xf32, #tpu.memory_space<vmem>>, vector<16x32xf32>
    tpu.vector_store %arg22[%c0_112, %c0_113], %272 {strides = array<i32>} : memref<32x128xf32, #tpu.memory_space<vmem>>, vector<16x32xf32>,
    %274 = vector.extract_strided_slice %251 {offsets = [0, 32], sizes = [16, 32], strides = [1, 1]} : vector<32x128xbf16> to vector<16x32xbf16>
    %275 = vector.extract_strided_slice %252 {offsets = [0, 32], sizes = [16, 32], strides = [1, 1]} : vector<32x128xbf16> to vector<16x32xbf16>
    %276 = vector.extract_strided_slice %253 {offsets = [0, 32], sizes = [16, 32], strides = [1, 1]} : vector<32x128xbf16> to vector<16x32xbf16>
    %cst_114 = arith.constant dense<0.000000e+00> : vector<16x16xf32>
    %277 = tpu.matmul %274, %275, %cst_114 {dimension_numbers = #tpu.dot_dimension_numbers<[1], [1], [0], [0], [0, 0, 1, 0], [], []>} : vector<16x32xbf16>, vector<16x32xbf16>, vector<16x16xf32> -> vector<16x16xf32>
    %cst_115 = arith.constant 0.176776692 : f32
    %278 = vector.broadcast %cst_115 : f32 to vector<16x16xf32>
    %279 = arith.mulf %277, %278 : vector<16x16xf32>
    %cst_116 = arith.constant dense<0xFF800000> : vector<16xf32>
    %280 = vector.multi_reduction <maximumf>, %279, %cst_116 [1] : vector<16x16xf32> to vector<16xf32>
    %cst_117 = arith.constant 0xFF800000 : f32
    %281 = vector.broadcast %cst_117 : f32 to vector<16xf32>
    %282 = arith.maximumf %281, %280 : vector<16xf32>
    %283 = vector.shape_cast %282 : vector<16xf32> to vector<16x1xf32>
    %284 = vector.broadcast %283 : vector<16x1xf32> to vector<16x16xf32>
    %285 = arith.subf %279, %284 : vector<16x16xf32>
    %286 = math.exp %285 : vector<16x16xf32>
    %cst_118 = arith.constant dense<0.000000e+00> : vector<16xf32>
    %287 = vector.multi_reduction <add>, %286, %cst_118 [1] : vector<16x16xf32> to vector<16xf32>
    %288 = vector.shape_cast %287 : vector<16xf32> to vector<16x1xf32>
    %289 = vector.broadcast %288 : vector<16x1xf32> to vector<16x16xf32>
    %290 = arith.divf %286, %289 : vector<16x16xf32>
    %291 = arith.truncf %290 : vector<16x16xf32> to vector<16x16xbf16>
    %cst_119 = arith.constant dense<0.000000e+00> : vector<16x32xf32>
    %292 = tpu.matmul %291, %276, %cst_119 {dimension_numbers = #tpu.dot_dimension_numbers<[1], [0], [0], [1], [0, 0, 1, 1], [], []>} : vector<16x16xbf16>, vector<16x32xbf16>, vector<16x32xf32> -> vector<16x32xf32>
    %c0_120 = arith.constant 0 : index
    %c32_121 = arith.constant 32 : index
    %293 = vector.load %arg22[%c0_120, %c32_121] : memref<32x128xf32, #tpu.memory_space<vmem>>, vector<16x32xf32>
    tpu.vector_store %arg22[%c0_120, %c32_121], %292 {strides = array<i32>} : memref<32x128xf32, #tpu.memory_space<vmem>>, vector<16x32xf32>,
    %294 = vector.extract_strided_slice %251 {offsets = [0, 64], sizes = [16, 32], strides = [1, 1]} : vector<32x128xbf16> to vector<16x32xbf16>
    %295 = vector.extract_strided_slice %252 {offsets = [0, 64], sizes = [16, 32], strides = [1, 1]} : vector<32x128xbf16> to vector<16x32xbf16>
    %296 = vector.extract_strided_slice %253 {offsets = [0, 64], sizes = [16, 32], strides = [1, 1]} : vector<32x128xbf16> to vector<16x32xbf16>
    %cst_122 = arith.constant dense<0.000000e+00> : vector<16x16xf32>
    %297 = tpu.matmul %294, %295, %cst_122 {dimension_numbers = #tpu.dot_dimension_numbers<[1], [1], [0], [0], [0, 0, 1, 0], [], []>} : vector<16x32xbf16>, vector<16x32xbf16>, vector<16x16xf32> -> vector<16x16xf32>
    %cst_123 = arith.constant 0.176776692 : f32
    %298 = vector.broadcast %cst_123 : f32 to vector<16x16xf32>
    %299 = arith.mulf %297, %298 : vector<16x16xf32>
    %cst_124 = arith.constant dense<0xFF800000> : vector<16xf32>
    %300 = vector.multi_reduction <maximumf>, %299, %cst_124 [1] : vector<16x16xf32> to vector<16xf32>
    %cst_125 = arith.constant 0xFF800000 : f32
    %301 = vector.broadcast %cst_125 : f32 to vector<16xf32>
    %302 = arith.maximumf %301, %300 : vector<16xf32>
    %303 = vector.shape_cast %302 : vector<16xf32> to vector<16x1xf32>
    %304 = vector.broadcast %303 : vector<16x1xf32> to vector<16x16xf32>
    %305 = arith.subf %299, %304 : vector<16x16xf32>
    %306 = math.exp %305 : vector<16x16xf32>
    %cst_126 = arith.constant dense<0.000000e+00> : vector<16xf32>
    %307 = vector.multi_reduction <add>, %306, %cst_126 [1] : vector<16x16xf32> to vector<16xf32>
    %308 = vector.shape_cast %307 : vector<16xf32> to vector<16x1xf32>
    %309 = vector.broadcast %308 : vector<16x1xf32> to vector<16x16xf32>
    %310 = arith.divf %306, %309 : vector<16x16xf32>
    %311 = arith.truncf %310 : vector<16x16xf32> to vector<16x16xbf16>
    %cst_127 = arith.constant dense<0.000000e+00> : vector<16x32xf32>
    %312 = tpu.matmul %311, %296, %cst_127 {dimension_numbers = #tpu.dot_dimension_numbers<[1], [0], [0], [1], [0, 0, 1, 1], [], []>} : vector<16x16xbf16>, vector<16x32xbf16>, vector<16x32xf32> -> vector<16x32xf32>
    %c0_128 = arith.constant 0 : index
    %c64_129 = arith.constant 64 : index
    %313 = vector.load %arg22[%c0_128, %c64_129] : memref<32x128xf32, #tpu.memory_space<vmem>>, vector<16x32xf32>
    tpu.vector_store %arg22[%c0_128, %c64_129], %312 {strides = array<i32>} : memref<32x128xf32, #tpu.memory_space<vmem>>, vector<16x32xf32>,
    %314 = vector.extract_strided_slice %251 {offsets = [0, 96], sizes = [16, 32], strides = [1, 1]} : vector<32x128xbf16> to vector<16x32xbf16>
    %315 = vector.extract_strided_slice %252 {offsets = [0, 96], sizes = [16, 32], strides = [1, 1]} : vector<32x128xbf16> to vector<16x32xbf16>
    %316 = vector.extract_strided_slice %253 {offsets = [0, 96], sizes = [16, 32], strides = [1, 1]} : vector<32x128xbf16> to vector<16x32xbf16>
    %cst_130 = arith.constant dense<0.000000e+00> : vector<16x16xf32>
    %317 = tpu.matmul %314, %315, %cst_130 {dimension_numbers = #tpu.dot_dimension_numbers<[1], [1], [0], [0], [0, 0, 1, 0], [], []>} : vector<16x32xbf16>, vector<16x32xbf16>, vector<16x16xf32> -> vector<16x16xf32>
    %cst_131 = arith.constant 0.176776692 : f32
    %318 = vector.broadcast %cst_131 : f32 to vector<16x16xf32>
    %319 = arith.mulf %317, %318 : vector<16x16xf32>
    %cst_132 = arith.constant dense<0xFF800000> : vector<16xf32>
    %320 = vector.multi_reduction <maximumf>, %319, %cst_132 [1] : vector<16x16xf32> to vector<16xf32>
    %cst_133 = arith.constant 0xFF800000 : f32
    %321 = vector.broadcast %cst_133 : f32 to vector<16xf32>
    %322 = arith.maximumf %321, %320 : vector<16xf32>
    %323 = vector.shape_cast %322 : vector<16xf32> to vector<16x1xf32>
    %324 = vector.broadcast %323 : vector<16x1xf32> to vector<16x16xf32>
    %325 = arith.subf %319, %324 : vector<16x16xf32>
    %326 = math.exp %325 : vector<16x16xf32>
    %cst_134 = arith.constant dense<0.000000e+00> : vector<16xf32>
    %327 = vector.multi_reduction <add>, %326, %cst_134 [1] : vector<16x16xf32> to vector<16xf32>
    %328 = vector.shape_cast %327 : vector<16xf32> to vector<16x1xf32>
    %329 = vector.broadcast %328 : vector<16x1xf32> to vector<16x16xf32>
    %330 = arith.divf %326, %329 : vector<16x16xf32>
    %331 = arith.truncf %330 : vector<16x16xf32> to vector<16x16xbf16>
    %cst_135 = arith.constant dense<0.000000e+00> : vector<16x32xf32>
    %332 = tpu.matmul %331, %316, %cst_135 {dimension_numbers = #tpu.dot_dimension_numbers<[1], [0], [0], [1], [0, 0, 1, 1], [], []>} : vector<16x16xbf16>, vector<16x32xbf16>, vector<16x32xf32> -> vector<16x32xf32>
    %c0_136 = arith.constant 0 : index
    %c96_137 = arith.constant 96 : index
    %333 = vector.load %arg22[%c0_136, %c96_137] : memref<32x128xf32, #tpu.memory_space<vmem>>, vector<16x32xf32>
    tpu.vector_store %arg22[%c0_136, %c96_137], %332 {strides = array<i32>} : memref<32x128xf32, #tpu.memory_space<vmem>>, vector<16x32xf32>,
    %334 = vector.extract_strided_slice %251 {offsets = [16, 0], sizes = [16, 32], strides = [1, 1]} : vector<32x128xbf16> to vector<16x32xbf16>
    %335 = vector.extract_strided_slice %252 {offsets = [16, 0], sizes = [16, 32], strides = [1, 1]} : vector<32x128xbf16> to vector<16x32xbf16>
    %336 = vector.extract_strided_slice %253 {offsets = [16, 0], sizes = [16, 32], strides = [1, 1]} : vector<32x128xbf16> to vector<16x32xbf16>
    %cst_138 = arith.constant dense<0.000000e+00> : vector<16x16xf32>
    %337 = tpu.matmul %334, %335, %cst_138 {dimension_numbers = #tpu.dot_dimension_numbers<[1], [1], [0], [0], [0, 0, 1, 0], [], []>} : vector<16x32xbf16>, vector<16x32xbf16>, vector<16x16xf32> -> vector<16x16xf32>
    %cst_139 = arith.constant 0.176776692 : f32
    %338 = vector.broadcast %cst_139 : f32 to vector<16x16xf32>
    %339 = arith.mulf %337, %338 : vector<16x16xf32>
    %cst_140 = arith.constant dense<0xFF800000> : vector<16xf32>
    %340 = vector.multi_reduction <maximumf>, %339, %cst_140 [1] : vector<16x16xf32> to vector<16xf32>
    %cst_141 = arith.constant 0xFF800000 : f32
    %341 = vector.broadcast %cst_141 : f32 to vector<16xf32>
    %342 = arith.maximumf %341, %340 : vector<16xf32>
    %343 = vector.shape_cast %342 : vector<16xf32> to vector<16x1xf32>
    %344 = vector.broadcast %343 : vector<16x1xf32> to vector<16x16xf32>
    %345 = arith.subf %339, %344 : vector<16x16xf32>
    %346 = math.exp %345 : vector<16x16xf32>
    %cst_142 = arith.constant dense<0.000000e+00> : vector<16xf32>
    %347 = vector.multi_reduction <add>, %346, %cst_142 [1] : vector<16x16xf32> to vector<16xf32>
    %348 = vector.shape_cast %347 : vector<16xf32> to vector<16x1xf32>
    %349 = vector.broadcast %348 : vector<16x1xf32> to vector<16x16xf32>
    %350 = arith.divf %346, %349 : vector<16x16xf32>
    %351 = arith.truncf %350 : vector<16x16xf32> to vector<16x16xbf16>
    %cst_143 = arith.constant dense<0.000000e+00> : vector<16x32xf32>
    %352 = tpu.matmul %351, %336, %cst_143 {dimension_numbers = #tpu.dot_dimension_numbers<[1], [0], [0], [1], [0, 0, 1, 1], [], []>} : vector<16x16xbf16>, vector<16x32xbf16>, vector<16x32xf32> -> vector<16x32xf32>
    %c16_144 = arith.constant 16 : index
    %c0_145 = arith.constant 0 : index
    %353 = vector.load %arg22[%c16_144, %c0_145] : memref<32x128xf32, #tpu.memory_space<vmem>>, vector<16x32xf32>
    tpu.vector_store %arg22[%c16_144, %c0_145], %352 {strides = array<i32>} : memref<32x128xf32, #tpu.memory_space<vmem>>, vector<16x32xf32>,
    %354 = vector.extract_strided_slice %251 {offsets = [16, 32], sizes = [16, 32], strides = [1, 1]} : vector<32x128xbf16> to vector<16x32xbf16>
    %355 = vector.extract_strided_slice %252 {offsets = [16, 32], sizes = [16, 32], strides = [1, 1]} : vector<32x128xbf16> to vector<16x32xbf16>
    %356 = vector.extract_strided_slice %253 {offsets = [16, 32], sizes = [16, 32], strides = [1, 1]} : vector<32x128xbf16> to vector<16x32xbf16>
    %cst_146 = arith.constant dense<0.000000e+00> : vector<16x16xf32>
    %357 = tpu.matmul %354, %355, %cst_146 {dimension_numbers = #tpu.dot_dimension_numbers<[1], [1], [0], [0], [0, 0, 1, 0], [], []>} : vector<16x32xbf16>, vector<16x32xbf16>, vector<16x16xf32> -> vector<16x16xf32>
    %cst_147 = arith.constant 0.176776692 : f32
    %358 = vector.broadcast %cst_147 : f32 to vector<16x16xf32>
    %359 = arith.mulf %357, %358 : vector<16x16xf32>
    %cst_148 = arith.constant dense<0xFF800000> : vector<16xf32>
    %360 = vector.multi_reduction <maximumf>, %359, %cst_148 [1] : vector<16x16xf32> to vector<16xf32>
    %cst_149 = arith.constant 0xFF800000 : f32
    %361 = vector.broadcast %cst_149 : f32 to vector<16xf32>
    %362 = arith.maximumf %361, %360 : vector<16xf32>
    %363 = vector.shape_cast %362 : vector<16xf32> to vector<16x1xf32>
    %364 = vector.broadcast %363 : vector<16x1xf32> to vector<16x16xf32>
    %365 = arith.subf %359, %364 : vector<16x16xf32>
    %366 = math.exp %365 : vector<16x16xf32>
    %cst_150 = arith.constant dense<0.000000e+00> : vector<16xf32>
    %367 = vector.multi_reduction <add>, %366, %cst_150 [1] : vector<16x16xf32> to vector<16xf32>
    %368 = vector.shape_cast %367 : vector<16xf32> to vector<16x1xf32>
    %369 = vector.broadcast %368 : vector<16x1xf32> to vector<16x16xf32>
    %370 = arith.divf %366, %369 : vector<16x16xf32>
    %371 = arith.truncf %370 : vector<16x16xf32> to vector<16x16xbf16>
    %cst_151 = arith.constant dense<0.000000e+00> : vector<16x32xf32>
    %372 = tpu.matmul %371, %356, %cst_151 {dimension_numbers = #tpu.dot_dimension_numbers<[1], [0], [0], [1], [0, 0, 1, 1], [], []>} : vector<16x16xbf16>, vector<16x32xbf16>, vector<16x32xf32> -> vector<16x32xf32>
    %c16_152 = arith.constant 16 : index
    %c32_153 = arith.constant 32 : index
    %373 = vector.load %arg22[%c16_152, %c32_153] : memref<32x128xf32, #tpu.memory_space<vmem>>, vector<16x32xf32>
    tpu.vector_store %arg22[%c16_152, %c32_153], %372 {strides = array<i32>} : memref<32x128xf32, #tpu.memory_space<vmem>>, vector<16x32xf32>,
    %374 = vector.extract_strided_slice %251 {offsets = [16, 64], sizes = [16, 32], strides = [1, 1]} : vector<32x128xbf16> to vector<16x32xbf16>
    %375 = vector.extract_strided_slice %252 {offsets = [16, 64], sizes = [16, 32], strides = [1, 1]} : vector<32x128xbf16> to vector<16x32xbf16>
    %376 = vector.extract_strided_slice %253 {offsets = [16, 64], sizes = [16, 32], strides = [1, 1]} : vector<32x128xbf16> to vector<16x32xbf16>
    %cst_154 = arith.constant dense<0.000000e+00> : vector<16x16xf32>
    %377 = tpu.matmul %374, %375, %cst_154 {dimension_numbers = #tpu.dot_dimension_numbers<[1], [1], [0], [0], [0, 0, 1, 0], [], []>} : vector<16x32xbf16>, vector<16x32xbf16>, vector<16x16xf32> -> vector<16x16xf32>
    %cst_155 = arith.constant 0.176776692 : f32
    %378 = vector.broadcast %cst_155 : f32 to vector<16x16xf32>
    %379 = arith.mulf %377, %378 : vector<16x16xf32>
    %cst_156 = arith.constant dense<0xFF800000> : vector<16xf32>
    %380 = vector.multi_reduction <maximumf>, %379, %cst_156 [1] : vector<16x16xf32> to vector<16xf32>
    %cst_157 = arith.constant 0xFF800000 : f32
    %381 = vector.broadcast %cst_157 : f32 to vector<16xf32>
    %382 = arith.maximumf %381, %380 : vector<16xf32>
    %383 = vector.shape_cast %382 : vector<16xf32> to vector<16x1xf32>
    %384 = vector.broadcast %383 : vector<16x1xf32> to vector<16x16xf32>
    %385 = arith.subf %379, %384 : vector<16x16xf32>
    %386 = math.exp %385 : vector<16x16xf32>
    %cst_158 = arith.constant dense<0.000000e+00> : vector<16xf32>
    %387 = vector.multi_reduction <add>, %386, %cst_158 [1] : vector<16x16xf32> to vector<16xf32>
    %388 = vector.shape_cast %387 : vector<16xf32> to vector<16x1xf32>
    %389 = vector.broadcast %388 : vector<16x1xf32> to vector<16x16xf32>
    %390 = arith.divf %386, %389 : vector<16x16xf32>
    %391 = arith.truncf %390 : vector<16x16xf32> to vector<16x16xbf16>
    %cst_159 = arith.constant dense<0.000000e+00> : vector<16x32xf32>
    %392 = tpu.matmul %391, %376, %cst_159 {dimension_numbers = #tpu.dot_dimension_numbers<[1], [0], [0], [1], [0, 0, 1, 1], [], []>} : vector<16x16xbf16>, vector<16x32xbf16>, vector<16x32xf32> -> vector<16x32xf32>
    %c16_160 = arith.constant 16 : index
    %c64_161 = arith.constant 64 : index
    %393 = vector.load %arg22[%c16_160, %c64_161] : memref<32x128xf32, #tpu.memory_space<vmem>>, vector<16x32xf32>
    tpu.vector_store %arg22[%c16_160, %c64_161], %392 {strides = array<i32>} : memref<32x128xf32, #tpu.memory_space<vmem>>, vector<16x32xf32>,
    %394 = vector.extract_strided_slice %251 {offsets = [16, 96], sizes = [16, 32], strides = [1, 1]} : vector<32x128xbf16> to vector<16x32xbf16>
    %395 = vector.extract_strided_slice %252 {offsets = [16, 96], sizes = [16, 32], strides = [1, 1]} : vector<32x128xbf16> to vector<16x32xbf16>
    %396 = vector.extract_strided_slice %253 {offsets = [16, 96], sizes = [16, 32], strides = [1, 1]} : vector<32x128xbf16> to vector<16x32xbf16>
    %cst_162 = arith.constant dense<0.000000e+00> : vector<16x16xf32>
    %397 = tpu.matmul %394, %395, %cst_162 {dimension_numbers = #tpu.dot_dimension_numbers<[1], [1], [0], [0], [0, 0, 1, 0], [], []>} : vector<16x32xbf16>, vector<16x32xbf16>, vector<16x16xf32> -> vector<16x16xf32>
    %cst_163 = arith.constant 0.176776692 : f32
    %398 = vector.broadcast %cst_163 : f32 to vector<16x16xf32>
    %399 = arith.mulf %397, %398 : vector<16x16xf32>
    %cst_164 = arith.constant dense<0xFF800000> : vector<16xf32>
    %400 = vector.multi_reduction <maximumf>, %399, %cst_164 [1] : vector<16x16xf32> to vector<16xf32>
    %cst_165 = arith.constant 0xFF800000 : f32
    %401 = vector.broadcast %cst_165 : f32 to vector<16xf32>
    %402 = arith.maximumf %401, %400 : vector<16xf32>
    %403 = vector.shape_cast %402 : vector<16xf32> to vector<16x1xf32>
    %404 = vector.broadcast %403 : vector<16x1xf32> to vector<16x16xf32>
    %405 = arith.subf %399, %404 : vector<16x16xf32>
    %406 = math.exp %405 : vector<16x16xf32>
    %cst_166 = arith.constant dense<0.000000e+00> : vector<16xf32>
    %407 = vector.multi_reduction <add>, %406, %cst_166 [1] : vector<16x16xf32> to vector<16xf32>
    %408 = vector.shape_cast %407 : vector<16xf32> to vector<16x1xf32>
    %409 = vector.broadcast %408 : vector<16x1xf32> to vector<16x16xf32>
    %410 = arith.divf %406, %409 : vector<16x16xf32>
    %411 = arith.truncf %410 : vector<16x16xf32> to vector<16x16xbf16>
    %cst_167 = arith.constant dense<0.000000e+00> : vector<16x32xf32>
    %412 = tpu.matmul %411, %396, %cst_167 {dimension_numbers = #tpu.dot_dimension_numbers<[1], [0], [0], [1], [0, 0, 1, 1], [], []>} : vector<16x16xbf16>, vector<16x32xbf16>, vector<16x32xf32> -> vector<16x32xf32>
    %c16_168 = arith.constant 16 : index
    %c96_169 = arith.constant 96 : index
    %413 = vector.load %arg22[%c16_168, %c96_169] : memref<32x128xf32, #tpu.memory_space<vmem>>, vector<16x32xf32>
    tpu.vector_store %arg22[%c16_168, %c96_169], %412 {strides = array<i32>} : memref<32x128xf32, #tpu.memory_space<vmem>>, vector<16x32xf32>,
    %c0_170 = arith.constant 0 : index
    %c0_171 = arith.constant 0 : index
    %414 = vector.load %arg22[%c0_170, %c0_171] : memref<32x128xf32, #tpu.memory_space<vmem>>, vector<32x128xf32>
    %c0_172 = arith.constant 0 : index
    %c1_173 = arith.constant 1 : index
    %c0_174 = arith.constant 0 : index
    %c0_175 = arith.constant 0 : index
    %415 = vector.load %arg9[%c0_172, %c1_173, %c0_174, %c0_175] : memref<1x2x128x128xbf16, #tpu.memory_space<vmem>>, vector<1x1x128x128xbf16>
    %416 = vector.shape_cast %415 : vector<1x1x128x128xbf16> to vector<128x128xbf16>
    %417 = vector.extract_strided_slice %5 {offsets = [1, 0], sizes = [1, 128], strides = [1, 1]} : vector<2x128xf32> to vector<1x128xf32>
    %418 = arith.truncf %414 : vector<32x128xf32> to vector<32x128xbf16>
    %cst_176 = arith.constant dense<0.000000e+00> : vector<32x128xf32>
    %419 = tpu.matmul %418, %416, %cst_176 {dimension_numbers = #tpu.dot_dimension_numbers<[1], [0], [0], [1], [0, 0, 1, 1], [], []>} : vector<32x128xbf16>, vector<128x128xbf16>, vector<32x128xf32> -> vector<32x128xf32>
    %420 = vector.broadcast %417 : vector<1x128xf32> to vector<32x128xf32>
    %421 = arith.addf %419, %420 : vector<32x128xf32>
    %c0_177 = arith.constant 0 : index
    %c0_178 = arith.constant 0 : index
    %422 = vector.load %arg21[%c0_177, %c0_178] : memref<32x128xf32, #tpu.memory_space<vmem>>, vector<32x128xf32>
    tpu.vector_store %arg21[%c0_177, %c0_178], %421 {strides = array<i32>} : memref<32x128xf32, #tpu.memory_space<vmem>>, vector<32x128xf32>,
    %423 = arith.index_cast %arg1 : i32 to index
    %424 = memref.load %arg2[%423] : memref<4xi32, #tpu.memory_space<smem>>
    %c0_i32_179 = arith.constant 0 : i32
    %425 = arith.cmpi ne, %424, %c0_i32_179 : i32
    %426 = arith.extui %425 : i1 to i32
    %c0_i32_180 = arith.constant 0 : i32
    %427 = arith.cmpi ne, %426, %c0_i32_180 : i32
    scf.if %427 {
      %537 = arith.truncf %73 : vector<32x128xf32> to vector<32x128xbf16>
      %538 = arith.truncf %77 : vector<32x128xf32> to vector<32x128xbf16>
      %539 = arith.truncf %78 : vector<32x128xf32> to vector<32x128xbf16>
      %540 = vector.extract_strided_slice %537 {offsets = [0, 0], sizes = [16, 32], strides = [1, 1]} : vector<32x128xbf16> to vector<16x32xbf16>
      %541 = vector.extract_strided_slice %538 {offsets = [0, 0], sizes = [16, 32], strides = [1, 1]} : vector<32x128xbf16> to vector<16x32xbf16>
      %542 = vector.extract_strided_slice %539 {offsets = [0, 0], sizes = [16, 32], strides = [1, 1]} : vector<32x128xbf16> to vector<16x32xbf16>
      %cst_228 = arith.constant dense<0.000000e+00> : vector<16x16xf32>
      %543 = tpu.matmul %540, %541, %cst_228 {dimension_numbers = #tpu.dot_dimension_numbers<[1], [1], [0], [0], [0, 0, 1, 0], [], []>} : vector<16x32xbf16>, vector<16x32xbf16>, vector<16x16xf32> -> vector<16x16xf32>
      %cst_229 = arith.constant 0.176776692 : f32
      %544 = vector.broadcast %cst_229 : f32 to vector<16x16xf32>
      %545 = arith.mulf %543, %544 : vector<16x16xf32>
      %cst_230 = arith.constant dense<0xFF800000> : vector<16xf32>
      %546 = vector.multi_reduction <maximumf>, %545, %cst_230 [1] : vector<16x16xf32> to vector<16xf32>
      %cst_231 = arith.constant 0xFF800000 : f32
      %547 = vector.broadcast %cst_231 : f32 to vector<16xf32>
      %548 = arith.maximumf %547, %546 : vector<16xf32>
      %549 = vector.shape_cast %548 : vector<16xf32> to vector<16x1xf32>
      %550 = vector.broadcast %549 : vector<16x1xf32> to vector<16x16xf32>
      %551 = arith.subf %545, %550 : vector<16x16xf32>
      %552 = math.exp %551 : vector<16x16xf32>
      %cst_232 = arith.constant dense<0.000000e+00> : vector<16xf32>
      %553 = vector.multi_reduction <add>, %552, %cst_232 [1] : vector<16x16xf32> to vector<16xf32>
      %554 = vector.shape_cast %553 : vector<16xf32> to vector<16x1xf32>
      %555 = vector.broadcast %554 : vector<16x1xf32> to vector<16x16xf32>
      %556 = arith.divf %552, %555 : vector<16x16xf32>
      %557 = arith.truncf %556 : vector<16x16xf32> to vector<16x16xbf16>
      %cst_233 = arith.constant dense<0.000000e+00> : vector<16x32xf32>
      %558 = tpu.matmul %557, %542, %cst_233 {dimension_numbers = #tpu.dot_dimension_numbers<[1], [0], [0], [1], [0, 0, 1, 1], [], []>} : vector<16x16xbf16>, vector<16x32xbf16>, vector<16x32xf32> -> vector<16x32xf32>
      %c0_234 = arith.constant 0 : index
      %c0_235 = arith.constant 0 : index
      %559 = vector.load %arg22[%c0_234, %c0_235] : memref<32x128xf32, #tpu.memory_space<vmem>>, vector<16x32xf32>
      tpu.vector_store %arg22[%c0_234, %c0_235], %558 {strides = array<i32>} : memref<32x128xf32, #tpu.memory_space<vmem>>, vector<16x32xf32>,
      %560 = vector.extract_strided_slice %537 {offsets = [0, 32], sizes = [16, 32], strides = [1, 1]} : vector<32x128xbf16> to vector<16x32xbf16>
      %561 = vector.extract_strided_slice %538 {offsets = [0, 32], sizes = [16, 32], strides = [1, 1]} : vector<32x128xbf16> to vector<16x32xbf16>
      %562 = vector.extract_strided_slice %539 {offsets = [0, 32], sizes = [16, 32], strides = [1, 1]} : vector<32x128xbf16> to vector<16x32xbf16>
      %cst_236 = arith.constant dense<0.000000e+00> : vector<16x16xf32>
      %563 = tpu.matmul %560, %561, %cst_236 {dimension_numbers = #tpu.dot_dimension_numbers<[1], [1], [0], [0], [0, 0, 1, 0], [], []>} : vector<16x32xbf16>, vector<16x32xbf16>, vector<16x16xf32> -> vector<16x16xf32>
      %cst_237 = arith.constant 0.176776692 : f32
      %564 = vector.broadcast %cst_237 : f32 to vector<16x16xf32>
      %565 = arith.mulf %563, %564 : vector<16x16xf32>
      %cst_238 = arith.constant dense<0xFF800000> : vector<16xf32>
      %566 = vector.multi_reduction <maximumf>, %565, %cst_238 [1] : vector<16x16xf32> to vector<16xf32>
      %cst_239 = arith.constant 0xFF800000 : f32
      %567 = vector.broadcast %cst_239 : f32 to vector<16xf32>
      %568 = arith.maximumf %567, %566 : vector<16xf32>
      %569 = vector.shape_cast %568 : vector<16xf32> to vector<16x1xf32>
      %570 = vector.broadcast %569 : vector<16x1xf32> to vector<16x16xf32>
      %571 = arith.subf %565, %570 : vector<16x16xf32>
      %572 = math.exp %571 : vector<16x16xf32>
      %cst_240 = arith.constant dense<0.000000e+00> : vector<16xf32>
      %573 = vector.multi_reduction <add>, %572, %cst_240 [1] : vector<16x16xf32> to vector<16xf32>
      %574 = vector.shape_cast %573 : vector<16xf32> to vector<16x1xf32>
      %575 = vector.broadcast %574 : vector<16x1xf32> to vector<16x16xf32>
      %576 = arith.divf %572, %575 : vector<16x16xf32>
      %577 = arith.truncf %576 : vector<16x16xf32> to vector<16x16xbf16>
      %cst_241 = arith.constant dense<0.000000e+00> : vector<16x32xf32>
      %578 = tpu.matmul %577, %562, %cst_241 {dimension_numbers = #tpu.dot_dimension_numbers<[1], [0], [0], [1], [0, 0, 1, 1], [], []>} : vector<16x16xbf16>, vector<16x32xbf16>, vector<16x32xf32> -> vector<16x32xf32>
      %c0_242 = arith.constant 0 : index
      %c32_243 = arith.constant 32 : index
      %579 = vector.load %arg22[%c0_242, %c32_243] : memref<32x128xf32, #tpu.memory_space<vmem>>, vector<16x32xf32>
      tpu.vector_store %arg22[%c0_242, %c32_243], %578 {strides = array<i32>} : memref<32x128xf32, #tpu.memory_space<vmem>>, vector<16x32xf32>,
      %580 = vector.extract_strided_slice %537 {offsets = [0, 64], sizes = [16, 32], strides = [1, 1]} : vector<32x128xbf16> to vector<16x32xbf16>
      %581 = vector.extract_strided_slice %538 {offsets = [0, 64], sizes = [16, 32], strides = [1, 1]} : vector<32x128xbf16> to vector<16x32xbf16>
      %582 = vector.extract_strided_slice %539 {offsets = [0, 64], sizes = [16, 32], strides = [1, 1]} : vector<32x128xbf16> to vector<16x32xbf16>
      %cst_244 = arith.constant dense<0.000000e+00> : vector<16x16xf32>
      %583 = tpu.matmul %580, %581, %cst_244 {dimension_numbers = #tpu.dot_dimension_numbers<[1], [1], [0], [0], [0, 0, 1, 0], [], []>} : vector<16x32xbf16>, vector<16x32xbf16>, vector<16x16xf32> -> vector<16x16xf32>
      %cst_245 = arith.constant 0.176776692 : f32
      %584 = vector.broadcast %cst_245 : f32 to vector<16x16xf32>
      %585 = arith.mulf %583, %584 : vector<16x16xf32>
      %cst_246 = arith.constant dense<0xFF800000> : vector<16xf32>
      %586 = vector.multi_reduction <maximumf>, %585, %cst_246 [1] : vector<16x16xf32> to vector<16xf32>
      %cst_247 = arith.constant 0xFF800000 : f32
      %587 = vector.broadcast %cst_247 : f32 to vector<16xf32>
      %588 = arith.maximumf %587, %586 : vector<16xf32>
      %589 = vector.shape_cast %588 : vector<16xf32> to vector<16x1xf32>
      %590 = vector.broadcast %589 : vector<16x1xf32> to vector<16x16xf32>
      %591 = arith.subf %585, %590 : vector<16x16xf32>
      %592 = math.exp %591 : vector<16x16xf32>
      %cst_248 = arith.constant dense<0.000000e+00> : vector<16xf32>
      %593 = vector.multi_reduction <add>, %592, %cst_248 [1] : vector<16x16xf32> to vector<16xf32>
      %594 = vector.shape_cast %593 : vector<16xf32> to vector<16x1xf32>
      %595 = vector.broadcast %594 : vector<16x1xf32> to vector<16x16xf32>
      %596 = arith.divf %592, %595 : vector<16x16xf32>
      %597 = arith.truncf %596 : vector<16x16xf32> to vector<16x16xbf16>
      %cst_249 = arith.constant dense<0.000000e+00> : vector<16x32xf32>
      %598 = tpu.matmul %597, %582, %cst_249 {dimension_numbers = #tpu.dot_dimension_numbers<[1], [0], [0], [1], [0, 0, 1, 1], [], []>} : vector<16x16xbf16>, vector<16x32xbf16>, vector<16x32xf32> -> vector<16x32xf32>
      %c0_250 = arith.constant 0 : index
      %c64_251 = arith.constant 64 : index
      %599 = vector.load %arg22[%c0_250, %c64_251] : memref<32x128xf32, #tpu.memory_space<vmem>>, vector<16x32xf32>
      tpu.vector_store %arg22[%c0_250, %c64_251], %598 {strides = array<i32>} : memref<32x128xf32, #tpu.memory_space<vmem>>, vector<16x32xf32>,
      %600 = vector.extract_strided_slice %537 {offsets = [0, 96], sizes = [16, 32], strides = [1, 1]} : vector<32x128xbf16> to vector<16x32xbf16>
      %601 = vector.extract_strided_slice %538 {offsets = [0, 96], sizes = [16, 32], strides = [1, 1]} : vector<32x128xbf16> to vector<16x32xbf16>
      %602 = vector.extract_strided_slice %539 {offsets = [0, 96], sizes = [16, 32], strides = [1, 1]} : vector<32x128xbf16> to vector<16x32xbf16>
      %cst_252 = arith.constant dense<0.000000e+00> : vector<16x16xf32>
      %603 = tpu.matmul %600, %601, %cst_252 {dimension_numbers = #tpu.dot_dimension_numbers<[1], [1], [0], [0], [0, 0, 1, 0], [], []>} : vector<16x32xbf16>, vector<16x32xbf16>, vector<16x16xf32> -> vector<16x16xf32>
      %cst_253 = arith.constant 0.176776692 : f32
      %604 = vector.broadcast %cst_253 : f32 to vector<16x16xf32>
      %605 = arith.mulf %603, %604 : vector<16x16xf32>
      %cst_254 = arith.constant dense<0xFF800000> : vector<16xf32>
      %606 = vector.multi_reduction <maximumf>, %605, %cst_254 [1] : vector<16x16xf32> to vector<16xf32>
      %cst_255 = arith.constant 0xFF800000 : f32
      %607 = vector.broadcast %cst_255 : f32 to vector<16xf32>
      %608 = arith.maximumf %607, %606 : vector<16xf32>
      %609 = vector.shape_cast %608 : vector<16xf32> to vector<16x1xf32>
      %610 = vector.broadcast %609 : vector<16x1xf32> to vector<16x16xf32>
      %611 = arith.subf %605, %610 : vector<16x16xf32>
      %612 = math.exp %611 : vector<16x16xf32>
      %cst_256 = arith.constant dense<0.000000e+00> : vector<16xf32>
      %613 = vector.multi_reduction <add>, %612, %cst_256 [1] : vector<16x16xf32> to vector<16xf32>
      %614 = vector.shape_cast %613 : vector<16xf32> to vector<16x1xf32>
      %615 = vector.broadcast %614 : vector<16x1xf32> to vector<16x16xf32>
      %616 = arith.divf %612, %615 : vector<16x16xf32>
      %617 = arith.truncf %616 : vector<16x16xf32> to vector<16x16xbf16>
      %cst_257 = arith.constant dense<0.000000e+00> : vector<16x32xf32>
      %618 = tpu.matmul %617, %602, %cst_257 {dimension_numbers = #tpu.dot_dimension_numbers<[1], [0], [0], [1], [0, 0, 1, 1], [], []>} : vector<16x16xbf16>, vector<16x32xbf16>, vector<16x32xf32> -> vector<16x32xf32>
      %c0_258 = arith.constant 0 : index
      %c96_259 = arith.constant 96 : index
      %619 = vector.load %arg22[%c0_258, %c96_259] : memref<32x128xf32, #tpu.memory_space<vmem>>, vector<16x32xf32>
      tpu.vector_store %arg22[%c0_258, %c96_259], %618 {strides = array<i32>} : memref<32x128xf32, #tpu.memory_space<vmem>>, vector<16x32xf32>,
      %620 = vector.extract_strided_slice %537 {offsets = [16, 0], sizes = [16, 32], strides = [1, 1]} : vector<32x128xbf16> to vector<16x32xbf16>
      %621 = vector.extract_strided_slice %538 {offsets = [16, 0], sizes = [16, 32], strides = [1, 1]} : vector<32x128xbf16> to vector<16x32xbf16>
      %622 = vector.extract_strided_slice %539 {offsets = [16, 0], sizes = [16, 32], strides = [1, 1]} : vector<32x128xbf16> to vector<16x32xbf16>
      %cst_260 = arith.constant dense<0.000000e+00> : vector<16x16xf32>
      %623 = tpu.matmul %620, %621, %cst_260 {dimension_numbers = #tpu.dot_dimension_numbers<[1], [1], [0], [0], [0, 0, 1, 0], [], []>} : vector<16x32xbf16>, vector<16x32xbf16>, vector<16x16xf32> -> vector<16x16xf32>
      %cst_261 = arith.constant 0.176776692 : f32
      %624 = vector.broadcast %cst_261 : f32 to vector<16x16xf32>
      %625 = arith.mulf %623, %624 : vector<16x16xf32>
      %cst_262 = arith.constant dense<0xFF800000> : vector<16xf32>
      %626 = vector.multi_reduction <maximumf>, %625, %cst_262 [1] : vector<16x16xf32> to vector<16xf32>
      %cst_263 = arith.constant 0xFF800000 : f32
      %627 = vector.broadcast %cst_263 : f32 to vector<16xf32>
      %628 = arith.maximumf %627, %626 : vector<16xf32>
      %629 = vector.shape_cast %628 : vector<16xf32> to vector<16x1xf32>
      %630 = vector.broadcast %629 : vector<16x1xf32> to vector<16x16xf32>
      %631 = arith.subf %625, %630 : vector<16x16xf32>
      %632 = math.exp %631 : vector<16x16xf32>
      %cst_264 = arith.constant dense<0.000000e+00> : vector<16xf32>
      %633 = vector.multi_reduction <add>, %632, %cst_264 [1] : vector<16x16xf32> to vector<16xf32>
      %634 = vector.shape_cast %633 : vector<16xf32> to vector<16x1xf32>
      %635 = vector.broadcast %634 : vector<16x1xf32> to vector<16x16xf32>
      %636 = arith.divf %632, %635 : vector<16x16xf32>
      %637 = arith.truncf %636 : vector<16x16xf32> to vector<16x16xbf16>
      %cst_265 = arith.constant dense<0.000000e+00> : vector<16x32xf32>
      %638 = tpu.matmul %637, %622, %cst_265 {dimension_numbers = #tpu.dot_dimension_numbers<[1], [0], [0], [1], [0, 0, 1, 1], [], []>} : vector<16x16xbf16>, vector<16x32xbf16>, vector<16x32xf32> -> vector<16x32xf32>
      %c16_266 = arith.constant 16 : index
      %c0_267 = arith.constant 0 : index
      %639 = vector.load %arg22[%c16_266, %c0_267] : memref<32x128xf32, #tpu.memory_space<vmem>>, vector<16x32xf32>
      tpu.vector_store %arg22[%c16_266, %c0_267], %638 {strides = array<i32>} : memref<32x128xf32, #tpu.memory_space<vmem>>, vector<16x32xf32>,
      %640 = vector.extract_strided_slice %537 {offsets = [16, 32], sizes = [16, 32], strides = [1, 1]} : vector<32x128xbf16> to vector<16x32xbf16>
      %641 = vector.extract_strided_slice %538 {offsets = [16, 32], sizes = [16, 32], strides = [1, 1]} : vector<32x128xbf16> to vector<16x32xbf16>
      %642 = vector.extract_strided_slice %539 {offsets = [16, 32], sizes = [16, 32], strides = [1, 1]} : vector<32x128xbf16> to vector<16x32xbf16>
      %cst_268 = arith.constant dense<0.000000e+00> : vector<16x16xf32>
      %643 = tpu.matmul %640, %641, %cst_268 {dimension_numbers = #tpu.dot_dimension_numbers<[1], [1], [0], [0], [0, 0, 1, 0], [], []>} : vector<16x32xbf16>, vector<16x32xbf16>, vector<16x16xf32> -> vector<16x16xf32>
      %cst_269 = arith.constant 0.176776692 : f32
      %644 = vector.broadcast %cst_269 : f32 to vector<16x16xf32>
      %645 = arith.mulf %643, %644 : vector<16x16xf32>
      %cst_270 = arith.constant dense<0xFF800000> : vector<16xf32>
      %646 = vector.multi_reduction <maximumf>, %645, %cst_270 [1] : vector<16x16xf32> to vector<16xf32>
      %cst_271 = arith.constant 0xFF800000 : f32
      %647 = vector.broadcast %cst_271 : f32 to vector<16xf32>
      %648 = arith.maximumf %647, %646 : vector<16xf32>
      %649 = vector.shape_cast %648 : vector<16xf32> to vector<16x1xf32>
      %650 = vector.broadcast %649 : vector<16x1xf32> to vector<16x16xf32>
      %651 = arith.subf %645, %650 : vector<16x16xf32>
      %652 = math.exp %651 : vector<16x16xf32>
      %cst_272 = arith.constant dense<0.000000e+00> : vector<16xf32>
      %653 = vector.multi_reduction <add>, %652, %cst_272 [1] : vector<16x16xf32> to vector<16xf32>
      %654 = vector.shape_cast %653 : vector<16xf32> to vector<16x1xf32>
      %655 = vector.broadcast %654 : vector<16x1xf32> to vector<16x16xf32>
      %656 = arith.divf %652, %655 : vector<16x16xf32>
      %657 = arith.truncf %656 : vector<16x16xf32> to vector<16x16xbf16>
      %cst_273 = arith.constant dense<0.000000e+00> : vector<16x32xf32>
      %658 = tpu.matmul %657, %642, %cst_273 {dimension_numbers = #tpu.dot_dimension_numbers<[1], [0], [0], [1], [0, 0, 1, 1], [], []>} : vector<16x16xbf16>, vector<16x32xbf16>, vector<16x32xf32> -> vector<16x32xf32>
      %c16_274 = arith.constant 16 : index
      %c32_275 = arith.constant 32 : index
      %659 = vector.load %arg22[%c16_274, %c32_275] : memref<32x128xf32, #tpu.memory_space<vmem>>, vector<16x32xf32>
      tpu.vector_store %arg22[%c16_274, %c32_275], %658 {strides = array<i32>} : memref<32x128xf32, #tpu.memory_space<vmem>>, vector<16x32xf32>,
      %660 = vector.extract_strided_slice %537 {offsets = [16, 64], sizes = [16, 32], strides = [1, 1]} : vector<32x128xbf16> to vector<16x32xbf16>
      %661 = vector.extract_strided_slice %538 {offsets = [16, 64], sizes = [16, 32], strides = [1, 1]} : vector<32x128xbf16> to vector<16x32xbf16>
      %662 = vector.extract_strided_slice %539 {offsets = [16, 64], sizes = [16, 32], strides = [1, 1]} : vector<32x128xbf16> to vector<16x32xbf16>
      %cst_276 = arith.constant dense<0.000000e+00> : vector<16x16xf32>
      %663 = tpu.matmul %660, %661, %cst_276 {dimension_numbers = #tpu.dot_dimension_numbers<[1], [1], [0], [0], [0, 0, 1, 0], [], []>} : vector<16x32xbf16>, vector<16x32xbf16>, vector<16x16xf32> -> vector<16x16xf32>
      %cst_277 = arith.constant 0.176776692 : f32
      %664 = vector.broadcast %cst_277 : f32 to vector<16x16xf32>
      %665 = arith.mulf %663, %664 : vector<16x16xf32>
      %cst_278 = arith.constant dense<0xFF800000> : vector<16xf32>
      %666 = vector.multi_reduction <maximumf>, %665, %cst_278 [1] : vector<16x16xf32> to vector<16xf32>
      %cst_279 = arith.constant 0xFF800000 : f32
      %667 = vector.broadcast %cst_279 : f32 to vector<16xf32>
      %668 = arith.maximumf %667, %666 : vector<16xf32>
      %669 = vector.shape_cast %668 : vector<16xf32> to vector<16x1xf32>
      %670 = vector.broadcast %669 : vector<16x1xf32> to vector<16x16xf32>
      %671 = arith.subf %665, %670 : vector<16x16xf32>
      %672 = math.exp %671 : vector<16x16xf32>
      %cst_280 = arith.constant dense<0.000000e+00> : vector<16xf32>
      %673 = vector.multi_reduction <add>, %672, %cst_280 [1] : vector<16x16xf32> to vector<16xf32>
      %674 = vector.shape_cast %673 : vector<16xf32> to vector<16x1xf32>
      %675 = vector.broadcast %674 : vector<16x1xf32> to vector<16x16xf32>
      %676 = arith.divf %672, %675 : vector<16x16xf32>
      %677 = arith.truncf %676 : vector<16x16xf32> to vector<16x16xbf16>
      %cst_281 = arith.constant dense<0.000000e+00> : vector<16x32xf32>
      %678 = tpu.matmul %677, %662, %cst_281 {dimension_numbers = #tpu.dot_dimension_numbers<[1], [0], [0], [1], [0, 0, 1, 1], [], []>} : vector<16x16xbf16>, vector<16x32xbf16>, vector<16x32xf32> -> vector<16x32xf32>
      %c16_282 = arith.constant 16 : index
      %c64_283 = arith.constant 64 : index
      %679 = vector.load %arg22[%c16_282, %c64_283] : memref<32x128xf32, #tpu.memory_space<vmem>>, vector<16x32xf32>
      tpu.vector_store %arg22[%c16_282, %c64_283], %678 {strides = array<i32>} : memref<32x128xf32, #tpu.memory_space<vmem>>, vector<16x32xf32>,
      %680 = vector.extract_strided_slice %537 {offsets = [16, 96], sizes = [16, 32], strides = [1, 1]} : vector<32x128xbf16> to vector<16x32xbf16>
      %681 = vector.extract_strided_slice %538 {offsets = [16, 96], sizes = [16, 32], strides = [1, 1]} : vector<32x128xbf16> to vector<16x32xbf16>
      %682 = vector.extract_strided_slice %539 {offsets = [16, 96], sizes = [16, 32], strides = [1, 1]} : vector<32x128xbf16> to vector<16x32xbf16>
      %cst_284 = arith.constant dense<0.000000e+00> : vector<16x16xf32>
      %683 = tpu.matmul %680, %681, %cst_284 {dimension_numbers = #tpu.dot_dimension_numbers<[1], [1], [0], [0], [0, 0, 1, 0], [], []>} : vector<16x32xbf16>, vector<16x32xbf16>, vector<16x16xf32> -> vector<16x16xf32>
      %cst_285 = arith.constant 0.176776692 : f32
      %684 = vector.broadcast %cst_285 : f32 to vector<16x16xf32>
      %685 = arith.mulf %683, %684 : vector<16x16xf32>
      %cst_286 = arith.constant dense<0xFF800000> : vector<16xf32>
      %686 = vector.multi_reduction <maximumf>, %685, %cst_286 [1] : vector<16x16xf32> to vector<16xf32>
      %cst_287 = arith.constant 0xFF800000 : f32
      %687 = vector.broadcast %cst_287 : f32 to vector<16xf32>
      %688 = arith.maximumf %687, %686 : vector<16xf32>
      %689 = vector.shape_cast %688 : vector<16xf32> to vector<16x1xf32>
      %690 = vector.broadcast %689 : vector<16x1xf32> to vector<16x16xf32>
      %691 = arith.subf %685, %690 : vector<16x16xf32>
      %692 = math.exp %691 : vector<16x16xf32>
      %cst_288 = arith.constant dense<0.000000e+00> : vector<16xf32>
      %693 = vector.multi_reduction <add>, %692, %cst_288 [1] : vector<16x16xf32> to vector<16xf32>
      %694 = vector.shape_cast %693 : vector<16xf32> to vector<16x1xf32>
      %695 = vector.broadcast %694 : vector<16x1xf32> to vector<16x16xf32>
      %696 = arith.divf %692, %695 : vector<16x16xf32>
      %697 = arith.truncf %696 : vector<16x16xf32> to vector<16x16xbf16>
      %cst_289 = arith.constant dense<0.000000e+00> : vector<16x32xf32>
      %698 = tpu.matmul %697, %682, %cst_289 {dimension_numbers = #tpu.dot_dimension_numbers<[1], [0], [0], [1], [0, 0, 1, 1], [], []>} : vector<16x16xbf16>, vector<16x32xbf16>, vector<16x32xf32> -> vector<16x32xf32>
      %c16_290 = arith.constant 16 : index
      %c96_291 = arith.constant 96 : index
      %699 = vector.load %arg22[%c16_290, %c96_291] : memref<32x128xf32, #tpu.memory_space<vmem>>, vector<16x32xf32>
      tpu.vector_store %arg22[%c16_290, %c96_291], %698 {strides = array<i32>} : memref<32x128xf32, #tpu.memory_space<vmem>>, vector<16x32xf32>,
      %c0_292 = arith.constant 0 : index
      %c0_293 = arith.constant 0 : index
      %700 = vector.load %arg22[%c0_292, %c0_293] : memref<32x128xf32, #tpu.memory_space<vmem>>, vector<32x128xf32>
      %c0_294 = arith.constant 0 : index
      %c0_295 = arith.constant 0 : index
      %c0_296 = arith.constant 0 : index
      %c0_297 = arith.constant 0 : index
      %701 = vector.load %arg9[%c0_294, %c0_295, %c0_296, %c0_297] : memref<1x2x128x128xbf16, #tpu.memory_space<vmem>>, vector<1x1x128x128xbf16>
      %702 = vector.shape_cast %701 : vector<1x1x128x128xbf16> to vector<128x128xbf16>
      %703 = vector.extract_strided_slice %5 {offsets = [0, 0], sizes = [1, 128], strides = [1, 1]} : vector<2x128xf32> to vector<1x128xf32>
      %704 = arith.truncf %700 : vector<32x128xf32> to vector<32x128xbf16>
      %cst_298 = arith.constant dense<0.000000e+00> : vector<32x128xf32>
      %705 = tpu.matmul %704, %702, %cst_298 {dimension_numbers = #tpu.dot_dimension_numbers<[1], [0], [0], [1], [0, 0, 1, 1], [], []>} : vector<32x128xbf16>, vector<128x128xbf16>, vector<32x128xf32> -> vector<32x128xf32>
      %706 = vector.broadcast %703 : vector<1x128xf32> to vector<32x128xf32>
      %707 = arith.addf %705, %706 : vector<32x128xf32>
      %708 = arith.truncf %76 : vector<32x128xf32> to vector<32x128xbf16>
      %709 = arith.truncf %74 : vector<32x128xf32> to vector<32x128xbf16>
      %710 = arith.truncf %75 : vector<32x128xf32> to vector<32x128xbf16>
      %711 = vector.extract_strided_slice %708 {offsets = [0, 0], sizes = [16, 32], strides = [1, 1]} : vector<32x128xbf16> to vector<16x32xbf16>
      %712 = vector.extract_strided_slice %709 {offsets = [0, 0], sizes = [16, 32], strides = [1, 1]} : vector<32x128xbf16> to vector<16x32xbf16>
      %713 = vector.extract_strided_slice %710 {offsets = [0, 0], sizes = [16, 32], strides = [1, 1]} : vector<32x128xbf16> to vector<16x32xbf16>
      %cst_299 = arith.constant dense<0.000000e+00> : vector<16x16xf32>
      %714 = tpu.matmul %711, %712, %cst_299 {dimension_numbers = #tpu.dot_dimension_numbers<[1], [1], [0], [0], [0, 0, 1, 0], [], []>} : vector<16x32xbf16>, vector<16x32xbf16>, vector<16x16xf32> -> vector<16x16xf32>
      %cst_300 = arith.constant 0.176776692 : f32
      %715 = vector.broadcast %cst_300 : f32 to vector<16x16xf32>
      %716 = arith.mulf %714, %715 : vector<16x16xf32>
      %cst_301 = arith.constant dense<0xFF800000> : vector<16xf32>
      %717 = vector.multi_reduction <maximumf>, %716, %cst_301 [1] : vector<16x16xf32> to vector<16xf32>
      %cst_302 = arith.constant 0xFF800000 : f32
      %718 = vector.broadcast %cst_302 : f32 to vector<16xf32>
      %719 = arith.maximumf %718, %717 : vector<16xf32>
      %720 = vector.shape_cast %719 : vector<16xf32> to vector<16x1xf32>
      %721 = vector.broadcast %720 : vector<16x1xf32> to vector<16x16xf32>
      %722 = arith.subf %716, %721 : vector<16x16xf32>
      %723 = math.exp %722 : vector<16x16xf32>
      %cst_303 = arith.constant dense<0.000000e+00> : vector<16xf32>
      %724 = vector.multi_reduction <add>, %723, %cst_303 [1] : vector<16x16xf32> to vector<16xf32>
      %725 = vector.shape_cast %724 : vector<16xf32> to vector<16x1xf32>
      %726 = vector.broadcast %725 : vector<16x1xf32> to vector<16x16xf32>
      %727 = arith.divf %723, %726 : vector<16x16xf32>
      %728 = arith.truncf %727 : vector<16x16xf32> to vector<16x16xbf16>
      %cst_304 = arith.constant dense<0.000000e+00> : vector<16x32xf32>
      %729 = tpu.matmul %728, %713, %cst_304 {dimension_numbers = #tpu.dot_dimension_numbers<[1], [0], [0], [1], [0, 0, 1, 1], [], []>} : vector<16x16xbf16>, vector<16x32xbf16>, vector<16x32xf32> -> vector<16x32xf32>
      %c0_305 = arith.constant 0 : index
      %c0_306 = arith.constant 0 : index
      %730 = vector.load %arg22[%c0_305, %c0_306] : memref<32x128xf32, #tpu.memory_space<vmem>>, vector<16x32xf32>
      tpu.vector_store %arg22[%c0_305, %c0_306], %729 {strides = array<i32>} : memref<32x128xf32, #tpu.memory_space<vmem>>, vector<16x32xf32>,
      %731 = vector.extract_strided_slice %708 {offsets = [0, 32], sizes = [16, 32], strides = [1, 1]} : vector<32x128xbf16> to vector<16x32xbf16>
      %732 = vector.extract_strided_slice %709 {offsets = [0, 32], sizes = [16, 32], strides = [1, 1]} : vector<32x128xbf16> to vector<16x32xbf16>
      %733 = vector.extract_strided_slice %710 {offsets = [0, 32], sizes = [16, 32], strides = [1, 1]} : vector<32x128xbf16> to vector<16x32xbf16>
      %cst_307 = arith.constant dense<0.000000e+00> : vector<16x16xf32>
      %734 = tpu.matmul %731, %732, %cst_307 {dimension_numbers = #tpu.dot_dimension_numbers<[1], [1], [0], [0], [0, 0, 1, 0], [], []>} : vector<16x32xbf16>, vector<16x32xbf16>, vector<16x16xf32> -> vector<16x16xf32>
      %cst_308 = arith.constant 0.176776692 : f32
      %735 = vector.broadcast %cst_308 : f32 to vector<16x16xf32>
      %736 = arith.mulf %734, %735 : vector<16x16xf32>
      %cst_309 = arith.constant dense<0xFF800000> : vector<16xf32>
      %737 = vector.multi_reduction <maximumf>, %736, %cst_309 [1] : vector<16x16xf32> to vector<16xf32>
      %cst_310 = arith.constant 0xFF800000 : f32
      %738 = vector.broadcast %cst_310 : f32 to vector<16xf32>
      %739 = arith.maximumf %738, %737 : vector<16xf32>
      %740 = vector.shape_cast %739 : vector<16xf32> to vector<16x1xf32>
      %741 = vector.broadcast %740 : vector<16x1xf32> to vector<16x16xf32>
      %742 = arith.subf %736, %741 : vector<16x16xf32>
      %743 = math.exp %742 : vector<16x16xf32>
      %cst_311 = arith.constant dense<0.000000e+00> : vector<16xf32>
      %744 = vector.multi_reduction <add>, %743, %cst_311 [1] : vector<16x16xf32> to vector<16xf32>
      %745 = vector.shape_cast %744 : vector<16xf32> to vector<16x1xf32>
      %746 = vector.broadcast %745 : vector<16x1xf32> to vector<16x16xf32>
      %747 = arith.divf %743, %746 : vector<16x16xf32>
      %748 = arith.truncf %747 : vector<16x16xf32> to vector<16x16xbf16>
      %cst_312 = arith.constant dense<0.000000e+00> : vector<16x32xf32>
      %749 = tpu.matmul %748, %733, %cst_312 {dimension_numbers = #tpu.dot_dimension_numbers<[1], [0], [0], [1], [0, 0, 1, 1], [], []>} : vector<16x16xbf16>, vector<16x32xbf16>, vector<16x32xf32> -> vector<16x32xf32>
      %c0_313 = arith.constant 0 : index
      %c32_314 = arith.constant 32 : index
      %750 = vector.load %arg22[%c0_313, %c32_314] : memref<32x128xf32, #tpu.memory_space<vmem>>, vector<16x32xf32>
      tpu.vector_store %arg22[%c0_313, %c32_314], %749 {strides = array<i32>} : memref<32x128xf32, #tpu.memory_space<vmem>>, vector<16x32xf32>,
      %751 = vector.extract_strided_slice %708 {offsets = [0, 64], sizes = [16, 32], strides = [1, 1]} : vector<32x128xbf16> to vector<16x32xbf16>
      %752 = vector.extract_strided_slice %709 {offsets = [0, 64], sizes = [16, 32], strides = [1, 1]} : vector<32x128xbf16> to vector<16x32xbf16>
      %753 = vector.extract_strided_slice %710 {offsets = [0, 64], sizes = [16, 32], strides = [1, 1]} : vector<32x128xbf16> to vector<16x32xbf16>
      %cst_315 = arith.constant dense<0.000000e+00> : vector<16x16xf32>
      %754 = tpu.matmul %751, %752, %cst_315 {dimension_numbers = #tpu.dot_dimension_numbers<[1], [1], [0], [0], [0, 0, 1, 0], [], []>} : vector<16x32xbf16>, vector<16x32xbf16>, vector<16x16xf32> -> vector<16x16xf32>
      %cst_316 = arith.constant 0.176776692 : f32
      %755 = vector.broadcast %cst_316 : f32 to vector<16x16xf32>
      %756 = arith.mulf %754, %755 : vector<16x16xf32>
      %cst_317 = arith.constant dense<0xFF800000> : vector<16xf32>
      %757 = vector.multi_reduction <maximumf>, %756, %cst_317 [1] : vector<16x16xf32> to vector<16xf32>
      %cst_318 = arith.constant 0xFF800000 : f32
      %758 = vector.broadcast %cst_318 : f32 to vector<16xf32>
      %759 = arith.maximumf %758, %757 : vector<16xf32>
      %760 = vector.shape_cast %759 : vector<16xf32> to vector<16x1xf32>
      %761 = vector.broadcast %760 : vector<16x1xf32> to vector<16x16xf32>
      %762 = arith.subf %756, %761 : vector<16x16xf32>
      %763 = math.exp %762 : vector<16x16xf32>
      %cst_319 = arith.constant dense<0.000000e+00> : vector<16xf32>
      %764 = vector.multi_reduction <add>, %763, %cst_319 [1] : vector<16x16xf32> to vector<16xf32>
      %765 = vector.shape_cast %764 : vector<16xf32> to vector<16x1xf32>
      %766 = vector.broadcast %765 : vector<16x1xf32> to vector<16x16xf32>
      %767 = arith.divf %763, %766 : vector<16x16xf32>
      %768 = arith.truncf %767 : vector<16x16xf32> to vector<16x16xbf16>
      %cst_320 = arith.constant dense<0.000000e+00> : vector<16x32xf32>
      %769 = tpu.matmul %768, %753, %cst_320 {dimension_numbers = #tpu.dot_dimension_numbers<[1], [0], [0], [1], [0, 0, 1, 1], [], []>} : vector<16x16xbf16>, vector<16x32xbf16>, vector<16x32xf32> -> vector<16x32xf32>
      %c0_321 = arith.constant 0 : index
      %c64_322 = arith.constant 64 : index
      %770 = vector.load %arg22[%c0_321, %c64_322] : memref<32x128xf32, #tpu.memory_space<vmem>>, vector<16x32xf32>
      tpu.vector_store %arg22[%c0_321, %c64_322], %769 {strides = array<i32>} : memref<32x128xf32, #tpu.memory_space<vmem>>, vector<16x32xf32>,
      %771 = vector.extract_strided_slice %708 {offsets = [0, 96], sizes = [16, 32], strides = [1, 1]} : vector<32x128xbf16> to vector<16x32xbf16>
      %772 = vector.extract_strided_slice %709 {offsets = [0, 96], sizes = [16, 32], strides = [1, 1]} : vector<32x128xbf16> to vector<16x32xbf16>
      %773 = vector.extract_strided_slice %710 {offsets = [0, 96], sizes = [16, 32], strides = [1, 1]} : vector<32x128xbf16> to vector<16x32xbf16>
      %cst_323 = arith.constant dense<0.000000e+00> : vector<16x16xf32>
      %774 = tpu.matmul %771, %772, %cst_323 {dimension_numbers = #tpu.dot_dimension_numbers<[1], [1], [0], [0], [0, 0, 1, 0], [], []>} : vector<16x32xbf16>, vector<16x32xbf16>, vector<16x16xf32> -> vector<16x16xf32>
      %cst_324 = arith.constant 0.176776692 : f32
      %775 = vector.broadcast %cst_324 : f32 to vector<16x16xf32>
      %776 = arith.mulf %774, %775 : vector<16x16xf32>
      %cst_325 = arith.constant dense<0xFF800000> : vector<16xf32>
      %777 = vector.multi_reduction <maximumf>, %776, %cst_325 [1] : vector<16x16xf32> to vector<16xf32>
      %cst_326 = arith.constant 0xFF800000 : f32
      %778 = vector.broadcast %cst_326 : f32 to vector<16xf32>
      %779 = arith.maximumf %778, %777 : vector<16xf32>
      %780 = vector.shape_cast %779 : vector<16xf32> to vector<16x1xf32>
      %781 = vector.broadcast %780 : vector<16x1xf32> to vector<16x16xf32>
      %782 = arith.subf %776, %781 : vector<16x16xf32>
      %783 = math.exp %782 : vector<16x16xf32>
      %cst_327 = arith.constant dense<0.000000e+00> : vector<16xf32>
      %784 = vector.multi_reduction <add>, %783, %cst_327 [1] : vector<16x16xf32> to vector<16xf32>
      %785 = vector.shape_cast %784 : vector<16xf32> to vector<16x1xf32>
      %786 = vector.broadcast %785 : vector<16x1xf32> to vector<16x16xf32>
      %787 = arith.divf %783, %786 : vector<16x16xf32>
      %788 = arith.truncf %787 : vector<16x16xf32> to vector<16x16xbf16>
      %cst_328 = arith.constant dense<0.000000e+00> : vector<16x32xf32>
      %789 = tpu.matmul %788, %773, %cst_328 {dimension_numbers = #tpu.dot_dimension_numbers<[1], [0], [0], [1], [0, 0, 1, 1], [], []>} : vector<16x16xbf16>, vector<16x32xbf16>, vector<16x32xf32> -> vector<16x32xf32>
      %c0_329 = arith.constant 0 : index
      %c96_330 = arith.constant 96 : index
      %790 = vector.load %arg22[%c0_329, %c96_330] : memref<32x128xf32, #tpu.memory_space<vmem>>, vector<16x32xf32>
      tpu.vector_store %arg22[%c0_329, %c96_330], %789 {strides = array<i32>} : memref<32x128xf32, #tpu.memory_space<vmem>>, vector<16x32xf32>,
      %791 = vector.extract_strided_slice %708 {offsets = [16, 0], sizes = [16, 32], strides = [1, 1]} : vector<32x128xbf16> to vector<16x32xbf16>
      %792 = vector.extract_strided_slice %709 {offsets = [16, 0], sizes = [16, 32], strides = [1, 1]} : vector<32x128xbf16> to vector<16x32xbf16>
      %793 = vector.extract_strided_slice %710 {offsets = [16, 0], sizes = [16, 32], strides = [1, 1]} : vector<32x128xbf16> to vector<16x32xbf16>
      %cst_331 = arith.constant dense<0.000000e+00> : vector<16x16xf32>
      %794 = tpu.matmul %791, %792, %cst_331 {dimension_numbers = #tpu.dot_dimension_numbers<[1], [1], [0], [0], [0, 0, 1, 0], [], []>} : vector<16x32xbf16>, vector<16x32xbf16>, vector<16x16xf32> -> vector<16x16xf32>
      %cst_332 = arith.constant 0.176776692 : f32
      %795 = vector.broadcast %cst_332 : f32 to vector<16x16xf32>
      %796 = arith.mulf %794, %795 : vector<16x16xf32>
      %cst_333 = arith.constant dense<0xFF800000> : vector<16xf32>
      %797 = vector.multi_reduction <maximumf>, %796, %cst_333 [1] : vector<16x16xf32> to vector<16xf32>
      %cst_334 = arith.constant 0xFF800000 : f32
      %798 = vector.broadcast %cst_334 : f32 to vector<16xf32>
      %799 = arith.maximumf %798, %797 : vector<16xf32>
      %800 = vector.shape_cast %799 : vector<16xf32> to vector<16x1xf32>
      %801 = vector.broadcast %800 : vector<16x1xf32> to vector<16x16xf32>
      %802 = arith.subf %796, %801 : vector<16x16xf32>
      %803 = math.exp %802 : vector<16x16xf32>
      %cst_335 = arith.constant dense<0.000000e+00> : vector<16xf32>
      %804 = vector.multi_reduction <add>, %803, %cst_335 [1] : vector<16x16xf32> to vector<16xf32>
      %805 = vector.shape_cast %804 : vector<16xf32> to vector<16x1xf32>
      %806 = vector.broadcast %805 : vector<16x1xf32> to vector<16x16xf32>
      %807 = arith.divf %803, %806 : vector<16x16xf32>
      %808 = arith.truncf %807 : vector<16x16xf32> to vector<16x16xbf16>
      %cst_336 = arith.constant dense<0.000000e+00> : vector<16x32xf32>
      %809 = tpu.matmul %808, %793, %cst_336 {dimension_numbers = #tpu.dot_dimension_numbers<[1], [0], [0], [1], [0, 0, 1, 1], [], []>} : vector<16x16xbf16>, vector<16x32xbf16>, vector<16x32xf32> -> vector<16x32xf32>
      %c16_337 = arith.constant 16 : index
      %c0_338 = arith.constant 0 : index
      %810 = vector.load %arg22[%c16_337, %c0_338] : memref<32x128xf32, #tpu.memory_space<vmem>>, vector<16x32xf32>
      tpu.vector_store %arg22[%c16_337, %c0_338], %809 {strides = array<i32>} : memref<32x128xf32, #tpu.memory_space<vmem>>, vector<16x32xf32>,
      %811 = vector.extract_strided_slice %708 {offsets = [16, 32], sizes = [16, 32], strides = [1, 1]} : vector<32x128xbf16> to vector<16x32xbf16>
      %812 = vector.extract_strided_slice %709 {offsets = [16, 32], sizes = [16, 32], strides = [1, 1]} : vector<32x128xbf16> to vector<16x32xbf16>
      %813 = vector.extract_strided_slice %710 {offsets = [16, 32], sizes = [16, 32], strides = [1, 1]} : vector<32x128xbf16> to vector<16x32xbf16>
      %cst_339 = arith.constant dense<0.000000e+00> : vector<16x16xf32>
      %814 = tpu.matmul %811, %812, %cst_339 {dimension_numbers = #tpu.dot_dimension_numbers<[1], [1], [0], [0], [0, 0, 1, 0], [], []>} : vector<16x32xbf16>, vector<16x32xbf16>, vector<16x16xf32> -> vector<16x16xf32>
      %cst_340 = arith.constant 0.176776692 : f32
      %815 = vector.broadcast %cst_340 : f32 to vector<16x16xf32>
      %816 = arith.mulf %814, %815 : vector<16x16xf32>
      %cst_341 = arith.constant dense<0xFF800000> : vector<16xf32>
      %817 = vector.multi_reduction <maximumf>, %816, %cst_341 [1] : vector<16x16xf32> to vector<16xf32>
      %cst_342 = arith.constant 0xFF800000 : f32
      %818 = vector.broadcast %cst_342 : f32 to vector<16xf32>
      %819 = arith.maximumf %818, %817 : vector<16xf32>
      %820 = vector.shape_cast %819 : vector<16xf32> to vector<16x1xf32>
      %821 = vector.broadcast %820 : vector<16x1xf32> to vector<16x16xf32>
      %822 = arith.subf %816, %821 : vector<16x16xf32>
      %823 = math.exp %822 : vector<16x16xf32>
      %cst_343 = arith.constant dense<0.000000e+00> : vector<16xf32>
      %824 = vector.multi_reduction <add>, %823, %cst_343 [1] : vector<16x16xf32> to vector<16xf32>
      %825 = vector.shape_cast %824 : vector<16xf32> to vector<16x1xf32>
      %826 = vector.broadcast %825 : vector<16x1xf32> to vector<16x16xf32>
      %827 = arith.divf %823, %826 : vector<16x16xf32>
      %828 = arith.truncf %827 : vector<16x16xf32> to vector<16x16xbf16>
      %cst_344 = arith.constant dense<0.000000e+00> : vector<16x32xf32>
      %829 = tpu.matmul %828, %813, %cst_344 {dimension_numbers = #tpu.dot_dimension_numbers<[1], [0], [0], [1], [0, 0, 1, 1], [], []>} : vector<16x16xbf16>, vector<16x32xbf16>, vector<16x32xf32> -> vector<16x32xf32>
      %c16_345 = arith.constant 16 : index
      %c32_346 = arith.constant 32 : index
      %830 = vector.load %arg22[%c16_345, %c32_346] : memref<32x128xf32, #tpu.memory_space<vmem>>, vector<16x32xf32>
      tpu.vector_store %arg22[%c16_345, %c32_346], %829 {strides = array<i32>} : memref<32x128xf32, #tpu.memory_space<vmem>>, vector<16x32xf32>,
      %831 = vector.extract_strided_slice %708 {offsets = [16, 64], sizes = [16, 32], strides = [1, 1]} : vector<32x128xbf16> to vector<16x32xbf16>
      %832 = vector.extract_strided_slice %709 {offsets = [16, 64], sizes = [16, 32], strides = [1, 1]} : vector<32x128xbf16> to vector<16x32xbf16>
      %833 = vector.extract_strided_slice %710 {offsets = [16, 64], sizes = [16, 32], strides = [1, 1]} : vector<32x128xbf16> to vector<16x32xbf16>
      %cst_347 = arith.constant dense<0.000000e+00> : vector<16x16xf32>
      %834 = tpu.matmul %831, %832, %cst_347 {dimension_numbers = #tpu.dot_dimension_numbers<[1], [1], [0], [0], [0, 0, 1, 0], [], []>} : vector<16x32xbf16>, vector<16x32xbf16>, vector<16x16xf32> -> vector<16x16xf32>
      %cst_348 = arith.constant 0.176776692 : f32
      %835 = vector.broadcast %cst_348 : f32 to vector<16x16xf32>
      %836 = arith.mulf %834, %835 : vector<16x16xf32>
      %cst_349 = arith.constant dense<0xFF800000> : vector<16xf32>
      %837 = vector.multi_reduction <maximumf>, %836, %cst_349 [1] : vector<16x16xf32> to vector<16xf32>
      %cst_350 = arith.constant 0xFF800000 : f32
      %838 = vector.broadcast %cst_350 : f32 to vector<16xf32>
      %839 = arith.maximumf %838, %837 : vector<16xf32>
      %840 = vector.shape_cast %839 : vector<16xf32> to vector<16x1xf32>
      %841 = vector.broadcast %840 : vector<16x1xf32> to vector<16x16xf32>
      %842 = arith.subf %836, %841 : vector<16x16xf32>
      %843 = math.exp %842 : vector<16x16xf32>
      %cst_351 = arith.constant dense<0.000000e+00> : vector<16xf32>
      %844 = vector.multi_reduction <add>, %843, %cst_351 [1] : vector<16x16xf32> to vector<16xf32>
      %845 = vector.shape_cast %844 : vector<16xf32> to vector<16x1xf32>
      %846 = vector.broadcast %845 : vector<16x1xf32> to vector<16x16xf32>
      %847 = arith.divf %843, %846 : vector<16x16xf32>
      %848 = arith.truncf %847 : vector<16x16xf32> to vector<16x16xbf16>
      %cst_352 = arith.constant dense<0.000000e+00> : vector<16x32xf32>
      %849 = tpu.matmul %848, %833, %cst_352 {dimension_numbers = #tpu.dot_dimension_numbers<[1], [0], [0], [1], [0, 0, 1, 1], [], []>} : vector<16x16xbf16>, vector<16x32xbf16>, vector<16x32xf32> -> vector<16x32xf32>
      %c16_353 = arith.constant 16 : index
      %c64_354 = arith.constant 64 : index
      %850 = vector.load %arg22[%c16_353, %c64_354] : memref<32x128xf32, #tpu.memory_space<vmem>>, vector<16x32xf32>
      tpu.vector_store %arg22[%c16_353, %c64_354], %849 {strides = array<i32>} : memref<32x128xf32, #tpu.memory_space<vmem>>, vector<16x32xf32>,
      %851 = vector.extract_strided_slice %708 {offsets = [16, 96], sizes = [16, 32], strides = [1, 1]} : vector<32x128xbf16> to vector<16x32xbf16>
      %852 = vector.extract_strided_slice %709 {offsets = [16, 96], sizes = [16, 32], strides = [1, 1]} : vector<32x128xbf16> to vector<16x32xbf16>
      %853 = vector.extract_strided_slice %710 {offsets = [16, 96], sizes = [16, 32], strides = [1, 1]} : vector<32x128xbf16> to vector<16x32xbf16>
      %cst_355 = arith.constant dense<0.000000e+00> : vector<16x16xf32>
      %854 = tpu.matmul %851, %852, %cst_355 {dimension_numbers = #tpu.dot_dimension_numbers<[1], [1], [0], [0], [0, 0, 1, 0], [], []>} : vector<16x32xbf16>, vector<16x32xbf16>, vector<16x16xf32> -> vector<16x16xf32>
      %cst_356 = arith.constant 0.176776692 : f32
      %855 = vector.broadcast %cst_356 : f32 to vector<16x16xf32>
      %856 = arith.mulf %854, %855 : vector<16x16xf32>
      %cst_357 = arith.constant dense<0xFF800000> : vector<16xf32>
      %857 = vector.multi_reduction <maximumf>, %856, %cst_357 [1] : vector<16x16xf32> to vector<16xf32>
      %cst_358 = arith.constant 0xFF800000 : f32
      %858 = vector.broadcast %cst_358 : f32 to vector<16xf32>
      %859 = arith.maximumf %858, %857 : vector<16xf32>
      %860 = vector.shape_cast %859 : vector<16xf32> to vector<16x1xf32>
      %861 = vector.broadcast %860 : vector<16x1xf32> to vector<16x16xf32>
      %862 = arith.subf %856, %861 : vector<16x16xf32>
      %863 = math.exp %862 : vector<16x16xf32>
      %cst_359 = arith.constant dense<0.000000e+00> : vector<16xf32>
      %864 = vector.multi_reduction <add>, %863, %cst_359 [1] : vector<16x16xf32> to vector<16xf32>
      %865 = vector.shape_cast %864 : vector<16xf32> to vector<16x1xf32>
      %866 = vector.broadcast %865 : vector<16x1xf32> to vector<16x16xf32>
      %867 = arith.divf %863, %866 : vector<16x16xf32>
      %868 = arith.truncf %867 : vector<16x16xf32> to vector<16x16xbf16>
      %cst_360 = arith.constant dense<0.000000e+00> : vector<16x32xf32>
      %869 = tpu.matmul %868, %853, %cst_360 {dimension_numbers = #tpu.dot_dimension_numbers<[1], [0], [0], [1], [0, 0, 1, 1], [], []>} : vector<16x16xbf16>, vector<16x32xbf16>, vector<16x32xf32> -> vector<16x32xf32>
      %c16_361 = arith.constant 16 : index
      %c96_362 = arith.constant 96 : index
      %870 = vector.load %arg22[%c16_361, %c96_362] : memref<32x128xf32, #tpu.memory_space<vmem>>, vector<16x32xf32>
      tpu.vector_store %arg22[%c16_361, %c96_362], %869 {strides = array<i32>} : memref<32x128xf32, #tpu.memory_space<vmem>>, vector<16x32xf32>,
      %c0_363 = arith.constant 0 : index
      %c0_364 = arith.constant 0 : index
      %871 = vector.load %arg22[%c0_363, %c0_364] : memref<32x128xf32, #tpu.memory_space<vmem>>, vector<32x128xf32>
      %c0_365 = arith.constant 0 : index
      %c1_366 = arith.constant 1 : index
      %c0_367 = arith.constant 0 : index
      %c0_368 = arith.constant 0 : index
      %872 = vector.load %arg9[%c0_365, %c1_366, %c0_367, %c0_368] : memref<1x2x128x128xbf16, #tpu.memory_space<vmem>>, vector<1x1x128x128xbf16>
      %873 = vector.shape_cast %872 : vector<1x1x128x128xbf16> to vector<128x128xbf16>
      %874 = vector.extract_strided_slice %5 {offsets = [1, 0], sizes = [1, 128], strides = [1, 1]} : vector<2x128xf32> to vector<1x128xf32>
      %875 = arith.truncf %871 : vector<32x128xf32> to vector<32x128xbf16>
      %cst_369 = arith.constant dense<0.000000e+00> : vector<32x128xf32>
      %876 = tpu.matmul %875, %873, %cst_369 {dimension_numbers = #tpu.dot_dimension_numbers<[1], [0], [0], [1], [0, 0, 1, 1], [], []>} : vector<32x128xbf16>, vector<128x128xbf16>, vector<32x128xf32> -> vector<32x128xf32>
      %877 = vector.broadcast %874 : vector<1x128xf32> to vector<32x128xf32>
      %878 = arith.addf %876, %877 : vector<32x128xf32>
      %879 = arith.index_cast %arg1 : i32 to index
      %c0_370 = arith.constant 0 : index
      %880 = memref.load %arg3[%879, %c0_370] : memref<4x4xf32, #tpu.memory_space<smem>>
      %881 = arith.index_cast %arg1 : i32 to index
      %c1_371 = arith.constant 1 : index
      %882 = memref.load %arg3[%881, %c1_371] : memref<4x4xf32, #tpu.memory_space<smem>>
      %883 = arith.index_cast %arg1 : i32 to index
      %c2 = arith.constant 2 : index
      %884 = memref.load %arg3[%883, %c2] : memref<4x4xf32, #tpu.memory_space<smem>>
      %885 = arith.index_cast %arg1 : i32 to index
      %c3 = arith.constant 3 : index
      %886 = memref.load %arg3[%885, %c3] : memref<4x4xf32, #tpu.memory_space<smem>>
      %c0_372 = arith.constant 0 : index
      %c0_373 = arith.constant 0 : index
      %887 = vector.load %arg20[%c0_372, %c0_373] : memref<32x128xf32, #tpu.memory_space<vmem>>, vector<32x128xf32>
      %888 = vector.broadcast %880 : f32 to vector<32x128xf32>
      %889 = arith.mulf %888, %887 : vector<32x128xf32>
      %890 = vector.broadcast %882 : f32 to vector<32x128xf32>
      %891 = arith.mulf %890, %707 : vector<32x128xf32>
      %892 = arith.addf %889, %891 : vector<32x128xf32>
      %c0_374 = arith.constant 0 : index
      %c0_375 = arith.constant 0 : index
      %893 = vector.load %arg20[%c0_374, %c0_375] : memref<32x128xf32, #tpu.memory_space<vmem>>, vector<32x128xf32>
      tpu.vector_store %arg20[%c0_374, %c0_375], %892 {strides = array<i32>} : memref<32x128xf32, #tpu.memory_space<vmem>>, vector<32x128xf32>,
      %c0_376 = arith.constant 0 : index
      %c0_377 = arith.constant 0 : index
      %894 = vector.load %arg21[%c0_376, %c0_377] : memref<32x128xf32, #tpu.memory_space<vmem>>, vector<32x128xf32>
      %895 = vector.broadcast %884 : f32 to vector<32x128xf32>
      %896 = arith.mulf %895, %894 : vector<32x128xf32>
      %897 = vector.broadcast %886 : f32 to vector<32x128xf32>
      %898 = arith.mulf %897, %878 : vector<32x128xf32>
      %899 = arith.addf %896, %898 : vector<32x128xf32>
      %c0_378 = arith.constant 0 : index
      %c0_379 = arith.constant 0 : index
      %900 = vector.load %arg21[%c0_378, %c0_379] : memref<32x128xf32, #tpu.memory_space<vmem>>, vector<32x128xf32>
      tpu.vector_store %arg21[%c0_378, %c0_379], %899 {strides = array<i32>} : memref<32x128xf32, #tpu.memory_space<vmem>>, vector<32x128xf32>,
    } else {
    }
    %c0_181 = arith.constant 0 : index
    %c0_182 = arith.constant 0 : index
    %428 = vector.load %arg20[%c0_181, %c0_182] : memref<32x128xf32, #tpu.memory_space<vmem>>, vector<32x128xf32>
    %429 = arith.addf %13, %428 : vector<32x128xf32>
    %c0_183 = arith.constant 0 : index
    %c0_184 = arith.constant 0 : index
    %430 = vector.load %arg21[%c0_183, %c0_184] : memref<32x128xf32, #tpu.memory_space<vmem>>, vector<32x128xf32>
    %431 = arith.addf %14, %430 : vector<32x128xf32>
    %432 = vector.extract_strided_slice %1 {offsets = [4, 0], sizes = [1, 128], strides = [1, 1]} : vector<8x128xf32> to vector<1x128xf32>
    %433 = vector.extract_strided_slice %1 {offsets = [5, 0], sizes = [1, 128], strides = [1, 1]} : vector<8x128xf32> to vector<1x128xf32>
    %cst_185 = arith.constant dense<0.000000e+00> : vector<32xf32>
    %434 = vector.multi_reduction <add>, %429, %cst_185 [1] : vector<32x128xf32> to vector<32xf32>
    %435 = vector.shape_cast %434 : vector<32xf32> to vector<32x1xf32>
    %cst_186 = arith.constant 1.280000e+02 : f32
    %436 = vector.broadcast %cst_186 : f32 to vector<32x1xf32>
    %437 = arith.divf %435, %436 : vector<32x1xf32>
    %438 = vector.broadcast %437 : vector<32x1xf32> to vector<32x128xf32>
    %439 = arith.subf %429, %438 : vector<32x128xf32>
    %440 = arith.mulf %439, %439 : vector<32x128xf32>
    %cst_187 = arith.constant dense<0.000000e+00> : vector<32xf32>
    %441 = vector.multi_reduction <add>, %440, %cst_187 [1] : vector<32x128xf32> to vector<32xf32>
    %442 = vector.shape_cast %441 : vector<32xf32> to vector<32x1xf32>
    %cst_188 = arith.constant 1.280000e+02 : f32
    %443 = vector.broadcast %cst_188 : f32 to vector<32x1xf32>
    %444 = arith.divf %442, %443 : vector<32x1xf32>
    %cst_189 = arith.constant 9.99999997E-7 : f32
    %445 = vector.broadcast %cst_189 : f32 to vector<32x1xf32>
    %446 = arith.addf %444, %445 : vector<32x1xf32>
    %447 = math.rsqrt %446 : vector<32x1xf32>
    %448 = vector.broadcast %447 : vector<32x1xf32> to vector<32x128xf32>
    %449 = arith.mulf %439, %448 : vector<32x128xf32>
    %450 = vector.broadcast %432 : vector<1x128xf32> to vector<32x128xf32>
    %451 = arith.mulf %449, %450 : vector<32x128xf32>
    %452 = vector.broadcast %433 : vector<1x128xf32> to vector<32x128xf32>
    %453 = arith.addf %451, %452 : vector<32x128xf32>
    %c0_190 = arith.constant 0 : index
    %c0_191 = arith.constant 0 : index
    %c0_192 = arith.constant 0 : index
    %c0_193 = arith.constant 0 : index
    %454 = vector.load %arg11[%c0_190, %c0_191, %c0_192, %c0_193] : memref<1x2x128x256xbf16, #tpu.memory_space<vmem>>, vector<1x1x128x256xbf16>
    %455 = vector.shape_cast %454 : vector<1x1x128x256xbf16> to vector<128x256xbf16>
    %456 = vector.extract_strided_slice %7 {offsets = [0, 0], sizes = [1, 256], strides = [1, 1]} : vector<2x256xf32> to vector<1x256xf32>
    %457 = arith.truncf %453 : vector<32x128xf32> to vector<32x128xbf16>
    %cst_194 = arith.constant dense<0.000000e+00> : vector<32x256xf32>
    %458 = tpu.matmul %457, %455, %cst_194 {dimension_numbers = #tpu.dot_dimension_numbers<[1], [0], [0], [1], [0, 0, 1, 1], [], []>} : vector<32x128xbf16>, vector<128x256xbf16>, vector<32x256xf32> -> vector<32x256xf32>
    %459 = vector.broadcast %456 : vector<1x256xf32> to vector<32x256xf32>
    %460 = arith.addf %458, %459 : vector<32x256xf32>
    %461 = arith.mulf %460, %460 : vector<32x256xf32>
    %462 = arith.mulf %460, %461 : vector<32x256xf32>
    %cst_195 = arith.constant 4.471500e-02 : f32
    %463 = vector.broadcast %cst_195 : f32 to vector<32x256xf32>
    %464 = arith.mulf %463, %462 : vector<32x256xf32>
    %465 = arith.addf %460, %464 : vector<32x256xf32>
    %cst_196 = arith.constant 0.797884583 : f32
    %466 = vector.broadcast %cst_196 : f32 to vector<32x256xf32>
    %467 = arith.mulf %466, %465 : vector<32x256xf32>
    %468 = math.tanh %467 : vector<32x256xf32>
    %cst_197 = arith.constant 1.000000e+00 : f32
    %469 = vector.broadcast %cst_197 : f32 to vector<32x256xf32>
    %470 = arith.addf %469, %468 : vector<32x256xf32>
    %cst_198 = arith.constant 5.000000e-01 : f32
    %471 = vector.broadcast %cst_198 : f32 to vector<32x256xf32>
    %472 = arith.mulf %471, %470 : vector<32x256xf32>
    %473 = arith.mulf %460, %472 : vector<32x256xf32>
    %c0_199 = arith.constant 0 : index
    %c0_200 = arith.constant 0 : index
    %c0_201 = arith.constant 0 : index
    %c0_202 = arith.constant 0 : index
    %474 = vector.load %arg13[%c0_199, %c0_200, %c0_201, %c0_202] : memref<1x2x256x128xbf16, #tpu.memory_space<vmem>>, vector<1x1x256x128xbf16>
    %475 = vector.shape_cast %474 : vector<1x1x256x128xbf16> to vector<256x128xbf16>
    %476 = vector.extract_strided_slice %9 {offsets = [0, 0], sizes = [1, 128], strides = [1, 1]} : vector<2x128xf32> to vector<1x128xf32>
    %477 = arith.truncf %473 : vector<32x256xf32> to vector<32x256xbf16>
    %cst_203 = arith.constant dense<0.000000e+00> : vector<32x128xf32>
    %478 = tpu.matmul %477, %475, %cst_203 {dimension_numbers = #tpu.dot_dimension_numbers<[1], [0], [0], [1], [0, 0, 1, 1], [], []>} : vector<32x256xbf16>, vector<256x128xbf16>, vector<32x128xf32> -> vector<32x128xf32>
    %479 = vector.broadcast %476 : vector<1x128xf32> to vector<32x128xf32>
    %480 = arith.addf %478, %479 : vector<32x128xf32>
    %481 = arith.addf %429, %480 : vector<32x128xf32>
    %482 = vector.extract_strided_slice %1 {offsets = [6, 0], sizes = [1, 128], strides = [1, 1]} : vector<8x128xf32> to vector<1x128xf32>
    %483 = vector.extract_strided_slice %1 {offsets = [7, 0], sizes = [1, 128], strides = [1, 1]} : vector<8x128xf32> to vector<1x128xf32>
    %cst_204 = arith.constant dense<0.000000e+00> : vector<32xf32>
    %484 = vector.multi_reduction <add>, %431, %cst_204 [1] : vector<32x128xf32> to vector<32xf32>
    %485 = vector.shape_cast %484 : vector<32xf32> to vector<32x1xf32>
    %cst_205 = arith.constant 1.280000e+02 : f32
    %486 = vector.broadcast %cst_205 : f32 to vector<32x1xf32>
    %487 = arith.divf %485, %486 : vector<32x1xf32>
    %488 = vector.broadcast %487 : vector<32x1xf32> to vector<32x128xf32>
    %489 = arith.subf %431, %488 : vector<32x128xf32>
    %490 = arith.mulf %489, %489 : vector<32x128xf32>
    %cst_206 = arith.constant dense<0.000000e+00> : vector<32xf32>
    %491 = vector.multi_reduction <add>, %490, %cst_206 [1] : vector<32x128xf32> to vector<32xf32>
    %492 = vector.shape_cast %491 : vector<32xf32> to vector<32x1xf32>
    %cst_207 = arith.constant 1.280000e+02 : f32
    %493 = vector.broadcast %cst_207 : f32 to vector<32x1xf32>
    %494 = arith.divf %492, %493 : vector<32x1xf32>
    %cst_208 = arith.constant 9.99999997E-7 : f32
    %495 = vector.broadcast %cst_208 : f32 to vector<32x1xf32>
    %496 = arith.addf %494, %495 : vector<32x1xf32>
    %497 = math.rsqrt %496 : vector<32x1xf32>
    %498 = vector.broadcast %497 : vector<32x1xf32> to vector<32x128xf32>
    %499 = arith.mulf %489, %498 : vector<32x128xf32>
    %500 = vector.broadcast %482 : vector<1x128xf32> to vector<32x128xf32>
    %501 = arith.mulf %499, %500 : vector<32x128xf32>
    %502 = vector.broadcast %483 : vector<1x128xf32> to vector<32x128xf32>
    %503 = arith.addf %501, %502 : vector<32x128xf32>
    %c0_209 = arith.constant 0 : index
    %c1_210 = arith.constant 1 : index
    %c0_211 = arith.constant 0 : index
    %c0_212 = arith.constant 0 : index
    %504 = vector.load %arg11[%c0_209, %c1_210, %c0_211, %c0_212] : memref<1x2x128x256xbf16, #tpu.memory_space<vmem>>, vector<1x1x128x256xbf16>
    %505 = vector.shape_cast %504 : vector<1x1x128x256xbf16> to vector<128x256xbf16>
    %506 = vector.extract_strided_slice %7 {offsets = [1, 0], sizes = [1, 256], strides = [1, 1]} : vector<2x256xf32> to vector<1x256xf32>
    %507 = arith.truncf %503 : vector<32x128xf32> to vector<32x128xbf16>
    %cst_213 = arith.constant dense<0.000000e+00> : vector<32x256xf32>
    %508 = tpu.matmul %507, %505, %cst_213 {dimension_numbers = #tpu.dot_dimension_numbers<[1], [0], [0], [1], [0, 0, 1, 1], [], []>} : vector<32x128xbf16>, vector<128x256xbf16>, vector<32x256xf32> -> vector<32x256xf32>
    %509 = vector.broadcast %506 : vector<1x256xf32> to vector<32x256xf32>
    %510 = arith.addf %508, %509 : vector<32x256xf32>
    %511 = arith.mulf %510, %510 : vector<32x256xf32>
    %512 = arith.mulf %510, %511 : vector<32x256xf32>
    %cst_214 = arith.constant 4.471500e-02 : f32
    %513 = vector.broadcast %cst_214 : f32 to vector<32x256xf32>
    %514 = arith.mulf %513, %512 : vector<32x256xf32>
    %515 = arith.addf %510, %514 : vector<32x256xf32>
    %cst_215 = arith.constant 0.797884583 : f32
    %516 = vector.broadcast %cst_215 : f32 to vector<32x256xf32>
    %517 = arith.mulf %516, %515 : vector<32x256xf32>
    %518 = math.tanh %517 : vector<32x256xf32>
    %cst_216 = arith.constant 1.000000e+00 : f32
    %519 = vector.broadcast %cst_216 : f32 to vector<32x256xf32>
    %520 = arith.addf %519, %518 : vector<32x256xf32>
    %cst_217 = arith.constant 5.000000e-01 : f32
    %521 = vector.broadcast %cst_217 : f32 to vector<32x256xf32>
    %522 = arith.mulf %521, %520 : vector<32x256xf32>
    %523 = arith.mulf %510, %522 : vector<32x256xf32>
    %c0_218 = arith.constant 0 : index
    %c1_219 = arith.constant 1 : index
    %c0_220 = arith.constant 0 : index
    %c0_221 = arith.constant 0 : index
    %524 = vector.load %arg13[%c0_218, %c1_219, %c0_220, %c0_221] : memref<1x2x256x128xbf16, #tpu.memory_space<vmem>>, vector<1x1x256x128xbf16>
    %525 = vector.shape_cast %524 : vector<1x1x256x128xbf16> to vector<256x128xbf16>
    %526 = vector.extract_strided_slice %9 {offsets = [1, 0], sizes = [1, 128], strides = [1, 1]} : vector<2x128xf32> to vector<1x128xf32>
    %527 = arith.truncf %523 : vector<32x256xf32> to vector<32x256xbf16>
    %cst_222 = arith.constant dense<0.000000e+00> : vector<32x128xf32>
    %528 = tpu.matmul %527, %525, %cst_222 {dimension_numbers = #tpu.dot_dimension_numbers<[1], [0], [0], [1], [0, 0, 1, 1], [], []>} : vector<32x256xbf16>, vector<256x128xbf16>, vector<32x128xf32> -> vector<32x128xf32>
    %529 = vector.broadcast %526 : vector<1x128xf32> to vector<32x128xf32>
    %530 = arith.addf %528, %529 : vector<32x128xf32>
    %531 = arith.addf %431, %530 : vector<32x128xf32>
    %c0_223 = arith.constant 0 : index
    %c0_224 = arith.constant 0 : index
    %532 = vector.load %arg18[%c0_223, %c0_224] : memref<32x128xf32, #tpu.memory_space<vmem>>, vector<32x128xf32>
    tpu.vector_store %arg18[%c0_223, %c0_224], %481 {strides = array<i32>} : memref<32x128xf32, #tpu.memory_space<vmem>>, vector<32x128xf32>,
    %c0_225 = arith.constant 0 : index
    %c0_226 = arith.constant 0 : index
    %533 = vector.load %arg19[%c0_225, %c0_226] : memref<32x128xf32, #tpu.memory_space<vmem>>, vector<32x128xf32>
    tpu.vector_store %arg19[%c0_225, %c0_226], %531 {strides = array<i32>} : memref<32x128xf32, #tpu.memory_space<vmem>>, vector<32x128xf32>,
    %c3_i32 = arith.constant 3 : i32
    %534 = arith.cmpi eq, %arg1, %c3_i32 : i32
    %535 = arith.extui %534 : i1 to i32
    %c0_i32_227 = arith.constant 0 : i32
    %536 = arith.cmpi ne, %535, %c0_i32_227 : i32
    scf.if %536 {
      %c0_228 = arith.constant 0 : index
      %c0_229 = arith.constant 0 : index
      %537 = vector.load %arg15[%c0_228, %c0_229] : memref<4x128xf32, #tpu.memory_space<vmem>>, vector<4x128xf32>
      %538 = vector.extract_strided_slice %537 {offsets = [0, 0], sizes = [1, 128], strides = [1, 1]} : vector<4x128xf32> to vector<1x128xf32>
      %539 = vector.extract_strided_slice %537 {offsets = [1, 0], sizes = [1, 128], strides = [1, 1]} : vector<4x128xf32> to vector<1x128xf32>
      %cst_230 = arith.constant dense<0.000000e+00> : vector<32xf32>
      %540 = vector.multi_reduction <add>, %481, %cst_230 [1] : vector<32x128xf32> to vector<32xf32>
      %541 = vector.shape_cast %540 : vector<32xf32> to vector<32x1xf32>
      %cst_231 = arith.constant 1.280000e+02 : f32
      %542 = vector.broadcast %cst_231 : f32 to vector<32x1xf32>
      %543 = arith.divf %541, %542 : vector<32x1xf32>
      %544 = vector.broadcast %543 : vector<32x1xf32> to vector<32x128xf32>
      %545 = arith.subf %481, %544 : vector<32x128xf32>
      %546 = arith.mulf %545, %545 : vector<32x128xf32>
      %cst_232 = arith.constant dense<0.000000e+00> : vector<32xf32>
      %547 = vector.multi_reduction <add>, %546, %cst_232 [1] : vector<32x128xf32> to vector<32xf32>
      %548 = vector.shape_cast %547 : vector<32xf32> to vector<32x1xf32>
      %cst_233 = arith.constant 1.280000e+02 : f32
      %549 = vector.broadcast %cst_233 : f32 to vector<32x1xf32>
      %550 = arith.divf %548, %549 : vector<32x1xf32>
      %cst_234 = arith.constant 9.99999997E-7 : f32
      %551 = vector.broadcast %cst_234 : f32 to vector<32x1xf32>
      %552 = arith.addf %550, %551 : vector<32x1xf32>
      %553 = math.rsqrt %552 : vector<32x1xf32>
      %554 = vector.broadcast %553 : vector<32x1xf32> to vector<32x128xf32>
      %555 = arith.mulf %545, %554 : vector<32x128xf32>
      %556 = vector.broadcast %538 : vector<1x128xf32> to vector<32x128xf32>
      %557 = arith.mulf %555, %556 : vector<32x128xf32>
      %558 = vector.broadcast %539 : vector<1x128xf32> to vector<32x128xf32>
      %559 = arith.addf %557, %558 : vector<32x128xf32>
      %c0_235 = arith.constant 0 : index
      %c0_236 = arith.constant 0 : index
      %560 = vector.load %arg16[%c0_235, %c0_236] : memref<32x128xf32, #tpu.memory_space<vmem>>, vector<32x128xf32>
      tpu.vector_store %arg16[%c0_235, %c0_236], %559 {strides = array<i32>} : memref<32x128xf32, #tpu.memory_space<vmem>>, vector<32x128xf32>,
      %561 = vector.extract_strided_slice %537 {offsets = [2, 0], sizes = [1, 128], strides = [1, 1]} : vector<4x128xf32> to vector<1x128xf32>
      %562 = vector.extract_strided_slice %537 {offsets = [3, 0], sizes = [1, 128], strides = [1, 1]} : vector<4x128xf32> to vector<1x128xf32>
      %cst_237 = arith.constant dense<0.000000e+00> : vector<32xf32>
      %563 = vector.multi_reduction <add>, %531, %cst_237 [1] : vector<32x128xf32> to vector<32xf32>
      %564 = vector.shape_cast %563 : vector<32xf32> to vector<32x1xf32>
      %cst_238 = arith.constant 1.280000e+02 : f32
      %565 = vector.broadcast %cst_238 : f32 to vector<32x1xf32>
      %566 = arith.divf %564, %565 : vector<32x1xf32>
      %567 = vector.broadcast %566 : vector<32x1xf32> to vector<32x128xf32>
      %568 = arith.subf %531, %567 : vector<32x128xf32>
      %569 = arith.mulf %568, %568 : vector<32x128xf32>
      %cst_239 = arith.constant dense<0.000000e+00> : vector<32xf32>
      %570 = vector.multi_reduction <add>, %569, %cst_239 [1] : vector<32x128xf32> to vector<32xf32>
      %571 = vector.shape_cast %570 : vector<32xf32> to vector<32x1xf32>
      %cst_240 = arith.constant 1.280000e+02 : f32
      %572 = vector.broadcast %cst_240 : f32 to vector<32x1xf32>
      %573 = arith.divf %571, %572 : vector<32x1xf32>
      %cst_241 = arith.constant 9.99999997E-7 : f32
      %574 = vector.broadcast %cst_241 : f32 to vector<32x1xf32>
      %575 = arith.addf %573, %574 : vector<32x1xf32>
      %576 = math.rsqrt %575 : vector<32x1xf32>
      %577 = vector.broadcast %576 : vector<32x1xf32> to vector<32x128xf32>
      %578 = arith.mulf %568, %577 : vector<32x128xf32>
      %579 = vector.broadcast %561 : vector<1x128xf32> to vector<32x128xf32>
      %580 = arith.mulf %578, %579 : vector<32x128xf32>
      %581 = vector.broadcast %562 : vector<1x128xf32> to vector<32x128xf32>
      %582 = arith.addf %580, %581 : vector<32x128xf32>
      %c0_242 = arith.constant 0 : index
      %c0_243 = arith.constant 0 : index
      %583 = vector.load %arg17[%c0_242, %c0_243] : memref<32x128xf32, #tpu.memory_space<vmem>>, vector<32x128xf32>
      tpu.vector_store %arg17[%c0_242, %c0_243], %582 {strides = array<i32>} : memref<32x128xf32, #tpu.memory_space<vmem>>, vector<32x128xf32>,
    } else {
    }
    return
  }
  func.func @transform_0(%arg0: i32, %arg1: i32) -> i32 {
    %c0_i32 = arith.constant 0 : i32
    %c0_i32_0 = arith.constant 0 : i32
    return %c0_i32 : i32
  }
  func.func @transform_1(%arg0: i32, %arg1: i32) -> (i32, i32) {
    %c0_i32 = arith.constant 0 : i32
    %c0_i32_0 = arith.constant 0 : i32
    %c0_i32_1 = arith.constant 0 : i32
    return %c0_i32, %c0_i32_0 : i32, i32
  }
  func.func @transform_2(%arg0: i32, %arg1: i32) -> (i32, i32) {
    %c0_i32 = arith.constant 0 : i32
    %c0_i32_0 = arith.constant 0 : i32
    return %arg0, %c0_i32 : i32, i32
  }
  func.func @transform_3(%arg0: i32, %arg1: i32) -> (i32, i32) {
    %c0_i32 = arith.constant 0 : i32
    %c0_i32_0 = arith.constant 0 : i32
    return %arg0, %c0_i32 : i32, i32
  }
  func.func @transform_4(%arg0: i32, %arg1: i32) -> (i32, i32, i32) {
    %c0_i32 = arith.constant 0 : i32
    %c0_i32_0 = arith.constant 0 : i32
    %c0_i32_1 = arith.constant 0 : i32
    return %arg1, %c0_i32, %c0_i32_0 : i32, i32, i32
  }
  func.func @transform_5(%arg0: i32, %arg1: i32) -> (i32, i32, i32, i32) {
    %c0_i32 = arith.constant 0 : i32
    %c0_i32_0 = arith.constant 0 : i32
    %c0_i32_1 = arith.constant 0 : i32
    %c0_i32_2 = arith.constant 0 : i32
    return %arg1, %c0_i32, %c0_i32_0, %c0_i32_1 : i32, i32, i32, i32
  }
  func.func @transform_6(%arg0: i32, %arg1: i32) -> (i32, i32, i32) {
    %c0_i32 = arith.constant 0 : i32
    %c0_i32_0 = arith.constant 0 : i32
    %c0_i32_1 = arith.constant 0 : i32
    return %arg1, %c0_i32, %c0_i32_0 : i32, i32, i32
  }
  func.func @transform_7(%arg0: i32, %arg1: i32) -> (i32, i32, i32, i32) {
    %c0_i32 = arith.constant 0 : i32
    %c0_i32_0 = arith.constant 0 : i32
    %c0_i32_1 = arith.constant 0 : i32
    %c0_i32_2 = arith.constant 0 : i32
    return %arg1, %c0_i32, %c0_i32_0, %c0_i32_1 : i32, i32, i32, i32
  }
  func.func @transform_8(%arg0: i32, %arg1: i32) -> (i32, i32, i32) {
    %c0_i32 = arith.constant 0 : i32
    %c0_i32_0 = arith.constant 0 : i32
    %c0_i32_1 = arith.constant 0 : i32
    return %arg1, %c0_i32, %c0_i32_0 : i32, i32, i32
  }
  func.func @transform_9(%arg0: i32, %arg1: i32) -> (i32, i32, i32, i32) {
    %c0_i32 = arith.constant 0 : i32
    %c0_i32_0 = arith.constant 0 : i32
    %c0_i32_1 = arith.constant 0 : i32
    %c0_i32_2 = arith.constant 0 : i32
    return %arg1, %c0_i32, %c0_i32_0, %c0_i32_1 : i32, i32, i32, i32
  }
  func.func @transform_10(%arg0: i32, %arg1: i32) -> (i32, i32, i32) {
    %c0_i32 = arith.constant 0 : i32
    %c0_i32_0 = arith.constant 0 : i32
    %c0_i32_1 = arith.constant 0 : i32
    return %arg1, %c0_i32, %c0_i32_0 : i32, i32, i32
  }
  func.func @transform_11(%arg0: i32, %arg1: i32) -> (i32, i32, i32, i32) {
    %c0_i32 = arith.constant 0 : i32
    %c0_i32_0 = arith.constant 0 : i32
    %c0_i32_1 = arith.constant 0 : i32
    %c0_i32_2 = arith.constant 0 : i32
    return %arg1, %c0_i32, %c0_i32_0, %c0_i32_1 : i32, i32, i32, i32
  }
  func.func @transform_12(%arg0: i32, %arg1: i32) -> (i32, i32, i32) {
    %c0_i32 = arith.constant 0 : i32
    %c0_i32_0 = arith.constant 0 : i32
    %c0_i32_1 = arith.constant 0 : i32
    return %arg1, %c0_i32, %c0_i32_0 : i32, i32, i32
  }
  func.func @transform_13(%arg0: i32, %arg1: i32) -> (i32, i32) {
    %c0_i32 = arith.constant 0 : i32
    %c0_i32_0 = arith.constant 0 : i32
    %c0_i32_1 = arith.constant 0 : i32
    return %c0_i32, %c0_i32_0 : i32, i32
  }
  func.func @transform_14(%arg0: i32, %arg1: i32) -> (i32, i32) {
    %c0_i32 = arith.constant 0 : i32
    %c0_i32_0 = arith.constant 0 : i32
    return %arg0, %c0_i32 : i32, i32
  }
  func.func @transform_15(%arg0: i32, %arg1: i32) -> (i32, i32) {
    %c0_i32 = arith.constant 0 : i32
    %c0_i32_0 = arith.constant 0 : i32
    return %arg0, %c0_i32 : i32, i32
  }
}

</mosaic_0001>

<bundles_post_ra>
// kernel: encoder_forward.1
= control target key start
LH: loop header
LB: loop body
LE: loop exit
PB: predicated region body
PF: predicated region fallthrough
CT: control target
= control target key end

     0   :  { %s10995_s0 = inlined_call_operand.vmem [shape: s32[4], index: 0, kind: input, shape index: {}]   ;;  %s10996_s1 = inlined_call_operand.hbm [shape: f32[4,4], index: 1, kind: input, shape index: {}]   ;;  %s10997_s2 = inlined_call_operand.hbm [shape: f32[32,128], index: 2, kind: input, shape index: {}]   ;;  %s10998_s3 = inlined_call_operand.hbm [shape: f32[32,128], index: 3, kind: input, shape index: {}]   ;;  %s10999_s4 = inlined_call_operand.hbm [shape: f32[4,8,128], index: 4, kind: input, shape index: {}]   ;;  %s11000_s5 = inlined_call_operand.hbm [shape: bf16[4,2,128,384], index: 5, kind: input, shape index: {}]   ;;  %s11001_s6 = inlined_call_operand.hbm [shape: f32[4,2,384], index: 6, kind: input, shape index: {}]   ;;  %s11002_s7 = inlined_call_operand.hbm [shape: bf16[4,2,128,128], index: 7, kind: input, shape index: {}]   ;;  %s11003_s8 = inlined_call_operand.vmem [shape: f32[4,2,128], index: 8, kind: input, shape index: {}]   ;;  %s11004_s9 = inlined_call_operand.hbm [shape: bf16[4,2,128,256], index: 9, kind: input, shape index: {}]   ;;  %s11005_s10 = inlined_call_operand.hbm [shape: f32[4,2,256], index: 10, kind: input, shape index: {}]   ;;  %s11006_s11 = inlined_call_operand.hbm [shape: bf16[4,2,256,128], index: 11, kind: input, shape index: {}]   ;;  %s11007_s12 = inlined_call_operand.hbm [shape: f32[4,2,128], index: 12, kind: input, shape index: {}]   ;;  %s11008_s13 = inlined_call_operand.hbm [shape: f32[4,128], index: 13, kind: input, shape index: {}]   ;;  %s11009_s14 = inlined_call_operand.hbm [shape: f32[32,128], index: 14, kind: output, shape index: {0}]   ;;  %s11010_s15 = inlined_call_operand.hbm [shape: f32[32,128], index: 15, kind: output, shape index: {1}]  }
   0x1   :  { %11063 = sst [smem:[#allocation76_spill]] %s10997_s2 }
   0x2   :  { %11064 = sst [smem:[#allocation77_spill]] %s10999_s4 }
   0x3   :  { %11065 = sst [smem:[#allocation78_spill]] %s11000_s5 }
   0x4   :  { %11066 = sst [smem:[#allocation79_spill]] %s11003_s8 }
   0x5   :  { %11067 = sst [smem:[#allocation80_spill]] %s11009_s14 }
   0x6   :  { %11068 = sst [smem:[#allocation81_spill]] %s11010_s15 }
   0x7   :  { %21 = vsyncpa [#allocation11], 0 }
   0x8   :  { %22 = vsyncpa [#allocation10], 0 }
   0x9   :  { %23 = vsyncpa [#allocation8], 0 }
   0xa   :  { %24 = vsyncpa [#allocation15], 0 }
   0xb   :  { %25 = vsyncpa [#allocation9], 0 }
   0xc   :  { %26 = vsyncpa [#allocation27], 0  ;;  %s8705_s18 = smov 0   ;;  %s8707_s19 = smov 0  }
   0xd   :  { %s8709_s20 = smov 0   ;;  %s8711_s21 = smov 0  }
   0xe   :  { %s8713_s22 = smov 0   ;;  %s8715_s23 = smov 0  }
   0xf LB: > { %11069 = sst [smem:[#allocation36_spill]] %s8585_s19  ;;  %s8734_s24 = sadd.s32 4294967295, %s8601_s23   ;;  %s8601_s23 = sphi %s8715_s23, %s32_s23   ;;  %s8597_s22 = sphi %s8713_s22, %s11202_s22   ;;  %s8593_s21 = sphi %s8711_s21, %s11201_s21   ;;  %s8589_s20 = sphi %s8709_s20, %s11199_s20   ;;  %s8585_s19 = sphi %s8707_s19, %s11198_s19   ;;  %s8581_s18 = sphi %s8705_s18, %s11197_s18  }
  0x10   : > { %11070 = sst [smem:[#allocation37_spill]] %s8589_s20  ;;  %p158_p0 = scmp.ne.s32.totalorder %s8585_s19, %s8581_s18 }
  0x11   : > { %11071 = sst [smem:[#allocation38_spill]] %s8593_s21  ;;  %p159_p1 = scmp.eq.s32.totalorder %s8734_s24, 0 }
  0x12   : > { %11072 = sst [smem:[#allocation39_spill]] %s8601_s23  ;;  %p6645_p2 = scmp.ge.s32.totalorder %s8601_s23, 1 }
  0x13   : > { %11073 = sst [smem:[#allocation40_spill]] %s8734_s24  ;;  %p450_p3 = scmp.lt.s32.totalorder %s8601_s23, 5 }
  0x14   : > { %p8742_p4 = por %p159_p1, %p158_p0  ;;  %s11076_s2 = sld [smem:[#allocation76_spill]] }
  0x15   : > { %p8749_p5 = pnand %p6645_p2, %p450_p3  ;;  %s8603_s30 = smov [#allocation13]  }
  0x16   : > { %s11074_s25 = scalar_select %p8742_p4, 1, 0 }
  0x17   : > { %s11077_s29 = scalar_select %p8749_p5, 1, 0 }
  0x18   : > { %11075 = sst [smem:[#allocation41_spill]] %s11074_s25  ;;  %p7643_p6 = pneg %p8749_p5 }
  0x19   : > { %11078 = sst [smem:[#allocation42_spill]] %s11077_s29  ;;  %s486_s16 = sshll.u32 %s8603_s30, 4  ;;  %s487_s16 = int_to_ptr.vmem [resolvable:$true] %s486_s16 }
  0x1a   : > { %s484_s28 = sshll.u32 %s11076_s2, 4  ;;  %p8757_p7 = pnand %p7643_p6, %p159_p1  ;;  %s485_s28 = int_to_ptr.hbm [resolvable:$true] %s484_s28 }
  0x1b   : > { %s11011_s18 = smov 128   ;;  %s11013_s26 = smov 8  }
  0x1c   : > { %7652 = dma.hbm_to_vmem [thread:$0]  (!%p8757_p7), %s485_s28, 512, %s487_s16, [#allocation8], %s11011_s18, %s11011_s18, %s11013_s26  }
  0x1d   : > { %s41_s27 = sadd.s32 1, %s8597_s22  ;;  %s145_s30 = sadd.s32 1, %s8589_s20 }
  0x1e   : > { %p42_p8 = scmp.ge.s32.totalorder %s41_s27, 4  ;;  %p152_p9 = scmp.ne.s32.totalorder %s8589_s20, %s8585_s19 }
  0x1f   : > { %p153_p10 = scmp.eq.s32.totalorder %s8601_s23, 0  ;;  %p7689_p12 = scmp.lt.s32.totalorder %s8601_s23, 4 }
  0x20   : > { %s11204_s27 = smov (%p42_p8, %s41_s27), 0  ;;  %s529_s14 = sand.u32 1, %s8601_s23  }
  0x21   : > { %11080 = sst [smem:[#allocation43_spill]] %s11204_s27  ;;  %p8773_p11 = por %p153_p10, %p152_p9 }
  0x22   : > { %s142_s15 = ssub.s32 %s8597_s22, %s11204_s27  ;;  %s8782_s28 = sand.u32 1, %s8589_s20  }
  0x23   : > { %p143_p13 = scmp.eq.s32.totalorder %s142_s15, 0  ;;  %s6653_s16 = sshll.u32 %s8597_s22, 3 }
  0x24   : > { %s6652_s26 = sshll.u32 %s8782_s28, 3  ;;  %s11083_s4 = sld [smem:[#allocation77_spill]] }
  0x25   : > { %s8786_s18 = scalar_select %p143_p13, %s8589_s20, %s145_s30  }
  0x26   : > { %s533_s24 = scalar_lea.vmem [#allocation16], %s6652_s26  ;;  %p8796_p0 = pnand %p7689_p12, %p8773_p11 }
  0x27   : > { %11082 = sst [smem:[#allocation44_spill]] %s8786_s18  ;;  %s541_s29 = sshll.u32 %s533_s24, 4  ;;  %s542_s29 = int_to_ptr.vmem [resolvable:$true] %s541_s29 }
  0x28   : > { %s7593_s30 = smul.u32 384, %s8782_s28  ;;  %s8802_s8 = scalar_lea.sflag [#allocation8], %s529_s14 }
  0x29   : > { %s7594_s27 = smul.u32 384, %s8597_s22  ;;  %s11085_s5 = sld [smem:[#allocation78_spill]] }
  0x2a   : > { %s537_s25 = scalar_lea.hbm %s11083_s4, %s6653_s16  ;;  %s552_s26 = scalar_lea.vmem [#allocation17], %s7593_s30 }
  0x2b   : > { %s539_s19 = sshll.u32 %s537_s25, 4  ;;  %s560_s16 = sshll.u32 %s552_s26, 4  ;;  %s540_s19 = int_to_ptr.hbm [resolvable:$true] %s539_s19  ;;  %s561_s16 = int_to_ptr.vmem [resolvable:$true] %s560_s16 }
  0x2c   : > { %7662 = dma.hbm_to_vmem [thread:$0]  (!%p8796_p0), %s540_s19, 128, %s542_s29, %s8802_s8  }
  0x2d   : > { %s7595_s4 = smul.u32 6, %s8782_s28  ;;  %s8606_s18 = smov 192  }
  0x2e   : > { %s8607_s14 = smov 12   ;;  %s7596_s20 = smul.u32 6, %s8597_s22 }
  0x2f   : > { %s557_s2 = scalar_lea.hbm %s11085_s5, %s7594_s27  ;;  %s574_s19 = scalar_lea.vmem [#allocation18], %s7595_s4 }
  0x30   : > { %s558_s25 = sshll.u32 %s557_s2, 4  ;;  %s583_s29 = sshll.u32 %s574_s19, 4  ;;  %s559_s25 = int_to_ptr.hbm [resolvable:$true] %s558_s25  ;;  %s584_s29 = int_to_ptr.vmem [resolvable:$true] %s583_s29 }
  0x31   : > { %7665 = dma.hbm_to_vmem [thread:$0]  (!%p8796_p0), %s559_s25, 6144, %s561_s16, %s8802_s8, %s8606_s18, %s8606_s18, %s8607_s14  }
  0x32   : > { %s6656_s23 = sshll.u32 %s8782_s28, 7  ;;  %s579_s30 = scalar_lea.hbm %s11001_s6, %s7596_s20 }
  0x33   : > { %s581_s24 = sshll.u32 %s579_s30, 4  ;;  %s7445_s2 = sshll.u32 %s8597_s22, 7  ;;  %s582_s24 = int_to_ptr.hbm [resolvable:$true] %s581_s24 }
  0x34   : > { %7668 = dma.hbm_to_vmem [thread:$0]  (!%p8796_p0), %s582_s24, 96, %s584_s29, %s8802_s8  }
  0x35   : > { %s599_s4 = scalar_lea.hbm %s11002_s7, %s7445_s2  ;;  %s594_s26 = scalar_lea.vmem [#allocation19], %s6656_s23 }
  0x36   : > { %s602_s16 = sshll.u32 %s594_s26, 4  ;;  %s600_s14 = sshll.u32 %s599_s4, 4  ;;  %s603_s16 = int_to_ptr.vmem [resolvable:$true] %s602_s16  ;;  %s601_s14 = int_to_ptr.hbm [resolvable:$true] %s600_s14 }
  0x37   : > { %s11028_s20 = sshll.u32 %s8782_s28, 8  ;;  %s11026_s19 = smov 64  }
  0x38   : > { %s11027_s21 = smov 4   ;;  %s7446_s29 = sshll.u32 %s8597_s22, 8 }
  0x39   : > { %7671 = dma.hbm_to_vmem [thread:$0]  (!%p8796_p0), %s601_s14, 2048, %s603_s16, %s8802_s8, %s11026_s19, %s11026_s19, %s11027_s21  }
  0x3a   : > { %s628_s23 = scalar_lea.hbm %s11004_s9, %s7446_s29  ;;  %s623_s24 = scalar_lea.vmem [#allocation20], %s11028_s20 }
  0x3b   : > { %s631_s2 = sshll.u32 %s623_s24, 4  ;;  %s629_s18 = sshll.u32 %s628_s23, 4  ;;  %s632_s2 = int_to_ptr.vmem [resolvable:$true] %s631_s2  ;;  %s630_s18 = int_to_ptr.hbm [resolvable:$true] %s629_s18 }
  0x3c   : > { %s6662_s25 = sshll.u32 %s8782_s28, 2  ;;  %s11086_s4 = smov 8  }
  0x3d   : > { %s11087_s26 = smov 128   ;;  %s7447_s16 = sshll.u32 %s8597_s22, 2 }
  0x3e   : > { %7674 = dma.hbm_to_vmem [thread:$0]  (!%p8796_p0), %s630_s18, 4096, %s632_s2, %s8802_s8, %s11087_s26, %s11087_s26, %s11086_s4  }
  0x3f   : > { %s650_s27 = scalar_lea.hbm %s11005_s10, %s7447_s16  ;;  %s645_s30 = scalar_lea.vmem [#allocation21], %s6662_s25 }
  0x40   : > { %s654_s21 = sshll.u32 %s645_s30, 4  ;;  %s652_s20 = sshll.u32 %s650_s27, 4  ;;  %s655_s21 = int_to_ptr.vmem [resolvable:$true] %s654_s21  ;;  %s653_s20 = int_to_ptr.hbm [resolvable:$true] %s652_s20 }
  0x41   : > { %s501_s5 = sshll.u32 %s10998_s3, 4  ;;  %s8610_s2 = smov [#allocation14]   ;;  %s502_s5 = int_to_ptr.hbm [resolvable:$true] %s501_s5 }
  0x42   : > { %7677 = dma.hbm_to_vmem [thread:$0]  (!%p8796_p0), %s653_s20, 64, %s655_s21, %s8802_s8  }
  0x43   : > { %s503_s18 = sshll.u32 %s8610_s2, 4  ;;  %s670_s25 = scalar_lea.hbm %s11006_s11, %s7446_s29  ;;  %s504_s18 = int_to_ptr.vmem [resolvable:$true] %s503_s18 }
  0x44   : > { %7655 = dma.hbm_to_vmem [thread:$0]  (!%p8757_p7), %s502_s5, 512, %s504_s18, [#allocation15], %s11087_s26, %s11087_s26, %s11086_s4  }
  0x45   : > { %s671_s14 = sshll.u32 %s670_s25, 4  ;;  %s11088_s27 = sshll.u32 %s8782_s28, 8  ;;  %s672_s14 = int_to_ptr.hbm [resolvable:$true] %s671_s14 }
  0x46   : > { %s665_s30 = scalar_lea.vmem [#allocation22], %s11088_s27  ;;  %s11089_s20 = smov 4  }
  0x47   : > { %s673_s23 = sshll.u32 %s665_s30, 4  ;;  %s11090_s21 = smov 64   ;;  %s674_s23 = int_to_ptr.vmem [resolvable:$true] %s673_s23 }
  0x48   : > { %7680 = dma.hbm_to_vmem [thread:$0]  (!%p8796_p0), %s672_s14, 4096, %s674_s23, %s8802_s8, %s11090_s21, %s11090_s21, %s11089_s20  }
  0x49   : > { %s462_s2 = sshll.u32 %s10995_s0, 4  ;;  %s472_s26 = sshll.u32 %s10996_s1, 4  ;;  %s463_s2 = int_to_ptr.vmem [resolvable:$true] %s462_s2  ;;  %s473_s26 = int_to_ptr.hbm [resolvable:$true] %s472_s26 }
  0x4a   : > { %s8611_s18 = smov [#allocation7]   ;;  %s8612_s19 = smov [#allocation12]  }
  0x4b   : > { %7646 = dma.vmem_to_smem (!%p8757_p7), %s463_s2, 16, %s8611_s18, [#allocation11]  }
  0x4c   : > { %7649 = dma.hbm_to_smem (!%p8757_p7), %s473_s26, 64, %s8612_s19, [#allocation10]  }
  0x4d   : > { %s516_s14 = sshll.u32 %s11008_s13, 4  ;;  %s8613_s27 = smov [#allocation24]   ;;  %s517_s14 = int_to_ptr.hbm [resolvable:$true] %s516_s14 }
  0x4e   : > { %s518_s30 = sshll.u32 %s8613_s27, 4  ;;  %s6668_s23 = sshll.u32 %s8782_s28, 1  ;;  %s519_s30 = int_to_ptr.vmem [resolvable:$true] %s518_s30 }
  0x4f   : > { %7658 = dma.hbm_to_vmem [thread:$0]  (!%p8757_p7), %s517_s14, 64, %s519_s30, [#allocation15]  }
  0x50   : > { %s6669_s20 = sshll.u32 %s8597_s22, 1  ;;  %s687_s2 = scalar_lea.vmem [#allocation23], %s6668_s23 }
  0x51   : > { %s691_s29 = scalar_lea.hbm %s11007_s12, %s6669_s20  ;;  %s695_s5 = sshll.u32 %s687_s2, 4  ;;  %s696_s5 = int_to_ptr.vmem [resolvable:$true] %s695_s5 }
  0x52   : > { %s693_s4 = sshll.u32 %s691_s29, 4  ;;  %704 = sbr.rel (%p8749_p5) target bundleno = 7083 (0x1bab), region = 76  ;;  %s694_s4 = int_to_ptr.hbm [resolvable:$true] %s693_s4 }
  0x53   : > { %7683 = dma.hbm_to_vmem [thread:$0]  (!%p8796_p0), %s694_s4, 32, %s696_s5, %s8802_s8  }
  0x57   : > { %s11092_s18 = sld [smem:[#allocation40_spill]] }
  0x58   : > { %8548 = dma.done.wait (%p159_p1), [#allocation11], 16  }
  0x59   : > { %8550 = vsyncadd (%p159_p1), [#allocation11], 4294967280 }
  0x5a   : > { %8552 = dma.done.wait (%p159_p1), [#allocation10], 64  }
  0x5b   : > { %8554 = vsyncadd (%p159_p1), [#allocation10], 4294967232 }
  0x5c   : > { %8556 = dma.done.wait (%p159_p1), [#allocation8], 512  }
  0x5d   : > { %8558 = vsyncadd (%p159_p1), [#allocation8], 4294966784 }
  0x5e   : > { %8560 = dma.done.wait (%p159_p1), [#allocation15], 512  }
  0x5f   : > { %8562 = vsyncadd (%p159_p1), [#allocation15], 4294966784  ;;  %s11093_s17 = sld [smem:[#allocation36_spill]]  ;;  %s726_s15 = sand.u32 1, %s11092_s18  }
  0x60   : > { %s727_s16 = scalar_lea.sflag [#allocation8], %s726_s15 }
  0x65   : > { %s728_s8 = sand.u32 1, %s11093_s17  }
  0x66   : > { %s6675_s19 = sshll.u32 %s728_s8, 3 }
  0x67   : > { %s730_s25 = scalar_lea.vmem [#allocation16], %s6675_s19 }
  0x68   : > { %8564 = dma.done.wait (%p8742_p4), %s727_s16, 16704  }
  0x69   : > { %8566 = vsyncadd (%p8742_p4), %s727_s16, 4294950592  ;;  %s7597_s14 = smul.u32 384, %s728_s8  ;;  %s6676_s27 = sshll.u32 %s728_s8, 7 }
  0x6a   : > { %s7598_s30 = smul.u32 6, %s728_s8  ;;  %s6677_s23 = sshll.u32 %s728_s8, 8 }
  0x6b   : > { %s6678_s20 = sshll.u32 %s728_s8, 2  ;;  %s6680_s21 = sshll.u32 %s728_s8, 1 }
  0x6c   : > { %s8919_s24 = scalar_lea.vmem [#allocation17], %s7597_s14  ;;  %s750_s29 = scalar_lea.vmem [#allocation18], %s7598_s30 }
  0x6d   : > { %s8921_s2 = scalar_lea.vmem [#allocation19], %s6676_s27  ;;  %s8923_s5 = scalar_lea.vmem [#allocation20], %s6677_s23 }
  0x6e   : > { %s780_s4 = scalar_lea.vmem [#allocation21], %s6678_s20  ;;  %s8925_s26 = scalar_lea.vmem [#allocation22], %s6677_s23 }
  0x6f   : > { %s800_s17 = scalar_lea.vmem [#allocation23], %s6680_s21 }
  0x70   : > { %8568 = dma.done.wait (%p159_p1), [#allocation15], 64  }
  0x71   : > { %8570 = vsyncadd (%p159_p1), [#allocation15], 4294967232 }
  0x72   : > { %811 = sfence }
  0x73   : > { %s11095_s28 = sld [smem:[#allocation38_spill]]  ;;  %v8932_v0 = vld [vmem:[%s730_s25] sm:$0xff]  ;;  %v8934_v1 = vld [vmem:[%s750_s29] sm:$0x3f]  ;;  %v8936_v2 = vld [vmem:[%s780_s4] sm:$0xf] }
  0x74   : > { %11096 = vst [vmem:[#allocation45_spill] sm:$0xff] %v8932_v0  ;;  %v8938_v3 = vld [vmem:[%s800_s17] sm:$0x3]  ;;  %s11099_s14 = sld [smem:[#allocation79_spill]] }
  0x75   : > { %11097 = vst [vmem:[#allocation46_spill] sm:$0xff] %v8936_v2 }
  0x76   : > { %11098 = vst [vmem:[#allocation47_spill] sm:$0xff] %v8938_v3 }
  0x79   : > { %p890_p2 = scmp.lt.s32.totalorder %s11095_s28, 3  ;;  %p6683_p1 = scmp.ne.s32.totalorder %s11095_s28, 0 }
  0x7b   : > { %s891_s15 = scalar_select %p890_p2, %s11095_s28, 3 }
  0x7c   : > { %905 = sbr.rel (%p6683_p1) target bundleno = 138 (0x8a), region = 132 }
  0x7d   : > { %s6682_s8 = sshll.u32 %s891_s15, 1 }
  0x7e   : > { %s893_s27 = scalar_lea.vmem %s11099_s14, %s6682_s8 }
  0x7f   : > { %v8944_v4 = vld [vmem:[%s893_s27] sm:$0x3] }
  0x81   : > { %v906_v5 = vld [vmem:[#allocation13] sm:$0xff]  ;;  %v907_v6 = vld [vmem:[#allocation13 + $0x8] sm:$0xff]  ;;  %v908_v7 = vld [vmem:[#allocation13 + $0x10] sm:$0xff] }
  0x82   : > { %910 = vst [vmem:[#allocation2 + $0x10] sm:$0xff] %v906_v5  ;;  %v909_v8 = vld [vmem:[#allocation13 + $0x18] sm:$0xff]  ;;  %v914_v9 = vld [vmem:[#allocation14] sm:$0xff]  ;;  %v915_v10 = vld [vmem:[#allocation14 + $0x8] sm:$0xff] }
  0x83   : > { %911 = vst [vmem:[#allocation2] sm:$0xff] %v907_v6  ;;  %v916_v11 = vld [vmem:[#allocation14 + $0x10] sm:$0xff]  ;;  %v917_v12 = vld [vmem:[#allocation14 + $0x18] sm:$0xff] }
  0x84   : > { %912 = vst [vmem:[#allocation2 + $0x18] sm:$0xff] %v908_v7 }
  0x85   : > { %913 = vst [vmem:[#allocation2 + $0x8] sm:$0xff] %v909_v8 }
  0x86   : > { %918 = vst [vmem:[#allocation3] sm:$0xff] %v914_v9 }
  0x87   : > { %919 = vst [vmem:[#allocation3 + $0x18] sm:$0xff] %v915_v10 }
  0x88   : > { %920 = vst [vmem:[#allocation3 + $0x8] sm:$0xff] %v916_v11 }
  0x89   : > { %921 = vst [vmem:[#allocation3 + $0x10] sm:$0xff] %v917_v12 }
  0x8a PF: > { %v8947_v13 = vld [vmem:[#allocation2 + $0x10] sm:$0xff]  ;;  %v8953_v15 = vld [vmem:[#allocation2] sm:$0xff]  ;;  %v8614_v17 = vmov 128.0   ;;  %v6770_v40 = vld [vmem:[%s8919_s24 + $0xa8] sm:$0xf]  ;;  %vm1597_vm13 = vcmask 261120  }
  0x8b   : > { %11100 = vst [vmem:[#allocation48_spill] sm:$0xff] %v8947_v13  ;;  %v8949_v14 = vld [vmem:[#allocation2 + $0x18] sm:$0xff]  ;;  %930 = vadd.xlane.f32.xlu0 %v8947_v13  ;;  %7769 = vrcp.f32 %v8614_v17  ;;  %v7471_v41 = vld [vmem:[%s8919_s24 + $0xb0] sm:$0xf0]  ;;  %v6772_v44 = vld [vmem:[%s8919_s24 + $0xb4] sm:$0xf0] }
  0x8c   : > { %11101 = vst [vmem:[#allocation49_spill] sm:$0xff] %v8949_v14  ;;  %934 = vadd.xlane.f32.xlu2 %v8949_v14  ;;  %v8955_v16 = vld [vmem:[#allocation2 + $0x8] sm:$0xff]  ;;  %v7470_v42 = vld [vmem:[%s8919_s24 + $0xac] sm:$0xf]  ;;  %v6771_v43 = vor.u32 %v7471_v41, %v6770_v40  ;;  %v6778_v45 = vld [vmem:[%s8919_s24 + $0xb0] sm:$0xf] }
  0x8d   : > { %11102 = vst [vmem:[#allocation50_spill] sm:$0xff] %v8953_v15  ;;  %v7472_v46 = vld [vmem:[%s8919_s24 + $0xb8] sm:$0xf0]  ;;  %v6775_v47 = vor.u32 %v7470_v42, %v6772_v44  ;;  %v6758_v49 = vld [vmem:[%s8919_s24 + $0x90] sm:$0xf]  ;;  %s8615_s18 = smov 64  }
  0x8e   : > { %11103 = vst [vmem:[#allocation51_spill] sm:$0xff] %v8955_v16  ;;  %v6779_v48 = vor.u32 %v7472_v46, %v6778_v45  ;;  %1289 = vmatpush.bf16.msra.mxu0 %v6771_v43  ;;  %v7468_v50 = vld [vmem:[%s8919_s24 + $0x98] sm:$0xf0]  ;;  %v7467_v51 = vld [vmem:[%s8919_s24 + $0x94] sm:$0xf]  ;;  %vm1620_vm14 = vcmask 130048  }
  0x8f   : > { %1308 = vmatpush.bf16.msra.mxu1 %v6775_v47  ;;  %v6759_v52 = vor.u32 %v7468_v50, %v6758_v49  ;;  %v6760_v53 = vld [vmem:[%s8919_s24 + $0x9c] sm:$0xf0]  ;;  %v6766_v54 = vld [vmem:[%s8919_s24 + $0x98] sm:$0xf]  ;;  %v7469_v55 = vld [vmem:[%s8919_s24 + $0xa0] sm:$0xf0] }
  0x90   : > { %1327 = vmatpush.bf16.msra.mxu2 %v6779_v48  ;;  %v6763_v56 = vor.u32 %v7467_v51, %v6760_v53  ;;  %v6767_v57 = vor.u32 %v7469_v55, %v6766_v54  ;;  %v6746_v58 = vld [vmem:[%s8919_s24 + $0x78] sm:$0xf]  ;;  %v7465_v59 = vld [vmem:[%s8919_s24 + $0x80] sm:$0xf0]  ;;  %v7464_v60 = vld [vmem:[%s8919_s24 + $0x7c] sm:$0xf] }
  0x91   : > { %v7770_v18 = vpop.eup %7769  ;;  %v6747_v61 = vor.u32 %v7465_v59, %v6746_v58  ;;  %v6748_v62 = vld [vmem:[%s8919_s24 + $0x84] sm:$0xf0]  ;;  %v6754_v63 = vld [vmem:[%s8919_s24 + $0x80] sm:$0xf]  ;;  %v7466_v5 = vld [vmem:[%s8919_s24 + $0x88] sm:$0xf0] }
  0x92   : > { %v939_v19 = vmul.f32 128.0, %v7770_v18  ;;  %vm943_vm0 = vweird.f32 %v7770_v18  ;;  %1290 = vmatpush.bf16.msra.mxu0 %v6759_v52  ;;  %v6751_v6 = vor.u32 %v7464_v60, %v6748_v62  ;;  %v6755_v7 = vor.u32 %v7466_v5, %v6754_v63  ;;  %v9003_v8 = vld [vmem:[#allocation3] sm:$0xff]  ;;  %v6734_v9 = vld [vmem:[%s8919_s24 + $0x60] sm:$0xf]  ;;  %v7462_v10 = vld [vmem:[%s8919_s24 + $0x68] sm:$0xf0] }
  0x93   : > { %932 = vadd.xlane.f32.xlu0 %v8953_v15  ;;  %1309 = vmatpush.bf16.msra.mxu1 %v6763_v56  ;;  %11105 = vst [vmem:[#allocation53_spill] sm:$0xff] %v9003_v8  ;;  %v6735_v11 = vor.u32 %v7462_v10, %v6734_v9  ;;  %v7461_v12 = vld [vmem:[%s8919_s24 + $0x64] sm:$0xf]  ;;  %v6736_v17 = vld [vmem:[%s8919_s24 + $0x6c] sm:$0xf0]  ;;  %s8616_s25 = smov 32  }
  0x94   : > { %936 = vadd.xlane.f32.xlu2 %v8955_v16  ;;  %v940_v20 = vsub.f32 1.0, %v939_v19  ;;  %1328 = vmatpush.bf16.msra.mxu2 %v6767_v57  ;;  %v6739_v19 = vor.u32 %v7461_v12, %v6736_v17  ;;  %v7455_v40 = vld [vmem:[%s8919_s24 + $0x34] sm:$0xf]  ;;  %v6712_v41 = vld [vmem:[%s8919_s24 + $0x3c] sm:$0xf0]  ;;  %s8617_s30 = smov 96  }
  0x95   : > { %v6718_v42 = vld [vmem:[%s8919_s24 + $0x38] sm:$0xf]  ;;  %v6715_v43 = vor.u32 %v7455_v40, %v6712_v41  ;;  %v7457_v44 = vld [vmem:[%s8919_s24 + $0x40] sm:$0xf0]  ;;  %v7452_v48 = vld [vmem:[%s8919_s24 + $0x1c] sm:$0xf] }
  0x96   : > { %v941_v21 = vmul.f32 %v7770_v18, %v940_v20  ;;  %1291 = vmatpush.bf16.msra.mxu0 %v6747_v61  ;;  %v7463_v20 = vld [vmem:[%s8919_s24 + $0x70] sm:$0xf0]  ;;  %v6719_v45 = vor.u32 %v7457_v44, %v6718_v42  ;;  %v6698_v46 = vld [vmem:[%s8919_s24 + $0x18] sm:$0xf]  ;;  %v7453_v47 = vld [vmem:[%s8919_s24 + $0x20] sm:$0xf0] }
  0x97   : > { %1310 = vmatpush.bf16.msra.mxu1 %v6751_v6  ;;  %v6699_v49 = vor.u32 %v7453_v47, %v6698_v46  ;;  %v6700_v50 = vld [vmem:[%s8919_s24 + $0x24] sm:$0xf0]  ;;  %v6706_v51 = vld [vmem:[%s8919_s24 + $0x20] sm:$0xf]  ;;  %v7454_v52 = vld [vmem:[%s8919_s24 + $0x28] sm:$0xf0] }
  0x98   : > { %v942_v22 = vadd.f32 %v7770_v18, %v941_v21  ;;  %1329 = vmatpush.bf16.msra.mxu2 %v6755_v7  ;;  %v6703_v55 = vor.u32 %v7452_v48, %v6700_v50  ;;  %v6707_v56 = vor.u32 %v7454_v52, %v6706_v51  ;;  %v6686_v58 = vld [vmem:[%s8919_s24] sm:$0xf]  ;;  %v7450_v59 = vld [vmem:[%s8919_s24 + $0x8] sm:$0xf0]  ;;  %v7449_v60 = vld [vmem:[%s8919_s24 + $0x4] sm:$0xf] }
  0x99   : > { %v6687_v63 = vor.u32 %v7450_v59, %v6686_v58  ;;  %v6688_v5 = vld [vmem:[%s8919_s24 + $0xc] sm:$0xf0]  ;;  %v6694_v7 = vld [vmem:[%s8919_s24 + $0x8] sm:$0xf]  ;;  %v7451_v9 = vld [vmem:[%s8919_s24 + $0x10] sm:$0xf0] }
  0x9a   : > { %v8959_v23 = vsel %vm943_vm0, %v7770_v18, %v942_v22  ;;  %v6742_v18 = vld [vmem:[%s8919_s24 + $0x68] sm:$0xf]  ;;  %1292 = vmatpush.bf16.msra.mxu0 %v6735_v11  ;;  %v6691_v6 = vor.u32 %v7449_v60, %v6688_v5  ;;  %v6695_v10 = vor.u32 %v7451_v9, %v6694_v7  ;;  %s11134_s23 = sld [smem:[#allocation38_spill]] }
  0x9b   : > { %11104 = vst [vmem:[#allocation52_spill] sm:$0xff] %v8959_v23  ;;  %v6743_v21 = vor.u32 %v7463_v20, %v6742_v18  ;;  %1311 = vmatpush.bf16.msra.mxu1 %v6739_v19  ;;  %v6722_v22 = vld [vmem:[%s8919_s24 + $0x48] sm:$0xf] }
  0x9c   : > { %1027 = vadd.xlane.f32.xlu2 %v9003_v8 }
  0x9d   : > { %1330 = vmatpush.bf16.msra.mxu2 %v6743_v21 }
  0xa0   : > { %s3477_s20 = sld [smem:[#allocation7 + %s11134_s23]] }
  0xa6   : > { %p7020_p3 = scmp.eq.s32.totalorder %s3477_s20, 0 }
  0xa7   : > { %s8618_s21 = smov (!%p7020_p3), 32   ;;  %s8620_s29 = smov (!%p7020_p3), 96  }
  0xa8   : > { %s11166_s4 = sld [smem:[#allocation38_spill]] (!%p7020_p3) }
  0xae   : > { %s10384_s17 = sshll.u32 (!%p7020_p3), %s11166_s4, 7 }
  0xaf   : > { %s5102_s28 = sadd.s32 (!%p7020_p3), 1, %s10384_s17  ;;  %s5101_s15 = sld [smem:[#allocation12 + %s10384_s17]] (!%p7020_p3) }
  0xb0   : > { %s5103_s8 = sld [smem:[#allocation12 + %s5102_s28]] (!%p7020_p3)  ;;  %s5106_s19 = sadd.s32 (!%p7020_p3), 3, %s10384_s17 }
  0xb1   : > { %s5107_s14 = sld [smem:[#allocation12 + %s5106_s19]] (!%p7020_p3) }
  0xfe   : > { %v931_v24 = vpop.xlane.xlu0 %930 }
  0xff   : > { %v935_v25 = vpop.xlane.xlu2 %934  ;;  %v945_v26 = vmul.f32 %v8959_v23, %v931_v24  ;;  %v7459_v24 = vld [vmem:[%s8919_s24 + $0x50] sm:$0xf0] }
 0x100   : > { %v947_v27 = vmul.f32 %v8959_v23, %v935_v25  ;;  %v7458_v25 = vld [vmem:[%s8919_s24 + $0x4c] sm:$0xf] }
 0x101   : > { %v8964_v28 = vsub.f32 %v8947_v13, %v945_v26  ;;  %v6723_v26 = vor.u32 %v7459_v24, %v6722_v22 }
 0x102   : > { %v8967_v29 = vsub.f32 %v8949_v14, %v947_v27  ;;  %v6724_v27 = vld [vmem:[%s8919_s24 + $0x54] sm:$0xf0] }
 0x103   : > { %v953_v30 = vmul.f32 %v8964_v28, %v8964_v28  ;;  %1293 = vmatpush.bf16.msra.mxu0 %v6723_v26 }
 0x104   : > { %v955_v31 = vmul.f32 %v8967_v29, %v8967_v29 }
 0x105   : > { %957 = vadd.xlane.f32.xlu1 %v953_v30  ;;  %v6730_v30 = vld [vmem:[%s8919_s24 + $0x50] sm:$0xf] }
 0x106   : > { %961 = vadd.xlane.f32.xlu0 %v955_v31  ;;  %v933_v32 = vpop.xlane.xlu0 %932  ;;  %v7460_v31 = vld [vmem:[%s8919_s24 + $0x58] sm:$0xf0] }
 0x107   : > { %v937_v33 = vpop.xlane.xlu2 %936  ;;  %v946_v34 = vmul.f32 %v8959_v23, %v933_v32  ;;  %v6727_v32 = vor.u32 %v7458_v25, %v6724_v27 }
 0x108   : > { %v948_v36 = vmul.f32 %v8959_v23, %v937_v33  ;;  %v6731_v33 = vor.u32 %v7460_v31, %v6730_v30 }
 0x109   : > { %v8975_v35 = vsub.f32 %v8953_v15, %v946_v34  ;;  %1312 = vmatpush.bf16.msra.mxu1 %v6727_v32  ;;  %v9018_v34 = vld [vmem:[#allocation3 + $0x10] sm:$0xff] }
 0x10a   : > { %v8981_v38 = vsub.f32 %v8955_v16, %v948_v36  ;;  %11106 = vst [vmem:[#allocation54_spill] sm:$0xff] %v9018_v34  ;;  %v6710_v36 = vld [vmem:[%s8919_s24 + $0x30] sm:$0xf]  ;;  %1331 = vmatpush.bf16.msra.mxu2 %v6731_v33  ;;  %1033 = vadd.xlane.f32.xlu2 %v9018_v34 }
 0x10b   : > { %v954_v37 = vmul.f32 %v8975_v35, %v8975_v35 }
 0x10c   : > { %v956_v39 = vmul.f32 %v8981_v38, %v8981_v38 }
 0x10d   : > { %959 = vadd.xlane.f32.xlu1 %v954_v37  ;;  %v7456_v37 = vld [vmem:[%s8919_s24 + $0x38] sm:$0xf0]  ;;  %1313 = vmatpush.bf16.msra.mxu1 %v6715_v43 }
 0x10e   : > { %1332 = vmatpush.bf16.msra.mxu2 %v6719_v45  ;;  %v1017_v45 = vperm.slane %v8932_v0, 0 }
 0x111   : > { %1314 = vmatpush.bf16.msra.mxu1 %v6703_v55 }
 0x112   : > { %1333 = vmatpush.bf16.msra.mxu2 %v6707_v56 }
 0x115   : > { %963 = vadd.xlane.f32.xlu1 %v956_v39  ;;  %v6711_v39 = vor.u32 %v7456_v37, %v6710_v36  ;;  %1315 = vmatpush.bf16.msra.mxu1 %v6691_v6 }
 0x116   : > { %1334 = vmatpush.bf16.msra.mxu2 %v6695_v10 }
 0x117   : > { %1294 = vmatpush.bf16.msra.mxu0 %v6711_v39 }
 0x11b   : > { %1295 = vmatpush.bf16.msra.mxu0 %v6699_v49 }
 0x11f   : > { %1296 = vmatpush.bf16.msra.mxu0 %v6687_v63 }
 0x178   : > { %v958_v53 = vpop.xlane.xlu1 %957 }
 0x179   : > { %v962_v54 = vpop.xlane.xlu0 %961  ;;  %v965_v57 = vmul.f32 %v958_v53, %v8959_v23  ;;  %v1022_v53 = vperm.slane %v8932_v0, 1 }
 0x17a   : > { %v967_v62 = vmul.f32 %v962_v54, %v8959_v23 }
 0x17b   : > { %v969_v61 = vadd.f32 1e-06, %v965_v57 }
 0x17c   : > { %v971_v11 = vadd.f32 1e-06, %v967_v62 }
 0x17d   : > { %7771 = vrsqrt.f32 %v969_v61  ;;  %vm979_vm2 = vweird.f32 %v969_v61 }
 0x17e   : > { %7773 = vrsqrt.f32 %v971_v11  ;;  %vm999_vm9 = vweird.f32 %v971_v11 }
 0x180   : > { %v960_v12 = vpop.xlane.xlu1 %959 }
 0x181   : > { %v966_v17 = vmul.f32 %v960_v12, %v8959_v23  ;;  %v7494_v12 = vld [vmem:[%s8919_s24 + $0x16c] sm:$0xf] }
 0x183   : > { %v7772_v18 = vpop.eup %7771  ;;  %v970_v19 = vadd.f32 1e-06, %v966_v17  ;;  %v6900_v17 = vld [vmem:[%s8919_s24 + $0x174] sm:$0xf0] }
 0x184   : > { %v974_v20 = vmul.f32 %v7772_v18, %v969_v61  ;;  %v7774_v25 = vpop.eup %7773  ;;  %vm980_vm1 = vweird.f32 %v7772_v18 }
 0x185   : > { %7775 = vrsqrt.f32 %v970_v19  ;;  %v994_v36 = vmul.f32 %v7774_v25, %v971_v11  ;;  %vm981_vm3 = vmor %vm979_vm2, %vm980_vm1  ;;  %vm989_vm5 = vweird.f32 %v970_v19  ;;  %vm1000_vm10 = vweird.f32 %v7774_v25 }
 0x186   : > { %v975_v21 = vmul.f32 %v7772_v18, %v974_v20  ;;  %vm1001_vm12 = vmor %vm999_vm9, %vm1000_vm10  ;;  %v6888_v20 = vld [vmem:[%s8919_s24 + $0x15c] sm:$0xf0] }
 0x187   : > { %v995_v41 = vmul.f32 %v7774_v25, %v994_v36  ;;  %v7485_v36 = vld [vmem:[%s8919_s24 + $0x124] sm:$0xf] }
 0x188   : > { %v976_v22 = vmul.f32 0.5, %v975_v21  ;;  %v964_v24 = vpop.xlane.xlu1 %963 }
 0x189   : > { %v968_v26 = vmul.f32 %v964_v24, %v8959_v23  ;;  %v996_v47 = vmul.f32 0.5, %v995_v41  ;;  %v6852_v41 = vld [vmem:[%s8919_s24 + $0x114] sm:$0xf0] }
 0x18a   : > { %v977_v27 = vsub.f32 1.5, %v976_v22 }
 0x18b   : > { %v7776_v30 = vpop.eup %7775  ;;  %v972_v31 = vadd.f32 1e-06, %v968_v26  ;;  %v997_v54 = vsub.f32 1.5, %v996_v47  ;;  %v6828_v47 = vld [vmem:[%s8919_s24 + $0xe4] sm:$0xf0] }
 0x18c   : > { %v978_v32 = vmul.f32 %v7772_v18, %v977_v27  ;;  %v984_v33 = vmul.f32 %v7776_v30, %v970_v19  ;;  %vm990_vm4 = vweird.f32 %v7776_v30  ;;  %v6903_v19 = vor.u32 %v7494_v12, %v6900_v17 }
 0x18d   : > { %7777 = vrsqrt.f32 %v972_v31  ;;  %vm991_vm6 = vmor %vm989_vm5, %vm990_vm4  ;;  %vm1009_vm7 = vweird.f32 %v972_v31  ;;  %v998_v59 = vmul.f32 %v7774_v25, %v997_v54 }
 0x18e   : > { %v985_v37 = vmul.f32 %v7776_v30, %v984_v33  ;;  %v982_v39 = vsel %vm981_vm3, %v7772_v18, %v978_v32  ;;  %v7491_v18 = vld [vmem:[%s8919_s24 + $0x154] sm:$0xf]  ;;  %1537 = vmatpush.bf16.msrb.mxu0 %v6903_v19  ;;  %v6876_v32 = vld [vmem:[%s8919_s24 + $0x144] sm:$0xf0] }
 0x18f   : > { %v1013_v44 = vmul.f32 %v982_v39, %v8964_v28  ;;  %v1002_v62 = vsel %vm1001_vm12, %v7774_v25, %v998_v59  ;;  %v6891_v21 = vor.u32 %v7491_v18, %v6888_v20  ;;  %v9085_v59 = vld [vmem:[#allocation3 + $0x8] sm:$0xff] }
 0x190   : > { %v986_v40 = vmul.f32 0.5, %v985_v37  ;;  %v1015_v5 = vmul.f32 %v1002_v62, %v8967_v29  ;;  %v1028_v29 = vpop.xlane.xlu2 %1027  ;;  %v6864_v37 = vld [vmem:[%s8919_s24 + $0x12c] sm:$0xf0]  ;;  %11108 = vst [vmem:[#allocation56_spill] sm:$0xff] %v9085_v59  ;;  %1031 = vadd.xlane.f32.xlu1 %v9085_v59 }
 0x191   : > { %v1018_v52 = vmul.f32 %v1017_v45, %v1013_v44  ;;  %v6867_v39 = vor.u32 %v7485_v36, %v6864_v37  ;;  %v6840_v44 = vld [vmem:[%s8919_s24 + $0xfc] sm:$0xf0] }
 0x192   : > { %v987_v42 = vsub.f32 1.5, %v986_v40  ;;  %v1020_v7 = vmul.f32 %v1017_v45, %v1015_v5  ;;  %1538 = vmatpush.bf16.msrb.mxu0 %v6891_v21  ;;  %v7482_v40 = vld [vmem:[%s8919_s24 + $0x10c] sm:$0xf] }
 0x193   : > { %v7778_v43 = vpop.eup %7777  ;;  %v1023_v57 = vadd.f32 %v1022_v53, %v1018_v52  ;;  %v1153_v52 = vperm.slane %v8934_v1, 2 }
 0x194   : > { %v988_v46 = vmul.f32 %v7776_v30, %v987_v42  ;;  %v1004_v48 = vmul.f32 %v7778_v43, %v972_v31  ;;  %vm1010_vm8 = vweird.f32 %v7778_v43  ;;  %v1025_v10 = vadd.f32 %v1022_v53, %v1020_v7  ;;  %v7488_v31 = vld [vmem:[%s8919_s24 + $0x13c] sm:$0xf] }
 0x195   : > { %vm1011_vm11 = vmor %vm1009_vm7, %vm1010_vm8  ;;  %v6879_v33 = vor.u32 %v7488_v31, %v6876_v32  ;;  %v6855_v42 = vor.u32 %v7482_v40, %v6852_v41 }
 0x196   : > { %v992_v49 = vsel %vm991_vm6, %v7776_v30, %v988_v46  ;;  %v1005_v50 = vmul.f32 %v7778_v43, %v1004_v48  ;;  %v7476_v46 = vld [vmem:[%s8919_s24 + $0xdc] sm:$0xf] }
 0x197   : > { %v1014_v51 = vmul.f32 %v992_v49, %v8975_v35  ;;  %1539 = vmatpush.bf16.msrb.mxu0 %v6879_v33  ;;  %v6831_v48 = vor.u32 %v7476_v46, %v6828_v47  ;;  %v7473_v49 = vld [vmem:[%s8919_s24 + $0xc4] sm:$0xf] }
 0x198   : > { %v1006_v55 = vmul.f32 0.5, %v1005_v50  ;;  %v1034_v25 = vpop.xlane.xlu2 %1033  ;;  %v6816_v50 = vld [vmem:[%s8919_s24 + $0xcc] sm:$0xf0] }
 0x199   : > { %v1019_v56 = vmul.f32 %v1017_v45, %v1014_v51  ;;  %v1038_v26 = vmul.f32 %v1034_v25, %v8959_v23  ;;  %v6819_v51 = vor.u32 %v7473_v49, %v6816_v50 }
 0x19a   : > { %v1007_v28 = vsub.f32 1.5, %v1006_v55  ;;  %v9078_v55 = vperm.slane %v1153_v52, 0 }
 0x19b   : > { %v1024_v58 = vadd.f32 %v1022_v53, %v1019_v56  ;;  %v9061_v27 = vsub.f32 %v9018_v34, %v1038_v26  ;;  %1540 = vmatpush.bf16.msrb.mxu0 %v6867_v39  ;;  %v1154_v56 = vperm.slane %v8934_v1, 4 }
 0x19c   : > { %v1008_v60 = vmul.f32 %v7778_v43, %v1007_v28  ;;  %v1152_v28 = vperm.slane %v8934_v1, 0 }
 0x19d   : > { %v1149_v61 = vpack.c.bf16 %v1024_v58, %v1023_v57  ;;  %v1046_v30 = vmul.f32 %v9061_v27, %v9061_v27  ;;  %v9083_v58 = vld [vmem:[#allocation3 + $0x18] sm:$0xff] }
 0x19e   : > { %v1012_v35 = vsel %vm1011_vm11, %v7778_v43, %v1008_v60  ;;  %v7479_v43 = vld [vmem:[%s8919_s24 + $0xf4] sm:$0xf]  ;;  %11107 = vst [vmem:[#allocation55_spill] sm:$0xff] %v9083_v58  ;;  %1029 = vadd.xlane.f32.xlu0 %v9083_v58 }
 0x19f   : > { %1297 = vmatmul.bf16.vlgmr.msra.gmra.mxu0 %v1149_v61  ;;  %1316 = vmatmul.bf16.vlgmr.msra.gmra.mxu1 %v1149_v61  ;;  %v1016_v63 = vmul.f32 %v1012_v35, %v8981_v38  ;;  %v1035_v38 = vmul.f32 %v1028_v29, %v8959_v23 }
 0x1a0   : > { %1335 = vmatmul.bf16.vlgmr.msra.gmra.mxu2 %v1149_v61  ;;  %1541 = vmatpush.bf16.msrb.mxu0 %v6855_v42  ;;  %v1160_v61 = vperm.slane %v1154_v56, 0 }
 0x1a1   : > { %v1021_v6 = vmul.f32 %v1017_v45, %v1016_v63  ;;  %v9055_v22 = vsub.f32 %v9003_v8, %v1035_v38  ;;  %v6843_v45 = vor.u32 %v7479_v43, %v6840_v44  ;;  %v1158_v63 = vperm.slane %v1152_v28, 0 }
 0x1a3   : > { %v1026_v9 = vadd.f32 %v1022_v53, %v1021_v6  ;;  %v1043_v24 = vmul.f32 %v9055_v22, %v9055_v22 }
 0x1a4   : > { %1542 = vmatpush.bf16.msrb.mxu0 %v6843_v45 }
 0x1a5   : > { %v1150_v11 = vpack.c.bf16 %v1026_v9, %v1025_v10  ;;  %1047 = vadd.xlane.f32.xlu2 %v1043_v24 }
 0x1a8   : > { %1543 = vmatpush.bf16.msrb.mxu0 %v6831_v48 }
 0x1ac   : > { %1544 = vmatpush.bf16.msrb.mxu0 %v6819_v51 }
 0x1ad   : > { %1053 = vadd.xlane.f32.xlu2 %v1046_v30 }
 0x1af   : > { %1302 = vmatmul.bf16.gmra.mxu0 %v1150_v11  ;;  %1321 = vmatmul.bf16.gmra.mxu1 %v1150_v11 }
 0x1b0   : > { %1340 = vmatmul.bf16.gmra.mxu2 %v1150_v11 }
 0x211   : > { %v1030_v28 = vpop.xlane.xlu0 %1029 }
 0x21c   : > { %v1298_v53 = vpop.f32.mrf.mxu0  ;;  %v1317_v54 = vpop.f32.mrf.mxu1 }
 0x21d   : > { %v1318_v57 = vadd.f32 %v1317_v54, %v9078_v55  ;;  %v1299_v11 = vadd.f32 %v1298_v53, %v1158_v63 }
 0x21f   : > { %v1579_v5 = vpack.c.bf16 %v1318_v57, %v1318_v57  ;;  %v1575_v24 = vpack.c.bf16 %v1299_v11, %v1299_v11 }
 0x221   : > { %v1594_v12 = vunpack.c.l.b16 %v1579_v5  ;;  %v1589_v33 = vunpack.c.l.b16 %v1575_v24  ;;  %v6886_v24 = vld [vmem:[%s8919_s24 + $0x150] sm:$0xf] }
 0x223   : > { %v1336_v60 = vpop.f32.mrf.mxu2 }
 0x224   : > { %v1300_v35 = vpop.f32.mrf.mxu0  ;;  %v1319_v62 = vpop.f32.mrf.mxu1  ;;  %v1337_v10 = vadd.f32 %v1336_v60, %v1160_v61  ;;  %v1036_v60 = vmul.f32 %v1030_v28, %v8959_v23  ;;  %v7483_v28 = vld [vmem:[%s8919_s24 + $0x110] sm:$0xf0] }
 0x225   : > { %v1320_v6 = vadd.f32 %v1319_v62, %v9078_v55  ;;  %v1301_v7 = vadd.f32 %v1300_v35, %v1158_v63 }
 0x226   : > { %v1583_v21 = vpack.c.bf16 %v1337_v10, %v1337_v10  ;;  %v9118_v62 = vsub.f32 %v9083_v58, %v1036_v60 }
 0x227   : > { %v1580_v9 = vpack.c.bf16 %v1320_v6, %v1320_v6  ;;  %v1576_v18 = vpack.c.bf16 %v1301_v7, %v1301_v7 }
 0x228   : > { %v1672_v31 = vunpack.c.l.b16 %v1583_v21  ;;  %v1044_v6 = vmul.f32 %v9118_v62, %v9118_v62 }
 0x229   : > { %v1595_v17 = vunpack.c.l.b16 %v1580_v9  ;;  %v1590_v30 = vunpack.c.l.b16 %v1576_v18  ;;  %v7495_v18 = vld [vmem:[%s8919_s24 + $0x170] sm:$0xf0] }
 0x22b   : > { %v9090_v19 = vpack.c.b16 %v1595_v17, %v1594_v12  ;;  %v1338_v20 = vpop.f32.mrf.mxu2  ;;  %v9101_v39 = vpack.c.b16 %v1590_v30, %v1589_v33  ;;  %v6898_v17 = vld [vmem:[%s8919_s24 + $0x168] sm:$0xf]  ;;  %v6894_v30 = vld [vmem:[%s8919_s24 + $0x158] sm:$0xf] }
 0x22c   : > { %v1339_v29 = vadd.f32 %v1338_v20, %v1160_v61  ;;  %v1303_v38 = vpop.f32.mrf.mxu0  ;;  %v6906_v20 = vld [vmem:[%s8919_s24 + $0x170] sm:$0xf]  ;;  %v6899_v21 = vor.u32 %v7495_v18, %v6898_v17  ;;  %v7481_v17 = vld [vmem:[%s8919_s24 + $0x100] sm:$0xf0] }
 0x22d   : > { %1803 = vrot.lane.b32.xlu2 %v9090_v19, %s8615_s18  ;;  %v9096_v25 = vsel %vm1597_vm13, %v9090_v19, 0  ;;  %v1304_v36 = vadd.f32 %v1303_v38, %v1158_v63 }
 0x22e   : > { %11109 = vst [vmem:[#allocation57_spill] sm:$0xff] %v9096_v25  ;;  %v1584_v26 = vpack.c.bf16 %v1339_v29, %v1339_v29  ;;  %1611 = vmatpush.bf16.xpose.msrb.mxu2 %v9096_v25  ;;  %v7496_v29 = vld [vmem:[%s8919_s24 + $0x178] sm:$0xf0]  ;;  %1518 = vmatpush.bf16.msra.mxu3 %v6899_v21  ;;  %v7477_v21 = vld [vmem:[%s8919_s24 + $0xe0] sm:$0xf0] }
 0x22f   : > { %v1577_v43 = vpack.c.bf16 %v1304_v36, %v1304_v36  ;;  %v6907_v38 = vor.u32 %v7496_v29, %v6906_v20  ;;  %v6874_v36 = vld [vmem:[%s8919_s24 + $0x138] sm:$0xf]  ;;  %v6834_v29 = vld [vmem:[%s8919_s24 + $0xe0] sm:$0xf] }
 0x230   : > { %v1673_v32 = vunpack.c.l.b16 %v1584_v26  ;;  %v7492_v26 = vld [vmem:[%s8919_s24 + $0x158] sm:$0xf0]  ;;  %v6826_v20 = vld [vmem:[%s8919_s24 + $0xd8] sm:$0xf] }
 0x231   : > { %v2015_v46 = vunpack.c.l.b16 %v1577_v43  ;;  %1556 = vmatpush.bf16.msrb.mxu1 %v6907_v38  ;;  %v7490_v43 = vld [vmem:[%s8919_s24 + $0x148] sm:$0xf0]  ;;  %v6827_v38 = vor.u32 %v7477_v21, %v6826_v20 }
 0x232   : > { %v9099_v37 = vpack.c.b16 %v1673_v32, %v1672_v31  ;;  %v6887_v31 = vor.u32 %v7492_v26, %v6886_v24  ;;  %v7493_v32 = vld [vmem:[%s8919_s24 + $0x160] sm:$0xf0]  ;;  %v7478_v24 = vld [vmem:[%s8919_s24 + $0xe8] sm:$0xf0] }
 0x233   : > { %v1341_v40 = vpop.f32.mrf.mxu2  ;;  %v6895_v33 = vor.u32 %v7493_v32, %v6894_v30  ;;  %v6835_v30 = vor.u32 %v7478_v24, %v6834_v29 }
 0x234   : > { %v1342_v41 = vadd.f32 %v1341_v40, %v1160_v61  ;;  %1686 = vmatpush.bf16.msra.mxu0 %v9099_v37  ;;  %v1305_v42 = vpop.f32.mrf.mxu0  ;;  %1519 = vmatpush.bf16.msra.mxu3 %v6887_v31  ;;  %v7489_v40 = vld [vmem:[%s8919_s24 + $0x140] sm:$0xf0] }
 0x235   : > { %v1306_v44 = vadd.f32 %v1305_v42, %v1158_v63  ;;  %6908 = vmatmul.msk.bf16.vlgmr.msrb.gmra.mxu2 %vm1597_vm13, %v9101_v39  ;;  %v1032_v63 = vpop.xlane.xlu1 %1031  ;;  %1557 = vmatpush.bf16.msrb.mxu1 %v6895_v33  ;;  %v6875_v42 = vor.u32 %v7489_v40, %v6874_v36  ;;  %v6814_v33 = vld [vmem:[%s8919_s24 + $0xc0] sm:$0xf]  ;;  %v7474_v36 = vld [vmem:[%s8919_s24 + $0xc8] sm:$0xf0]  ;;  %v6822_v40 = vld [vmem:[%s8919_s24 + $0xc8] sm:$0xf] }
 0x236   : > { %v1585_v50 = vpack.c.bf16 %v1342_v41, %v1342_v41  ;;  %v1037_v7 = vmul.f32 %v1032_v63, %v8959_v23  ;;  %v6882_v41 = vld [vmem:[%s8919_s24 + $0x140] sm:$0xf]  ;;  %v7484_v63 = vld [vmem:[%s8919_s24 + $0x118] sm:$0xf0] }
 0x237   : > { %v1578_v45 = vpack.c.bf16 %v1306_v44, %v1306_v44  ;;  %v6883_v44 = vor.u32 %v7490_v43, %v6882_v41  ;;  %v6815_v43 = vor.u32 %v7474_v36, %v6814_v33 }
 0x238   : > { %v2096_v53 = vunpack.c.l.b16 %v1585_v50  ;;  %v9128_v11 = vsub.f32 %v9085_v59, %v1037_v7  ;;  %1520 = vmatpush.bf16.msra.mxu3 %v6875_v42  ;;  %v7480_v7 = vld [vmem:[%s8919_s24 + $0xf8] sm:$0xf0] }
 0x239   : > { %v2016_v47 = vunpack.c.l.b16 %v1578_v45  ;;  %v1048_v45 = vpop.xlane.xlu2 %1047  ;;  %1558 = vmatpush.bf16.msrb.mxu1 %v6883_v44  ;;  %v7475_v44 = vld [vmem:[%s8919_s24 + $0xd0] sm:$0xf0] }
 0x23a   : > { %v1045_v12 = vmul.f32 %v9128_v11, %v9128_v11  ;;  %v1055_v50 = vmul.f32 %v1048_v45, %v8959_v23 }
 0x23b   : > { %v9106_v48 = vpack.c.b16 %v2016_v47, %v2015_v46  ;;  %v1343_v49 = vpop.f32.mrf.mxu2  ;;  %v6862_v46 = vld [vmem:[%s8919_s24 + $0x120] sm:$0xf]  ;;  %v7486_v47 = vld [vmem:[%s8919_s24 + $0x128] sm:$0xf0] }
 0x23c   : > { %v1344_v51 = vadd.f32 %v1343_v49, %v1160_v61  ;;  %v6870_v49 = vld [vmem:[%s8919_s24 + $0x128] sm:$0xf]  ;;  %v9152_v60 = vadd.f32 1e-06, %v1055_v50 }
 0x23d   : > { %2224 = vrot.lane.b32.xlu2 %v9106_v48, %s8615_s18 }
 0x23e   : > { %v1586_v52 = vpack.c.bf16 %v1344_v51, %v1344_v51  ;;  %v6863_v51 = vor.u32 %v7486_v47, %v6862_v46  ;;  %7779 = vrsqrt.f32 %v9152_v60  ;;  %v6823_v47 = vor.u32 %v7475_v44, %v6822_v40 }
 0x23f   : > { %vm1069_vm15 = vweird.f32 %v9152_v60 }
 0x240   : > { %v2097_v54 = vunpack.c.l.b16 %v1586_v52  ;;  %v7487_v52 = vld [vmem:[%s8919_s24 + $0x130] sm:$0xf0]  ;;  %1521 = vmatpush.bf16.msra.mxu3 %v6863_v51 }
 0x241   : > { %v1054_v41 = vpop.xlane.xlu2 %1053 }
 0x242   : > { %v9110_v56 = vpack.c.b16 %v2097_v54, %v2096_v53  ;;  %v6871_v53 = vor.u32 %v7487_v52, %v6870_v49  ;;  %v6850_v54 = vld [vmem:[%s8919_s24 + $0x108] sm:$0xf]  ;;  %v1058_v46 = vmul.f32 %v1054_v41, %v8959_v23 }
 0x244   : > { %11110 = vst [vmem:[#allocation58_spill] sm:$0xff] %v9110_v56  ;;  %1559 = vmatpush.bf16.msrb.mxu1 %v6871_v53  ;;  %v7780_v31 = vpop.eup %7779  ;;  %v9171_v50 = vadd.f32 1e-06, %v1058_v46 }
 0x245   : > { %v1064_v45 = vmul.f32 %v7780_v31, %v9152_v60  ;;  %vm1070_vm0 = vweird.f32 %v7780_v31 }
 0x246   : > { %vm1071_vm1 = vmor %vm1069_vm15, %vm1070_vm0  ;;  %vm1099_vm7 = vweird.f32 %v9171_v50 }
 0x247   : > { %v1065_v49 = vmul.f32 %v7780_v31, %v1064_v45 }
 0x2b8   : > { %v1613_v57 = vpop.f32.mrf.mxu2 }
 0x2b9   : > { %v9113_v35 = vmul.f32 0.17677669, %v1613_v57  ;;  %v6858_v57 = vld [vmem:[%s8919_s24 + $0x110] sm:$0xf] }
 0x2bb   : > { %v1621_v61 = vsel %vm1620_vm14, %v9113_v35, -inf }
 0x2bc   : > { %1622 = vmax.xlane.f32.xlu0 %v1621_v61  ;;  %v6851_v61 = vor.u32 %v7483_v28, %v6850_v54 }
 0x2be   : > { %1522 = vmatpush.bf16.msra.mxu3 %v6851_v61  ;;  %v1066_v61 = vmul.f32 0.5, %v1065_v49 }
 0x2c0   : > { %v1615_v5 = vpop.f32.mrf.mxu2 }
 0x2c1   : > { %v9123_v9 = vmul.f32 0.17677669, %v1615_v5  ;;  %v6859_v5 = vor.u32 %v7484_v63, %v6858_v57 }
 0x2c3   : > { %v1624_v10 = vsel %vm1620_vm14, %v9123_v9, -inf  ;;  %1560 = vmatpush.bf16.msrb.mxu1 %v6859_v5  ;;  %v1067_v5 = vsub.f32 1.5, %v1066_v61 }
 0x2c4   : > { %1625 = vmax.xlane.f32.xlu1 %v1624_v10  ;;  %1049 = vadd.xlane.f32.xlu0 %v1044_v6  ;;  %v6838_v6 = vld [vmem:[%s8919_s24 + $0xf0] sm:$0xf]  ;;  %v6846_v10 = vld [vmem:[%s8919_s24 + $0xf8] sm:$0xf]  ;;  %s8619_s24 = smov (!%p7020_p3), 64  }
 0x2c5   : > { %v6847_v18 = vor.u32 %v7481_v17, %v6846_v10  ;;  %v1322_v10 = vpop.f32.mrf.mxu1  ;;  %v1068_v20 = vmul.f32 %v7780_v31, %v1067_v5 }
 0x2c7   : > { %1561 = vmatpush.bf16.msrb.mxu1 %v6847_v18 }
 0x2cb   : > { %1562 = vmatpush.bf16.msrb.mxu1 %v6835_v30 }
 0x2cc   : > { %1051 = vadd.xlane.f32.xlu1 %v1045_v12  ;;  %v6839_v12 = vor.u32 %v7480_v7, %v6838_v6 }
 0x2cd   : > { %v1324_v36 = vpop.f32.mrf.mxu1 }
 0x2ce   : > { %1523 = vmatpush.bf16.msra.mxu3 %v6839_v12  ;;  %v1325_v46 = vadd.f32 %v1324_v36, %v9078_v55 }
 0x2cf   : > { %1563 = vmatpush.bf16.msrb.mxu1 %v6823_v47 }
 0x2d2   : > { %1524 = vmatpush.bf16.msra.mxu3 %v6827_v38 }
 0x2d6   : > { %1525 = vmatpush.bf16.msra.mxu3 %v6815_v43 }
 0x32f   : > { %v1623_v26 = vpop.xlane.xlu0 %1622 }
 0x330   : > { %v1627_v32 = vsub.f32 %v9113_v35, %v1623_v26  ;;  %v1072_v26 = vsel %vm1071_vm1, %v7780_v31, %v1068_v20 }
 0x331   : > { %v1103_v40 = vmul.f32 %v1072_v26, %v9055_v22  ;;  %v1323_v22 = vadd.f32 %v1322_v10, %v9078_v55 }
 0x332   : > { %v1629_v42 = vmul.f32 1.442695, %v1627_v32 }
 0x334   : > { %7781 = vpow2.f32 %v1629_v42  ;;  %v1107_v42 = vperm.slane %v8932_v0, 2 }
 0x335   : > { %7783 = vrsqrt.f32 %v9171_v50 }
 0x337   : > { %v1626_v35 = vpop.xlane.xlu1 %1625  ;;  %v1050_v51 = vpop.xlane.xlu0 %1049 }
 0x338   : > { %v1628_v52 = vsub.f32 %v9123_v9, %v1626_v35  ;;  %v1056_v53 = vmul.f32 %v1050_v51, %v8959_v23  ;;  %v1108_v35 = vmul.f32 %v1107_v42, %v1103_v40  ;;  %v1112_v51 = vperm.slane %v8932_v0, 3 }
 0x33a   : > { %v9175_v54 = vpop.eup %7781  ;;  %v1631_v28 = vmul.f32 1.442695, %v1628_v52  ;;  %v1060_v57 = vadd.f32 1e-06, %v1056_v53 }
 0x33b   : > { %v1633_v63 = vsel %vm1620_vm14, %v9175_v54, 0.0  ;;  %v9181_v9 = vpop.eup %7783 }
 0x33c   : > { %7785 = vpow2.f32 %v1631_v28  ;;  %1634 = vadd.xlane.f32.xlu0 %v1633_v63  ;;  %v1094_v29 = vmul.f32 %v9181_v9, %v9171_v50  ;;  %vm1079_vm2 = vweird.f32 %v1060_v57  ;;  %vm1100_vm8 = vweird.f32 %v9181_v9 }
 0x33d   : > { %7787 = vrsqrt.f32 %v1060_v57  ;;  %v1113_v63 = vadd.f32 %v1112_v51, %v1108_v35  ;;  %vm1101_vm10 = vmor %vm1099_vm7, %vm1100_vm8 }
 0x33e   : > { %v1095_v60 = vmul.f32 %v9181_v9, %v1094_v29 }
 0x33f   : > { %v1052_v6 = vpop.xlane.xlu1 %1051 }
 0x340   : > { %v1057_v7 = vmul.f32 %v1052_v6, %v8959_v23  ;;  %v1096_v43 = vmul.f32 0.5, %v1095_v60 }
 0x342   : > { %v9184_v12 = vpop.eup %7785  ;;  %v1061_v17 = vadd.f32 1e-06, %v1057_v7  ;;  %v1097_v52 = vsub.f32 1.5, %v1096_v43  ;;  %v1804_v7 = vpop.permute.xlu2 %1803 }
 0x343   : > { %v7788_v18 = vpop.eup %7787  ;;  %v1636_v21 = vsel %vm1620_vm14, %v9184_v12, 0.0 }
 0x344   : > { %v1074_v38 = vmul.f32 %v7788_v18, %v1060_v57  ;;  %7789 = vrsqrt.f32 %v1061_v17  ;;  %1637 = vadd.xlane.f32.xlu1 %v1636_v21  ;;  %vm1080_vm3 = vweird.f32 %v7788_v18  ;;  %vm1089_vm5 = vweird.f32 %v1061_v17 }
 0x345   : > { %vm1081_vm4 = vmor %vm1079_vm2, %vm1080_vm3  ;;  %v1582_v57 = vpack.c.bf16 %v1325_v46, %v1325_v46  ;;  %v1098_v6 = vmul.f32 %v9181_v9, %v1097_v52 }
 0x346   : > { %v1075_v24 = vmul.f32 %v7788_v18, %v1074_v38 }
 0x347   : > { %v2021_v50 = vunpack.c.l.b16 %v1582_v57  ;;  %v1102_v20 = vsel %vm1101_vm10, %v9181_v9, %v1098_v6 }
 0x348   : > { %v1076_v30 = vmul.f32 0.5, %v1075_v24  ;;  %v1106_v24 = vmul.f32 %v1102_v20, %v9061_v27 }
 0x34a   : > { %v7790_v32 = vpop.eup %7789  ;;  %v1077_v33 = vsub.f32 1.5, %v1076_v30  ;;  %v1111_v60 = vmul.f32 %v1107_v42, %v1106_v24 }
 0x34b   : > { %v1084_v41 = vmul.f32 %v7790_v32, %v1061_v17  ;;  %vm1090_vm6 = vweird.f32 %v7790_v32  ;;  %v1581_v17 = vpack.c.bf16 %v1323_v22, %v1323_v22 }
 0x34c   : > { %v1078_v44 = vmul.f32 %v7788_v18, %v1077_v33  ;;  %vm9201_vm9 = vmor %vm1089_vm5, %vm1090_vm6 }
 0x34d   : > { %v1085_v45 = vmul.f32 %v7790_v32, %v1084_v41  ;;  %v2020_v21 = vunpack.c.l.b16 %v1581_v17  ;;  %v1382_v17 = vperm.slane %v8934_v1, 3 }
 0x34e   : > { %v1082_v31 = vsel %vm1081_vm4, %v7788_v18, %v1078_v44  ;;  %v9209_v18 = vsel %vm1597_vm13, %v1804_v7, 0  ;;  %v1383_v7 = vperm.slane %v8934_v1, 5 }
 0x34f   : > { %v1104_v47 = vmul.f32 %v1082_v31, %v9118_v62  ;;  %v1086_v49 = vmul.f32 0.5, %v1085_v45  ;;  %v9214_v38 = vpack.c.b16 %v2021_v50, %v2020_v21  ;;  %v1388_v50 = vperm.slane %v1382_v17, 1  ;;  %v7502_v17 = vld [vmem:[%s8921_s2 + $0x28] sm:$0xff] }
 0x350   : > { %1801 = vrot.lane.b32.xlu0 %v9101_v39, %s8615_s18 }
 0x351   : > { %v1087_v53 = vsub.f32 1.5, %v1086_v49  ;;  %v1109_v28 = vmul.f32 %v1107_v42, %v1104_v47  ;;  %v9224_v6 = vsel %vm1597_vm13, %v9214_v38, 0 }
 0x352   : > { %11113 = vst [vmem:[#allocation59_spill] sm:$0xff] %v9224_v6 }
 0x353   : > { %v1088_v62 = vmul.f32 %v7790_v32, %v1087_v53  ;;  %v1114_v5 = vadd.f32 %v1112_v51, %v1109_v28 }
 0x355   : > { %v1379_v55 = vpack.c.bf16 %v1114_v5, %v1113_v63  ;;  %v1092_v10 = vsel %vm9201_vm9, %v7790_v32, %v1088_v62  ;;  %v1116_v32 = vadd.f32 %v1112_v51, %v1111_v60 }
 0x356   : > { %v1105_v29 = vmul.f32 %v1092_v10, %v9128_v11 }
 0x357   : > { %1526 = vmatmul.bf16.vlgmr.msra.gmra.mxu3 %v1379_v55  ;;  %1545 = vmatmul.bf16.vlgmr.msrb.gmra.mxu0 %v1379_v55 }
 0x358   : > { %1564 = vmatmul.bf16.vlgmr.msrb.gmra.mxu1 %v1379_v55  ;;  %1818 = vmatpush.bf16.xpose.msrb.mxu0 %v9209_v18  ;;  %v1110_v26 = vmul.f32 %v1107_v42, %v1105_v29  ;;  %v9229_v55 = vperm.slane %v1383_v7, 1 }
 0x35a   : > { %v1115_v30 = vadd.f32 %v1112_v51, %v1110_v26 }
 0x35c   : > { %v1380_v33 = vpack.c.bf16 %v1116_v32, %v1115_v30 }
 0x35d   : > { %2226 = vrot.lane.b32.xlu1 %v9214_v38, %s8615_s18 }
 0x367   : > { %1531 = vmatmul.bf16.gmra.mxu3 %v1380_v33  ;;  %1550 = vmatmul.bf16.gmra.mxu0 %v1380_v33 }
 0x368   : > { %1569 = vmatmul.bf16.gmra.mxu1 %v1380_v33 }
 0x3af   : > { %v1635_v9 = vpop.xlane.xlu0 %1634 }
 0x3b0   : > { %7791 = vrcp.f32 %v1635_v9  ;;  %v1650_v46 = vand.u32 2147483648, %v1635_v9  ;;  %vm1644_vm12 = vweird.f32 %v1635_v9  ;;  %v1648_v42 = vand.u32 2147483647, %v1635_v9 }
 0x3b2   : > { %v1651_v52 = vor.u32 1.1754944e-38, %v1650_v46  ;;  %vm1649_vm1 = vcmp.eq.f32.partialorder %v1648_v42, 8.507059e+37 }
 0x3b6   : > { %v7792_v36 = vpop.eup %7791 }
 0x3b7   : > { %v1640_v40 = vmul.f32 %v7792_v36, %v1635_v9  ;;  %v1638_v11 = vpop.xlane.xlu1 %1637  ;;  %vm1645_vm11 = vweird.f32 %v7792_v36 }
 0x3b8   : > { %7793 = vrcp.f32 %v1638_v11  ;;  %vm1646_vm15 = vmor %vm1644_vm12, %vm1645_vm11  ;;  %v1665_v47 = vand.u32 2147483648, %v1638_v11  ;;  %v1663_v51 = vand.u32 2147483647, %v1638_v11  ;;  %vm1659_vm2 = vweird.f32 %v1638_v11 }
 0x3b9   : > { %v1641_v41 = vsub.f32 1.0, %v1640_v40 }
 0x3ba   : > { %v1666_v28 = vor.u32 1.1754944e-38, %v1665_v47  ;;  %vm1664_vm4 = vcmp.eq.f32.partialorder %v1663_v51, 8.507059e+37  ;;  %v1381_v47 = vperm.slane %v8934_v1, 1 }
 0x3bb   : > { %v1642_v43 = vmul.f32 %v7792_v36, %v1641_v41 }
 0x3bd   : > { %v1643_v44 = vadd.f32 %v7792_v36, %v1642_v43 }
 0x3be   : > { %v7794_v27 = vpop.eup %7793 }
 0x3bf   : > { %v1655_v45 = vmul.f32 %v7794_v27, %v1638_v11  ;;  %v1647_v49 = vsel %vm1646_vm15, %v7792_v36, %v1643_v44  ;;  %vm1660_vm0 = vweird.f32 %v7794_v27 }
 0x3c0   : > { %v1652_v53 = vsel %vm1649_vm1, %v1651_v52, %v1647_v49  ;;  %vm1661_vm3 = vmor %vm1659_vm2, %vm1660_vm0  ;;  %v7504_v52 = vld [vmem:[%s8921_s2 + $0x38] sm:$0xff] }
 0x3c1   : > { %v1656_v31 = vsub.f32 1.0, %v1655_v45  ;;  %v1653_v61 = vmul.f32 %v9175_v54, %v1652_v53 }
 0x3c2   : > { %v9234_v24 = vpop.permute.xlu0 %1801 }
 0x3c3   : > { %v1657_v35 = vmul.f32 %v7794_v27, %v1656_v31 }
 0x3c5   : > { %v1658_v22 = vadd.f32 %v7794_v27, %v1657_v35  ;;  %v9250_v35 = vperm.slane %v1381_v47, 1 }
 0x3c7   : > { %v1662_v57 = vsel %vm1661_vm3, %v7794_v27, %v1658_v22 }
 0x3c8   : > { %v1667_v62 = vsel %vm1664_vm4, %v1666_v28, %v1662_v57 }
 0x3c9   : > { %v1668_v63 = vmul.f32 %v9184_v12, %v1667_v62  ;;  %v7503_v62 = vld [vmem:[%s8921_s2 + $0x30] sm:$0xff] }
 0x3cb   : > { %v1669_v5 = vpack.c.bf16 %v1668_v63, %v1653_v61 }
 0x3cd   : > { %6909 = vmatmul.msk.bf16.vlgmr.msra.gmra.mxu0 %vm1620_vm14, %v1669_v5 }
 0x3ce   : > { %2036 = vmatpush.bf16.xpose.msra.mxu0 %v9224_v6 }
 0x3cf   : > { %v2227_v21 = vpop.permute.xlu1 %2226 }
 0x3d0   : > { %v9237_v60 = vsel %vm1597_vm13, %v2227_v21, 0 }
 0x3d1   : > { %11114 = vst [vmem:[#allocation60_spill] sm:$0xff] %v9237_v60 }
 0x3d4   : > { %v1546_v10 = vpop.f32.mrf.mxu0 }
 0x3d5   : > { %v1565_v54 = vpop.f32.mrf.mxu1  ;;  %v1547_v20 = vadd.f32 %v1546_v10, %v1388_v50 }
 0x3d6   : > { %v1566_v12 = vadd.f32 %v1565_v54, %v9229_v55 }
 0x3d7   : > { %v2532_v30 = vpack.c.bf16 %v1547_v20, %v1547_v20  ;;  %v7501_v20 = vld [vmem:[%s8921_s2 + $0x20] sm:$0xff] }
 0x3d8   : > { %v2536_v9 = vpack.c.bf16 %v1566_v12, %v1566_v12 }
 0x3d9   : > { %v2547_v41 = vunpack.c.l.b16 %v2532_v30 }
 0x3da   : > { %v9232_v29 = vpop.f32.mrf.mxu3  ;;  %v2623_v27 = vunpack.c.l.b16 %v2536_v9  ;;  %v9265_v9 = vpop.permute.xlu2 %2224 }
 0x3dc   : > { %v1548_v26 = vpop.f32.mrf.mxu0 }
 0x3dd   : > { %v1549_v32 = vadd.f32 %v1548_v26, %v1388_v50  ;;  %v1567_v33 = vpop.f32.mrf.mxu1  ;;  %6912 = vmatmul.msk.bf16.vlgmr.msrb.gmra.mxu0 %vm1597_vm13, %v9234_v24 }
 0x3de   : > { %v1568_v36 = vadd.f32 %v1567_v33, %v9229_v55  ;;  %2241 = vmatpush.bf16.xpose.msrb.mxu0 %v9237_v60  ;;  %v7500_v33 = vld [vmem:[%s8921_s2 + $0x18] sm:$0xff] }
 0x3df   : > { %v2533_v40 = vpack.c.bf16 %v1549_v32, %v1549_v32 }
 0x3e0   : > { %v2537_v11 = vpack.c.bf16 %v1568_v36, %v1568_v36 }
 0x3e1   : > { %v2548_v43 = vunpack.c.l.b16 %v2533_v40  ;;  %v7499_v40 = vld [vmem:[%s8921_s2 + $0x10] sm:$0xff] }
 0x3e2   : > { %v2624_v44 = vunpack.c.l.b16 %v2537_v11  ;;  %v9243_v45 = vpop.f32.mrf.mxu3 }
 0x3e3   : > { %v9245_v46 = vpack.c.b16 %v2548_v43, %v2547_v41  ;;  %v7498_v43 = vld [vmem:[%s8921_s2 + $0x8] sm:$0xff] }
 0x3e4   : > { %v9247_v42 = vpack.c.b16 %v2624_v44, %v2623_v27  ;;  %v1551_v31 = vpop.f32.mrf.mxu0 }
 0x3e5   : > { %v1552_v49 = vadd.f32 %v1551_v31, %v1388_v50  ;;  %v1570_v63 = vpop.f32.mrf.mxu1  ;;  %v7497_v31 = vld [vmem:[%s8921_s2] sm:$0xff] }
 0x3e6   : > { %v1571_v11 = vadd.f32 %v1570_v63, %v9229_v55 }
 0x3e7   : > { %v2534_v28 = vpack.c.bf16 %v1552_v49, %v1552_v49 }
 0x3e8   : > { %v2538_v27 = vpack.c.bf16 %v1571_v11, %v1571_v11 }
 0x3e9   : > { %v2968_v1 = vunpack.c.l.b16 %v2534_v28 }
 0x3ea   : > { %v1532_v51 = vpop.f32.mrf.mxu3  ;;  %v3044_v47 = vunpack.c.l.b16 %v2538_v27 }
 0x3eb   : > { %v1533_v22 = vadd.f32 %v1532_v51, %v9250_v35 }
 0x3ec   : > { %v1553_v53 = vpop.f32.mrf.mxu0 }
 0x3ed   : > { %v1554_v57 = vadd.f32 %v1553_v53, %v1388_v50  ;;  %6916 = vmatmul.msk.bf16.vlgmr.msra.gmra.mxu0 %vm1597_vm13, %v9106_v48  ;;  %v2530_v10 = vpack.c.bf16 %v1533_v22, %v1533_v22  ;;  %v1572_v32 = vpop.f32.mrf.mxu1 }
 0x3ee   : > { %2505 = vmatpush.bf16.msra.mxu0 %v7504_v52  ;;  %v1573_v36 = vadd.f32 %v1572_v32, %v9229_v55 }
 0x3ef   : > { %v2535_v61 = vpack.c.bf16 %v1554_v57, %v1554_v57  ;;  %v2963_v21 = vunpack.c.l.b16 %v2530_v10 }
 0x3f0   : > { %v2539_v41 = vpack.c.bf16 %v1573_v36, %v1573_v36 }
 0x3f1   : > { %v2969_v5 = vunpack.c.l.b16 %v2535_v61 }
 0x3f2   : > { %v1534_v7 = vpop.f32.mrf.mxu3  ;;  %2506 = vmatpush.bf16.msra.mxu0 %v7503_v62  ;;  %v3045_v44 = vunpack.c.l.b16 %v2539_v41 }
 0x3f3   : > { %v9258_v54 = vpack.c.b16 %v2969_v5, %v2968_v1  ;;  %v1535_v50 = vadd.f32 %v1534_v7, %v9250_v35 }
 0x3f4   : > { %v9274_v49 = vpack.c.b16 %v3045_v44, %v3044_v47 }
 0x3f5   : > { %v2531_v12 = vpack.c.bf16 %v1535_v50, %v1535_v50 }
 0x3f6   : > { %2507 = vmatpush.bf16.msra.mxu0 %v7502_v17 }
 0x3f7   : > { %v2964_v26 = vunpack.c.l.b16 %v2531_v12 }
 0x3f9   : > { %v9262_v30 = vpack.c.b16 %v2964_v26, %v2963_v21 }
 0x3fa   : > { %2508 = vmatpush.bf16.msra.mxu0 %v7501_v20 }
 0x3fd   : > { %6920 = vmatmul.msk.bf16.vlgmr.msrb.gmra.mxu0 %vm1597_vm13, %v9265_v9 }
 0x3fe   : > { %2509 = vmatpush.bf16.msra.mxu0 %v7500_v33 }
 0x402   : > { %2510 = vmatpush.bf16.msra.mxu0 %v7499_v40 }
 0x406   : > { %2511 = vmatpush.bf16.msra.mxu0 %v7498_v43 }
 0x40a   : > { %2512 = vmatpush.bf16.msra.mxu0 %v7497_v31 }
 0x40e   : > { %3058 = vmatpush.bf16.msrb.mxu0 %v9274_v49 }
 0x44a   : > { %v1688_v51 = vpop.f32.mrf.mxu0 }
 0x44b   : > { %1693 = vst.msk [vmem:[#allocation6] sm:$0xff] %vm1597_vm13, %v1688_v51 }
 0x452   : > { %v1690_v52 = vpop.f32.mrf.mxu0 }
 0x453   : > { %1694 = vst.msk [vmem:[#allocation6 + $0x8] sm:$0xff] %vm1597_vm13, %v1690_v52 }
 0x45a   : > { %v1820_v55 = vpop.f32.mrf.mxu0 }
 0x45b   : > { %v1825_v22 = vmul.f32 0.17677669, %v1820_v55 }
 0x45d   : > { %v1827_v53 = vsel %vm1620_vm14, %v1825_v22, -inf }
 0x45e   : > { %1828 = vmax.xlane.f32.xlu0 %v1827_v53 }
 0x462   : > { %v1822_v28 = vpop.f32.mrf.mxu0 }
 0x463   : > { %v1826_v57 = vmul.f32 0.17677669, %v1822_v28 }
 0x465   : > { %v1830_v62 = vsel %vm1620_vm14, %v1826_v57, -inf }
 0x466   : > { %1831 = vmax.xlane.f32.xlu2 %v1830_v62 }
 0x46a   : > { %v2038_v61 = vpop.f32.mrf.mxu0 }
 0x46b   : > { %v2043_v63 = vmul.f32 0.17677669, %v2038_v61 }
 0x46d   : > { %v2045_v1 = vsel %vm1620_vm14, %v2043_v63, -inf }
 0x46e   : > { %2046 = vmax.xlane.f32.xlu1 %v2045_v1 }
 0x472   : > { %v2040_v5 = vpop.f32.mrf.mxu0 }
 0x473   : > { %v2044_v7 = vmul.f32 0.17677669, %v2040_v5 }
 0x475   : > { %v2048_v17 = vsel %vm1620_vm14, %v2044_v7, -inf }
 0x476   : > { %2049 = vmax.xlane.f32.xlu0 %v2048_v17 }
 0x47a   : > { %v2243_v10 = vpop.f32.mrf.mxu0 }
 0x47b   : > { %v2248_v50 = vmul.f32 0.17677669, %v2243_v10 }
 0x47d   : > { %v2250_v12 = vsel %vm1620_vm14, %v2248_v50, -inf }
 0x47e   : > { %2251 = vmax.xlane.f32.xlu2 %v2250_v12 }
 0x482   : > { %v2245_v20 = vpop.f32.mrf.mxu0 }
 0x483   : > { %v2249_v21 = vmul.f32 0.17677669, %v2245_v20 }
 0x485   : > { %v2253_v26 = vsel %vm1620_vm14, %v2249_v21, -inf }
 0x487   : > { %1909 = vrot.lane.b32.xlu1 %v9090_v19, %s8616_s25 }
 0x48a   : > { %1697 = vrot.lane.b32.xlu0 %v9090_v19, %s8617_s30 }
 0x48f   : > { %1907 = vrot.lane.b32.xlu1 %v9101_v39, %s8616_s25 }
 0x496   : > { %1695 = vrot.lane.b32.xlu2 %v9101_v39, %s8617_s30 }
 0x497   : > { %1876 = vrot.lane.b32.xlu1 %v9099_v37, %s8615_s18 }
 0x4c1   : > { %2254 = vmax.xlane.f32.xlu1 %v2253_v26 }
 0x4d1   : > { %v1829_v32 = vpop.xlane.xlu0 %1828 }
 0x4d2   : > { %v1833_v33 = vsub.f32 %v1825_v22, %v1829_v32 }
 0x4d4   : > { %v1835_v36 = vmul.f32 1.442695, %v1833_v33 }
 0x4d6   : > { %7795 = vpow2.f32 %v1835_v36 }
 0x4d9   : > { %v1832_v40 = vpop.xlane.xlu2 %1831 }
 0x4da   : > { %v1834_v19 = vsub.f32 %v1826_v57, %v1832_v40 }
 0x4dc   : > { %v9295_v11 = vpop.eup %7795  ;;  %v1837_v41 = vmul.f32 1.442695, %v1834_v19 }
 0x4dd   : > { %v1839_v43 = vsel %vm1620_vm14, %v9295_v11, 0.0 }
 0x4de   : > { %7797 = vpow2.f32 %v1837_v41  ;;  %1840 = vadd.xlane.f32.xlu2 %v1839_v43 }
 0x4e1   : > { %v2047_v27 = vpop.xlane.xlu1 %2046 }
 0x4e2   : > { %v2051_v44 = vsub.f32 %v2043_v63, %v2047_v27 }
 0x4e4   : > { %v9299_v31 = vpop.eup %7797  ;;  %v2053_v47 = vmul.f32 1.442695, %v2051_v44 }
 0x4e5   : > { %v1842_v51 = vsel %vm1620_vm14, %v9299_v31, 0.0 }
 0x4e6   : > { %7799 = vpow2.f32 %v2053_v47  ;;  %1843 = vadd.xlane.f32.xlu1 %v1842_v51 }
 0x4e9   : > { %v2050_v52 = vpop.xlane.xlu0 %2049 }
 0x4ea   : > { %v2052_v55 = vsub.f32 %v2044_v7, %v2050_v52 }
 0x4ec   : > { %v9303_v22 = vpop.eup %7799  ;;  %v2055_v53 = vmul.f32 1.442695, %v2052_v55 }
 0x4ed   : > { %v2057_v28 = vsel %vm1620_vm14, %v9303_v22, 0.0 }
 0x4ee   : > { %7801 = vpow2.f32 %v2055_v53  ;;  %2058 = vadd.xlane.f32.xlu0 %v2057_v28 }
 0x4f1   : > { %v2252_v57 = vpop.xlane.xlu2 %2251 }
 0x4f2   : > { %v2256_v62 = vsub.f32 %v2248_v50, %v2252_v57 }
 0x4f4   : > { %v9307_v61 = vpop.eup %7801  ;;  %v2258_v63 = vmul.f32 1.442695, %v2256_v62 }
 0x4f5   : > { %v2060_v1 = vsel %vm1620_vm14, %v9307_v61, 0.0 }
 0x4f6   : > { %7803 = vpow2.f32 %v2258_v63  ;;  %2061 = vadd.xlane.f32.xlu2 %v2060_v1 }
 0x4f9   : > { %v1910_v5 = vpop.permute.xlu1 %1909  ;;  %v9327_v26 = vpop.permute.xlu2 %1695 }
 0x4fa   : > { %v9319_v50 = vsel %vm1597_vm13, %v1910_v5, 0 }
 0x4fb   : > { %11116 = vst [vmem:[#allocation62_spill] sm:$0xff] %v9319_v50 }
 0x4fc   : > { %v9311_v7 = vpop.eup %7803  ;;  %v1698_v17 = vpop.permute.xlu0 %1697 }
 0x4fd   : > { %v9314_v10 = vsel %vm1597_vm13, %v1698_v17, 0  ;;  %v2262_v12 = vsel %vm1620_vm14, %v9311_v7, 0.0 }
 0x4fe   : > { %11115 = vst [vmem:[#allocation61_spill] sm:$0xff] %v9314_v10  ;;  %1712 = vmatpush.bf16.xpose.msra.mxu2 %v9314_v10  ;;  %2263 = vadd.xlane.f32.xlu0 %v2262_v12 }
 0x4ff   : > { %2121 = vrot.lane.b32.xlu1 %v9214_v38, %s8617_s30 }
 0x501   : > { %v9325_v20 = vpop.permute.xlu1 %1907 }
 0x505   : > { %6910 = vmatmul.msk.bf16.vlgmr.msra.gmra.mxu2 %vm1597_vm13, %v9327_v26 }
 0x506   : > { %1924 = vmatpush.bf16.xpose.msrb.mxu2 %v9319_v50 }
 0x509   : > { %v9331_v32 = vpop.permute.xlu1 %1876 }
 0x50a   : > { %11117 = vst [vmem:[#allocation63_spill] sm:$0xff] %v9331_v32  ;;  %1889 = vmatpush.bf16.msra.mxu1 %v9331_v32 }
 0x50e   : > { %2110 = vmatpush.bf16.msrb.mxu1 %v9110_v56  ;;  %2331 = vrot.lane.b32.xlu2 %v9214_v38, %s8616_s25 }
 0x512   : > { %2119 = vrot.lane.b32.xlu0 %v9106_v48, %s8617_s30 }
 0x515   : > { %6914 = vmatmul.msk.bf16.vlgmr.msrb.gmra.mxu2 %vm1597_vm13, %v9325_v20 }
 0x51a   : > { %2329 = vrot.lane.b32.xlu0 %v9106_v48, %s8616_s25 }
 0x522   : > { %2299 = vrot.lane.b32.xlu0 %v9110_v56, %s8615_s18 }
 0x534   : > { %v2255_v33 = vpop.xlane.xlu1 %2254 }
 0x535   : > { %v2257_v36 = vsub.f32 %v2249_v21, %v2255_v33 }
 0x537   : > { %v2260_v40 = vmul.f32 1.442695, %v2257_v36 }
 0x539   : > { %7805 = vpow2.f32 %v2260_v40 }
 0x53f   : > { %v9345_v19 = vpop.eup %7805 }
 0x540   : > { %v2265_v38 = vsel %vm1620_vm14, %v9345_v19, 0.0 }
 0x541   : > { %2266 = vadd.xlane.f32.xlu1 %v2265_v38 }
 0x551   : > { %v1841_v41 = vpop.xlane.xlu2 %1840 }
 0x552   : > { %7807 = vrcp.f32 %v1841_v41  ;;  %v1856_v28 = vand.u32 2147483648, %v1841_v41  ;;  %vm1850_vm6 = vweird.f32 %v1841_v41  ;;  %v1854_v57 = vand.u32 2147483647, %v1841_v41 }
 0x554   : > { %v1857_v12 = vor.u32 1.1754944e-38, %v1856_v28  ;;  %vm1855_vm9 = vcmp.eq.f32.partialorder %v1854_v57, 8.507059e+37 }
 0x558   : > { %v7808_v43 = vpop.eup %7807 }
 0x559   : > { %v1846_v27 = vmul.f32 %v7808_v43, %v1841_v41  ;;  %v1844_v44 = vpop.xlane.xlu1 %1843  ;;  %vm1851_vm5 = vweird.f32 %v7808_v43 }
 0x55a   : > { %7809 = vrcp.f32 %v1844_v44  ;;  %vm1852_vm7 = vmor %vm1850_vm6, %vm1851_vm5  ;;  %v1871_v63 = vand.u32 2147483648, %v1844_v44  ;;  %v1869_v17 = vand.u32 2147483647, %v1844_v44  ;;  %vm1865_vm10 = vweird.f32 %v1844_v44 }
 0x55b   : > { %v1847_v47 = vsub.f32 1.0, %v1846_v27 }
 0x55c   : > { %v1872_v38 = vor.u32 1.1754944e-38, %v1871_v63  ;;  %vm1870_vm12 = vcmp.eq.f32.partialorder %v1869_v17, 8.507059e+37 }
 0x55d   : > { %v1848_v51 = vmul.f32 %v7808_v43, %v1847_v47 }
 0x55f   : > { %v1849_v55 = vadd.f32 %v7808_v43, %v1848_v51 }
 0x560   : > { %v7810_v52 = vpop.eup %7809 }
 0x561   : > { %v1861_v21 = vmul.f32 %v7810_v52, %v1844_v44  ;;  %v2059_v53 = vpop.xlane.xlu0 %2058  ;;  %v1853_v1 = vsel %vm1852_vm7, %v7808_v43, %v1849_v55  ;;  %vm1866_vm8 = vweird.f32 %v7810_v52 }
 0x562   : > { %7811 = vrcp.f32 %v2059_v53  ;;  %v1858_v40 = vsel %vm1855_vm9, %v1857_v12, %v1853_v1  ;;  %vm1867_vm11 = vmor %vm1865_vm10, %vm1866_vm8  ;;  %vm2068_vm0 = vweird.f32 %v2059_v53  ;;  %v2072_v12 = vand.u32 2147483647, %v2059_v53 }
 0x563   : > { %v1862_v62 = vsub.f32 1.0, %v1861_v21  ;;  %v1859_v21 = vmul.f32 %v9295_v11, %v1858_v40 }
 0x564   : > { %vm2073_vm3 = vcmp.eq.f32.partialorder %v2072_v12, 8.507059e+37 }
 0x565   : > { %v1863_v5 = vmul.f32 %v7810_v52, %v1862_v62 }
 0x567   : > { %v1864_v33 = vadd.f32 %v7810_v52, %v1863_v5 }
 0x568   : > { %v7812_v36 = vpop.eup %7811 }
 0x569   : > { %v1868_v27 = vsel %vm1867_vm11, %v7810_v52, %v1864_v33  ;;  %v2064_v47 = vmul.f32 %v7812_v36, %v2059_v53  ;;  %v2062_v51 = vpop.xlane.xlu2 %2061  ;;  %vm2069_vm15 = vweird.f32 %v7812_v36  ;;  %v2074_v52 = vand.u32 2147483648, %v2059_v53 }
 0x56a   : > { %v1873_v41 = vsel %vm1870_vm12, %v1872_v38, %v1868_v27  ;;  %7813 = vrcp.f32 %v2062_v51  ;;  %vm2070_vm1 = vmor %vm2068_vm0, %vm2069_vm15  ;;  %v2087_v27 = vand.u32 2147483647, %v2062_v51  ;;  %vm2083_vm4 = vweird.f32 %v2062_v51 }
 0x56b   : > { %v1874_v43 = vmul.f32 %v9299_v31, %v1873_v41  ;;  %v2065_v55 = vsub.f32 1.0, %v2064_v47  ;;  %v2089_v31 = vand.u32 2147483648, %v2062_v51  ;;  %v2075_v47 = vor.u32 1.1754944e-38, %v2074_v52 }
 0x56c   : > { %vm2088_vm6 = vcmp.eq.f32.partialorder %v2087_v27, 8.507059e+37 }
 0x56d   : > { %v2066_v62 = vmul.f32 %v7812_v36, %v2065_v55  ;;  %v1875_v28 = vpack.c.bf16 %v1874_v43, %v1859_v21  ;;  %v2090_v53 = vor.u32 1.1754944e-38, %v2089_v31 }
 0x56f   : > { %6913 = vmatmul.msk.bf16.vlgmr.msra.gmra.mxu1 %vm1620_vm14, %v1875_v28  ;;  %v2067_v57 = vadd.f32 %v7812_v36, %v2066_v62 }
 0x570   : > { %v7814_v44 = vpop.eup %7813 }
 0x571   : > { %v2079_v1 = vmul.f32 %v7814_v44, %v2062_v51  ;;  %v2122_v63 = vpop.permute.xlu1 %2121  ;;  %v2332_v17 = vpop.permute.xlu2 %2331  ;;  %v2071_v40 = vsel %vm2070_vm1, %v7812_v36, %v2067_v57  ;;  %vm2084_vm2 = vweird.f32 %v7814_v44 }
 0x572   : > { %v9353_v5 = vsel %vm1597_vm13, %v2122_v63, 0  ;;  %v9357_v33 = vsel %vm1597_vm13, %v2332_v17, 0  ;;  %v2076_v21 = vsel %vm2073_vm3, %v2075_v47, %v2071_v40  ;;  %vm2085_vm5 = vmor %vm2083_vm4, %vm2084_vm2  ;;  %v2264_v36 = vpop.xlane.xlu0 %2263 }
 0x573   : > { %11118 = vst [vmem:[#allocation64_spill] sm:$0xff] %v9353_v5  ;;  %v2080_v11 = vsub.f32 1.0, %v2079_v1  ;;  %2136 = vmatpush.bf16.xpose.msra.mxu2 %v9353_v5  ;;  %v2077_v62 = vmul.f32 %v9303_v22, %v2076_v21  ;;  %7815 = vrcp.f32 %v2264_v36  ;;  %vm2273_vm8 = vweird.f32 %v2264_v36 }
 0x574   : > { %11119 = vst [vmem:[#allocation65_spill] sm:$0xff] %v9357_v33 }
 0x575   : > { %v2081_v38 = vmul.f32 %v7814_v44, %v2080_v11  ;;  %v9385_v11 = vsel %vm1597_vm13, %v9245_v46, 0 }
 0x577   : > { %v2082_v41 = vadd.f32 %v7814_v44, %v2081_v38 }
 0x579   : > { %v2086_v43 = vsel %vm2085_vm5, %v7814_v44, %v2082_v41  ;;  %v7816_v21 = vpop.eup %7815 }
 0x57a   : > { %v2091_v55 = vsel %vm2088_vm6, %v2090_v53, %v2086_v43  ;;  %v2269_v53 = vmul.f32 %v7816_v21, %v2264_v36  ;;  %vm2274_vm7 = vweird.f32 %v7816_v21 }
 0x57b   : > { %2346 = vmatpush.bf16.xpose.msrb.mxu2 %v9357_v33  ;;  %v2092_v28 = vmul.f32 %v9307_v61, %v2091_v55  ;;  %vm2275_vm9 = vmor %vm2273_vm8, %vm2274_vm7 }
 0x57c   : > { %v2270_v43 = vsub.f32 1.0, %v2269_v53 }
 0x57d   : > { %v2093_v57 = vpack.c.bf16 %v2092_v28, %v2077_v62 }
 0x57e   : > { %v2271_v62 = vmul.f32 %v7816_v21, %v2270_v43 }
 0x57f   : > { %6917 = vmatmul.msk.bf16.vlgmr.msrb.gmra.mxu1 %vm1620_vm14, %v2093_v57 }
 0x580   : > { %v2272_v57 = vadd.f32 %v7816_v21, %v2271_v62 }
 0x584   : > { %v9363_v1 = vpop.permute.xlu0 %2119 }
 0x585   : > { %6918 = vmatmul.msk.bf16.vlgmr.msra.gmra.mxu2 %vm1597_vm13, %v9363_v1 }
 0x586   : > { %2637 = vmatpush.bf16.msra.mxu2 %v9247_v42 }
 0x588   : > { %v1714_v51 = vpop.f32.mrf.mxu2 }
 0x589   : > { %v9368_v63 = vmul.f32 0.17677669, %v1714_v51 }
 0x58b   : > { %v1721_v44 = vsel %vm1620_vm14, %v9368_v63, -inf }
 0x58c   : > { %v9372_v22 = vpop.permute.xlu0 %2329  ;;  %1722 = vmax.xlane.f32.xlu2 %v1721_v44  ;;  %v2279_v44 = vand.u32 2147483648, %v2264_v36 }
 0x58e   : > { %v2280_v3 = vor.u32 1.1754944e-38, %v2279_v44 }
 0x590   : > { %v1716_v61 = vpop.f32.mrf.mxu2 }
 0x591   : > { %v9374_v52 = vmul.f32 0.17677669, %v1716_v61  ;;  %v2277_v61 = vand.u32 2147483647, %v2264_v36 }
 0x593   : > { %v1724_v17 = vsel %vm1620_vm14, %v9374_v52, -inf  ;;  %vm2278_vm11 = vcmp.eq.f32.partialorder %v2277_v61, 8.507059e+37 }
 0x594   : > { %v9378_v12 = vpop.permute.xlu0 %2299  ;;  %1725 = vmax.xlane.f32.xlu1 %v1724_v17 }
 0x595   : > { %11120 = vst [vmem:[#allocation66_spill] sm:$0xff] %v9378_v12  ;;  %2312 = vmatpush.bf16.msra.mxu1 %v9378_v12  ;;  %6922 = vmatmul.msk.bf16.vlgmr.msrb.gmra.mxu2 %vm1597_vm13, %v9372_v22 }
 0x598   : > { %v1926_v31 = vpop.f32.mrf.mxu2 }
 0x599   : > { %2563 = vmatpush.bf16.xpose.msrb.mxu1 %v9385_v11  ;;  %v9388_v40 = vmul.f32 0.17677669, %v1926_v31 }
 0x59b   : > { %v1933_v38 = vsel %vm1620_vm14, %v9388_v40, -inf }
 0x59c   : > { %1934 = vmax.xlane.f32.xlu0 %v1933_v38  ;;  %v2276_v38 = vsel %vm2275_vm9, %v7816_v21, %v2272_v57  ;;  %v1530_v21 = vadd.f32 %v9243_v45, %v9250_v35  ;;  %v1528_v57 = vadd.f32 %v9232_v29, %v9250_v35 }
 0x59d   : > { %v2281_v2 = vsel %vm2278_vm11, %v2280_v3, %v2276_v38 }
 0x59e   : > { %v2282_v34 = vmul.f32 %v9311_v7, %v2281_v2  ;;  %v2528_v3 = vpack.c.bf16 %v1528_v57, %v1528_v57 }
 0x5a0   : > { %v1928_v27 = vpop.f32.mrf.mxu2  ;;  %v2542_v61 = vunpack.c.l.b16 %v2528_v3 }
 0x5a1   : > { %v9392_v47 = vmul.f32 0.17677669, %v1928_v27 }
 0x5a3   : > { %v1936_v41 = vsel %vm1620_vm14, %v9392_v47, -inf }
 0x5a4   : > { %1937 = vmax.xlane.f32.xlu1 %v1936_v41 }
 0x5b4   : > { %v2267_v55 = vpop.xlane.xlu1 %2266 }
 0x5b5   : > { %7817 = vrcp.f32 %v2267_v55  ;;  %v2294_v31 = vand.u32 2147483648, %v2267_v55  ;;  %v2292_v41 = vand.u32 2147483647, %v2267_v55  ;;  %vm2288_vm12 = vweird.f32 %v2267_v55 }
 0x5b7   : > { %v2295_v43 = vor.u32 1.1754944e-38, %v2294_v31  ;;  %vm2293_vm0 = vcmp.eq.f32.partialorder %v2292_v41, 8.507059e+37 }
 0x5bb   : > { %v7818_v28 = vpop.eup %7817 }
 0x5bc   : > { %v2284_v51 = vmul.f32 %v7818_v28, %v2267_v55  ;;  %vm2289_vm10 = vweird.f32 %v7818_v28  ;;  %v2529_v55 = vpack.c.bf16 %v1530_v21, %v1530_v21 }
 0x5bd   : > { %vm2290_vm15 = vmor %vm2288_vm12, %vm2289_vm10 }
 0x5be   : > { %v2285_v17 = vsub.f32 1.0, %v2284_v51  ;;  %v2543_v44 = vunpack.c.l.b16 %v2529_v55 }
 0x5c0   : > { %v2286_v27 = vmul.f32 %v7818_v28, %v2285_v17 }
 0x5c2   : > { %v2287_v53 = vadd.f32 %v7818_v28, %v2286_v27 }
 0x5c4   : > { %v2291_v62 = vsel %vm2290_vm15, %v7818_v28, %v2287_v53  ;;  %v9403_v28 = vpack.c.b16 %v2543_v44, %v2542_v61 }
 0x5c5   : > { %v2296_v0 = vsel %vm2293_vm0, %v2295_v43, %v2291_v62 }
 0x5c6   : > { %v2297_v36 = vmul.f32 %v9345_v19, %v2296_v0  ;;  %11121 = vst [vmem:[#allocation67_spill] sm:$0xff] %v9403_v28 }
 0x5c8   : > { %v2298_v51 = vpack.c.bf16 %v2297_v36, %v2282_v34 }
 0x5ca   : > { %6921 = vmatmul.msk.bf16.vlgmr.msra.gmra.mxu1 %vm1620_vm14, %v2298_v51 }
 0x5da   : > { %6956 = vmatmul.msk.bf16.vlgmr.msrb.gmra.mxu1 %vm1597_vm13, %v9403_v28 }
 0x5ec   : > { %v9407_v2 = vpop.f32.mrf.mxu1 }
 0x5f4   : > { %v9409_v0 = vpop.f32.mrf.mxu1 }
 0x5fc   : > { %v2112_v34 = vpop.f32.mrf.mxu1 }
 0x5fd   : > { %2117 = vst.msk [vmem:[#allocation6 + $0x10] sm:$0xff] %vm1597_vm13, %v2112_v34 }
 0x5ff   : > { %v1723_v38 = vpop.xlane.xlu2 %1722 }
 0x600   : > { %v1727_v36 = vsub.f32 %v9368_v63, %v1723_v38 }
 0x602   : > { %v1729_v57 = vmul.f32 1.442695, %v1727_v36 }
 0x604   : > { %v2114_v45 = vpop.f32.mrf.mxu1 }
 0x605   : > { %2118 = vst.msk [vmem:[#allocation6 + $0x18] sm:$0xff] %vm1597_vm13, %v2114_v45 }
 0x607   : > { %v1726_v29 = vpop.xlane.xlu1 %1725 }
 0x608   : > { %v1728_v35 = vsub.f32 %v9374_v52, %v1726_v29  ;;  %v2138_v7 = vpop.f32.mrf.mxu2 }
 0x609   : > { %v2143_v19 = vmul.f32 0.17677669, %v2138_v7 }
 0x60a   : > { %v1731_v17 = vmul.f32 1.442695, %v1728_v35 }
 0x60b   : > { %v2145_v31 = vsel %vm1620_vm14, %v2143_v19, -inf }
 0x60c   : > { %7819 = vpow2.f32 %v1731_v17  ;;  %2146 = vmax.xlane.f32.xlu1 %v2145_v31 }
 0x60f   : > { %v1935_v27 = vpop.xlane.xlu0 %1934 }
 0x610   : > { %v1939_v41 = vsub.f32 %v9388_v40, %v1935_v27  ;;  %v2140_v53 = vpop.f32.mrf.mxu2 }
 0x611   : > { %v2144_v43 = vmul.f32 0.17677669, %v2140_v53 }
 0x612   : > { %v9416_v62 = vpop.eup %7819  ;;  %v1941_v51 = vmul.f32 1.442695, %v1939_v41 }
 0x613   : > { %v2148_v52 = vsel %vm1620_vm14, %v2144_v43, -inf  ;;  %v1736_v21 = vsel %vm1620_vm14, %v9416_v62, 0.0 }
 0x614   : > { %7821 = vpow2.f32 %v1941_v51  ;;  %2149 = vmax.xlane.f32.xlu1 %v2148_v52  ;;  %1737 = vadd.xlane.f32.xlu0 %v1736_v21 }
 0x615   : > { %7823 = vpow2.f32 %v1729_v57 }
 0x617   : > { %v1938_v55 = vpop.xlane.xlu1 %1937 }
 0x618   : > { %v2348_v3 = vpop.f32.mrf.mxu2  ;;  %v1940_v61 = vsub.f32 %v9392_v47, %v1938_v55 }
 0x619   : > { %v2353_v44 = vmul.f32 0.17677669, %v2348_v3 }
 0x61a   : > { %v9422_v40 = vpop.eup %7821  ;;  %v1943_v45 = vmul.f32 1.442695, %v1940_v61 }
 0x61b   : > { %v1945_v63 = vsel %vm1620_vm14, %v9422_v40, 0.0  ;;  %v2355_v34 = vsel %vm1620_vm14, %v2353_v44, -inf  ;;  %v9428_v29 = vpop.eup %7823 }
 0x61c   : > { %1946 = vadd.xlane.f32.xlu0 %v1945_v63  ;;  %2356 = vmax.xlane.f32.xlu1 %v2355_v34  ;;  %7825 = vpow2.f32 %v1943_v45  ;;  %v1733_v31 = vsel %vm1620_vm14, %v9428_v29, 0.0 }
 0x620   : > { %v2350_v35 = vpop.f32.mrf.mxu2 }
 0x621   : > { %v2354_v7 = vmul.f32 0.17677669, %v2350_v35 }
 0x622   : > { %v9433_v47 = vpop.eup %7825 }
 0x623   : > { %v2358_v17 = vsel %vm1620_vm14, %v2354_v7, -inf  ;;  %v1948_v38 = vsel %vm1620_vm14, %v9433_v47, 0.0 }
 0x624   : > { %2359 = vmax.xlane.f32.xlu2 %v2358_v17  ;;  %1734 = vadd.xlane.f32.xlu1 %v1733_v31 }
 0x62c   : > { %1949 = vadd.xlane.f32.xlu2 %v1948_v38 }
 0x63d   : > { %1770 = vrot.lane.b32.xlu1 %v9099_v37, %s8617_s30 }
 0x647   : > { %v9439_v27 = vpop.f32.mrf.mxu1 }
 0x64f   : > { %v9441_v41 = vpop.f32.mrf.mxu1 }
 0x657   : > { %v2565_v53 = vpop.f32.mrf.mxu1 }
 0x658   : > { %v9443_v36 = vmul.f32 0.17677669, %v2565_v53 }
 0x65a   : > { %v2572_v51 = vsel %vm1620_vm14, %v9443_v36, -inf }
 0x65b   : > { %2573 = vmax.xlane.f32.xlu2 %v2572_v51 }
 0x65f   : > { %v2567_v52 = vpop.f32.mrf.mxu1 }
 0x660   : > { %v9447_v21 = vmul.f32 0.17677669, %v2567_v52 }
 0x662   : > { %v2575_v57 = vsel %vm1620_vm14, %v9447_v21, -inf }
 0x667   : > { %2576 = vmax.xlane.f32.xlu1 %v2575_v57 }
 0x67f   : > { %v2147_v55 = vpop.xlane.xlu1 %2146 }
 0x680   : > { %v2151_v3 = vsub.f32 %v2143_v19, %v2147_v55  ;;  %2194 = vrot.lane.b32.xlu1 %v9110_v56, %s8617_s30 }
 0x682   : > { %v2153_v61 = vmul.f32 1.442695, %v2151_v3 }
 0x684   : > { %7827 = vpow2.f32 %v2153_v61 }
 0x687   : > { %v2150_v63 = vpop.xlane.xlu1 %2149  ;;  %v1738_v31 = vpop.xlane.xlu0 %1737 }
 0x688   : > { %2404 = vrot.lane.b32.xlu1 %v9110_v56, %s8616_s25  ;;  %v2152_v34 = vsub.f32 %v2144_v43, %v2150_v63  ;;  %v1765_v23 = vand.u32 2147483648, %v1738_v31  ;;  %vm1759_vm5 = vweird.f32 %v1738_v31  ;;  %v1763_v59 = vand.u32 2147483647, %v1738_v31 }
 0x68a   : > { %v9455_v45 = vpop.eup %7827  ;;  %v2155_v35 = vmul.f32 1.442695, %v2152_v34  ;;  %vm1764_vm8 = vcmp.eq.f32.partialorder %v1763_v59, 8.507059e+37 }
 0x68b   : > { %v2157_v17 = vsel %vm1620_vm14, %v9455_v45, 0.0 }
 0x68c   : > { %2158 = vadd.xlane.f32.xlu0 %v2157_v17  ;;  %7829 = vpow2.f32 %v2155_v35 }
 0x68d   : > { %7831 = vrcp.f32 %v1738_v31 }
 0x68f   : > { %v2357_v19 = vpop.xlane.xlu1 %2356 }
 0x690   : > { %2646 = vrot.lane.b32.xlu1 %v9403_v28, %s8617_s30  ;;  %v2361_v38 = vsub.f32 %v2353_v44, %v2357_v19 }
 0x692   : > { %v9461_v53 = vpop.eup %7829  ;;  %v2363_v51 = vmul.f32 1.442695, %v2361_v38 }
 0x693   : > { %v2160_v43 = vsel %vm1620_vm14, %v9461_v53, 0.0  ;;  %v7832_v52 = vpop.eup %7831 }
 0x694   : > { %7833 = vpow2.f32 %v2363_v51  ;;  %2161 = vadd.xlane.f32.xlu2 %v2160_v43  ;;  %v1755_v3 = vmul.f32 %v7832_v52, %v1738_v31  ;;  %vm1760_vm2 = vweird.f32 %v7832_v52 }
 0x695   : > { %vm1761_vm6 = vmor %vm1759_vm5, %vm1760_vm2 }
 0x696   : > { %v1756_v35 = vsub.f32 1.0, %v1755_v3 }
 0x697   : > { %v1735_v57 = vpop.xlane.xlu1 %1734  ;;  %v2360_v55 = vpop.xlane.xlu2 %2359 }
 0x698   : > { %7835 = vrcp.f32 %v1735_v57  ;;  %2753 = vrot.lane.b32.xlu1 %v9245_v46, %s8615_s18  ;;  %v2362_v61 = vsub.f32 %v2354_v7, %v2360_v55  ;;  %v1757_v38 = vmul.f32 %v7832_v52, %v1756_v35  ;;  %v1750_v55 = vand.u32 2147483648, %v1735_v57 }
 0x699   : > { %vm1744_vm3 = vweird.f32 %v1735_v57 }
 0x69a   : > { %v9467_v63 = vpop.eup %7833  ;;  %v2365_v44 = vmul.f32 1.442695, %v2362_v61  ;;  %v1758_v61 = vadd.f32 %v7832_v52, %v1757_v38 }
 0x69b   : > { %v2367_v34 = vsel %vm1620_vm14, %v9467_v63, 0.0 }
 0x69c   : > { %7837 = vpow2.f32 %v2365_v44  ;;  %2368 = vadd.xlane.f32.xlu2 %v2367_v34  ;;  %v1748_v34 = vand.u32 2147483647, %v1735_v57  ;;  %v1762_v15 = vsel %vm1761_vm6, %v7832_v52, %v1758_v61 }
 0x69e   : > { %v7836_v17 = vpop.eup %7835  ;;  %vm1749_vm7 = vcmp.eq.f32.partialorder %v1748_v34, 8.507059e+37 }
 0x69f   : > { %v1740_v19 = vmul.f32 %v7836_v17, %v1735_v57  ;;  %vm1745_vm1 = vweird.f32 %v7836_v17  ;;  %v1950_v31 = vpop.xlane.xlu2 %1949 }
 0x6a0   : > { %1982 = vrot.lane.b32.xlu0 %v9099_v37, %s8616_s25  ;;  %2751 = vrot.lane.b32.xlu1 %v9403_v28, %s8615_s18  ;;  %vm1746_vm4 = vmor %vm1744_vm3, %vm1745_vm1  ;;  %vm1971_vm11 = vweird.f32 %v1950_v31 }
 0x6a1   : > { %v1741_v51 = vsub.f32 1.0, %v1740_v19  ;;  %v1751_v19 = vor.u32 1.1754944e-38, %v1750_v55 }
 0x6a2   : > { %v9475_v7 = vpop.eup %7837 }
 0x6a3   : > { %v1742_v43 = vmul.f32 %v7836_v17, %v1741_v51  ;;  %v2370_v3 = vsel %vm1620_vm14, %v9475_v7, 0.0  ;;  %v1766_v51 = vor.u32 1.1754944e-38, %v1765_v23 }
 0x6a4   : > { %2371 = vadd.xlane.f32.xlu2 %v2370_v3 }
 0x6a5   : > { %v1743_v44 = vadd.f32 %v7836_v17, %v1742_v43  ;;  %v1767_v58 = vsel %vm1764_vm8, %v1766_v51, %v1762_v15 }
 0x6a6   : > { %v1768_v57 = vmul.f32 %v9416_v62, %v1767_v58 }
 0x6a7   : > { %v1747_v35 = vsel %vm1746_vm4, %v7836_v17, %v1743_v44 }
 0x6a8   : > { %v1752_v16 = vsel %vm1749_vm7, %v1751_v19, %v1747_v35 }
 0x6a9   : > { %v1753_v13 = vmul.f32 %v9428_v29, %v1752_v16  ;;  %v1947_v29 = vpop.xlane.xlu0 %1946 }
 0x6aa   : > { %vm1956_vm15 = vweird.f32 %v1947_v29 }
 0x6ab   : > { %v1769_v43 = vpack.c.bf16 %v1768_v57, %v1753_v13 }
 0x6af   : > { %v9480_v38 = vpop.permute.xlu1 %1770 }
 0x6b0   : > { %11122 = vst [vmem:[#allocation68_spill] sm:$0xff] %v9480_v38  ;;  %1783 = vmatpush.bf16.msrb.mxu3 %v9480_v38 }
 0x6b3   : > { %6911 = vmatmul.msk.bf16.vlgmr.msrb.gmra.mxu3 %vm1620_vm14, %v1769_v43 }
 0x6ce   : > { %v2574_v17 = vpop.xlane.xlu2 %2573 }
 0x6cf   : > { %v2578_v52 = vsub.f32 %v9443_v36, %v2574_v17 }
 0x6d1   : > { %v2580_v55 = vmul.f32 1.442695, %v2578_v52 }
 0x6d3   : > { %7839 = vpow2.f32 %v2580_v55  ;;  %v1977_v55 = vand.u32 2147483648, %v1950_v31 }
 0x6d5   : > { %v1978_v14 = vor.u32 1.1754944e-38, %v1977_v55 }
 0x6d9   : > { %v9486_v23 = vpop.eup %7839 }
 0x6da   : > { %v2577_v15 = vpop.xlane.xlu1 %2576  ;;  %v2584_v16 = vsel %vm1620_vm14, %v9486_v23, 0.0 }
 0x6db   : > { %v2579_v59 = vsub.f32 %v9447_v21, %v2577_v15  ;;  %2585 = vadd.xlane.f32.xlu2 %v2584_v16  ;;  %v1975_v16 = vand.u32 2147483647, %v1950_v31 }
 0x6dd   : > { %v2582_v58 = vmul.f32 1.442695, %v2579_v59  ;;  %vm1976_vm1 = vcmp.eq.f32.partialorder %v1975_v16, 8.507059e+37 }
 0x6df   : > { %7841 = vpow2.f32 %v2582_v58 }
 0x6e0   : > { %7843 = vrcp.f32 %v1950_v31 }
 0x6e1   : > { %7845 = vrcp.f32 %v1947_v29 }
 0x6e5   : > { %v9491_v13 = vpop.eup %7841 }
 0x6e6   : > { %v2587_v62 = vsel %vm1620_vm14, %v9491_v13, 0.0  ;;  %v7844_v3 = vpop.eup %7843 }
 0x6e7   : > { %2588 = vadd.xlane.f32.xlu0 %v2587_v62  ;;  %v7846_v61 = vpop.eup %7845  ;;  %v1967_v21 = vmul.f32 %v7844_v3, %v1950_v31  ;;  %vm1972_vm9 = vweird.f32 %v7844_v3  ;;  %v1962_v62 = vand.u32 2147483648, %v1947_v29 }
 0x6e8   : > { %v1952_v34 = vmul.f32 %v7846_v61, %v1947_v29  ;;  %vm1957_vm10 = vweird.f32 %v7846_v61  ;;  %vm1973_vm12 = vmor %vm1971_vm11, %vm1972_vm9 }
 0x6e9   : > { %v1968_v35 = vsub.f32 1.0, %v1967_v21  ;;  %v1960_v21 = vand.u32 2147483647, %v1947_v29  ;;  %vm1958_vm0 = vmor %vm1956_vm15, %vm1957_vm10  ;;  %v1963_v31 = vor.u32 1.1754944e-38, %v1962_v62 }
 0x6ea   : > { %v1953_v19 = vsub.f32 1.0, %v1952_v34 }
 0x6eb   : > { %v1969_v57 = vmul.f32 %v7844_v3, %v1968_v35  ;;  %vm1961_vm2 = vcmp.eq.f32.partialorder %v1960_v21, 8.507059e+37 }
 0x6ec   : > { %v1954_v17 = vmul.f32 %v7846_v61, %v1953_v19 }
 0x6ed   : > { %v1970_v52 = vadd.f32 %v7844_v3, %v1969_v57 }
 0x6ee   : > { %v1955_v15 = vadd.f32 %v7846_v61, %v1954_v17 }
 0x6ef   : > { %v1974_v34 = vsel %vm1973_vm12, %v7844_v3, %v1970_v52 }
 0x6f0   : > { %v1959_v57 = vsel %vm1958_vm0, %v7846_v61, %v1955_v15  ;;  %v1979_v8 = vsel %vm1976_vm1, %v1978_v14, %v1974_v34 }
 0x6f1   : > { %v1964_v56 = vsel %vm1961_vm2, %v1963_v31, %v1959_v57  ;;  %v1980_v29 = vmul.f32 %v9433_v47, %v1979_v8 }
 0x6f2   : > { %v9495_v36 = vpop.permute.xlu1 %2194  ;;  %v1965_v55 = vmul.f32 %v9422_v40, %v1964_v56 }
 0x6f3   : > { %11123 = vst [vmem:[#allocation69_spill] sm:$0xff] %v9495_v36  ;;  %2648 = vrot.lane.b32.xlu2 %v9245_v46, %s8617_s30 }
 0x6f4   : > { %v1981_v16 = vpack.c.bf16 %v1980_v29, %v1965_v55 }
 0x6fa   : > { %v9499_v44 = vpop.permute.xlu1 %2404 }
 0x6fb   : > { %11124 = vst [vmem:[#allocation70_spill] sm:$0xff] %v9499_v44 }
 0x6ff   : > { %v9501_v51 = vpop.xlane.xlu0 %2158 }
 0x700   : > { %7847 = vrcp.f32 %v9501_v51  ;;  %v2174_v34 = vand.u32 2147483648, %v9501_v51  ;;  %vm2168_vm7 = vweird.f32 %v9501_v51  ;;  %v2172_v57 = vand.u32 2147483647, %v9501_v51 }
 0x702   : > { %v9503_v43 = vpop.permute.xlu1 %2646  ;;  %vm2173_vm10 = vcmp.eq.f32.partialorder %v2172_v57, 8.507059e+37 }
 0x703   : > { %11125 = vst [vmem:[#allocation71_spill] sm:$0xff] %v9503_v43 }
 0x706   : > { %v7848_v58 = vpop.eup %7847 }
 0x707   : > { %v2162_v59 = vpop.xlane.xlu2 %2161  ;;  %v2164_v17 = vmul.f32 %v7848_v58, %v9501_v51  ;;  %vm2169_vm4 = vweird.f32 %v7848_v58 }
 0x708   : > { %7849 = vrcp.f32 %v2162_v59  ;;  %v2189_v8 = vand.u32 2147483648, %v2162_v59  ;;  %vm2183_vm5 = vweird.f32 %v2162_v59  ;;  %v2187_v40 = vand.u32 2147483647, %v2162_v59  ;;  %vm2170_vm8 = vmor %vm2168_vm7, %vm2169_vm4 }
 0x709   : > { %v2165_v3 = vsub.f32 1.0, %v2164_v17 }
 0x70a   : > { %v2754_v35 = vpop.permute.xlu1 %2753  ;;  %v2190_v31 = vor.u32 1.1754944e-38, %v2189_v8  ;;  %vm2188_vm9 = vcmp.eq.f32.partialorder %v2187_v40, 8.507059e+37 }
 0x70b   : > { %v9507_v19 = vsel %vm1597_vm13, %v2754_v35, 0  ;;  %v2166_v15 = vmul.f32 %v7848_v58, %v2165_v3 }
 0x70c   : > { %2768 = vmatpush.bf16.xpose.msrb.mxu2 %v9507_v19 }
 0x70d   : > { %v2167_v56 = vadd.f32 %v7848_v58, %v2166_v15 }
 0x70e   : > { %v7850_v12 = vpop.eup %7849 }
 0x70f   : > { %v2179_v52 = vmul.f32 %v7850_v12, %v2162_v59  ;;  %v9512_v60 = vpop.xlane.xlu2 %2368  ;;  %vm2184_vm3 = vweird.f32 %v7850_v12  ;;  %v2171_v29 = vsel %vm2170_vm8, %v7848_v58, %v2167_v56 }
 0x710   : > { %7851 = vrcp.f32 %v9512_v60  ;;  %vm2185_vm6 = vmor %vm2183_vm5, %vm2184_vm3  ;;  %vm2378_vm1 = vweird.f32 %v9512_v60 }
 0x711   : > { %v2180_v35 = vsub.f32 1.0, %v2179_v52  ;;  %v2175_v52 = vor.u32 1.1754944e-38, %v2174_v34  ;;  %v2384_v34 = vand.u32 2147483648, %v9512_v60 }
 0x712   : > { %v9515_v61 = vpop.permute.xlu0 %1982 }
 0x713   : > { %11126 = vst [vmem:[#allocation72_spill] sm:$0xff] %v9515_v61  ;;  %1995 = vmatpush.bf16.msra.mxu3 %v9515_v61  ;;  %v2181_v14 = vmul.f32 %v7850_v12, %v2180_v35  ;;  %v2176_v35 = vsel %vm2173_vm10, %v2175_v52, %v2171_v29  ;;  %v2385_v57 = vor.u32 1.1754944e-38, %v2384_v34 }
 0x715   : > { %v2182_v62 = vadd.f32 %v7850_v12, %v2181_v14 }
 0x716   : > { %6915 = vmatmul.msk.bf16.vlgmr.msra.gmra.mxu3 %vm1620_vm14, %v1981_v16  ;;  %v7852_v21 = vpop.eup %7851 }
 0x717   : > { %2207 = vmatpush.bf16.msrb.mxu3 %v9495_v36  ;;  %v2372_v47 = vpop.xlane.xlu2 %2371  ;;  %v2186_v17 = vsel %vm2185_vm6, %v7850_v12, %v2182_v62  ;;  %v2374_v3 = vmul.f32 %v7852_v21, %v9512_v60  ;;  %vm2379_vm12 = vweird.f32 %v7852_v21 }
 0x718   : > { %7853 = vrcp.f32 %v2372_v47  ;;  %v2191_v55 = vsel %vm2188_vm9, %v2190_v31, %v2186_v17  ;;  %v2399_v58 = vand.u32 2147483648, %v2372_v47  ;;  %vm2393_vm15 = vweird.f32 %v2372_v47  ;;  %vm2380_vm2 = vmor %vm2378_vm1, %vm2379_vm12 }
 0x719   : > { %v2192_v15 = vmul.f32 %v9461_v53, %v2191_v55  ;;  %v2375_v14 = vsub.f32 1.0, %v2374_v3  ;;  %v2397_v40 = vand.u32 2147483647, %v2372_v47 }
 0x71b   : > { %2417 = vmatpush.bf16.msra.mxu3 %v9499_v44  ;;  %v2177_v44 = vmul.f32 %v9455_v45, %v2176_v35  ;;  %v2376_v51 = vmul.f32 %v7852_v21, %v2375_v14  ;;  %v2382_v45 = vand.u32 2147483647, %v9512_v60  ;;  %vm2398_vm3 = vcmp.eq.f32.partialorder %v2397_v40, 8.507059e+37 }
 0x71d   : > { %v2193_v62 = vpack.c.bf16 %v2192_v15, %v2177_v44  ;;  %v2377_v56 = vadd.f32 %v7852_v21, %v2376_v51  ;;  %vm2383_vm4 = vcmp.eq.f32.partialorder %v2382_v45, 8.507059e+37 }
 0x71e   : > { %v7854_v59 = vpop.eup %7853 }
 0x71f   : > { %v2389_v16 = vmul.f32 %v7854_v59, %v2372_v47  ;;  %vm2394_vm11 = vweird.f32 %v7854_v59  ;;  %v2381_v44 = vsel %vm2380_vm2, %v7852_v21, %v2377_v56 }
 0x720   : > { %vm2395_vm0 = vmor %vm2393_vm15, %vm2394_vm11  ;;  %v2386_v31 = vsel %vm2383_vm4, %v2385_v57, %v2381_v44 }
 0x721   : > { %v2390_v33 = vsub.f32 1.0, %v2389_v16  ;;  %v2387_v47 = vmul.f32 %v9467_v63, %v2386_v31 }
 0x723   : > { %v2391_v12 = vmul.f32 %v7854_v59, %v2390_v33  ;;  %v2400_v33 = vor.u32 1.1754944e-38, %v2399_v58 }
 0x725   : > { %v2392_v8 = vadd.f32 %v7854_v59, %v2391_v12 }
 0x726   : > { %6919 = vmatmul.msk.bf16.vlgmr.msrb.gmra.mxu3 %vm1620_vm14, %v2193_v62 }
 0x727   : > { %v2396_v53 = vsel %vm2395_vm0, %v7854_v59, %v2392_v8 }
 0x728   : > { %v2401_v17 = vsel %vm2398_vm3, %v2400_v33, %v2396_v53 }
 0x729   : > { %v2402_v29 = vmul.f32 %v9475_v7, %v2401_v17 }
 0x72b   : > { %v2403_v3 = vpack.c.bf16 %v2402_v29, %v2387_v47  ;;  %v9544_v47 = vpop.permute.xlu1 %2751 }
 0x72c   : > { %11127 = vst [vmem:[#allocation73_spill] sm:$0xff] %v9544_v47 }
 0x736   : > { %6923 = vmatmul.msk.bf16.vlgmr.msra.gmra.mxu3 %vm1620_vm14, %v2403_v3  ;;  %v9548_v3 = vpop.f32.mrf.mxu3 }
 0x74e   : > { %v2586_v52 = vpop.xlane.xlu2 %2585 }
 0x74f   : > { %7855 = vrcp.f32 %v2586_v52  ;;  %v2601_v51 = vand.u32 2147483648, %v2586_v52  ;;  %vm2595_vm6 = vweird.f32 %v2586_v52  ;;  %v2599_v12 = vand.u32 2147483647, %v2586_v52 }
 0x751   : > { %v2602_v34 = vor.u32 1.1754944e-38, %v2601_v51  ;;  %vm2600_vm9 = vcmp.eq.f32.partialorder %v2599_v12, 8.507059e+37 }
 0x755   : > { %v7856_v55 = vpop.eup %7855 }
 0x756   : > { %v2591_v60 = vmul.f32 %v7856_v55, %v2586_v52  ;;  %v2649_v59 = vpop.permute.xlu2 %2648  ;;  %vm2596_vm5 = vweird.f32 %v7856_v55  ;;  %v9550_v52 = vpop.f32.mrf.mxu3 }
 0x757   : > { %v9536_v35 = vsel %vm1597_vm13, %v2649_v59, 0  ;;  %vm2597_vm7 = vmor %vm2595_vm6, %vm2596_vm5 }
 0x758   : > { %2663 = vmatpush.bf16.xpose.msrb.mxu3 %v9536_v35  ;;  %v2592_v21 = vsub.f32 1.0, %v2591_v60 }
 0x75a   : > { %v2589_v15 = vpop.xlane.xlu0 %2588  ;;  %v2593_v14 = vmul.f32 %v7856_v55, %v2592_v21 }
 0x75b   : > { %7857 = vrcp.f32 %v2589_v15  ;;  %v2616_v8 = vand.u32 2147483648, %v2589_v15  ;;  %v2614_v40 = vand.u32 2147483647, %v2589_v15  ;;  %vm2610_vm10 = vweird.f32 %v2589_v15 }
 0x75c   : > { %v2594_v7 = vadd.f32 %v7856_v55, %v2593_v14 }
 0x75d   : > { %v2617_v33 = vor.u32 1.1754944e-38, %v2616_v8  ;;  %vm2615_vm12 = vcmp.eq.f32.partialorder %v2614_v40, 8.507059e+37 }
 0x75e   : > { %v2598_v58 = vsel %vm2597_vm7, %v7856_v55, %v2594_v7 }
 0x75f   : > { %6958 = vmatmul.msk.bf16.vlgmr.msrb.gmra.mxu3 %vm1597_vm13, %v9503_v43  ;;  %v2603_v53 = vsel %vm2600_vm9, %v2602_v34, %v2598_v58 }
 0x760   : > { %v2604_v17 = vmul.f32 %v9486_v23, %v2603_v53 }
 0x761   : > { %v7858_v63 = vpop.eup %7857 }
 0x762   : > { %v2606_v16 = vmul.f32 %v7858_v63, %v2589_v15  ;;  %vm2611_vm8 = vweird.f32 %v7858_v63 }
 0x763   : > { %vm2612_vm11 = vmor %vm2610_vm10, %vm2611_vm8 }
 0x764   : > { %v2607_v62 = vsub.f32 1.0, %v2606_v16 }
 0x766   : > { %v2608_v56 = vmul.f32 %v7858_v63, %v2607_v62 }
 0x768   : > { %v2609_v45 = vadd.f32 %v7858_v63, %v2608_v56 }
 0x76a   : > { %v2613_v44 = vsel %vm2612_vm11, %v7858_v63, %v2609_v45 }
 0x76b   : > { %v2618_v57 = vsel %vm2615_vm12, %v2617_v33, %v2613_v44 }
 0x76c   : > { %v2619_v31 = vmul.f32 %v9491_v13, %v2618_v57 }
 0x76e   : > { %v2620_v29 = vpack.c.bf16 %v2619_v31, %v2604_v17 }
 0x770   : > { %6957 = vmatmul.msk.bf16.vlgmr.msra.gmra.mxu2 %vm1620_vm14, %v2620_v29 }
 0x780   : > { %6960 = vmatmul.msk.bf16.vlgmr.msrb.gmra.mxu2 %vm1597_vm13, %v9544_v47 }
 0x799   : > { %v9552_v55 = vpop.f32.mrf.mxu3 }
 0x7a1   : > { %v9554_v60 = vpop.f32.mrf.mxu3 }
 0x7a9   : > { %v9556_v59 = vpop.f32.mrf.mxu3 }
 0x7b1   : > { %v9558_v23 = vpop.f32.mrf.mxu3 }
 0x7b9   : > { %v9560_v13 = vpop.f32.mrf.mxu3 }
 0x7c1   : > { %v9562_v21 = vpop.f32.mrf.mxu3 }
 0x7e2   : > { %v2665_v15 = vpop.f32.mrf.mxu3 }
 0x7e3   : > { %v2670_v14 = vmul.f32 0.17677669, %v2665_v15 }
 0x7e5   : > { %v2672_v63 = vsel %vm1620_vm14, %v2670_v14, -inf }
 0x7e6   : > { %2673 = vmax.xlane.f32.xlu2 %v2672_v63 }
 0x7ea   : > { %v2667_v7 = vpop.f32.mrf.mxu3 }
 0x7eb   : > { %v2671_v16 = vmul.f32 0.17677669, %v2667_v7 }
 0x7ed   : > { %v2675_v51 = vsel %vm1620_vm14, %v2671_v16, -inf }
 0x7ee   : > { %2676 = vmax.xlane.f32.xlu1 %v2675_v51 }
 0x7f3   : > { %v9587_v17 = vpop.f32.mrf.mxu2 }
 0x7fb   : > { %v9589_v31 = vpop.f32.mrf.mxu2 }
 0x7fe   : > { %2858 = vrot.lane.b32.xlu2 %v9245_v46, %s8616_s25 }
 0x803   : > { %v2770_v29 = vpop.f32.mrf.mxu2 }
 0x804   : > { %v2775_v15 = vmul.f32 0.17677669, %v2770_v29 }
 0x807   : > { %2721 = vrot.lane.b32.xlu1 %v9247_v42, %s8617_s30 }
 0x80b   : > { %v2772_v63 = vpop.f32.mrf.mxu2 }
 0x80c   : > { %v2776_v7 = vmul.f32 0.17677669, %v2772_v63 }
 0x80f   : > { %2856 = vrot.lane.b32.xlu1 %v9403_v28, %s8616_s25 }
 0x817   : > { %3174 = vrot.lane.b32.xlu1 %v9258_v54, %s8615_s18 }
 0x81f   : > { %3277 = vrot.lane.b32.xlu1 %v9262_v30, %s8616_s25 }
 0x859   : > { %v2674_v12 = vpop.xlane.xlu2 %2673 }
 0x85a   : > { %v2678_v62 = vsub.f32 %v2670_v14, %v2674_v12  ;;  %v2777_v14 = vsel %vm1620_vm14, %v2775_v15, -inf }
 0x85c   : > { %v2680_v8 = vmul.f32 1.442695, %v2678_v62 }
 0x85e   : > { %7859 = vpow2.f32 %v2680_v8 }
 0x861   : > { %v2677_v58 = vpop.xlane.xlu1 %2676  ;;  %v2859_v33 = vpop.permute.xlu2 %2858 }
 0x862   : > { %v2679_v56 = vsub.f32 %v2671_v16, %v2677_v58  ;;  %v9581_v57 = vsel %vm1597_vm13, %v2859_v33, 0  ;;  %v2780_v16 = vsel %vm1620_vm14, %v2776_v7, -inf }
 0x864   : > { %v7860_v40 = vpop.eup %7859  ;;  %v2682_v46 = vmul.f32 1.442695, %v2679_v56 }
 0x865   : > { %v2684_v34 = vsel %vm1620_vm14, %v7860_v40, 0.0 }
 0x866   : > { %7861 = vpow2.f32 %v2682_v46  ;;  %2685 = vadd.xlane.f32.xlu0 %v2684_v34 }
 0x86c   : > { %v7862_v45 = vpop.eup %7861 }
 0x86d   : > { %v2687_v53 = vsel %vm1620_vm14, %v7862_v45, 0.0 }
 0x86e   : > { %2688 = vadd.xlane.f32.xlu0 %v2687_v53 }
 0x879   : > { %v9578_v44 = vpop.permute.xlu1 %2721 }
 0x87a   : > { %2734 = vmatpush.bf16.msra.mxu1 %v9578_v44 }
 0x87e   : > { %2873 = vmatpush.bf16.xpose.msrb.mxu1 %v9581_v57 }
 0x882   : > { %2826 = vrot.lane.b32.xlu0 %v9247_v42, %s8615_s18 }
 0x8ac   : > { %2778 = vmax.xlane.f32.xlu0 %v2777_v14 }
 0x8b4   : > { %2781 = vmax.xlane.f32.xlu0 %v2780_v16 }
 0x8c8   : > { %3069 = vrot.lane.b32.xlu0 %v9258_v54, %s8617_s30 }
 0x8d9   : > { %v2686_v51 = vpop.xlane.xlu0 %2685 }
 0x8da   : > { %7863 = vrcp.f32 %v2686_v51  ;;  %v2701_v33 = vand.u32 2147483648, %v2686_v51  ;;  %vm2695_vm0 = vweird.f32 %v2686_v51  ;;  %v2699_v29 = vand.u32 2147483647, %v2686_v51 }
 0x8dc   : > { %v2702_v47 = vor.u32 1.1754944e-38, %v2701_v33  ;;  %vm2700_vm3 = vcmp.eq.f32.partialorder %v2699_v29, 8.507059e+37 }
 0x8e0   : > { %v7864_v12 = vpop.eup %7863 }
 0x8e1   : > { %v2691_v62 = vmul.f32 %v7864_v12, %v2686_v51  ;;  %v2689_v8 = vpop.xlane.xlu0 %2688  ;;  %vm2696_vm15 = vweird.f32 %v7864_v12 }
 0x8e2   : > { %7865 = vrcp.f32 %v2689_v8  ;;  %vm2697_vm1 = vmor %vm2695_vm0, %vm2696_vm15  ;;  %v2716_v63 = vand.u32 2147483648, %v2689_v8  ;;  %v2714_v36 = vand.u32 2147483647, %v2689_v8  ;;  %vm2710_vm4 = vweird.f32 %v2689_v8 }
 0x8e3   : > { %v2692_v58 = vsub.f32 1.0, %v2691_v62 }
 0x8e4   : > { %vm2715_vm6 = vcmp.eq.f32.partialorder %v2714_v36, 8.507059e+37 }
 0x8e5   : > { %v2693_v56 = vmul.f32 %v7864_v12, %v2692_v58  ;;  %v2717_v58 = vor.u32 1.1754944e-38, %v2716_v63 }
 0x8e7   : > { %v2694_v34 = vadd.f32 %v7864_v12, %v2693_v56 }
 0x8e8   : > { %v7866_v46 = vpop.eup %7865 }
 0x8e9   : > { %v2706_v53 = vmul.f32 %v7866_v46, %v2689_v8  ;;  %v2698_v16 = vsel %vm2697_vm1, %v7864_v12, %v2694_v34  ;;  %vm2711_vm2 = vweird.f32 %v7866_v46  ;;  %v9600_v12 = vsel %vm1597_vm13, %v9258_v54, 0 }
 0x8ea   : > { %v2703_v62 = vsel %vm2700_vm3, %v2702_v47, %v2698_v16  ;;  %vm2712_vm5 = vmor %vm2710_vm4, %vm2711_vm2  ;;  %vm1798_vm1 = vcmask 523520   ;;  %vm1904_vm2 = vcmask 785920   ;;  %vm2010_vm3 = vcmask 1048320  }
 0x8eb   : > { %v2707_v14 = vsub.f32 1.0, %v2706_v53  ;;  %v2704_v43 = vmul.f32 %v7860_v40, %v2703_v62 }
 0x8ed   : > { %v2708_v5 = vmul.f32 %v7866_v46, %v2707_v14 }
 0x8ef   : > { %v2709_v61 = vadd.f32 %v7866_v46, %v2708_v5  ;;  %v9604_v5 = vpop.permute.xlu1 %2856 }
 0x8f0   : > { %11128 = vst [vmem:[#allocation74_spill] sm:$0xff] %v9604_v5 }
 0x8f1   : > { %v2713_v56 = vsel %vm2712_vm5, %v7866_v46, %v2709_v61 }
 0x8f2   : > { %v2718_v6 = vsel %vm2715_vm6, %v2717_v58, %v2713_v56 }
 0x8f3   : > { %v2719_v32 = vmul.f32 %v7862_v45, %v2718_v6 }
 0x8f4   : > { %v9595_v51 = vpop.permute.xlu0 %2826 }
 0x8f5   : > { %2839 = vmatpush.bf16.msra.mxu3 %v9595_v51  ;;  %v2720_v34 = vpack.c.bf16 %v2719_v32, %v2704_v43 }
 0x8f7   : > { %6959 = vmatmul.msk.bf16.vlgmr.msra.gmra.mxu1 %vm1620_vm14, %v2720_v34 }
 0x8f9   : > { %2984 = vmatpush.bf16.xpose.msrb.mxu3 %v9600_v12 }
 0x907   : > { %6962 = vmatmul.msk.bf16.vlgmr.msrb.gmra.mxu1 %vm1597_vm13, %v9604_v5 }
 0x91f   : > { %v2779_v36 = vpop.xlane.xlu0 %2778 }
 0x920   : > { %v2783_v6 = vsub.f32 %v2775_v15, %v2779_v36 }
 0x922   : > { %v2785_v61 = vmul.f32 1.442695, %v2783_v6 }
 0x924   : > { %7867 = vpow2.f32 %v2785_v61 }
 0x927   : > { %v2782_v47 = vpop.xlane.xlu0 %2781 }
 0x928   : > { %v2784_v40 = vsub.f32 %v2776_v7, %v2782_v47 }
 0x92a   : > { %v7868_v45 = vpop.eup %7867  ;;  %v2787_v8 = vmul.f32 1.442695, %v2784_v40 }
 0x92b   : > { %v2789_v46 = vsel %vm1620_vm14, %v7868_v45, 0.0 }
 0x92c   : > { %7869 = vpow2.f32 %v2787_v8  ;;  %2790 = vadd.xlane.f32.xlu2 %v2789_v46 }
 0x932   : > { %v7870_v32 = vpop.eup %7869 }
 0x933   : > { %v2792_v43 = vsel %vm1620_vm14, %v7870_v32, 0.0 }
 0x934   : > { %2793 = vadd.xlane.f32.xlu0 %v2792_v43 }
 0x93a   : > { %v3070_v53 = vpop.permute.xlu0 %3069 }
 0x93b   : > { %v9611_v33 = vsel %vm1597_vm13, %v3070_v53, 0 }
 0x93c   : > { %3084 = vmatpush.bf16.xpose.msra.mxu1 %v9611_v33 }
 0x944   : > { %3067 = vrot.lane.b32.xlu2 %v9262_v30, %s8617_s30 }
 0x948   : > { %3279 = vrot.lane.b32.xlu0 %v9258_v54, %s8616_s25 }
 0x94c   : > { %3172 = vrot.lane.b32.xlu2 %v9262_v30, %s8615_s18 }
 0x974   : > { %v9620_v15 = vpop.f32.mrf.mxu1 }
 0x97c   : > { %v9622_v7 = vpop.f32.mrf.mxu1 }
 0x984   : > { %v2875_v29 = vpop.f32.mrf.mxu1 }
 0x985   : > { %v9624_v14 = vmul.f32 0.17677669, %v2875_v29 }
 0x987   : > { %v2882_v63 = vsel %vm1620_vm14, %v9624_v14, -inf }
 0x988   : > { %2883 = vmax.xlane.f32.xlu0 %v2882_v63 }
 0x98c   : > { %v2877_v16 = vpop.f32.mrf.mxu1 }
 0x98d   : > { %v9628_v62 = vmul.f32 0.17677669, %v2877_v16 }
 0x98f   : > { %v2885_v54 = vsel %vm1620_vm14, %v9628_v62, -inf }
 0x990   : > { %2886 = vmax.xlane.f32.xlu2 %v2885_v54 }
 0x99f   : > { %v2791_v58 = vpop.xlane.xlu2 %2790 }
 0x9a0   : > { %7871 = vrcp.f32 %v2791_v58  ;;  %v2806_v43 = vand.u32 2147483648, %v2791_v58  ;;  %vm2800_vm8 = vweird.f32 %v2791_v58  ;;  %v2804_v53 = vand.u32 2147483647, %v2791_v58 }
 0x9a2   : > { %v2807_v10 = vor.u32 1.1754944e-38, %v2806_v43  ;;  %vm2805_vm11 = vcmp.eq.f32.partialorder %v2804_v53, 8.507059e+37 }
 0x9a6   : > { %v7872_v56 = vpop.eup %7871 }
 0x9a7   : > { %v2796_v34 = vmul.f32 %v7872_v56, %v2791_v58  ;;  %v9632_v36 = vpop.permute.xlu2 %3067  ;;  %v2794_v6 = vpop.xlane.xlu0 %2793  ;;  %vm2801_vm7 = vweird.f32 %v7872_v56 }
 0x9a8   : > { %11129 = vst [vmem:[#allocation75_spill] sm:$0xff] %v9632_v36  ;;  %7873 = vrcp.f32 %v2794_v6  ;;  %6966 = vmatmul.msk.bf16.vlgmr.msra.gmra.mxu1 %vm1597_vm13, %v9632_v36  ;;  %vm2802_vm9 = vmor %vm2800_vm8, %vm2801_vm7  ;;  %v2821_v63 = vand.u32 2147483648, %v2794_v6  ;;  %v2819_v5 = vand.u32 2147483647, %v2794_v6  ;;  %vm2815_vm12 = vweird.f32 %v2794_v6  ;;  %v3175_v36 = vpop.permute.xlu1 %3174 }
 0x9a9   : > { %v2797_v61 = vsub.f32 1.0, %v2796_v34 }
 0x9aa   : > { %vm2820_vm0 = vcmp.eq.f32.partialorder %v2819_v5, 8.507059e+37 }
 0x9ab   : > { %v2798_v47 = vmul.f32 %v7872_v56, %v2797_v61  ;;  %v2822_v61 = vor.u32 1.1754944e-38, %v2821_v63 }
 0x9ad   : > { %v2799_v8 = vadd.f32 %v7872_v56, %v2798_v47 }
 0x9ae   : > { %v7874_v40 = vpop.eup %7873 }
 0x9af   : > { %v2811_v46 = vmul.f32 %v7874_v40, %v2794_v6  ;;  %v2803_v16 = vsel %vm2802_vm9, %v7872_v56, %v2799_v8  ;;  %vm2816_vm10 = vweird.f32 %v7874_v40  ;;  %v9641_v8 = vsel %vm1597_vm13, %v3175_v36, 0 }
 0x9b0   : > { %v2808_v34 = vsel %vm2805_vm11, %v2807_v10, %v2803_v16  ;;  %vm2817_vm15 = vmor %vm2815_vm12, %vm2816_vm10  ;;  %v9645_v10 = vpop.permute.xlu1 %3277 }
 0x9b1   : > { %v2812_v29 = vsub.f32 1.0, %v2811_v46  ;;  %v2809_v38 = vmul.f32 %v7868_v45, %v2808_v34 }
 0x9b3   : > { %v2813_v54 = vmul.f32 %v7874_v40, %v2812_v29 }
 0x9b5   : > { %v2814_v50 = vadd.f32 %v7874_v40, %v2813_v54 }
 0x9b7   : > { %v2818_v47 = vsel %vm2817_vm15, %v7874_v40, %v2814_v50  ;;  %v9651_v50 = vpop.permute.xlu2 %3172 }
 0x9b8   : > { %v2823_v28 = vsel %vm2820_vm0, %v2822_v61, %v2818_v47 }
 0x9b9   : > { %v2824_v58 = vmul.f32 %v7870_v32, %v2823_v28 }
 0x9ba   : > { %v3280_v46 = vpop.permute.xlu0 %3279 }
 0x9bb   : > { %v9637_v25 = vsel %vm1597_vm13, %v3280_v46, 0  ;;  %v2825_v56 = vpack.c.bf16 %v2824_v58, %v2809_v38 }
 0x9bc   : > { %3294 = vmatpush.bf16.xpose.msrb.mxu1 %v9637_v25 }
 0x9bd   : > { %6961 = vmatmul.msk.bf16.vlgmr.msra.gmra.mxu3 %vm1620_vm14, %v2825_v56 }
 0x9be   : > { %3189 = vmatpush.bf16.xpose.msra.mxu3 %v9641_v8 }
 0x9c3   : > { %6970 = vmatmul.msk.bf16.vlgmr.msrb.gmra.mxu1 %vm1597_vm13, %v9645_v10 }
 0x9cd   : > { %6964 = vmatmul.msk.bf16.vlgmr.msrb.gmra.mxu3 %vm1597_vm13, %v9262_v30 }
 0x9dd   : > { %6968 = vmatmul.msk.bf16.vlgmr.msra.gmra.mxu3 %vm1597_vm13, %v9651_v50 }
 0xa03   : > { %v2887_v16 = vpop.xlane.xlu2 %2886 }
 0xa04   : > { %v2889_v54 = vsub.f32 %v9628_v62, %v2887_v16 }
 0xa06   : > { %v2892_v34 = vmul.f32 1.442695, %v2889_v54 }
 0xa08   : > { %7875 = vpow2.f32 %v2892_v34 }
 0xa25   : > { %v3086_v28 = vpop.f32.mrf.mxu1 }
 0xa26   : > { %v3091_v38 = vmul.f32 0.17677669, %v3086_v28 }
 0xa28   : > { %v3093_v5 = vsel %vm1620_vm14, %v3091_v38, -inf }
 0xa29   : > { %3094 = vmax.xlane.f32.xlu1 %v3093_v5 }
 0xa2d   : > { %v3088_v45 = vpop.f32.mrf.mxu1 }
 0xa2e   : > { %v3092_v32 = vmul.f32 0.17677669, %v3088_v45 }
 0xa30   : > { %v3096_v36 = vsel %vm1620_vm14, %v3092_v32, -inf }
 0xa31   : > { %3097 = vmax.xlane.f32.xlu2 %v3096_v36 }
 0xa40   : > { %v3296_v6 = vpop.f32.mrf.mxu1 }
 0xa41   : > { %v3301_v40 = vmul.f32 0.17677669, %v3296_v6 }
 0xa42   : > { %1794 = vrot.lane.b32.xlu1 %v9550_v52, %s8616_s25  ;;  %v9671_v52 = vpop.eup %7875 }
 0xa43   : > { %v3303_v43 = vsel %vm1620_vm14, %v3301_v40, -inf  ;;  %v2897_v61 = vsel %vm1620_vm14, %v9671_v52, 0.0 }
 0xa44   : > { %3304 = vmax.xlane.f32.xlu2 %v3303_v43 }
 0xa48   : > { %v3298_v53 = vpop.f32.mrf.mxu1 }
 0xa49   : > { %v9660_v29 = vmul.f32 0.17677669, %v3298_v53 }
 0xa4b   : > { %v3306_v63 = vsel %vm1620_vm14, %v9660_v29, -inf }
 0xa4c   : > { %3307 = vmax.xlane.f32.xlu0 %v3306_v63 }
 0xa5c   : > { %1898 = vrot.lane.b32.xlu2 %v9407_v2, %s8615_s18  ;;  %v9681_v2 = vpop.f32.mrf.mxu3 }
 0xa60   : > { %1792 = vrot.lane.b32.xlu0 %v9548_v3, %s8616_s25  ;;  %v2884_v3 = vpop.xlane.xlu0 %2883 }
 0xa64   : > { %2004 = vrot.lane.b32.xlu2 %v9552_v55, %s8617_s30  ;;  %v2888_v55 = vsub.f32 %v9624_v14, %v2884_v3 }
 0xa66   : > { %v2890_v62 = vmul.f32 1.442695, %v2888_v55 }
 0xa68   : > { %1900 = vrot.lane.b32.xlu0 %v9409_v0, %s8615_s18  ;;  %v9688_v0 = vpop.f32.mrf.mxu3  ;;  %7877 = vpow2.f32 %v2890_v62 }
 0xa6c   : > { %2898 = vadd.xlane.f32.xlu1 %v2897_v61  ;;  %2006 = vrot.lane.b32.xlu2 %v9554_v60, %s8617_s30 }
 0xa6e   : > { %v9690_v47 = vpop.eup %7877 }
 0xa70   : > { %v2986_v60 = vpop.f32.mrf.mxu3 }
 0xa74   : > { %2216 = vrot.lane.b32.xlu2 %v9556_v59, %s8616_s25  ;;  %v2894_v59 = vsel %vm1620_vm14, %v9690_v47, 0.0 }
 0xa78   : > { %v2988_v58 = vpop.f32.mrf.mxu3 }
 0xa7c   : > { %2218 = vrot.lane.b32.xlu2 %v9558_v23, %s8616_s25 }
 0xa80   : > { %v3191_v28 = vpop.f32.mrf.mxu3 }
 0xa81   : > { %v9713_v3 = vmul.f32 0.17677669, %v3191_v28 }
 0xa84   : > { %2321 = vrot.lane.b32.xlu2 %v9439_v27, %s8615_s18 }
 0xa88   : > { %v3193_v6 = vpop.f32.mrf.mxu3 }
 0xa92   : > { %2895 = vadd.xlane.f32.xlu0 %v2894_v59 }
 0xa9c   : > { %v3095_v46 = vpop.xlane.xlu1 %3094 }
 0xa9d   : > { %v3099_v23 = vsub.f32 %v3091_v38, %v3095_v46  ;;  %v9702_v38 = vmul.f32 0.17677669, %v3193_v6 }
 0xa9f   : > { %v3101_v56 = vmul.f32 1.442695, %v3099_v23  ;;  %v3201_v63 = vsel %vm1620_vm14, %v9702_v38, -inf }
 0xaa1   : > { %7879 = vpow2.f32 %v3101_v56 }
 0xaa4   : > { %v3098_v14 = vpop.xlane.xlu2 %3097 }
 0xaa5   : > { %v3100_v5 = vsub.f32 %v3092_v32, %v3098_v14  ;;  %v9706_v32 = vmul.f32 0.17677669, %v2988_v58  ;;  %v3198_v58 = vsel %vm1620_vm14, %v9713_v3, -inf  ;;  %v9724_v14 = vmul.f32 0.17677669, %v2986_v60 }
 0xaa6   : > { %2323 = vrot.lane.b32.xlu0 %v9441_v41, %s8615_s18 }
 0xaa7   : > { %v3103_v27 = vmul.f32 1.442695, %v3100_v5  ;;  %v9696_v45 = vpop.eup %7879  ;;  %v2996_v34 = vsel %vm1620_vm14, %v9706_v32, -inf }
 0xaa8   : > { %v3105_v36 = vsel %vm1620_vm14, %v9696_v45, 0.0 }
 0xaa9   : > { %7881 = vpow2.f32 %v3103_v27  ;;  %v2993_v27 = vsel %vm1620_vm14, %v9724_v14, -inf }
 0xaad   : > { %3106 = vadd.xlane.f32.xlu2 %v3105_v36 }
 0xaaf   : > { %v9700_v43 = vpop.eup %7881 }
 0xab0   : > { %v3108_v53 = vsel %vm1620_vm14, %v9700_v43, 0.0 }
 0xab1   : > { %3109 = vadd.xlane.f32.xlu1 %v3108_v53 }
 0xab4   : > { %v1795_v41 = vpop.permute.xlu1 %1794 }
 0xab5   : > { %1800 = vst.msk [vmem:[#allocation6 + $0x8] sm:$0xff] %vm1798_vm1, %v1795_v41  ;;  %3202 = vmax.xlane.f32.xlu2 %v3201_v63 }
 0xab7   : > { %v3305_v16 = vpop.xlane.xlu2 %3304 }
 0xab8   : > { %v3309_v54 = vsub.f32 %v3301_v40, %v3305_v16 }
 0xab9   : > { %2997 = vmax.xlane.f32.xlu1 %v2996_v34 }
 0xaba   : > { %v3311_v61 = vmul.f32 1.442695, %v3309_v54 }
 0xabc   : > { %7883 = vpow2.f32 %v3311_v61 }
 0xabf   : > { %v1899_v55 = vpop.permute.xlu2 %1898  ;;  %v3308_v62 = vpop.xlane.xlu0 %3307 }
 0xac0   : > { %v3310_v59 = vsub.f32 %v9660_v29, %v3308_v62 }
 0xac1   : > { %3199 = vmax.xlane.f32.xlu1 %v3198_v58 }
 0xac2   : > { %v9718_v46 = vpop.eup %7883  ;;  %v3313_v23 = vmul.f32 1.442695, %v3310_v59 }
 0xac3   : > { %v3315_v40 = vsel %vm1620_vm14, %v9718_v46, 0.0 }
 0xac4   : > { %7885 = vpow2.f32 %v3313_v23  ;;  %3316 = vadd.xlane.f32.xlu2 %v3315_v40 }
 0xac7   : > { %v2005_v56 = vpop.permute.xlu2 %2004 }
 0xaca   : > { %v9722_v28 = vpop.eup %7885 }
 0xacb   : > { %v3318_v29 = vsel %vm1620_vm14, %v9722_v28, 0.0 }
 0xacc   : > { %3319 = vadd.xlane.f32.xlu2 %v3318_v29 }
 0xacf   : > { %v2007_v5 = vpop.permute.xlu2 %2006 }
 0xad0   : > { %2994 = vmax.xlane.f32.xlu0 %v2993_v27 }
 0xad2   : > { %v1793_v36 = vpop.permute.xlu0 %1792 }
 0xad3   : > { %1799 = vst.msk [vmem:[#allocation6] sm:$0xff] %vm1798_vm1, %v1793_v36 }
 0xad4   : > { %1905 = vst.msk [vmem:[#allocation6] sm:$0xff] %vm1904_vm2, %v1899_v55 }
 0xad5   : > { %2011 = vst.msk [vmem:[#allocation6] sm:$0xff] %vm2010_vm3, %v2005_v56 }
 0xad7   : > { %v2217_v60 = vpop.permute.xlu2 %2216 }
 0xad8   : > { %2222 = vst.msk [vmem:[#allocation6 + $0x10] sm:$0xff] %vm1798_vm1, %v2217_v60 }
 0xada   : > { %2426 = vrot.lane.b32.xlu1 %v9560_v13, %s8617_s30  ;;  %v1901_v6 = vpop.permute.xlu0 %1900 }
 0xadb   : > { %1906 = vst.msk [vmem:[#allocation6 + $0x8] sm:$0xff] %vm1904_vm2, %v1901_v6 }
 0xadc   : > { %2012 = vst.msk [vmem:[#allocation6 + $0x8] sm:$0xff] %vm2010_vm3, %v2007_v5  ;;  %v2434_v53 = vld [vmem:[#allocation6] sm:$0xff] }
 0xadd   : > { %2644 = vst.msk [vmem:[#allocation6] sm:$0xff] %vm1597_vm13, %v9587_v17 }
 0xadf   : > { %v2219_v41 = vpop.permute.xlu2 %2218 }
 0xae0   : > { %2223 = vst.msk [vmem:[#allocation6 + $0x18] sm:$0xff] %vm1798_vm1, %v2219_v41 }
 0xae3   : > { %v2435_v63 = vld [vmem:[#allocation6 + $0x8] sm:$0xff] }
 0xae4   : > { %2428 = vrot.lane.b32.xlu0 %v9562_v21, %s8617_s30  ;;  %3142 = vrot.lane.b32.xlu2 %v9274_v49, %s8617_s30  ;;  %v2454_v13 = vpack.c.bf16 %v2435_v63, %v2434_v53  ;;  %2645 = vst.msk [vmem:[#allocation6 + $0x8] sm:$0xff] %vm1597_vm13, %v9589_v31  ;;  %v9759_v31 = vpop.xlane.xlu1 %2898 }
 0xae6   : > { %2513 = vmatmul.bf16.vlgmr.msra.gmra.mxu0 %v2454_v13 }
 0xae7   : > { %v2322_v16 = vpop.permute.xlu2 %2321 }
 0xae8   : > { %2327 = vst.msk [vmem:[#allocation6 + $0x10] sm:$0xff] %vm1904_vm2, %v2322_v16 }
 0xaec   : > { %2931 = vrot.lane.b32.xlu0 %v9247_v42, %s8616_s25  ;;  %3352 = vrot.lane.b32.xlu2 %v9274_v49, %s8616_s25 }
 0xaf4   : > { %2745 = vrot.lane.b32.xlu2 %v9622_v7, %s8616_s25 }
 0xafc   : > { %2848 = vrot.lane.b32.xlu2 %v9681_v2, %s8615_s18 }
 0xb05   : > { %v9756_v21 = vpop.xlane.xlu0 %2895 }
 0xb06   : > { %vm2905_vm0 = vweird.f32 %v9756_v21 }
 0xb18   : > { %v2324_v17 = vpop.permute.xlu0 %2323 }
 0xb19   : > { %2328 = vst.msk [vmem:[#allocation6 + $0x18] sm:$0xff] %vm1904_vm2, %v2324_v17 }
 0xb20   : > { %v3107_v54 = vpop.xlane.xlu2 %3106 }
 0xb21   : > { %7887 = vrcp.f32 %v3107_v54  ;;  %v3122_v29 = vand.u32 2147483648, %v3107_v54  ;;  %vm3116_vm5 = vweird.f32 %v3107_v54  ;;  %v3120_v27 = vand.u32 2147483647, %v3107_v54 }
 0xb23   : > { %v3123_v13 = vor.u32 1.1754944e-38, %v3122_v29  ;;  %vm3121_vm9 = vcmp.eq.f32.partialorder %v3120_v27, 8.507059e+37 }
 0xb24   : > { %v3110_v34 = vpop.xlane.xlu1 %3109 }
 0xb25   : > { %7889 = vrcp.f32 %v3110_v34  ;;  %v3137_v36 = vand.u32 2147483648, %v3110_v34  ;;  %v3135_v53 = vand.u32 2147483647, %v3110_v34  ;;  %vm3131_vm8 = vweird.f32 %v3110_v34 }
 0xb27   : > { %v7888_v61 = vpop.eup %7887  ;;  %vm3136_vm11 = vcmp.eq.f32.partialorder %v3135_v53, 8.507059e+37 }
 0xb28   : > { %v3112_v55 = vmul.f32 %v7888_v61, %v3107_v54  ;;  %vm3117_vm4 = vweird.f32 %v7888_v61  ;;  %v3203_v2 = vpop.xlane.xlu2 %3202 }
 0xb29   : > { %vm3118_vm6 = vmor %vm3116_vm5, %vm3117_vm4  ;;  %v3205_v41 = vsub.f32 %v9702_v38, %v3203_v2  ;;  %vm2920_vm5 = vweird.f32 %v9759_v31 }
 0xb2a   : > { %v3113_v62 = vsub.f32 1.0, %v3112_v55 }
 0xb2b   : > { %v7890_v59 = vpop.eup %7889  ;;  %v3208_v54 = vmul.f32 1.442695, %v3205_v41 }
 0xb2c   : > { %v3114_v58 = vmul.f32 %v7888_v61, %v3113_v62  ;;  %v3127_v7 = vmul.f32 %v7890_v59, %v3110_v34  ;;  %v2998_v23 = vpop.xlane.xlu1 %2997  ;;  %vm3132_vm7 = vweird.f32 %v7890_v59 }
 0xb2d   : > { %v3000_v40 = vsub.f32 %v9706_v32, %v2998_v23  ;;  %vm3133_vm10 = vmor %vm3131_vm8, %vm3132_vm7  ;;  %v3138_v32 = vor.u32 1.1754944e-38, %v3137_v36 }
 0xb2e   : > { %v3115_v56 = vadd.f32 %v7888_v61, %v3114_v58  ;;  %v3128_v5 = vsub.f32 1.0, %v3127_v7 }
 0xb2f   : > { %v3003_v60 = vmul.f32 1.442695, %v3000_v40 }
 0xb30   : > { %v3129_v6 = vmul.f32 %v7890_v59, %v3128_v5  ;;  %v3119_v63 = vsel %vm3118_vm6, %v7888_v61, %v3115_v56 }
 0xb31   : > { %7891 = vpow2.f32 %v3003_v60  ;;  %v3124_v17 = vsel %vm3121_vm9, %v3123_v13, %v3119_v63 }
 0xb32   : > { %v3130_v16 = vadd.f32 %v7890_v59, %v3129_v6  ;;  %v9769_v38 = vmul.f32 %v9696_v45, %v3124_v17  ;;  %7893 = vpow2.f32 %v3208_v54 }
 0xb33   : > { %7895 = vrcp.f32 %v9756_v21 }
 0xb34   : > { %v3134_v55 = vsel %vm3133_vm10, %v7890_v59, %v3130_v16  ;;  %7897 = vrcp.f32 %v9759_v31  ;;  %v3200_v40 = vpop.xlane.xlu1 %3199 }
 0xb35   : > { %v3139_v62 = vsel %vm3136_vm11, %v3138_v32, %v3134_v55  ;;  %v3204_v36 = vsub.f32 %v9713_v3, %v3200_v40  ;;  %v2909_v40 = vand.u32 2147483647, %v9756_v21 }
 0xb36   : > { %v9764_v58 = vmul.f32 %v9700_v43, %v3139_v62  ;;  %v2911_v62 = vand.u32 2147483648, %v9756_v21 }
 0xb37   : > { %v9766_v7 = vpop.eup %7891  ;;  %v9771_v61 = vpop.xlane.xlu2 %3316  ;;  %v3206_v63 = vmul.f32 1.442695, %v3204_v36  ;;  %vm2910_vm7 = vcmp.eq.f32.partialorder %v2909_v40, 8.507059e+37 }
 0xb38   : > { %v3008_v34 = vsel %vm1620_vm14, %v9766_v7, 0.0  ;;  %v3141_v59 = vpack.c.bf16 %v9764_v58, %v9769_v38  ;;  %v9778_v23 = vpop.eup %7893  ;;  %v3330_v58 = vand.u32 2147483647, %v9771_v61 }
 0xb39   : > { %3009 = vadd.xlane.f32.xlu1 %v3008_v34  ;;  %v3213_v45 = vsel %vm1620_vm14, %v9778_v23, 0.0  ;;  %v7896_v2 = vpop.eup %7895 }
 0xb3a   : > { %v7898_v5 = vpop.eup %7897  ;;  %v2901_v27 = vmul.f32 %v7896_v2, %v9756_v21  ;;  %vm2906_vm12 = vweird.f32 %v7896_v2 }
 0xb3b   : > { %v2916_v53 = vmul.f32 %v7898_v5, %v9759_v31  ;;  %vm2921_vm15 = vweird.f32 %v7898_v5  ;;  %vm9804_vm4 = vmor %vm2905_vm0, %vm2906_vm12 }
 0xb3c   : > { %v2902_v41 = vsub.f32 1.0, %v2901_v27  ;;  %v2924_v27 = vand.u32 2147483647, %v9759_v31  ;;  %vm2922_vm6 = vmor %vm2920_vm5, %vm2921_vm15  ;;  %vm3326_vm15 = vweird.f32 %v9771_v61  ;;  %vm3331_vm5 = vcmp.eq.f32.partialorder %v3330_v58, 8.507059e+37 }
 0xb3d   : > { %v2917_v13 = vsub.f32 1.0, %v2916_v53  ;;  %v2912_v53 = vor.u32 1.1754944e-38, %v2911_v62 }
 0xb3e   : > { %vm2925_vm8 = vcmp.eq.f32.partialorder %v2924_v27, 8.507059e+37 }
 0xb3f   : > { %v9781_v43 = vpop.xlane.xlu2 %3319  ;;  %v2918_v55 = vmul.f32 %v7898_v5, %v2917_v13 }
 0xb40   : > { %vm3341_vm11 = vweird.f32 %v9781_v43 }
 0xb41   : > { %3214 = vadd.xlane.f32.xlu1 %v3213_v45  ;;  %v2919_v45 = vadd.f32 %v7898_v5, %v2918_v55 }
 0xb43   : > { %v2995_v56 = vpop.xlane.xlu0 %2994 }
 0xb44   : > { %v2999_v29 = vsub.f32 %v9724_v14, %v2995_v56  ;;  %v2903_v14 = vmul.f32 %v7896_v2, %v2902_v41  ;;  %v2926_v56 = vand.u32 2147483648, %v9759_v31 }
 0xb46   : > { %v3001_v60 = vmul.f32 1.442695, %v2999_v29  ;;  %v2904_v54 = vadd.f32 %v7896_v2, %v2903_v14  ;;  %v2927_v13 = vor.u32 1.1754944e-38, %v2926_v56 }
 0xb47   : > { %v9788_v6 = vpop.permute.xlu2 %3142 }
 0xb48   : > { %7899 = vpow2.f32 %v3001_v60  ;;  %v2908_v36 = vsel %vm9804_vm4, %v7896_v2, %v2904_v54 }
 0xb49   : > { %7901 = vpow2.f32 %v3206_v63  ;;  %v2923_v63 = vsel %vm2922_vm6, %v7898_v5, %v2919_v45 }
 0xb4a   : > { %v2928_v31 = vsel %vm2925_vm8, %v2927_v13, %v2923_v63  ;;  %7903 = vrcp.f32 %v9781_v43  ;;  %v3347_v13 = vand.u32 2147483648, %v9781_v43 }
 0xb4b   : > { %v2929_v14 = vmul.f32 %v9671_v52, %v2928_v31  ;;  %7905 = vrcp.f32 %v9771_v61  ;;  %v3345_v31 = vand.u32 2147483647, %v9781_v43 }
 0xb4c   : > { %v2427_v16 = vpop.permute.xlu1 %2426 }
 0xb4d   : > { %2432 = vst.msk [vmem:[#allocation6 + $0x10] sm:$0xff] %vm2010_vm3, %v2427_v16  ;;  %v2913_v16 = vsel %vm2910_vm7, %v2912_v53, %v2908_v36  ;;  %vm3346_vm4 = vcmp.eq.f32.partialorder %v3345_v31, 8.507059e+37 }
 0xb4e   : > { %v9792_v32 = vpop.eup %7899  ;;  %v2914_v2 = vmul.f32 %v9690_v47, %v2913_v16 }
 0xb4f   : > { %v9794_v17 = vpop.permute.xlu2 %3352  ;;  %v3005_v3 = vsel %vm1620_vm14, %v9792_v32, 0.0  ;;  %v9799_v34 = vpop.eup %7901 }
 0xb50   : > { %3006 = vadd.xlane.f32.xlu0 %v3005_v3  ;;  %v3210_v21 = vsel %vm1620_vm14, %v9799_v34, 0.0  ;;  %v2930_v62 = vpack.c.bf16 %v2929_v14, %v2914_v2  ;;  %v7904_v47 = vpop.eup %7903  ;;  %v3332_v2 = vand.u32 2147483648, %v9771_v61 }
 0xb51   : > { %v7906_v40 = vpop.eup %7905  ;;  %v3337_v56 = vmul.f32 %v7904_v47, %v9781_v43  ;;  %vm3342_vm9 = vweird.f32 %v7904_v47 }
 0xb52   : > { %v3322_v29 = vmul.f32 %v7906_v40, %v9771_v61  ;;  %vm3327_vm10 = vweird.f32 %v7906_v40  ;;  %vm3343_vm12 = vmor %vm3341_vm11, %vm3342_vm9 }
 0xb53   : > { %v3338_v27 = vsub.f32 1.0, %v3337_v56  ;;  %vm3328_vm0 = vmor %vm3326_vm15, %vm3327_vm10 }
 0xb54   : > { %v2436_v5 = vld [vmem:[#allocation6 + $0x10] sm:$0xff] }
 0xb56   : > { %v2429_v60 = vpop.permute.xlu0 %2428 }
 0xb57   : > { %2433 = vst.msk [vmem:[#allocation6 + $0x18] sm:$0xff] %vm2010_vm3, %v2429_v60  ;;  %v2746_v41 = vpop.permute.xlu2 %2745  ;;  %v3323_v60 = vsub.f32 1.0, %v3322_v29 }
 0xb58   : > { %2750 = vst.msk [vmem:[#allocation6 + $0x8] sm:$0xff] %vm1798_vm1, %v2746_v41  ;;  %3211 = vadd.xlane.f32.xlu0 %v3210_v21  ;;  %v3339_v41 = vmul.f32 %v7904_v47, %v3338_v27 }
 0xb59   : > { %v3324_v21 = vmul.f32 %v7906_v40, %v3323_v60 }
 0xb5a   : > { %2743 = vrot.lane.b32.xlu1 %v9620_v15, %s8616_s25  ;;  %v9827_v15 = vperm.slane %v8944_v4, 0  ;;  %v3340_v63 = vadd.f32 %v7904_v47, %v3339_v41 }
 0xb5b   : > { %v3325_v16 = vadd.f32 %v7906_v40, %v3324_v21 }
 0xb5c   : > { %v3344_v38 = vsel %vm3343_vm12, %v7904_v47, %v3340_v63 }
 0xb5d   : > { %v3329_v14 = vsel %vm3328_vm0, %v7906_v40, %v3325_v16 }
 0xb5e   : > { %v9821_v3 = vpop.permute.xlu0 %2931  ;;  %v2437_v55 = vld [vmem:[#allocation6 + $0x18] sm:$0xff] }
 0xb5f   : > { %2944 = vmatpush.bf16.msra.mxu2 %v9821_v3  ;;  %v2455_v54 = vpack.c.bf16 %v2437_v55, %v2436_v5  ;;  %v3333_v5 = vor.u32 1.1754944e-38, %v3332_v2  ;;  %v2849_v16 = vpop.permute.xlu2 %2848 }
 0xb61   : > { %2518 = vmatmul.bf16.gmra.mxu0 %v2455_v54  ;;  %v3334_v54 = vsel %vm3331_vm5, %v3333_v5, %v3329_v14 }
 0xb62   : > { %6963 = vmatmul.msk.bf16.vlgmr.msra.gmra.mxu2 %vm1620_vm14, %v2930_v62 }
 0xb63   : > { %3155 = vmatpush.bf16.msrb.mxu2 %v9788_v6  ;;  %v2514_v52 = vpop.f32.mrf.mxu0 }
 0xb64   : > { %v2515_v45 = vadd.f32 %v2514_v52, %v9827_v15 }
 0xb66   : > { %2524 = vst [vmem:[#allocation4] sm:$0xff] %v2515_v45 }
 0xb67   : > { %3365 = vmatpush.bf16.msra.mxu2 %v9794_v17 }
 0xb6b   : > { %v2516_v36 = vpop.f32.mrf.mxu0 }
 0xb6c   : > { %v2517_v53 = vadd.f32 %v2516_v36, %v9827_v15  ;;  %3247 = vrot.lane.b32.xlu0 %v9274_v49, %s8615_s18 }
 0xb6e   : > { %2525 = vst [vmem:[#allocation4 + $0x8] sm:$0xff] %v2517_v53 }
 0xb72   : > { %6967 = vmatmul.msk.bf16.vlgmr.msrb.gmra.mxu2 %vm1620_vm14, %v3141_v59  ;;  %v3348_v59 = vor.u32 1.1754944e-38, %v3347_v13 }
 0xb74   : > { %2850 = vrot.lane.b32.xlu0 %v9688_v0, %s8615_s18  ;;  %v3349_v55 = vsel %vm3346_vm4, %v3348_v59, %v3344_v38  ;;  %v3335_v0 = vmul.f32 %v9718_v46, %v3334_v54 }
 0xb75   : > { %v3350_v43 = vmul.f32 %v9722_v28, %v3349_v55 }
 0xb77   : > { %v3351_v62 = vpack.c.bf16 %v3350_v43, %v3335_v0 }
 0xb82   : > { %6971 = vmatmul.msk.bf16.vlgmr.msra.gmra.mxu2 %vm1620_vm14, %v3351_v62 }
 0xbac   : > { %v3010_v52 = vpop.xlane.xlu1 %3009 }
 0xbad   : > { %7907 = vrcp.f32 %v3010_v52  ;;  %vm3031_vm7 = vweird.f32 %v3010_v52  ;;  %v3037_v53 = vand.u32 2147483648, %v3010_v52  ;;  %v3035_v21 = vand.u32 2147483647, %v3010_v52 }
 0xbaf   : > { %v3038_v14 = vor.u32 1.1754944e-38, %v3037_v53  ;;  %vm3036_vm10 = vcmp.eq.f32.partialorder %v3035_v21, 8.507059e+37 }
 0xbb3   : > { %v7908_v45 = vpop.eup %7907 }
 0xbb4   : > { %v3027_v61 = vmul.f32 %v7908_v45, %v3010_v52  ;;  %v9852_v56 = vpop.xlane.xlu1 %3214  ;;  %vm3032_vm6 = vweird.f32 %v7908_v45 }
 0xbb5   : > { %vm9857_vm8 = vmor %vm3031_vm7, %vm3032_vm6  ;;  %vm3236_vm7 = vweird.f32 %v9852_v56 }
 0xbb6   : > { %v3028_v47 = vsub.f32 1.0, %v3027_v61 }
 0xbb8   : > { %v3029_v29 = vmul.f32 %v7908_v45, %v3028_v47 }
 0xbba   : > { %v3030_v36 = vadd.f32 %v7908_v45, %v3029_v29 }
 0xbbc   : > { %v3034_v31 = vsel %vm9857_vm8, %v7908_v45, %v3030_v36 }
 0xbbd   : > { %v3039_v54 = vsel %vm3036_vm10, %v3038_v14, %v3034_v31 }
 0xbbe   : > { %v3040_v61 = vmul.f32 %v9766_v7, %v3039_v54  ;;  %v3242_v7 = vand.u32 2147483648, %v9852_v56 }
 0xbc3   : > { %v3007_v40 = vpop.xlane.xlu0 %3006 }
 0xbc4   : > { %7909 = vrcp.f32 %v3007_v40  ;;  %v3022_v2 = vand.u32 2147483648, %v3007_v40  ;;  %v3020_v59 = vand.u32 2147483647, %v3007_v40  ;;  %vm3016_vm11 = vweird.f32 %v3007_v40 }
 0xbc5   : > { %7911 = vrcp.f32 %v9852_v56 }
 0xbc6   : > { %v3023_v43 = vor.u32 1.1754944e-38, %v3022_v2  ;;  %vm3021_vm15 = vcmp.eq.f32.partialorder %v3020_v59, 8.507059e+37 }
 0xbca   : > { %v7910_v27 = vpop.eup %7909 }
 0xbcb   : > { %v3012_v28 = vmul.f32 %v7910_v27, %v3007_v40  ;;  %v3212_v46 = vpop.xlane.xlu0 %3211  ;;  %v9855_v60 = vpop.eup %7911  ;;  %vm3017_vm9 = vweird.f32 %v7910_v27 }
 0xbcc   : > { %7913 = vrcp.f32 %v3212_v46  ;;  %v2744_v13 = vpop.permute.xlu1 %2743  ;;  %v3232_v58 = vmul.f32 %v9855_v60, %v9852_v56  ;;  %vm3018_vm12 = vmor %vm3016_vm11, %vm3017_vm9  ;;  %v3227_v40 = vand.u32 2147483648, %v3212_v46  ;;  %vm3237_vm4 = vweird.f32 %v9855_v60 }
 0xbcd   : > { %v3013_v63 = vsub.f32 1.0, %v3012_v28  ;;  %2749 = vst.msk [vmem:[#allocation6] sm:$0xff] %vm1798_vm1, %v2744_v13  ;;  %vm3221_vm5 = vweird.f32 %v3212_v46  ;;  %vm3238_vm8 = vmor %vm3236_vm7, %vm3237_vm4 }
 0xbce   : > { %2854 = vst.msk [vmem:[#allocation6] sm:$0xff] %vm1904_vm2, %v2849_v16  ;;  %v3233_v0 = vsub.f32 1.0, %v3232_v58  ;;  %v3228_v13 = vor.u32 1.1754944e-38, %v3227_v40 }
 0xbcf   : > { %v3014_v38 = vmul.f32 %v7910_v27, %v3013_v63 }
 0xbd0   : > { %v3234_v36 = vmul.f32 %v9855_v60, %v3233_v0 }
 0xbd1   : > { %v3015_v5 = vadd.f32 %v7910_v27, %v3014_v38 }
 0xbd2   : > { %v7914_v55 = vpop.eup %7913  ;;  %v3235_v21 = vadd.f32 %v9855_v60, %v3234_v36 }
 0xbd3   : > { %v3019_v62 = vsel %vm3018_vm12, %v7910_v27, %v3015_v5  ;;  %v3217_v52 = vmul.f32 %v7914_v55, %v3212_v46  ;;  %vm3222_vm0 = vweird.f32 %v7914_v55  ;;  %v3225_v27 = vand.u32 2147483647, %v3212_v46 }
 0xbd4   : > { %v3024_v45 = vsel %vm3021_vm15, %v3023_v43, %v3019_v62  ;;  %vm3223_vm6 = vmor %vm3221_vm5, %vm3222_vm0  ;;  %v3239_v2 = vsel %vm3238_vm8, %v9855_v60, %v3235_v21  ;;  %v3243_v46 = vor.u32 1.1754944e-38, %v3242_v7 }
 0xbd5   : > { %v3025_v47 = vmul.f32 %v9792_v32, %v3024_v45  ;;  %v3218_v29 = vsub.f32 1.0, %v3217_v52  ;;  %v3240_v32 = vand.u32 2147483647, %v9852_v56  ;;  %vm3226_vm9 = vcmp.eq.f32.partialorder %v3225_v27, 8.507059e+37  ;;  %v7512_v52 = vld [vmem:[%s8921_s2 + $0x78] sm:$0xff]  ;;  %v7511_v45 = vld [vmem:[%s8921_s2 + $0x70] sm:$0xff] }
 0xbd6   : > { %3454 = vmatpush.bf16.msrb.mxu3 %v7512_v52 }
 0xbd7   : > { %v3219_v28 = vmul.f32 %v7914_v55, %v3218_v29  ;;  %v3041_v53 = vpack.c.bf16 %v3040_v61, %v3025_v47  ;;  %vm3241_vm10 = vcmp.eq.f32.partialorder %v3240_v32, 8.507059e+37  ;;  %v7510_v61 = vld [vmem:[%s8921_s2 + $0x68] sm:$0xff]  ;;  %v7509_v47 = vld [vmem:[%s8921_s2 + $0x60] sm:$0xff]  ;;  %v7508_v29 = vld [vmem:[%s8921_s2 + $0x58] sm:$0xff] }
 0xbd8   : > { %v3244_v59 = vsel %vm3241_vm10, %v3243_v46, %v3239_v2 }
 0xbd9   : > { %v3220_v41 = vadd.f32 %v7914_v55, %v3219_v28  ;;  %6965 = vmatmul.msk.bf16.vlgmr.msrb.gmra.mxu0 %vm1620_vm14, %v3041_v53  ;;  %v3245_v14 = vmul.f32 %v9778_v23, %v3244_v59  ;;  %v7507_v28 = vld [vmem:[%s8921_s2 + $0x50] sm:$0xff]  ;;  %v7506_v53 = vld [vmem:[%s8921_s2 + $0x48] sm:$0xff] }
 0xbda   : > { %3455 = vmatpush.bf16.msrb.mxu3 %v7511_v45 }
 0xbdb   : > { %v3224_v63 = vsel %vm3223_vm6, %v7914_v55, %v3220_v41  ;;  %v7505_v41 = vld [vmem:[%s8921_s2 + $0x40] sm:$0xff] }
 0xbdc   : > { %v3229_v38 = vsel %vm3226_vm9, %v3228_v13, %v3224_v63 }
 0xbdd   : > { %v3230_v56 = vmul.f32 %v9799_v34, %v3229_v38 }
 0xbde   : > { %v9876_v16 = vpop.permute.xlu0 %3247  ;;  %v2519_v31 = vpop.f32.mrf.mxu0  ;;  %3456 = vmatpush.bf16.msrb.mxu3 %v7510_v61 }
 0xbdf   : > { %v2520_v58 = vadd.f32 %v2519_v31, %v9827_v15  ;;  %3260 = vmatpush.bf16.msra.mxu0 %v9876_v16  ;;  %v3246_v43 = vpack.c.bf16 %v3245_v14, %v3230_v56 }
 0xbe1   : > { %2526 = vst [vmem:[#allocation4 + $0x10] sm:$0xff] %v2520_v58 }
 0xbe2   : > { %3457 = vmatpush.bf16.msrb.mxu3 %v7509_v47 }
 0xbe5   : > { %v2946_v5 = vpop.f32.mrf.mxu2 }
 0xbe6   : > { %2953 = vrot.lane.b32.xlu2 %v2946_v5, %s8617_s30  ;;  %v2851_v55 = vpop.permute.xlu0 %2850  ;;  %v2521_v60 = vpop.f32.mrf.mxu0  ;;  %3458 = vmatpush.bf16.msrb.mxu3 %v7508_v29 }
 0xbe7   : > { %2855 = vst.msk [vmem:[#allocation6 + $0x8] sm:$0xff] %vm1904_vm2, %v2851_v55  ;;  %v2522_v54 = vadd.f32 %v2521_v60, %v9827_v15 }
 0xbe9   : > { %2527 = vst [vmem:[#allocation4 + $0x18] sm:$0xff] %v2522_v54  ;;  %6969 = vmatmul.msk.bf16.vlgmr.msra.gmra.mxu0 %vm1620_vm14, %v3246_v43  ;;  %v9913_v54 = vperm.slane %v8944_v4, 1 }
 0xbea   : > { %3459 = vmatpush.bf16.msrb.mxu3 %v7507_v28 }
 0xbed   : > { %v2948_v34 = vpop.f32.mrf.mxu2 }
 0xbee   : > { %2955 = vrot.lane.b32.xlu1 %v2948_v34, %s8617_s30  ;;  %3460 = vmatpush.bf16.msrb.mxu3 %v7506_v53 }
 0xbf2   : > { %3461 = vmatpush.bf16.msrb.mxu3 %v7505_v41 }
 0xbf5   : > { %v3157_v23 = vpop.f32.mrf.mxu2 }
 0xbf6   : > { %3164 = vrot.lane.b32.xlu0 %v3157_v23, %s8616_s25 }
 0xbfd   : > { %v3159_v0 = vpop.f32.mrf.mxu2 }
 0xbfe   : > { %3166 = vrot.lane.b32.xlu2 %v3159_v0, %s8616_s25 }
 0xc05   : > { %v3367_v62 = vpop.f32.mrf.mxu2 }
 0xc06   : > { %3374 = vrot.lane.b32.xlu2 %v3367_v62, %s8617_s30 }
 0xc0d   : > { %v3369_v58 = vpop.f32.mrf.mxu2 }
 0xc40   : > { %v2954_v36 = vpop.permute.xlu2 %2953 }
 0xc41   : > { %2959 = vst.msk [vmem:[#allocation6] sm:$0xff] %vm2010_vm3, %v2954_v36 }
 0xc48   : > { %v3382_v13 = vld [vmem:[#allocation6] sm:$0xff] }
 0xc56   : > { %v3060_v40 = vpop.f32.mrf.mxu0 }
 0xc57   : > { %3065 = vst.msk [vmem:[#allocation6 + $0x10] sm:$0xff] %vm1597_vm13, %v3060_v40 }
 0xc58   : > { %v3167_v27 = vpop.permute.xlu2 %3166 }
 0xc5e   : > { %v3062_v21 = vpop.f32.mrf.mxu0 }
 0xc5f   : > { %3066 = vst.msk [vmem:[#allocation6 + $0x18] sm:$0xff] %vm1597_vm13, %v3062_v21 }
 0xc60   : > { %3171 = vst.msk [vmem:[#allocation6 + $0x18] sm:$0xff] %vm1798_vm1, %v3167_v27  ;;  %v2956_v7 = vpop.permute.xlu1 %2955  ;;  %v3375_v59 = vpop.permute.xlu2 %3374 }
 0xc61   : > { %2960 = vst.msk [vmem:[#allocation6 + $0x8] sm:$0xff] %vm2010_vm3, %v2956_v7 }
 0xc66   : > { %v3262_v32 = vpop.f32.mrf.mxu0 }
 0xc67   : > { %3269 = vrot.lane.b32.xlu1 %v3262_v32, %s8615_s18 }
 0xc68   : > { %v3165_v63 = vpop.permute.xlu0 %3164  ;;  %v3383_v31 = vld [vmem:[#allocation6 + $0x8] sm:$0xff] }
 0xc69   : > { %3170 = vst.msk [vmem:[#allocation6 + $0x10] sm:$0xff] %vm1798_vm1, %v3165_v63  ;;  %v3403_v2 = vpack.c.bf16 %v3383_v31, %v3382_v13 }
 0xc6b   : > { %3462 = vmatmul.bf16.vlgmr.msrb.gmra.mxu3 %v3403_v2 }
 0xc6e   : > { %v3264_v46 = vpop.f32.mrf.mxu0 }
 0xc6f   : > { %3376 = vrot.lane.b32.xlu1 %v3369_v58, %s8617_s30  ;;  %3271 = vrot.lane.b32.xlu0 %v3264_v46, %s8615_s18 }
 0xcd9   : > { %v3270_v38 = vpop.permute.xlu1 %3269 }
 0xcda   : > { %3275 = vst.msk [vmem:[#allocation6 + $0x10] sm:$0xff] %vm1904_vm2, %v3270_v38 }
 0xcdb   : > { %3380 = vst.msk [vmem:[#allocation6 + $0x10] sm:$0xff] %vm2010_vm3, %v3375_v59 }
 0xce1   : > { %v3272_v56 = vpop.permute.xlu0 %3271  ;;  %v3377_v14 = vpop.permute.xlu1 %3376 }
 0xce2   : > { %3276 = vst.msk [vmem:[#allocation6 + $0x18] sm:$0xff] %vm1904_vm2, %v3272_v56  ;;  %v3384_v5 = vld [vmem:[#allocation6 + $0x10] sm:$0xff] }
 0xce3   : > { %3381 = vst.msk [vmem:[#allocation6 + $0x18] sm:$0xff] %vm2010_vm3, %v3377_v14 }
 0xcea   : > { %v3385_v55 = vld [vmem:[#allocation6 + $0x18] sm:$0xff] }
 0xceb   : > { %v3404_v60 = vpack.c.bf16 %v3385_v55, %v3384_v5 }
 0xced   : > { %3467 = vmatmul.bf16.gmra.mxu3 %v3404_v60 }
 0xcee   : > { %v3463_v43 = vpop.f32.mrf.mxu3 }
 0xcef   : > { %v3464_v34 = vadd.f32 %v3463_v43, %v9913_v54 }
 0xcf1   : > { %3473 = vst [vmem:[#allocation5] sm:$0xff] %v3464_v34 }
 0xcf6   : > { %v3465_v23 = vpop.f32.mrf.mxu3 }
 0xcf7   : > { %v3466_v0 = vadd.f32 %v3465_v23, %v9913_v54 }
 0xcf9   : > { %3474 = vst [vmem:[#allocation5 + $0x10] sm:$0xff] %v3466_v0 }
 0xd70   : > { %v3468_v62 = vpop.f32.mrf.mxu3 }
 0xd71   : > { %v3469_v52 = vadd.f32 %v3468_v62, %v9913_v54 }
 0xd73   : > { %3475 = vst [vmem:[#allocation5 + $0x18] sm:$0xff] %v3469_v52 }
 0xd77   : > { %3481 = sbr.rel (%p7020_p3) target bundleno = 6065 (0x17b1), region = 136 }
 0xd78   : > { %v3470_v45 = vpop.f32.mrf.mxu3 }
 0xd79   : > { %v3471_v61 = vadd.f32 %v3470_v45, %v9913_v54 }
 0xd7b   : > { %3476 = vst [vmem:[#allocation5 + $0x8] sm:$0xff] %v3471_v61 }
 0xd7c   : > { %3489 = vmatpush.bf16.xpose.msra.mxu0 %v9385_v11  ;;  %3557 = vmatpush.bf16.msra.mxu1 %v9247_v42 }
 0xd7d   : > { %3641 = vmatpush.bf16.msra.mxu3 %v9578_v44  ;;  %3825 = vmatpush.bf16.msra.mxu2 %v9821_v3 }
 0xd80   : > { %3573 = vmatpush.bf16.xpose.msrb.mxu1 %v9536_v35 }
 0xd81   : > { %3733 = vmatpush.bf16.msrb.mxu3 %v9595_v51  ;;  %4001 = vmatpush.bf16.msrb.mxu2 %v9788_v6 }
 0xd83   : > { %7021 = vmatmul.msk.bf16.vlgmr.msra.gmra.mxu0 %vm1597_vm13, %v9101_v39 }
 0xd84   : > { %3757 = vmatpush.bf16.xpose.msrb.mxu0 %v9581_v57 }
 0xd8c   : > { %3933 = vmatpush.bf16.xpose.msra.mxu0 %v9611_v33 }
 0xd93   : > { %7027 = vmatmul.msk.bf16.vlgmr.msrb.gmra.mxu0 %vm1597_vm13, %v9325_v20 }
 0xd94   : > { %4117 = vmatpush.bf16.xpose.msrb.mxu0 %v9637_v25 }
 0xda3   : > { %7031 = vmatmul.msk.bf16.vlgmr.msra.gmra.mxu0 %vm1597_vm13, %v9363_v1 }
 0xda4   : > { %4366 = vmatpush.bf16.msra.mxu0 %v9099_v37 }
 0xdb3   : > { %7035 = vmatmul.msk.bf16.vlgmr.msrb.gmra.mxu0 %vm1597_vm13, %v9372_v22 }
 0xdb4   : > { %4474 = vmatpush.bf16.xpose.msrb.mxu0 %v9209_v18 }
 0xe00   : > { %v3491_v4 = vpop.f32.mrf.mxu0 }
 0xe01   : > { %v3496_v42 = vmul.f32 0.17677669, %v3491_v4 }
 0xe03   : > { %v3498_v39 = vsel %vm1620_vm14, %v3496_v42, -inf }
 0xe04   : > { %3499 = vmax.xlane.f32.xlu0 %v3498_v39 }
 0xe08   : > { %v3493_v11 = vpop.f32.mrf.mxu0 }
 0xe09   : > { %v3497_v35 = vmul.f32 0.17677669, %v3493_v11 }
 0xe0b   : > { %v3501_v20 = vsel %vm1620_vm14, %v3497_v35, -inf }
 0xe0c   : > { %3502 = vmax.xlane.f32.xlu0 %v3501_v20 }
 0xe77   : > { %v3500_v25 = vpop.xlane.xlu0 %3499 }
 0xe78   : > { %v3504_v44 = vsub.f32 %v3496_v42, %v3500_v25 }
 0xe7a   : > { %v3506_v1 = vmul.f32 1.442695, %v3504_v44 }
 0xe7c   : > { %7915 = vpow2.f32 %v3506_v1 }
 0xe7f   : > { %v3503_v37 = vpop.xlane.xlu0 %3502 }
 0xe80   : > { %v3505_v57 = vsub.f32 %v3497_v35, %v3503_v37 }
 0xe82   : > { %v7916_v51 = vpop.eup %7915  ;;  %v3508_v22 = vmul.f32 1.442695, %v3505_v57 }
 0xe83   : > { %v3510_v18 = vsel %vm1620_vm14, %v7916_v51, 0.0 }
 0xe84   : > { %7917 = vpow2.f32 %v3508_v22  ;;  %3511 = vadd.xlane.f32.xlu1 %v3510_v18 }
 0xe8a   : > { %v7918_v33 = vpop.eup %7917 }
 0xe8b   : > { %v3513_v6 = vsel %vm1620_vm14, %v7918_v33, 0.0 }
 0xe8c   : > { %3514 = vadd.xlane.f32.xlu1 %v3513_v6 }
 0xef7   : > { %v3512_v3 = vpop.xlane.xlu1 %3511 }
 0xef8   : > { %7919 = vrcp.f32 %v3512_v3  ;;  %v3527_v27 = vand.u32 2147483648, %v3512_v3  ;;  %vm3521_vm12 = vweird.f32 %v3512_v3  ;;  %v3525_v32 = vand.u32 2147483647, %v3512_v3 }
 0xefa   : > { %v3528_v58 = vor.u32 1.1754944e-38, %v3527_v27  ;;  %vm3526_vm5 = vcmp.eq.f32.partialorder %v3525_v32, 8.507059e+37 }
 0xefe   : > { %v7920_v47 = vpop.eup %7919 }
 0xeff   : > { %v3517_v29 = vmul.f32 %v7920_v47, %v3512_v3  ;;  %v3515_v36 = vpop.xlane.xlu1 %3514  ;;  %vm3522_vm11 = vweird.f32 %v7920_v47 }
 0xf00   : > { %7921 = vrcp.f32 %v3515_v36  ;;  %v3542_v63 = vand.u32 2147483648, %v3515_v36  ;;  %vm3523_vm15 = vmor %vm3521_vm12, %vm3522_vm11  ;;  %v3540_v2 = vand.u32 2147483647, %v3515_v36  ;;  %vm3536_vm4 = vweird.f32 %v3515_v36 }
 0xf01   : > { %v3518_v28 = vsub.f32 1.0, %v3517_v29 }
 0xf02   : > { %v3543_v59 = vor.u32 1.1754944e-38, %v3542_v63  ;;  %vm3541_vm7 = vcmp.eq.f32.partialorder %v3540_v2, 8.507059e+37 }
 0xf03   : > { %v3519_v53 = vmul.f32 %v7920_v47, %v3518_v28 }
 0xf05   : > { %v3520_v21 = vadd.f32 %v7920_v47, %v3519_v53 }
 0xf06   : > { %v7922_v41 = vpop.eup %7921 }
 0xf07   : > { %v3532_v40 = vmul.f32 %v7922_v41, %v3515_v36  ;;  %v3524_v31 = vsel %vm3523_vm15, %v7920_v47, %v3520_v21  ;;  %vm3537_vm0 = vweird.f32 %v7922_v41 }
 0xf08   : > { %v3529_v38 = vsel %vm3526_vm5, %v3528_v58, %v3524_v31  ;;  %vm3538_vm6 = vmor %vm3536_vm4, %vm3537_vm0 }
 0xf09   : > { %v3533_v7 = vsub.f32 1.0, %v3532_v40  ;;  %v3530_v5 = vmul.f32 %v7916_v51, %v3529_v38 }
 0xf0b   : > { %v3534_v13 = vmul.f32 %v7922_v41, %v3533_v7  ;;  %v3759_v7 = vpop.f32.mrf.mxu0 }
 0xf0d   : > { %v3535_v46 = vadd.f32 %v7922_v41, %v3534_v13 }
 0xf0f   : > { %v3539_v56 = vsel %vm3538_vm6, %v7922_v41, %v3535_v46 }
 0xf10   : > { %v3544_v14 = vsel %vm3541_vm7, %v3543_v59, %v3539_v56 }
 0xf11   : > { %v3545_v55 = vmul.f32 %v7918_v33, %v3544_v14 }
 0xf13   : > { %v3546_v60 = vpack.c.bf16 %v3545_v55, %v3530_v5  ;;  %v3761_v38 = vpop.f32.mrf.mxu0 }
 0xf15   : > { %7022 = vmatmul.msk.bf16.vlgmr.msra.gmra.mxu1 %vm1620_vm14, %v3546_v60 }
 0xf16   : > { %3665 = vmatpush.bf16.xpose.msra.mxu1 %v9507_v19 }
 0xf25   : > { %7023 = vmatmul.msk.bf16.vlgmr.msrb.gmra.mxu1 %vm1597_vm13, %v9327_v26 }
 0xf26   : > { %3849 = vmatpush.bf16.xpose.msrb.mxu1 %v9600_v12 }
 0xf35   : > { %7025 = vmatmul.msk.bf16.vlgmr.msra.gmra.mxu1 %vm1597_vm13, %v9234_v24 }
 0xf36   : > { %4025 = vmatpush.bf16.xpose.msra.mxu1 %v9641_v8 }
 0xf45   : > { %7029 = vmatmul.msk.bf16.vlgmr.msrb.gmra.mxu1 %vm1597_vm13, %v9106_v48 }
 0xf55   : > { %7033 = vmatmul.msk.bf16.vlgmr.msra.gmra.mxu1 %vm1597_vm13, %v9265_v9 }
 0xf92   : > { %v3559_v43 = vpop.f32.mrf.mxu1 }
 0xf93   : > { %3564 = vst.msk [vmem:[#allocation6] sm:$0xff] %vm1597_vm13, %v3559_v43  ;;  %v3935_v43 = vpop.f32.mrf.mxu0 }
 0xf9a   : > { %v3561_v19 = vpop.f32.mrf.mxu1 }
 0xf9b   : > { %3565 = vst.msk [vmem:[#allocation6 + $0x8] sm:$0xff] %vm1597_vm13, %v3561_v19 }
 0xfa2   : > { %v3575_v26 = vpop.f32.mrf.mxu1 }
 0xfa3   : > { %v3580_v34 = vmul.f32 0.17677669, %v3575_v26 }
 0xfa5   : > { %v3582_v12 = vsel %vm1620_vm14, %v3580_v34, -inf }
 0xfa6   : > { %3583 = vmax.xlane.f32.xlu2 %v3582_v12 }
 0xfaa   : > { %v3577_v24 = vpop.f32.mrf.mxu1 }
 0xfab   : > { %v3581_v23 = vmul.f32 0.17677669, %v3577_v24 }
 0xfad   : > { %v3585_v8 = vsel %vm1620_vm14, %v3581_v23, -inf }
 0xfae   : > { %3586 = vmax.xlane.f32.xlu2 %v3585_v8  ;;  %v3937_v8 = vpop.f32.mrf.mxu0 }
 0xfb2   : > { %v3667_v48 = vpop.f32.mrf.mxu1 }
 0xfb3   : > { %v3672_v0 = vmul.f32 0.17677669, %v3667_v48 }
 0xfb5   : > { %v3674_v9 = vsel %vm1620_vm14, %v3672_v0, -inf }
 0xfb6   : > { %3675 = vmax.xlane.f32.xlu0 %v3674_v9 }
 0xfba   : > { %v3669_v62 = vpop.f32.mrf.mxu1 }
 0xfbb   : > { %v3673_v52 = vmul.f32 0.17677669, %v3669_v62 }
 0xfbd   : > { %v3677_v45 = vsel %vm1620_vm14, %v3673_v52, -inf }
 0xfbe   : > { %3678 = vmax.xlane.f32.xlu1 %v3677_v45 }
 0xfc2   : > { %v3851_v61 = vpop.f32.mrf.mxu1 }
 0xfc3   : > { %v3856_v4 = vmul.f32 0.17677669, %v3851_v61  ;;  %v9998_v61 = vmul.f32 0.17677669, %v3761_v38 }
 0xfc5   : > { %v3858_v42 = vsel %vm1620_vm14, %v3856_v4, -inf }
 0xfc6   : > { %3859 = vmax.xlane.f32.xlu2 %v3858_v42  ;;  %v4119_v42 = vpop.f32.mrf.mxu0 }
 0xfca   : > { %v3853_v39 = vpop.f32.mrf.mxu1 }
 0xfcb   : > { %v3857_v11 = vmul.f32 0.17677669, %v3853_v39  ;;  %v3769_v39 = vsel %vm1620_vm14, %v9998_v61, -inf }
 0xfcd   : > { %v3861_v35 = vsel %vm1620_vm14, %v3857_v11, -inf }
 0xfce   : > { %3862 = vmax.xlane.f32.xlu0 %v3861_v35 }
 0xfd2   : > { %v4027_v20 = vpop.f32.mrf.mxu1 }
 0xfd3   : > { %v4032_v25 = vmul.f32 0.17677669, %v4027_v20 }
 0xfd5   : > { %v4034_v44 = vsel %vm1620_vm14, %v4032_v25, -inf }
 0xfd6   : > { %4035 = vmax.xlane.f32.xlu1 %v4034_v44 }
 0xfda   : > { %v4029_v1 = vpop.f32.mrf.mxu1 }
 0xfdb   : > { %v4033_v37 = vmul.f32 0.17677669, %v4029_v1  ;;  %v4121_v1 = vpop.f32.mrf.mxu0 }
 0xfdd   : > { %v4037_v57 = vsel %vm1620_vm14, %v4033_v37, -inf }
 0xfde   : > { %4038 = vmax.xlane.f32.xlu2 %v4037_v57 }
0x1019   : > { %v3584_v51 = vpop.xlane.xlu2 %3583 }
0x101a   : > { %v3588_v22 = vsub.f32 %v3580_v34, %v3584_v51  ;;  %v10018_v51 = vmul.f32 0.17677669, %v4119_v42 }
0x101c   : > { %v3590_v18 = vmul.f32 1.442695, %v3588_v22  ;;  %v4126_v22 = vsel %vm1620_vm14, %v10018_v51, -inf }
0x101e   : > { %7923 = vpow2.f32 %v3590_v18 }
0x1021   : > { %v3587_v33 = vpop.xlane.xlu2 %3586 }
0x1022   : > { %v3589_v6 = vsub.f32 %v3581_v23, %v3587_v33  ;;  %v9990_v23 = vmul.f32 0.17677669, %v3759_v7 }
0x1024   : > { %v9966_v3 = vpop.eup %7923  ;;  %v3592_v47 = vmul.f32 1.442695, %v3589_v6  ;;  %v3766_v9 = vsel %vm1620_vm14, %v9990_v23, -inf }
0x1025   : > { %v3594_v29 = vsel %vm1620_vm14, %v9966_v3, 0.0 }
0x1026   : > { %7925 = vpow2.f32 %v3592_v47  ;;  %3595 = vadd.xlane.f32.xlu0 %v3594_v29 }
0x1029   : > { %v3676_v36 = vpop.xlane.xlu0 %3675 }
0x102a   : > { %v3680_v28 = vsub.f32 %v3672_v0, %v3676_v36 }
0x102c   : > { %v9970_v53 = vpop.eup %7925  ;;  %v3682_v41 = vmul.f32 1.442695, %v3680_v28 }
0x102d   : > { %v3597_v40 = vsel %vm1620_vm14, %v9970_v53, 0.0 }
0x102e   : > { %7927 = vpow2.f32 %v3682_v41  ;;  %3598 = vadd.xlane.f32.xlu1 %v3597_v40 }
0x1031   : > { %v3679_v21 = vpop.xlane.xlu1 %3678 }
0x1032   : > { %v3681_v27 = vsub.f32 %v3673_v52, %v3679_v21 }
0x1034   : > { %v9974_v32 = vpop.eup %7927  ;;  %v3684_v63 = vmul.f32 1.442695, %v3681_v27 }
0x1035   : > { %v3686_v13 = vsel %vm1620_vm14, %v9974_v32, 0.0 }
0x1036   : > { %7929 = vpow2.f32 %v3684_v63  ;;  %3687 = vadd.xlane.f32.xlu2 %v3686_v13 }
0x1039   : > { %v3860_v31 = vpop.xlane.xlu2 %3859 }
0x103a   : > { %v3864_v2 = vsub.f32 %v3856_v4, %v3860_v31  ;;  %v10000_v4 = vmul.f32 0.17677669, %v3937_v8 }
0x103c   : > { %v9978_v58 = vpop.eup %7929  ;;  %v3866_v46 = vmul.f32 1.442695, %v3864_v2  ;;  %v3945_v35 = vsel %vm1620_vm14, %v10000_v4, -inf }
0x103d   : > { %v3689_v59 = vsel %vm1620_vm14, %v9978_v58, 0.0 }
0x103e   : > { %7931 = vpow2.f32 %v3866_v46  ;;  %3690 = vadd.xlane.f32.xlu0 %v3689_v59 }
0x1041   : > { %v3863_v56 = vpop.xlane.xlu0 %3862 }
0x1042   : > { %v3865_v14 = vsub.f32 %v3857_v11, %v3863_v56 }
0x1044   : > { %v9982_v5 = vpop.eup %7931  ;;  %v3868_v55 = vmul.f32 1.442695, %v3865_v14 }
0x1045   : > { %v3870_v60 = vsel %vm1620_vm14, %v9982_v5, 0.0 }
0x1046   : > { %7933 = vpow2.f32 %v3868_v55  ;;  %3871 = vadd.xlane.f32.xlu1 %v3870_v60 }
0x1049   : > { %v4036_v19 = vpop.xlane.xlu1 %4035 }
0x104a   : > { %v4040_v26 = vsub.f32 %v4032_v25, %v4036_v19  ;;  %v10010_v25 = vmul.f32 0.17677669, %v3935_v43 }
0x104c   : > { %v9986_v34 = vpop.eup %7933  ;;  %v4042_v12 = vmul.f32 1.442695, %v4040_v26  ;;  %v3942_v44 = vsel %vm1620_vm14, %v10010_v25, -inf }
0x104d   : > { %v3873_v24 = vsel %vm1620_vm14, %v9986_v34, 0.0 }
0x104e   : > { %7935 = vpow2.f32 %v4042_v12  ;;  %3874 = vadd.xlane.f32.xlu2 %v3873_v24 }
0x1051   : > { %v4039_v48 = vpop.xlane.xlu2 %4038 }
0x1052   : > { %v4041_v0 = vsub.f32 %v4033_v37, %v4039_v48  ;;  %v10014_v37 = vmul.f32 0.17677669, %v4121_v1 }
0x1054   : > { %v9994_v62 = vpop.eup %7935  ;;  %v4044_v52 = vmul.f32 1.442695, %v4041_v0  ;;  %v4129_v57 = vsel %vm1620_vm14, %v10014_v37, -inf }
0x1055   : > { %v4046_v45 = vsel %vm1620_vm14, %v9994_v62, 0.0 }
0x1056   : > { %7937 = vpow2.f32 %v4044_v52  ;;  %4047 = vadd.xlane.f32.xlu0 %v4046_v45  ;;  %3767 = vmax.xlane.f32.xlu2 %v3766_v9 }
0x105c   : > { %v10004_v11 = vpop.eup %7937 }
0x105d   : > { %v4049_v20 = vsel %vm1620_vm14, %v10004_v11, 0.0 }
0x105e   : > { %3770 = vmax.xlane.f32.xlu0 %v3769_v39  ;;  %4050 = vadd.xlane.f32.xlu1 %v4049_v20 }
0x105f   : > { %3946 = vmax.xlane.f32.xlu2 %v3945_v35 }
0x1066   : > { %3943 = vmax.xlane.f32.xlu1 %v3942_v44  ;;  %4127 = vmax.xlane.f32.xlu0 %v4126_v22 }
0x106e   : > { %4130 = vmax.xlane.f32.xlu1 %v4129_v57 }
0x1099   : > { %v3596_v18 = vpop.xlane.xlu0 %3595 }
0x109a   : > { %7939 = vrcp.f32 %v3596_v18  ;;  %v3611_v27 = vand.u32 2147483648, %v3596_v18  ;;  %vm3605_vm9 = vweird.f32 %v3596_v18  ;;  %v3609_v63 = vand.u32 2147483647, %v3596_v18 }
0x109c   : > { %v3612_v38 = vor.u32 1.1754944e-38, %v3611_v27  ;;  %vm3610_vm15 = vcmp.eq.f32.partialorder %v3609_v63, 8.507059e+37 }
0x10a0   : > { %v7940_v33 = vpop.eup %7939 }
0x10a1   : > { %v3601_v6 = vmul.f32 %v7940_v33, %v3596_v18  ;;  %v3599_v47 = vpop.xlane.xlu1 %3598  ;;  %vm3606_vm8 = vweird.f32 %v7940_v33 }
0x10a2   : > { %7941 = vrcp.f32 %v3599_v47  ;;  %v3626_v31 = vand.u32 2147483648, %v3599_v47  ;;  %vm3607_vm10 = vmor %vm3605_vm9, %vm3606_vm8  ;;  %v3624_v46 = vand.u32 2147483647, %v3599_v47  ;;  %vm3620_vm12 = vweird.f32 %v3599_v47 }
0x10a3   : > { %v3602_v29 = vsub.f32 1.0, %v3601_v6 }
0x10a4   : > { %v3627_v19 = vor.u32 1.1754944e-38, %v3626_v31  ;;  %vm3625_vm4 = vcmp.eq.f32.partialorder %v3624_v46, 8.507059e+37 }
0x10a5   : > { %v3603_v36 = vmul.f32 %v7940_v33, %v3602_v29 }
0x10a7   : > { %v3604_v21 = vadd.f32 %v7940_v33, %v3603_v36 }
0x10a8   : > { %v7942_v28 = vpop.eup %7941 }
0x10a9   : > { %v3616_v41 = vmul.f32 %v7942_v28, %v3599_v47  ;;  %v3688_v40 = vpop.xlane.xlu2 %3687  ;;  %vm3621_vm11 = vweird.f32 %v7942_v28  ;;  %v3608_v2 = vsel %vm3607_vm10, %v7940_v33, %v3604_v21 }
0x10aa   : > { %7943 = vrcp.f32 %v3688_v40  ;;  %vm3622_vm0 = vmor %vm3620_vm12, %vm3621_vm11  ;;  %v3613_v60 = vsel %vm3610_vm15, %v3612_v38, %v3608_v2  ;;  %v3703_v39 = vand.u32 2147483648, %v3688_v40  ;;  %vm3697_vm6 = vweird.f32 %v3688_v40 }
0x10ab   : > { %v3617_v7 = vsub.f32 1.0, %v3616_v41  ;;  %v3614_v24 = vmul.f32 %v9966_v3, %v3613_v60  ;;  %v3701_v20 = vand.u32 2147483647, %v3688_v40 }
0x10ac   : > { %v3704_v22 = vor.u32 1.1754944e-38, %v3703_v39 }
0x10ad   : > { %v3618_v13 = vmul.f32 %v7942_v28, %v3617_v7  ;;  %vm3702_vm10 = vcmp.eq.f32.partialorder %v3701_v20, 8.507059e+37 }
0x10af   : > { %v3619_v59 = vadd.f32 %v7942_v28, %v3618_v13 }
0x10b0   : > { %v7944_v56 = vpop.eup %7943 }
0x10b1   : > { %v3693_v14 = vmul.f32 %v7944_v56, %v3688_v40  ;;  %v3691_v55 = vpop.xlane.xlu0 %3690  ;;  %v3623_v43 = vsel %vm3622_vm0, %v7942_v28, %v3619_v59  ;;  %vm3698_vm5 = vweird.f32 %v7944_v56 }
0x10b2   : > { %7945 = vrcp.f32 %v3691_v55  ;;  %v3628_v12 = vsel %vm3625_vm4, %v3627_v19, %v3623_v43  ;;  %vm10026_vm7 = vmor %vm3697_vm6, %vm3698_vm5  ;;  %v3718_v44 = vand.u32 2147483648, %v3691_v55  ;;  %v3716_v1 = vand.u32 2147483647, %v3691_v55 }
0x10b3   : > { %v3694_v26 = vsub.f32 1.0, %v3693_v14  ;;  %v3629_v8 = vmul.f32 %v9970_v53, %v3628_v12  ;;  %vm3712_vm9 = vweird.f32 %v3691_v55 }
0x10b4   : > { %v3719_v33 = vor.u32 1.1754944e-38, %v3718_v44  ;;  %vm3717_vm12 = vcmp.eq.f32.partialorder %v3716_v1, 8.507059e+37 }
0x10b5   : > { %v3695_v48 = vmul.f32 %v7944_v56, %v3694_v26  ;;  %v3630_v0 = vpack.c.bf16 %v3629_v8, %v3614_v24 }
0x10b7   : > { %7024 = vmatmul.msk.bf16.vlgmr.msra.gmra.mxu3 %vm1620_vm14, %v3630_v0  ;;  %v3696_v42 = vadd.f32 %v7944_v56, %v3695_v48 }
0x10b8   : > { %v7946_v9 = vpop.eup %7945  ;;  %3917 = vmatpush.bf16.msra.mxu3 %v9274_v49 }
0x10b9   : > { %v3708_v52 = vmul.f32 %v7946_v9, %v3691_v55  ;;  %v3872_v45 = vpop.xlane.xlu1 %3871  ;;  %vm3713_vm8 = vweird.f32 %v7946_v9  ;;  %v3700_v57 = vsel %vm10026_vm7, %v7944_v56, %v3696_v42 }
0x10ba   : > { %7947 = vrcp.f32 %v3872_v45  ;;  %vm3714_vm11 = vmor %vm3712_vm9, %vm3713_vm8  ;;  %v3705_v29 = vsel %vm3702_vm10, %v3704_v22, %v3700_v57  ;;  %v3887_v38 = vand.u32 2147483648, %v3872_v45  ;;  %vm3881_vm0 = vweird.f32 %v3872_v45 }
0x10bb   : > { %v3709_v35 = vsub.f32 1.0, %v3708_v52  ;;  %v3706_v40 = vmul.f32 %v9974_v32, %v3705_v29 }
0x10bc   : > { %v3888_v19 = vor.u32 1.1754944e-38, %v3887_v38 }
0x10bd   : > { %v3710_v53 = vmul.f32 %v7946_v9, %v3709_v35 }
0x10bf   : > { %v3711_v49 = vadd.f32 %v7946_v9, %v3710_v53 }
0x10c0   : > { %v7948_v18 = vpop.eup %7947 }
0x10c1   : > { %v3877_v6 = vmul.f32 %v7948_v18, %v3872_v45  ;;  %v3875_v47 = vpop.xlane.xlu2 %3874  ;;  %v3715_v36 = vsel %vm3714_vm11, %v7946_v9, %v3711_v49  ;;  %vm3882_vm15 = vweird.f32 %v7948_v18 }
0x10c2   : > { %7949 = vrcp.f32 %v3875_v47  ;;  %v3720_v41 = vsel %vm3717_vm12, %v3719_v33, %v3715_v36  ;;  %vm10040_vm4 = vmor %vm3881_vm0, %vm3882_vm15  ;;  %v3902_v55 = vand.u32 2147483648, %v3875_v47  ;;  %v3900_v43 = vand.u32 2147483647, %v3875_v47 }
0x10c3   : > { %v3878_v28 = vsub.f32 1.0, %v3877_v6  ;;  %v3721_v21 = vmul.f32 %v9978_v58, %v3720_v41  ;;  %v3885_v58 = vand.u32 2147483647, %v3872_v45  ;;  %vm3896_vm6 = vweird.f32 %v3875_v47 }
0x10c4   : > { %v3903_v24 = vor.u32 1.1754944e-38, %v3902_v55  ;;  %vm3901_vm9 = vcmp.eq.f32.partialorder %v3900_v43, 8.507059e+37 }
0x10c5   : > { %v3879_v27 = vmul.f32 %v7948_v18, %v3878_v28  ;;  %v3722_v7 = vpack.c.bf16 %v3721_v21, %v3706_v40  ;;  %vm3886_vm7 = vcmp.eq.f32.partialorder %v3885_v58, 8.507059e+37 }
0x10c7   : > { %7026 = vmatmul.msk.bf16.vlgmr.msrb.gmra.mxu3 %vm1620_vm14, %v3722_v7  ;;  %v3880_v46 = vadd.f32 %v7948_v18, %v3879_v27 }
0x10c8   : > { %v7950_v63 = vpop.eup %7949  ;;  %4093 = vmatpush.bf16.msrb.mxu3 %v9876_v16 }
0x10c9   : > { %v3892_v13 = vmul.f32 %v7950_v63, %v3875_v47  ;;  %v10035_v31 = vpop.xlane.xlu0 %4047  ;;  %v3768_v2 = vpop.xlane.xlu2 %3767  ;;  %vm3897_vm5 = vweird.f32 %v7950_v63  ;;  %v3884_v16 = vsel %vm10040_vm4, %v7948_v18, %v3880_v46  ;;  %v11139_v18 = vld [vmem:[#allocation57_spill] sm:$0xff] }
0x10ca   : > { %7951 = vrcp.f32 %v10035_v31  ;;  %v3772_v32 = vsub.f32 %v9990_v23, %v3768_v2  ;;  %vm3898_vm8 = vmor %vm3896_vm6, %vm3897_vm5  ;;  %v3889_v9 = vsel %vm3886_vm7, %v3888_v19, %v3884_v16  ;;  %vm4057_vm11 = vweird.f32 %v10035_v31 }
0x10cb   : > { %v3893_v59 = vsub.f32 1.0, %v3892_v13  ;;  %v3890_v35 = vmul.f32 %v9982_v5, %v3889_v9  ;;  %v4063_v5 = vand.u32 2147483648, %v10035_v31  ;;  %v4061_v33 = vand.u32 2147483647, %v10035_v31 }
0x10cc   : > { %v3774_v60 = vmul.f32 1.442695, %v3772_v32 }
0x10cd   : > { %v3894_v14 = vmul.f32 %v7950_v63, %v3893_v59  ;;  %v4064_v27 = vor.u32 1.1754944e-38, %v4063_v5  ;;  %vm4062_vm0 = vcmp.eq.f32.partialorder %v4061_v33, 8.507059e+37 }
0x10ce   : > { %7953 = vpow2.f32 %v3774_v60  ;;  %v11142_v60 = vld [vmem:[#allocation68_spill] sm:$0xff] }
0x10cf   : > { %v3895_v26 = vadd.f32 %v7950_v63, %v3894_v14 }
0x10d0   : > { %v7952_v12 = vpop.eup %7951 }
0x10d1   : > { %v3899_v23 = vsel %vm3898_vm8, %v7950_v63, %v3895_v26  ;;  %v4053_v8 = vmul.f32 %v7952_v12, %v10035_v31  ;;  %v3771_v48 = vpop.xlane.xlu0 %3770  ;;  %v4051_v0 = vpop.xlane.xlu1 %4050  ;;  %vm4058_vm10 = vweird.f32 %v7952_v12 }
0x10d2   : > { %v3773_v52 = vsub.f32 %v9998_v61, %v3771_v48  ;;  %7955 = vrcp.f32 %v4051_v0  ;;  %v3904_v42 = vsel %vm3901_vm9, %v3903_v24, %v3899_v23  ;;  %vm10062_vm12 = vmor %vm4057_vm11, %vm4058_vm10  ;;  %v4076_v36 = vand.u32 2147483647, %v4051_v0  ;;  %v3947_v19 = vpop.xlane.xlu2 %3946 }
0x10d3   : > { %v4054_v45 = vsub.f32 1.0, %v4053_v8  ;;  %v3905_v20 = vmul.f32 %v9986_v34, %v3904_v42  ;;  %v4078_v28 = vand.u32 2147483648, %v4051_v0  ;;  %vm4072_vm4 = vweird.f32 %v4051_v0 }
0x10d4   : > { %v3776_v39 = vmul.f32 1.442695, %v3773_v52  ;;  %v10050_v3 = vpop.eup %7953  ;;  %vm4077_vm6 = vcmp.eq.f32.partialorder %v4076_v36, 8.507059e+37 }
0x10d5   : > { %v4055_v53 = vmul.f32 %v7952_v12, %v4054_v45  ;;  %v3778_v44 = vsel %vm1620_vm14, %v10050_v3, 0.0  ;;  %v3906_v1 = vpack.c.bf16 %v3905_v20, %v3890_v35  ;;  %v4079_v63 = vor.u32 1.1754944e-38, %v4078_v28 }
0x10d6   : > { %7957 = vpow2.f32 %v3776_v39  ;;  %3779 = vadd.xlane.f32.xlu2 %v3778_v44 }
0x10d7   : > { %7030 = vmatmul.msk.bf16.vlgmr.msra.gmra.mxu3 %vm1620_vm14, %v3906_v1  ;;  %v4056_v61 = vadd.f32 %v7952_v12, %v4055_v53 }
0x10d8   : > { %v7956_v57 = vpop.eup %7955  ;;  %4298 = vmatpush.bf16.xpose.msra.mxu3 %v11139_v18 }
0x10d9   : > { %v4068_v22 = vmul.f32 %v7956_v57, %v4051_v0  ;;  %v3944_v49 = vpop.xlane.xlu1 %3943  ;;  %v4060_v40 = vsel %vm10062_vm12, %v7952_v12, %v4056_v61  ;;  %vm4073_vm15 = vweird.f32 %v7956_v57  ;;  %v4128_v12 = vpop.xlane.xlu0 %4127 }
0x10da   : > { %v3948_v34 = vsub.f32 %v10010_v25, %v3944_v49  ;;  %vm4074_vm5 = vmor %vm4072_vm4, %vm4073_vm15  ;;  %v4065_v13 = vsel %vm4062_vm0, %v4064_v27, %v4060_v40  ;;  %v3949_v27 = vsub.f32 %v10000_v4, %v3947_v19 }
0x10db   : > { %v4069_v6 = vsub.f32 1.0, %v4068_v22  ;;  %v4066_v59 = vmul.f32 %v9994_v62, %v4065_v13 }
0x10dc   : > { %v10060_v47 = vpop.eup %7957  ;;  %v3950_v41 = vmul.f32 1.442695, %v3948_v34 }
0x10dd   : > { %v4070_v21 = vmul.f32 %v7956_v57, %v4069_v6  ;;  %v3781_v25 = vsel %vm1620_vm14, %v10060_v47, 0.0 }
0x10de   : > { %7959 = vpow2.f32 %v3950_v41  ;;  %3782 = vadd.xlane.f32.xlu0 %v3781_v25 }
0x10df   : > { %v4071_v7 = vadd.f32 %v7956_v57, %v4070_v21 }
0x10e1   : > { %v4075_v31 = vsel %vm4074_vm5, %v7956_v57, %v4071_v7  ;;  %v4131_v2 = vpop.xlane.xlu1 %4130  ;;  %v3952_v7 = vmul.f32 1.442695, %v3949_v27 }
0x10e2   : > { %v4133_v46 = vsub.f32 %v10014_v37, %v4131_v2  ;;  %v4080_v38 = vsel %vm4077_vm6, %v4079_v63, %v4075_v31  ;;  %v11144_v37 = vld [vmem:[#allocation62_spill] sm:$0xff]  ;;  %v4132_v31 = vsub.f32 %v10018_v51, %v4128_v12 }
0x10e3   : > { %v4081_v32 = vmul.f32 %v10004_v11, %v4080_v38  ;;  %v11143_v11 = vld [vmem:[#allocation67_spill] sm:$0xff] }
0x10e4   : > { %v10073_v58 = vpop.eup %7959  ;;  %v4136_v56 = vmul.f32 1.442695, %v4133_v46 }
0x10e5   : > { %v3954_v14 = vsel %vm1620_vm14, %v10073_v58, 0.0  ;;  %v4082_v55 = vpack.c.bf16 %v4081_v32, %v4066_v59 }
0x10e6   : > { %7961 = vpow2.f32 %v4136_v56  ;;  %3955 = vadd.xlane.f32.xlu0 %v3954_v14 }
0x10e7   : > { %7034 = vmatmul.msk.bf16.vlgmr.msrb.gmra.mxu3 %vm1620_vm14, %v4082_v55 }
0x10e8   : > { %4450 = vmatpush.bf16.msrb.mxu3 %v11142_v60 }
0x10ec   : > { %v10079_v16 = vpop.eup %7961 }
0x10ed   : > { %v4141_v62 = vsel %vm1620_vm14, %v10079_v16, 0.0 }
0x10ee   : > { %4142 = vadd.xlane.f32.xlu0 %v4141_v62 }
0x10f7   : > { %7069 = vmatmul.msk.bf16.vlgmr.msra.gmra.mxu3 %vm1597_vm13, %v11143_v11 }
0x10f8   : > { %4566 = vmatpush.bf16.xpose.msra.mxu3 %v11144_v37 }
0x113a   : > { %v10086_v43 = vpop.f32.mrf.mxu3 }
0x1142   : > { %v10088_v26 = vpop.f32.mrf.mxu3 }
0x1149   : > { %v3780_v23 = vpop.xlane.xlu2 %3779 }
0x114a   : > { %7963 = vrcp.f32 %v3780_v23  ;;  %v10090_v24 = vpop.f32.mrf.mxu3  ;;  %vm3789_vm7 = vweird.f32 %v3780_v23  ;;  %v3795_v39 = vand.u32 2147483648, %v3780_v23  ;;  %v3793_v53 = vand.u32 2147483647, %v3780_v23 }
0x114c   : > { %v3796_v49 = vor.u32 1.1754944e-38, %v3795_v39  ;;  %vm3794_vm12 = vcmp.eq.f32.partialorder %v3793_v53, 8.507059e+37 }
0x1150   : > { %v7964_v8 = vpop.eup %7963 }
0x1151   : > { %v3783_v48 = vpop.xlane.xlu0 %3782  ;;  %v3785_v0 = vmul.f32 %v7964_v8, %v3780_v23  ;;  %vm3790_vm8 = vweird.f32 %v7964_v8 }
0x1152   : > { %7965 = vrcp.f32 %v3783_v48  ;;  %v10092_v9 = vpop.f32.mrf.mxu3  ;;  %vm3804_vm9 = vweird.f32 %v3783_v48  ;;  %v3810_v1 = vand.u32 2147483648, %v3783_v48  ;;  %vm3791_vm10 = vmor %vm3789_vm7, %vm3790_vm8  ;;  %v3808_v61 = vand.u32 2147483647, %v3783_v48 }
0x1153   : > { %v3786_v52 = vsub.f32 1.0, %v3785_v0  ;;  %7967 = vpow2.f32 %v3952_v7 }
0x1154   : > { %v3811_v34 = vor.u32 1.1754944e-38, %v3810_v1  ;;  %vm3809_vm0 = vcmp.eq.f32.partialorder %v3808_v61, 8.507059e+37 }
0x1155   : > { %v3787_v45 = vmul.f32 %v7964_v8, %v3786_v52 }
0x1157   : > { %v3788_v20 = vadd.f32 %v7964_v8, %v3787_v45 }
0x1158   : > { %v7966_v42 = vpop.eup %7965 }
0x1159   : > { %v3800_v35 = vmul.f32 %v7966_v42, %v3783_v48  ;;  %vm3805_vm11 = vweird.f32 %v7966_v42  ;;  %v3792_v18 = vsel %vm3791_vm10, %v7964_v8, %v3788_v20  ;;  %v10107_v2 = vpop.eup %7967  ;;  %v3956_v32 = vpop.xlane.xlu0 %3955 }
0x115a   : > { %v3919_v57 = vpop.f32.mrf.mxu3  ;;  %vm3806_vm15 = vmor %vm3804_vm9, %vm3805_vm11  ;;  %v3797_v33 = vsel %vm3794_vm12, %v3796_v49, %v3792_v18  ;;  %v3957_v4 = vsel %vm1620_vm14, %v10107_v2, 0.0  ;;  %vm3965_vm4 = vweird.f32 %v3956_v32  ;;  %v3971_v39 = vand.u32 2147483648, %v3956_v32 }
0x115b   : > { %v3801_v44 = vsub.f32 1.0, %v3800_v35  ;;  %3924 = vst.msk [vmem:[#allocation6 + $0x10] sm:$0xff] %vm1597_vm13, %v3919_v57  ;;  %v3798_v28 = vmul.f32 %v10050_v3, %v3797_v33 }
0x115d   : > { %v3802_v22 = vmul.f32 %v7966_v42, %v3801_v44 }
0x115f   : > { %v3803_v5 = vadd.f32 %v7966_v42, %v3802_v22  ;;  %v3972_v22 = vor.u32 1.1754944e-38, %v3971_v39 }
0x1161   : > { %v3807_v6 = vsel %vm3806_vm15, %v7966_v42, %v3803_v5  ;;  %v10116_v11 = vpop.xlane.xlu0 %4142  ;;  %v3969_v42 = vand.u32 2147483647, %v3956_v32 }
0x1162   : > { %v3921_v29 = vpop.f32.mrf.mxu3  ;;  %v3812_v36 = vsel %vm3809_vm0, %v3811_v34, %v3807_v6  ;;  %vm4164_vm12 = vweird.f32 %v10116_v11 }
0x1163   : > { %3925 = vst.msk [vmem:[#allocation6 + $0x18] sm:$0xff] %vm1597_vm13, %v3921_v29  ;;  %v3813_v41 = vmul.f32 %v10060_v47, %v3812_v36  ;;  %v4134_v47 = vmul.f32 1.442695, %v4132_v31  ;;  %vm10127_vm7 = vcmp.eq.f32.partialorder %v3969_v42, 8.507059e+37 }
0x1165   : > { %v3814_v40 = vpack.c.bf16 %v3813_v41, %v3798_v28  ;;  %7969 = vpow2.f32 %v4134_v47 }
0x1166   : > { %7971 = vrcp.f32 %v3956_v32 }
0x1167   : > { %7028 = vmatmul.msk.bf16.vlgmr.msra.gmra.mxu2 %vm1620_vm14, %v3814_v40 }
0x1168   : > { %4185 = vmatpush.bf16.msra.mxu2 %v9794_v17 }
0x116a   : > { %v10100_v21 = vpop.f32.mrf.mxu3 }
0x116b   : > { %v10112_v59 = vpop.eup %7969 }
0x116c   : > { %v4138_v51 = vsel %vm1620_vm14, %v10112_v59, 0.0  ;;  %v7972_v14 = vpop.eup %7971 }
0x116d   : > { %v3961_v62 = vmul.f32 %v7972_v14, %v3956_v32  ;;  %vm3966_vm5 = vweird.f32 %v7972_v14 }
0x116e   : > { %vm10123_vm6 = vmor %vm3965_vm4, %vm3966_vm5 }
0x116f   : > { %v3962_v37 = vsub.f32 1.0, %v3961_v62 }
0x1171   : > { %v3963_v48 = vmul.f32 %v7972_v14, %v3962_v37 }
0x1172   : > { %v10102_v25 = vpop.f32.mrf.mxu3 }
0x1173   : > { %v3964_v20 = vadd.f32 %v7972_v14, %v3963_v48 }
0x1175   : > { %v3968_v6 = vsel %vm10123_vm6, %v7972_v14, %v3964_v20 }
0x1176   : > { %v3973_v40 = vsel %vm10127_vm7, %v3972_v22, %v3968_v6 }
0x117a   : > { %v4300_v63 = vpop.f32.mrf.mxu3 }
0x117b   : > { %v4305_v13 = vmul.f32 0.17677669, %v4300_v63 }
0x117d   : > { %v4307_v3 = vsel %vm1620_vm14, %v4305_v13, -inf }
0x117e   : > { %4308 = vmax.xlane.f32.xlu1 %v4307_v3  ;;  %v3974_v3 = vmul.f32 %v10073_v58, %v3973_v40  ;;  %v4168_v58 = vand.u32 2147483647, %v10116_v11 }
0x1180   : > { %vm4169_vm7 = vcmp.eq.f32.partialorder %v4168_v58, 8.507059e+37 }
0x1182   : > { %v4302_v46 = vpop.f32.mrf.mxu3 }
0x1183   : > { %v4306_v17 = vmul.f32 0.17677669, %v4302_v46 }
0x1185   : > { %v4310_v38 = vsel %vm1620_vm14, %v4306_v17, -inf }
0x1186   : > { %4311 = vmax.xlane.f32.xlu2 %v4310_v38  ;;  %3958 = vadd.xlane.f32.xlu1 %v3957_v4 }
0x118e   : > { %4139 = vadd.xlane.f32.xlu2 %v4138_v51  ;;  %v4170_v51 = vand.u32 2147483648, %v10116_v11 }
0x11f1   : > { %v4309_v56 = vpop.xlane.xlu1 %4308 }
0x11f2   : > { %v4313_v55 = vsub.f32 %v4305_v13, %v4309_v56  ;;  %v11149_v56 = vld [vmem:[#allocation61_spill] sm:$0xff] }
0x11f4   : > { %v4315_v60 = vmul.f32 1.442695, %v4313_v55 }
0x11f6   : > { %7973 = vpow2.f32 %v4315_v60  ;;  %v4171_v60 = vor.u32 1.1754944e-38, %v4170_v51 }
0x11f9   : > { %v3959_v19 = vpop.xlane.xlu1 %3958  ;;  %v4312_v12 = vpop.xlane.xlu2 %4311 }
0x11fa   : > { %7975 = vrcp.f32 %v3959_v19  ;;  %v4314_v23 = vsub.f32 %v4306_v17, %v4312_v12  ;;  %v3986_v18 = vand.u32 2147483648, %v3959_v19  ;;  %v3984_v33 = vand.u32 2147483647, %v3959_v19 }
0x11fb   : > { %7977 = vrcp.f32 %v10116_v11  ;;  %vm3980_vm9 = vweird.f32 %v3959_v19 }
0x11fc   : > { %v10119_v8 = vpop.eup %7973  ;;  %v4317_v0 = vmul.f32 1.442695, %v4314_v23  ;;  %v3987_v41 = vor.u32 1.1754944e-38, %v3986_v18  ;;  %vm3985_vm11 = vcmp.eq.f32.partialorder %v3984_v33, 8.507059e+37 }
0x11fd   : > { %v4319_v52 = vsel %vm1620_vm14, %v10119_v8, 0.0 }
0x11fe   : > { %4320 = vadd.xlane.f32.xlu1 %v4319_v52  ;;  %7979 = vpow2.f32 %v4317_v0  ;;  %v11150_v52 = vld [vmem:[#allocation63_spill] sm:$0xff] }
0x1200   : > { %v7976_v45 = vpop.eup %7975 }
0x1201   : > { %v7978_v35 = vpop.eup %7977  ;;  %v3976_v53 = vmul.f32 %v7976_v45, %v3959_v19  ;;  %v4140_v44 = vpop.xlane.xlu2 %4139  ;;  %vm3981_vm8 = vweird.f32 %v7976_v45 }
0x1202   : > { %7981 = vrcp.f32 %v4140_v44  ;;  %v4160_v49 = vmul.f32 %v7978_v35, %v10116_v11  ;;  %vm3982_vm10 = vmor %vm3980_vm9, %vm3981_vm8  ;;  %vm4165_vm15 = vweird.f32 %v7978_v35  ;;  %v4155_v32 = vand.u32 2147483648, %v4140_v44  ;;  %v11151_v11 = vld [vmem:[#allocation71_spill] sm:$0xff] }
0x1203   : > { %v3977_v57 = vsub.f32 1.0, %v3976_v53  ;;  %vm4166_vm4 = vmor %vm4164_vm12, %vm4165_vm15  ;;  %vm4149_vm5 = vweird.f32 %v4140_v44 }
0x1204   : > { %v10132_v5 = vpop.eup %7979  ;;  %v4161_v27 = vsub.f32 1.0, %v4160_v49  ;;  %v4156_v62 = vor.u32 1.1754944e-38, %v4155_v32 }
0x1205   : > { %v3978_v34 = vmul.f32 %v7976_v45, %v3977_v57  ;;  %v4322_v29 = vsel %vm1620_vm14, %v10132_v5, 0.0 }
0x1206   : > { %4323 = vadd.xlane.f32.xlu2 %v4322_v29  ;;  %v4162_v46 = vmul.f32 %v7978_v35, %v4161_v27 }
0x1207   : > { %v3979_v36 = vadd.f32 %v7976_v45, %v3978_v34 }
0x1208   : > { %v7982_v28 = vpop.eup %7981  ;;  %v4163_v14 = vadd.f32 %v7978_v35, %v4162_v46 }
0x1209   : > { %v4145_v7 = vmul.f32 %v7982_v28, %v4140_v44  ;;  %v3983_v63 = vsel %vm3982_vm10, %v7976_v45, %v3979_v36  ;;  %vm4150_vm0 = vweird.f32 %v7982_v28  ;;  %v11152_v45 = vld [vmem:[#allocation59_spill] sm:$0xff] }
0x120a   : > { %v3988_v13 = vsel %vm3985_vm11, %v3987_v41, %v3983_v63  ;;  %vm4151_vm6 = vmor %vm4149_vm5, %vm4150_vm0  ;;  %v4167_v37 = vsel %vm4166_vm4, %v7978_v35, %v4163_v14 }
0x120b   : > { %v4146_v31 = vsub.f32 1.0, %v4145_v7  ;;  %v3989_v47 = vmul.f32 %v10107_v2, %v3988_v13  ;;  %v4153_v2 = vand.u32 2147483647, %v4140_v44  ;;  %v4172_v12 = vsel %vm4169_vm7, %v4171_v60, %v4167_v37  ;;  %v10154_v44 = vpop.f32.mrf.mxu2 }
0x120c   : > { %v4173_v48 = vmul.f32 %v10079_v16, %v4172_v12 }
0x120d   : > { %v4147_v17 = vmul.f32 %v7982_v28, %v4146_v31  ;;  %v3990_v38 = vpack.c.bf16 %v3989_v47, %v3974_v3  ;;  %vm4154_vm8 = vcmp.eq.f32.partialorder %v4153_v2, 8.507059e+37  ;;  %v11153_v3 = vld [vmem:[#allocation72_spill] sm:$0xff] }
0x120f   : > { %v4148_v4 = vadd.f32 %v7982_v28, %v4147_v17  ;;  %7032 = vmatmul.msk.bf16.vlgmr.msrb.gmra.mxu2 %vm1620_vm14, %v3990_v38  ;;  %v11154_v17 = vld [vmem:[#allocation73_spill] sm:$0xff] }
0x1210   : > { %4382 = vmatpush.bf16.xpose.msrb.mxu2 %v11149_v56  ;;  %v11155_v38 = vld [vmem:[#allocation69_spill] sm:$0xff] }
0x1211   : > { %v4152_v55 = vsel %vm4151_vm6, %v7982_v28, %v4148_v4 }
0x1212   : > { %v4157_v19 = vsel %vm4154_vm8, %v4156_v62, %v4152_v55 }
0x1213   : > { %v4158_v23 = vmul.f32 %v10112_v59, %v4157_v19  ;;  %v10156_v40 = vpop.f32.mrf.mxu2 }
0x1215   : > { %v4174_v0 = vpack.c.bf16 %v4173_v48, %v4158_v23 }
0x121f   : > { %7036 = vmatmul.msk.bf16.vlgmr.msra.gmra.mxu2 %vm1620_vm14, %v4174_v0 }
0x1220   : > { %4542 = vmatpush.bf16.msra.mxu2 %v11150_v52 }
0x122f   : > { %7071 = vmatmul.msk.bf16.vlgmr.msrb.gmra.mxu2 %vm1597_vm13, %v11151_v11 }
0x1230   : > { %4658 = vmatpush.bf16.xpose.msrb.mxu2 %v11152_v45 }
0x1271   : > { %v4321_v42 = vpop.xlane.xlu1 %4320 }
0x1272   : > { %7983 = vrcp.f32 %v4321_v42  ;;  %v4336_v61 = vand.u32 2147483648, %v4321_v42  ;;  %vm4330_vm10 = vweird.f32 %v4321_v42  ;;  %v4334_v22 = vand.u32 2147483647, %v4321_v42 }
0x1274   : > { %v4337_v29 = vor.u32 1.1754944e-38, %v4336_v61  ;;  %vm4335_vm15 = vcmp.eq.f32.partialorder %v4334_v22, 8.507059e+37 }
0x1278   : > { %v7984_v39 = vpop.eup %7983 }
0x1279   : > { %v4326_v35 = vmul.f32 %v7984_v39, %v4321_v42  ;;  %v4324_v20 = vpop.xlane.xlu2 %4323  ;;  %vm4331_vm9 = vweird.f32 %v7984_v39 }
0x127a   : > { %7985 = vrcp.f32 %v4324_v20  ;;  %vm4332_vm11 = vmor %vm4330_vm10, %vm4331_vm9  ;;  %v4351_v18 = vand.u32 2147483648, %v4324_v20  ;;  %v4349_v6 = vand.u32 2147483647, %v4324_v20  ;;  %vm4345_vm0 = vweird.f32 %v4324_v20 }
0x127b   : > { %v4327_v53 = vsub.f32 1.0, %v4326_v35 }
0x127c   : > { %v4352_v28 = vor.u32 1.1754944e-38, %v4351_v18  ;;  %vm4350_vm5 = vcmp.eq.f32.partialorder %v4349_v6, 8.507059e+37 }
0x127d   : > { %v4328_v59 = vmul.f32 %v7984_v39, %v4327_v53 }
0x127f   : > { %v4329_v1 = vadd.f32 %v7984_v39, %v4328_v59 }
0x1280   : > { %v7986_v16 = vpop.eup %7985 }
0x1281   : > { %v4341_v57 = vmul.f32 %v7986_v16, %v4324_v20  ;;  %v4333_v34 = vsel %vm4332_vm11, %v7984_v39, %v4329_v1  ;;  %vm4346_vm12 = vweird.f32 %v7986_v16 }
0x1282   : > { %vm4347_vm4 = vmor %vm4345_vm0, %vm4346_vm12  ;;  %v4338_v41 = vsel %vm4335_vm15, %v4337_v29, %v4333_v34 }
0x1283   : > { %v4342_v49 = vsub.f32 1.0, %v4341_v57  ;;  %v4339_v63 = vmul.f32 %v10119_v8, %v4338_v41 }
0x1285   : > { %v4343_v33 = vmul.f32 %v7986_v16, %v4342_v49 }
0x1287   : > { %v4344_v36 = vadd.f32 %v7986_v16, %v4343_v33 }
0x1289   : > { %v4348_v27 = vsel %vm4347_vm4, %v7986_v16, %v4344_v36 }
0x128a   : > { %v4353_v7 = vsel %vm4350_vm5, %v4352_v28, %v4348_v27 }
0x128b   : > { %v4354_v13 = vmul.f32 %v10132_v5, %v4353_v7 }
0x128d   : > { %v4355_v31 = vpack.c.bf16 %v4354_v13, %v4339_v63 }
0x128f   : > { %7070 = vmatmul.msk.bf16.vlgmr.msra.gmra.mxu0 %vm1620_vm14, %v4355_v31 }
0x1290   : > { %4634 = vmatpush.bf16.msra.mxu0 %v11153_v3 }
0x1292   : > { %v10162_v47 = vpop.f32.mrf.mxu2 }
0x129a   : > { %v10164_v46 = vpop.f32.mrf.mxu2 }
0x129f   : > { %7073 = vmatmul.msk.bf16.vlgmr.msrb.gmra.mxu0 %vm1597_vm13, %v11154_v17 }
0x12a0   : > { %4810 = vmatpush.bf16.msrb.mxu0 %v11155_v38 }
0x12a2   : > { %v10169_v4 = vpop.f32.mrf.mxu2 }
0x12aa   : > { %v10171_v51 = vpop.f32.mrf.mxu2 }
0x12b2   : > { %v4384_v8 = vpop.f32.mrf.mxu2 }
0x12b3   : > { %v4389_v5 = vmul.f32 0.17677669, %v4384_v8 }
0x12b5   : > { %v4391_v32 = vsel %vm1620_vm14, %v4389_v5, -inf }
0x12b6   : > { %4392 = vmax.xlane.f32.xlu0 %v4391_v32 }
0x12ba   : > { %v4386_v56 = vpop.f32.mrf.mxu2 }
0x12bb   : > { %v4390_v14 = vmul.f32 0.17677669, %v4386_v56 }
0x12bd   : > { %v4394_v58 = vsel %vm1620_vm14, %v4390_v14, -inf }
0x12be   : > { %4395 = vmax.xlane.f32.xlu1 %v4394_v58 }
0x130c   : > { %v10175_v2 = vpop.f32.mrf.mxu0 }
0x1314   : > { %v10177_v55 = vpop.f32.mrf.mxu0 }
0x131c   : > { %v4476_v60 = vpop.f32.mrf.mxu0 }
0x131d   : > { %v4481_v62 = vmul.f32 0.17677669, %v4476_v60 }
0x131f   : > { %v4483_v37 = vsel %vm1620_vm14, %v4481_v62, -inf }
0x1320   : > { %4484 = vmax.xlane.f32.xlu2 %v4483_v37 }
0x1324   : > { %v4478_v19 = vpop.f32.mrf.mxu0 }
0x1325   : > { %v4482_v12 = vmul.f32 0.17677669, %v4478_v19 }
0x1327   : > { %v4486_v23 = vsel %vm1620_vm14, %v4482_v12, -inf }
0x1328   : > { %4487 = vmax.xlane.f32.xlu0 %v4486_v23 }
0x1329   : > { %v4393_v48 = vpop.xlane.xlu0 %4392 }
0x132a   : > { %v4397_v0 = vsub.f32 %v4389_v5, %v4393_v48  ;;  %v11156_v48 = vld [vmem:[#allocation64_spill] sm:$0xff] }
0x132c   : > { %v4399_v52 = vmul.f32 1.442695, %v4397_v0  ;;  %v11157_v0 = vld [vmem:[#allocation74_spill] sm:$0xff] }
0x132e   : > { %7987 = vpow2.f32 %v4399_v52  ;;  %v11158_v52 = vld [vmem:[#allocation65_spill] sm:$0xff] }
0x1331   : > { %v4396_v11 = vpop.xlane.xlu1 %4395 }
0x1332   : > { %v4398_v45 = vsub.f32 %v4390_v14, %v4396_v11  ;;  %v11159_v11 = vld [vmem:[#allocation75_spill] sm:$0xff] }
0x1334   : > { %v7988_v42 = vpop.eup %7987  ;;  %v4401_v39 = vmul.f32 1.442695, %v4398_v45 }
0x1335   : > { %v4403_v35 = vsel %vm1620_vm14, %v7988_v42, 0.0 }
0x1336   : > { %7989 = vpow2.f32 %v4401_v39  ;;  %4404 = vadd.xlane.f32.xlu1 %v4403_v35 }
0x133c   : > { %v7990_v20 = vpop.eup %7989 }
0x133d   : > { %v4406_v53 = vsel %vm1620_vm14, %v7990_v20, 0.0 }
0x133e   : > { %4407 = vadd.xlane.f32.xlu2 %v4406_v53 }
0x1393   : > { %v4485_v59 = vpop.xlane.xlu2 %4484 }
0x1394   : > { %v4489_v16 = vsub.f32 %v4481_v62, %v4485_v59 }
0x1396   : > { %v4491_v1 = vmul.f32 1.442695, %v4489_v16 }
0x1398   : > { %7991 = vpow2.f32 %v4491_v1 }
0x139b   : > { %v4488_v57 = vpop.xlane.xlu0 %4487 }
0x139c   : > { %v4490_v61 = vsub.f32 %v4482_v12, %v4488_v57 }
0x139e   : > { %v10183_v22 = vpop.eup %7991  ;;  %v4493_v49 = vmul.f32 1.442695, %v4490_v61 }
0x139f   : > { %v4495_v18 = vsel %vm1620_vm14, %v10183_v22, 0.0 }
0x13a0   : > { %7993 = vpow2.f32 %v4493_v49  ;;  %4496 = vadd.xlane.f32.xlu0 %v4495_v18 }
0x13a6   : > { %v10187_v34 = vpop.eup %7993 }
0x13a7   : > { %v4498_v33 = vsel %vm1620_vm14, %v10187_v34, 0.0 }
0x13a8   : > { %4499 = vadd.xlane.f32.xlu1 %v4498_v33 }
0x13a9   : > { %v4405_v6 = vpop.xlane.xlu1 %4404 }
0x13aa   : > { %7995 = vrcp.f32 %v4405_v6  ;;  %v4420_v31 = vand.u32 2147483648, %v4405_v6  ;;  %vm4414_vm7 = vweird.f32 %v4405_v6  ;;  %v4418_v3 = vand.u32 2147483647, %v4405_v6 }
0x13ac   : > { %v4421_v56 = vor.u32 1.1754944e-38, %v4420_v31  ;;  %vm4419_vm10 = vcmp.eq.f32.partialorder %v4418_v3, 8.507059e+37  ;;  %v11160_v3 = vld [vmem:[#allocation60_spill] sm:$0xff] }
0x13b0   : > { %v7996_v29 = vpop.eup %7995 }
0x13b1   : > { %v4410_v36 = vmul.f32 %v7996_v29, %v4405_v6  ;;  %v4408_v28 = vpop.xlane.xlu2 %4407  ;;  %vm4415_vm6 = vweird.f32 %v7996_v29 }
0x13b2   : > { %7997 = vrcp.f32 %v4408_v28  ;;  %vm4416_vm8 = vmor %vm4414_vm7, %vm4415_vm6  ;;  %v4435_v38 = vand.u32 2147483648, %v4408_v28  ;;  %v4433_v32 = vand.u32 2147483647, %v4408_v28  ;;  %vm4429_vm11 = vweird.f32 %v4408_v28 }
0x13b3   : > { %v4411_v41 = vsub.f32 1.0, %v4410_v36 }
0x13b4   : > { %v4436_v58 = vor.u32 1.1754944e-38, %v4435_v38  ;;  %vm4434_vm15 = vcmp.eq.f32.partialorder %v4433_v32, 8.507059e+37 }
0x13b5   : > { %v4412_v27 = vmul.f32 %v7996_v29, %v4411_v41 }
0x13b7   : > { %v4413_v63 = vadd.f32 %v7996_v29, %v4412_v27 }
0x13b8   : > { %v7998_v7 = vpop.eup %7997 }
0x13b9   : > { %v4425_v13 = vmul.f32 %v7998_v7, %v4408_v28  ;;  %v4417_v8 = vsel %vm4416_vm8, %v7996_v29, %v4413_v63  ;;  %vm4430_vm9 = vweird.f32 %v7998_v7 }
0x13ba   : > { %vm4431_vm12 = vmor %vm4429_vm11, %vm4430_vm9  ;;  %v4422_v60 = vsel %vm4419_vm10, %v4421_v56, %v4417_v8 }
0x13bb   : > { %v4426_v17 = vsub.f32 1.0, %v4425_v13  ;;  %v4423_v19 = vmul.f32 %v7988_v42, %v4422_v60 }
0x13bd   : > { %v4427_v5 = vmul.f32 %v7998_v7, %v4426_v17 }
0x13bf   : > { %v4428_v14 = vadd.f32 %v7998_v7, %v4427_v5 }
0x13c1   : > { %v4432_v62 = vsel %vm4431_vm12, %v7998_v7, %v4428_v14 }
0x13c2   : > { %v4437_v37 = vsel %vm4434_vm15, %v4436_v58, %v4432_v62 }
0x13c3   : > { %v4438_v12 = vmul.f32 %v7990_v20, %v4437_v37 }
0x13c5   : > { %v4439_v23 = vpack.c.bf16 %v4438_v12, %v4423_v19 }
0x13c7   : > { %7072 = vmatmul.msk.bf16.vlgmr.msrb.gmra.mxu3 %vm1620_vm14, %v4439_v23 }
0x13c8   : > { %4742 = vmatpush.bf16.xpose.msrb.mxu3 %v11156_v48 }
0x13d7   : > { %7075 = vmatmul.msk.bf16.vlgmr.msra.gmra.mxu3 %vm1597_vm13, %v11157_v0 }
0x13d8   : > { %4926 = vmatpush.bf16.xpose.msra.mxu3 %v11158_v52 }
0x13e7   : > { %7079 = vmatmul.msk.bf16.vlgmr.msrb.gmra.mxu3 %vm1597_vm13, %v11159_v11 }
0x13f7   : > { %7083 = vmatmul.msk.bf16.vlgmr.msra.gmra.mxu3 %vm1597_vm13, %v9645_v10 }
0x1413   : > { %v4497_v45 = vpop.xlane.xlu0 %4496 }
0x1414   : > { %7999 = vrcp.f32 %v4497_v45  ;;  %v4512_v57 = vand.u32 2147483648, %v4497_v45  ;;  %vm4506_vm4 = vweird.f32 %v4497_v45  ;;  %v4510_v61 = vand.u32 2147483647, %v4497_v45 }
0x1416   : > { %v4513_v29 = vor.u32 1.1754944e-38, %v4512_v57  ;;  %vm4511_vm7 = vcmp.eq.f32.partialorder %v4510_v61, 8.507059e+37 }
0x141a   : > { %v8000_v42 = vpop.eup %7999 }
0x141b   : > { %v4502_v39 = vmul.f32 %v8000_v42, %v4497_v45  ;;  %v4500_v35 = vpop.xlane.xlu1 %4499  ;;  %vm4507_vm0 = vweird.f32 %v8000_v42 }
0x141c   : > { %8001 = vrcp.f32 %v4500_v35  ;;  %vm4508_vm5 = vmor %vm4506_vm4, %vm4507_vm0  ;;  %v4527_v18 = vand.u32 2147483648, %v4500_v35  ;;  %v4525_v6 = vand.u32 2147483647, %v4500_v35  ;;  %vm4521_vm8 = vweird.f32 %v4500_v35 }
0x141d   : > { %v4503_v20 = vsub.f32 1.0, %v4502_v39 }
0x141e   : > { %v4528_v28 = vor.u32 1.1754944e-38, %v4527_v18  ;;  %vm4526_vm10 = vcmp.eq.f32.partialorder %v4525_v6, 8.507059e+37 }
0x141f   : > { %v4504_v53 = vmul.f32 %v8000_v42, %v4503_v20 }
0x1421   : > { %v4505_v16 = vadd.f32 %v8000_v42, %v4504_v53 }
0x1422   : > { %v8002_v59 = vpop.eup %8001 }
0x1423   : > { %v4517_v1 = vmul.f32 %v8002_v59, %v4500_v35  ;;  %v4509_v33 = vsel %vm4508_vm5, %v8000_v42, %v4505_v16  ;;  %vm4522_vm6 = vweird.f32 %v8002_v59 }
0x1424   : > { %vm4523_vm9 = vmor %vm4521_vm8, %vm4522_vm6  ;;  %v4514_v41 = vsel %vm4511_vm7, %v4513_v29, %v4509_v33 }
0x1425   : > { %v4518_v49 = vsub.f32 1.0, %v4517_v1  ;;  %v4515_v63 = vmul.f32 %v10183_v22, %v4514_v41 }
0x1427   : > { %v4519_v10 = vmul.f32 %v8002_v59, %v4518_v49 }
0x1429   : > { %v4520_v36 = vadd.f32 %v8002_v59, %v4519_v10 }
0x142b   : > { %v4524_v27 = vsel %vm4523_vm9, %v8002_v59, %v4520_v36 }
0x142c   : > { %v4529_v7 = vsel %vm4526_vm10, %v4528_v28, %v4524_v27 }
0x142d   : > { %v4530_v13 = vmul.f32 %v10187_v34, %v4529_v7 }
0x142f   : > { %v4531_v31 = vpack.c.bf16 %v4530_v13, %v4515_v63  ;;  %v7520_v13 = vld [vmem:[%s8921_s2 + $0x38] sm:$0xff] }
0x1430   : > { %4272 = vmatpush.bf16.msrb.mxu1 %v7520_v13 }
0x1431   : > { %7074 = vmatmul.msk.bf16.vlgmr.msra.gmra.mxu2 %vm1620_vm14, %v4531_v31 }
0x1432   : > { %4834 = vmatpush.bf16.xpose.msra.mxu2 %v11160_v3  ;;  %v7519_v3 = vld [vmem:[%s8921_s2 + $0x30] sm:$0xff] }
0x1434   : > { %4273 = vmatpush.bf16.msrb.mxu1 %v7519_v3 }
0x1441   : > { %7077 = vmatmul.msk.bf16.vlgmr.msrb.gmra.mxu2 %vm1597_vm13, %v9262_v30 }
0x144a   : > { %v10206_v17 = vpop.f32.mrf.mxu3 }
0x1451   : > { %7081 = vmatmul.msk.bf16.vlgmr.msra.gmra.mxu2 %vm1597_vm13, %v9651_v50 }
0x1452   : > { %v10208_v38 = vpop.f32.mrf.mxu3 }
0x145a   : > { %v4568_v8 = vpop.f32.mrf.mxu3 }
0x145b   : > { %v4573_v5 = vmul.f32 0.17677669, %v4568_v8 }
0x145d   : > { %v4575_v22 = vsel %vm1620_vm14, %v4573_v5, -inf }
0x145e   : > { %4576 = vmax.xlane.f32.xlu2 %v4575_v22 }
0x1462   : > { %v4570_v34 = vpop.f32.mrf.mxu3 }
0x1463   : > { %v10213_v32 = vmul.f32 0.17677669, %v4570_v34  ;;  %v7517_v34 = vld [vmem:[%s8921_s2 + $0x20] sm:$0xff] }
0x1465   : > { %v4578_v56 = vsel %vm1620_vm14, %v10213_v32, -inf }
0x1466   : > { %4579 = vmax.xlane.f32.xlu0 %v4578_v56  ;;  %v7515_v56 = vld [vmem:[%s8921_s2 + $0x10] sm:$0xff] }
0x146a   : > { %v4744_v30 = vpop.f32.mrf.mxu3 }
0x146b   : > { %v10217_v14 = vmul.f32 0.17677669, %v4744_v30  ;;  %v7514_v30 = vld [vmem:[%s8921_s2 + $0x8] sm:$0xff] }
0x146d   : > { %v4751_v58 = vsel %vm1620_vm14, %v10217_v14, -inf }
0x146e   : > { %4752 = vmax.xlane.f32.xlu0 %v4751_v58 }
0x1472   : > { %v4746_v50 = vpop.f32.mrf.mxu3 }
0x1473   : > { %v10221_v60 = vmul.f32 0.17677669, %v4746_v50 }
0x1475   : > { %v4754_v62 = vsel %vm1620_vm14, %v10221_v60, -inf }
0x1476   : > { %4755 = vmax.xlane.f32.xlu1 %v4754_v62 }
0x147a   : > { %v4928_v37 = vpop.f32.mrf.mxu3 }
0x147b   : > { %v10225_v19 = vmul.f32 0.17677669, %v4928_v37 }
0x147d   : > { %v4935_v12 = vsel %vm1620_vm14, %v10225_v19, -inf }
0x147e   : > { %4936 = vmax.xlane.f32.xlu1 %v4935_v12 }
0x1482   : > { %v4930_v23 = vpop.f32.mrf.mxu3  ;;  %3650 = vrot.lane.b32.xlu0 %v10086_v43, %s8618_s21 }
0x1483   : > { %v10231_v48 = vmul.f32 0.17677669, %v4930_v23 }
0x1485   : > { %v4938_v0 = vsel %vm1620_vm14, %v10231_v48, -inf }
0x1486   : > { %4939 = vmax.xlane.f32.xlu2 %v4938_v0 }
0x148a   : > { %3744 = vrot.lane.b32.xlu0 %v10092_v9, %s8619_s24 }
0x1497   : > { %3652 = vrot.lane.b32.xlu1 %v10088_v26, %s8618_s21 }
0x149e   : > { %3742 = vrot.lane.b32.xlu2 %v10090_v24, %s8619_s24 }
0x14b4   : > { %v10241_v52 = vpop.f32.mrf.mxu2 }
0x14bc   : > { %v10243_v11 = vpop.f32.mrf.mxu2 }
0x14c4   : > { %v4660_v43 = vpop.f32.mrf.mxu2 }
0x14c5   : > { %v10245_v45 = vmul.f32 0.17677669, %v4660_v43 }
0x14c7   : > { %v4667_v42 = vsel %vm1620_vm14, %v10245_v45, -inf }
0x14c8   : > { %4668 = vmax.xlane.f32.xlu1 %v4667_v42 }
0x14cc   : > { %v4662_v39 = vpop.f32.mrf.mxu2 }
0x14cd   : > { %v10249_v35 = vmul.f32 0.17677669, %v4662_v39 }
0x14cf   : > { %v4670_v26 = vsel %vm1620_vm14, %v10249_v35, -inf }
0x14d0   : > { %4671 = vmax.xlane.f32.xlu2 %v4670_v26 }
0x14d1   : > { %v4577_v9 = vpop.xlane.xlu2 %4576 }
0x14d2   : > { %v4581_v24 = vsub.f32 %v4573_v5, %v4577_v9  ;;  %v7518_v5 = vld [vmem:[%s8921_s2 + $0x28] sm:$0xff] }
0x14d3   : > { %4274 = vmatpush.bf16.msrb.mxu1 %v7518_v5 }
0x14d4   : > { %v4583_v20 = vmul.f32 1.442695, %v4581_v24  ;;  %v4836_v53 = vpop.f32.mrf.mxu2 }
0x14d6   : > { %8003 = vpow2.f32 %v4583_v20 }
0x14d7   : > { %4275 = vmatpush.bf16.msrb.mxu1 %v7517_v34 }
0x14d9   : > { %v4580_v61 = vpop.xlane.xlu0 %4579 }
0x14dc   : > { %v10253_v59 = vpop.eup %8003  ;;  %v4838_v1 = vpop.f32.mrf.mxu2 }
0x14dd   : > { %v4587_v16 = vsel %vm1620_vm14, %v10253_v59, 0.0  ;;  %v10257_v57 = vmul.f32 0.17677669, %v4838_v1 }
0x14de   : > { %4588 = vadd.xlane.f32.xlu0 %v4587_v16 }
0x14df   : > { %v4846_v49 = vsel %vm1620_vm14, %v10257_v57, -inf }
0x14e1   : > { %3836 = vrot.lane.b32.xlu1 %v10156_v40, %s8620_s29  ;;  %v4753_v18 = vpop.xlane.xlu0 %4752 }
0x14e2   : > { %v4757_v36 = vsub.f32 %v10217_v14, %v4753_v18  ;;  %v7513_v14 = vld [vmem:[%s8921_s2] sm:$0xff] }
0x14e4   : > { %v4759_v28 = vmul.f32 1.442695, %v4757_v36 }
0x14e6   : > { %4847 = vmax.xlane.f32.xlu0 %v4846_v49 }
0x14e8   : > { %3834 = vrot.lane.b32.xlu2 %v10154_v44, %s8620_s29 }
0x14e9   : > { %4010 = vrot.lane.b32.xlu1 %v10162_v47, %s8618_s21  ;;  %v4756_v10 = vpop.xlane.xlu1 %4755  ;;  %v4582_v47 = vsub.f32 %v10213_v32, %v4580_v61  ;;  %v7516_v32 = vld [vmem:[%s8921_s2 + $0x18] sm:$0xff] }
0x14ea   : > { %4276 = vmatpush.bf16.msrb.mxu1 %v7516_v32 }
0x14ee   : > { %4277 = vmatpush.bf16.msrb.mxu1 %v7515_v56 }
0x14f1   : > { %4012 = vrot.lane.b32.xlu1 %v10164_v46, %s8618_s21  ;;  %v4937_v44 = vpop.xlane.xlu1 %4936 }
0x14f2   : > { %4278 = vmatpush.bf16.msrb.mxu1 %v7514_v30  ;;  %v4941_v0 = vsub.f32 %v10225_v19, %v4937_v44  ;;  %v11162_v44 = vld [vmem:[#allocation66_spill] sm:$0xff] }
0x14f4   : > { %v3651_v33 = vpop.permute.xlu0 %3650  ;;  %v4943_v39 = vmul.f32 1.442695, %v4941_v0 }
0x14f5   : > { %3656 = vst.msk [vmem:[#allocation6] sm:$0xff] %vm1798_vm1, %v3651_v33 }
0x14f6   : > { %4279 = vmatpush.bf16.msrb.mxu1 %v7513_v14 }
0x14f9   : > { %v10270_v6 = vpop.xlane.xlu2 %4939  ;;  %4102 = vrot.lane.b32.xlu1 %v10100_v21, %s8619_s24  ;;  %v4585_v21 = vmul.f32 1.442695, %v4582_v47 }
0x14fa   : > { %4196 = vrot.lane.b32.xlu0 %v10171_v51, %s8620_s29  ;;  %v10284_v51 = vmul.f32 0.17677669, %v4836_v53  ;;  %v4942_v61 = vsub.f32 %v10231_v48, %v10270_v6 }
0x14fb   : > { %8005 = vpow2.f32 %v4585_v21 }
0x14fc   : > { %v3745_v29 = vpop.permute.xlu0 %3744  ;;  %8007 = vpow2.f32 %v4759_v28 }
0x1501   : > { %v3743_v40 = vpop.permute.xlu2 %3742  ;;  %4104 = vrot.lane.b32.xlu1 %v10102_v25, %s8619_s24  ;;  %v4843_v25 = vsel %vm1620_vm14, %v10284_v51, -inf  ;;  %v10289_v41 = vpop.eup %8005 }
0x1502   : > { %3748 = vst.msk [vmem:[#allocation6] sm:$0xff] %vm1904_vm2, %v3743_v40  ;;  %v4590_v27 = vsel %vm1620_vm14, %v10289_v41, 0.0  ;;  %v10294_v63 = vpop.eup %8007 }
0x1503   : > { %v4763_v31 = vsel %vm1620_vm14, %v10294_v63, 0.0 }
0x1509   : > { %v3653_v46 = vpop.permute.xlu1 %3652  ;;  %4194 = vrot.lane.b32.xlu1 %v10169_v4, %s8620_s29  ;;  %v4758_v4 = vsub.f32 %v10221_v60, %v4756_v10  ;;  %v11161_v60 = vld [vmem:[#allocation58_spill] sm:$0xff] }
0x150a   : > { %3657 = vst.msk [vmem:[#allocation6 + $0x8] sm:$0xff] %vm1798_vm1, %v3653_v46  ;;  %4726 = vmatpush.bf16.msra.mxu1 %v11161_v60 }
0x150b   : > { %3749 = vst.msk [vmem:[#allocation6 + $0x8] sm:$0xff] %vm1904_vm2, %v3745_v29  ;;  %v4761_v7 = vmul.f32 1.442695, %v4758_v4 }
0x150d   : > { %8009 = vpow2.f32 %v4761_v7 }
0x1511   : > { %4844 = vmax.xlane.f32.xlu2 %v4843_v25 }
0x1513   : > { %v10300_v8 = vpop.eup %8009 }
0x1514   : > { %v4766_v22 = vsel %vm1620_vm14, %v10300_v8, 0.0 }
0x1519   : > { %4591 = vadd.xlane.f32.xlu2 %v4590_v27 }
0x1521   : > { %4764 = vadd.xlane.f32.xlu2 %v4763_v31 }
0x1529   : > { %4767 = vadd.xlane.f32.xlu2 %v4766_v22 }
0x153b   : > { %v4669_v58 = vpop.xlane.xlu1 %4668 }
0x153c   : > { %v4673_v50 = vsub.f32 %v10245_v45, %v4669_v58 }
0x153e   : > { %v4675_v62 = vmul.f32 1.442695, %v4673_v50 }
0x1540   : > { %8011 = vpow2.f32 %v4675_v62 }
0x1543   : > { %v4672_v37 = vpop.xlane.xlu2 %4671 }
0x1544   : > { %v4674_v12 = vsub.f32 %v10249_v35, %v4672_v37 }
0x1546   : > { %v10313_v23 = vpop.eup %8011  ;;  %v4677_v43 = vmul.f32 1.442695, %v4674_v12 }
0x1547   : > { %v4679_v42 = vsel %vm1620_vm14, %v10313_v23, 0.0 }
0x1548   : > { %8013 = vpow2.f32 %v4677_v43  ;;  %4680 = vadd.xlane.f32.xlu1 %v4679_v42 }
0x1549   : > { %8015 = vpow2.f32 %v4943_v39 }
0x154b   : > { %v3835_v45 = vpop.permute.xlu2 %3834 }
0x154c   : > { %3840 = vst.msk [vmem:[#allocation6] sm:$0xff] %vm2010_vm3, %v3835_v45 }
0x154e   : > { %v10319_v26 = vpop.eup %8013 }
0x154f   : > { %v4682_v35 = vsel %vm1620_vm14, %v10319_v26, 0.0  ;;  %v10325_v20 = vpop.eup %8015 }
0x1550   : > { %4683 = vadd.xlane.f32.xlu2 %v4682_v35  ;;  %v4947_v53 = vsel %vm1620_vm14, %v10325_v20, 0.0 }
0x1551   : > { %v10323_v9 = vpop.xlane.xlu0 %4588 }
0x1552   : > { %v4604_v56 = vand.u32 2147483648, %v10323_v9  ;;  %vm4598_vm12 = vweird.f32 %v10323_v9  ;;  %v4602_v14 = vand.u32 2147483647, %v10323_v9 }
0x1553   : > { %v3837_v19 = vpop.permute.xlu1 %3836  ;;  %v4202_v24 = vld [vmem:[#allocation6] sm:$0xff] }
0x1554   : > { %3841 = vst.msk [vmem:[#allocation6 + $0x8] sm:$0xff] %vm2010_vm3, %v3837_v19  ;;  %v4605_v12 = vor.u32 1.1754944e-38, %v4604_v56  ;;  %vm4603_vm5 = vcmp.eq.f32.partialorder %v4602_v14, 8.507059e+37 }
0x1555   : > { %4373 = vst.msk [vmem:[#allocation6] sm:$0xff] %vm1597_vm13, %v10175_v2  ;;  %v4945_v2 = vmul.f32 1.442695, %v4942_v61 }
0x1558   : > { %4948 = vadd.xlane.f32.xlu2 %v4947_v53 }
0x1559   : > { %v4848_v16 = vpop.xlane.xlu0 %4847 }
0x155a   : > { %v4850_v1 = vsub.f32 %v10257_v57, %v4848_v16 }
0x155b   : > { %v4011_v18 = vpop.permute.xlu1 %4010  ;;  %v4203_v33 = vld [vmem:[#allocation6 + $0x8] sm:$0xff] }
0x155c   : > { %v4853_v49 = vmul.f32 1.442695, %v4850_v1  ;;  %4016 = vst.msk [vmem:[#allocation6 + $0x10] sm:$0xff] %vm1798_vm1, %v4011_v18  ;;  %v4222_v10 = vpack.c.bf16 %v4203_v33, %v4202_v24 }
0x155d   : > { %4374 = vst.msk [vmem:[#allocation6 + $0x8] sm:$0xff] %vm1597_vm13, %v10177_v55 }
0x155e   : > { %8017 = vpow2.f32 %v4853_v49  ;;  %4280 = vmatmul.bf16.vlgmr.msrb.gmra.mxu1 %v4222_v10  ;;  %v11165_v10 = vld [vmem:[#allocation70_spill] sm:$0xff] }
0x155f   : > { %4902 = vmatpush.bf16.msrb.mxu1 %v11162_v44  ;;  %8019 = vpow2.f32 %v4945_v2 }
0x1560   : > { %8021 = vrcp.f32 %v10323_v9 }
0x1561   : > { %4459 = vrot.lane.b32.xlu1 %v10206_v17, %s8618_s21 }
0x1563   : > { %v4013_v48 = vpop.permute.xlu1 %4012 }
0x1564   : > { %v10341_v57 = vpop.eup %8017  ;;  %4017 = vst.msk [vmem:[#allocation6 + $0x18] sm:$0xff] %vm1798_vm1, %v4013_v48 }
0x1565   : > { %v4858_v6 = vsel %vm1620_vm14, %v10341_v57, 0.0  ;;  %v10346_v40 = vpop.eup %8019 }
0x1566   : > { %4859 = vadd.xlane.f32.xlu2 %v4858_v6  ;;  %v4950_v17 = vsel %vm1620_vm14, %v10346_v40, 0.0  ;;  %v8022_v4 = vpop.eup %8021 }
0x1567   : > { %v4594_v7 = vmul.f32 %v8022_v4, %v10323_v9  ;;  %vm4599_vm11 = vweird.f32 %v8022_v4 }
0x1568   : > { %vm10368_vm15 = vmor %vm4598_vm12, %vm4599_vm11 }
0x1569   : > { %4553 = vrot.lane.b32.xlu1 %v10243_v11, %s8619_s24  ;;  %v4595_v31 = vsub.f32 1.0, %v4594_v7 }
0x156b   : > { %v4103_v55 = vpop.permute.xlu1 %4102  ;;  %v4596_v22 = vmul.f32 %v8022_v4, %v4595_v31 }
0x156c   : > { %4108 = vst.msk [vmem:[#allocation6 + $0x10] sm:$0xff] %vm1904_vm2, %v4103_v55  ;;  %v4197_v46 = vpop.permute.xlu0 %4196 }
0x156e   : > { %4951 = vadd.xlane.f32.xlu2 %v4950_v17 }
0x1573   : > { %v4105_v47 = vpop.permute.xlu1 %4104 }
0x1574   : > { %4109 = vst.msk [vmem:[#allocation6 + $0x18] sm:$0xff] %vm1904_vm2, %v4105_v47 }
0x1575   : > { %4201 = vst.msk [vmem:[#allocation6 + $0x18] sm:$0xff] %vm2010_vm3, %v4197_v46 }
0x157b   : > { %v4195_v29 = vpop.permute.xlu1 %4194 }
0x157c   : > { %4200 = vst.msk [vmem:[#allocation6 + $0x10] sm:$0xff] %vm2010_vm3, %v4195_v29  ;;  %v4205_v11 = vld [vmem:[#allocation6 + $0x18] sm:$0xff] }
0x1583   : > { %v4204_v21 = vld [vmem:[#allocation6 + $0x10] sm:$0xff] }
0x1584   : > { %v4845_v36 = vpop.xlane.xlu2 %4844  ;;  %v4223_v25 = vpack.c.bf16 %v4205_v11, %v4204_v21 }
0x1585   : > { %v4849_v28 = vsub.f32 %v10284_v51, %v4845_v36 }
0x1586   : > { %4461 = vrot.lane.b32.xlu2 %v10208_v38, %s8618_s21  ;;  %4285 = vmatmul.bf16.gmra.mxu1 %v4223_v25  ;;  %v4597_v38 = vadd.f32 %v8022_v4, %v4596_v22 }
0x1587   : > { %v4851_v27 = vmul.f32 1.442695, %v4849_v28 }
0x1588   : > { %v4601_v62 = vsel %vm10368_vm15, %v8022_v4, %v4597_v38 }
0x1589   : > { %8023 = vpow2.f32 %v4851_v27  ;;  %v4606_v9 = vsel %vm4603_vm5, %v4605_v12, %v4601_v62 }
0x158a   : > { %v4607_v53 = vmul.f32 %v10253_v59, %v4606_v9 }
0x158c   : > { %v4592_v13 = vpop.xlane.xlu2 %4591 }
0x158d   : > { %8025 = vrcp.f32 %v4592_v13  ;;  %v4619_v60 = vand.u32 2147483648, %v4592_v13  ;;  %v4617_v37 = vand.u32 2147483647, %v4592_v13  ;;  %vm4613_vm4 = vweird.f32 %v4592_v13 }
0x158f   : > { %v10361_v3 = vpop.eup %8023  ;;  %v4620_v39 = vor.u32 1.1754944e-38, %v4619_v60  ;;  %vm4618_vm7 = vcmp.eq.f32.partialorder %v4617_v37, 8.507059e+37 }
0x1590   : > { %v4855_v5 = vsel %vm1620_vm14, %v10361_v3, 0.0 }
0x1591   : > { %4856 = vadd.xlane.f32.xlu0 %v4855_v5 }
0x1593   : > { %v8026_v51 = vpop.eup %8025 }
0x1594   : > { %v4609_v34 = vmul.f32 %v8026_v51, %v4592_v13  ;;  %v4765_v32 = vpop.xlane.xlu2 %4764  ;;  %vm4614_vm0 = vweird.f32 %v8026_v51 }
0x1595   : > { %8027 = vrcp.f32 %v4765_v32  ;;  %vm4615_vm6 = vmor %vm4613_vm4, %vm4614_vm0  ;;  %v4780_v2 = vand.u32 2147483648, %v4765_v32  ;;  %vm4774_vm9 = vweird.f32 %v4765_v32  ;;  %v4778_v44 = vand.u32 2147483647, %v4765_v32 }
0x1596   : > { %v4610_v30 = vsub.f32 1.0, %v4609_v34 }
0x1597   : > { %v4781_v17 = vor.u32 1.1754944e-38, %v4780_v2  ;;  %vm4779_vm12 = vcmp.eq.f32.partialorder %v4778_v44, 8.507059e+37 }
0x1598   : > { %v4611_v50 = vmul.f32 %v8026_v51, %v4610_v30 }
0x159a   : > { %v4612_v0 = vadd.f32 %v8026_v51, %v4611_v50 }
0x159b   : > { %v8028_v43 = vpop.eup %8027 }
0x159c   : > { %v4616_v42 = vsel %vm4615_vm6, %v8026_v51, %v4612_v0  ;;  %v4770_v45 = vmul.f32 %v8028_v43, %v4765_v32  ;;  %v4768_v35 = vpop.xlane.xlu2 %4767  ;;  %vm4775_vm8 = vweird.f32 %v8028_v43 }
0x159d   : > { %8029 = vrcp.f32 %v4768_v35  ;;  %v4621_v24 = vsel %vm4618_vm7, %v4620_v39, %v4616_v42  ;;  %vm4776_vm10 = vmor %vm4774_vm9, %vm4775_vm8  ;;  %v4795_v59 = vand.u32 2147483648, %v4768_v35  ;;  %v4793_v55 = vand.u32 2147483647, %v4768_v35 }
0x159e   : > { %v4771_v19 = vsub.f32 1.0, %v4770_v45  ;;  %v4622_v16 = vmul.f32 %v10289_v41, %v4621_v24  ;;  %vm4789_vm15 = vweird.f32 %v4768_v35  ;;  %v10400_v24 = vstv %s5101_s15 }
0x159f   : > { %v4796_v46 = vor.u32 1.1754944e-38, %v4795_v59  ;;  %vm4794_vm4 = vcmp.eq.f32.partialorder %v4793_v55, 8.507059e+37 }
0x15a0   : > { %v4772_v1 = vmul.f32 %v8028_v43, %v4771_v19  ;;  %v4623_v61 = vpack.c.bf16 %v4622_v16, %v4607_v53  ;;  %v5108_v19 = vld [vmem:[#allocation4] sm:$0xff]  ;;  %v10402_v16 = vstv %s5103_s8 }
0x15a2   : > { %7076 = vmatmul.msk.bf16.vlgmr.msra.gmra.mxu0 %vm1620_vm14, %v4623_v61  ;;  %v4773_v18 = vadd.f32 %v8028_v43, %v4772_v1 }
0x15a3   : > { %v8030_v49 = vpop.eup %8029  ;;  %4994 = vmatpush.bf16.msra.mxu0 %v11165_v10  ;;  %v5109_v10 = vld [vmem:[#allocation4 + $0x8] sm:$0xff] }
0x15a4   : > { %v4785_v33 = vmul.f32 %v8030_v49, %v4768_v35  ;;  %v4777_v41 = vsel %vm4776_vm10, %v8028_v43, %v4773_v18  ;;  %vm4790_vm11 = vweird.f32 %v8030_v49  ;;  %v5114_v59 = vmul.f32 %v10400_v24, %v5109_v10 }
0x15a5   : > { %4551 = vrot.lane.b32.xlu0 %v10241_v52, %s8619_s24  ;;  %vm4791_vm0 = vmor %vm4789_vm15, %vm4790_vm11  ;;  %v4782_v29 = vsel %vm4779_vm12, %v4781_v17, %v4777_v41 }
0x15a6   : > { %v4786_v48 = vsub.f32 1.0, %v4785_v33  ;;  %v4783_v52 = vmul.f32 %v10294_v63, %v4782_v29 }
0x15a8   : > { %v4787_v6 = vmul.f32 %v8030_v49, %v4786_v48 }
0x15aa   : > { %v4788_v47 = vadd.f32 %v8030_v49, %v4787_v6 }
0x15ac   : > { %v4792_v21 = vsel %vm4791_vm0, %v8030_v49, %v4788_v47  ;;  %v5113_v49 = vmul.f32 %v10400_v24, %v5108_v19 }
0x15ad   : > { %v4797_v11 = vsel %vm4794_vm4, %v4796_v46, %v4792_v21 }
0x15ae   : > { %v4798_v36 = vmul.f32 %v10300_v8, %v4797_v11 }
0x15b0   : > { %v4799_v25 = vpack.c.bf16 %v4798_v36, %v4783_v52 }
0x15b2   : > { %7080 = vmatmul.msk.bf16.vlgmr.msrb.gmra.mxu0 %vm1620_vm14, %v4799_v25 }
0x15bb   : > { %v4681_v28 = vpop.xlane.xlu1 %4680 }
0x15bc   : > { %8031 = vrcp.f32 %v4681_v28  ;;  %v4696_v34 = vand.u32 2147483648, %v4681_v28  ;;  %vm4690_vm6 = vweird.f32 %v4681_v28  ;;  %v4694_v63 = vand.u32 2147483647, %v4681_v28 }
0x15be   : > { %v4697_v58 = vor.u32 1.1754944e-38, %v4696_v34  ;;  %vm4695_vm9 = vcmp.eq.f32.partialorder %v4694_v63, 8.507059e+37 }
0x15c2   : > { %v8032_v4 = vpop.eup %8031 }
0x15c3   : > { %v4686_v27 = vmul.f32 %v8032_v4, %v4681_v28  ;;  %v4684_v7 = vpop.xlane.xlu2 %4683  ;;  %vm4691_vm5 = vweird.f32 %v8032_v4 }
0x15c4   : > { %8033 = vrcp.f32 %v4684_v7  ;;  %vm10386_vm7 = vmor %vm4690_vm6, %vm4691_vm5  ;;  %v4711_v38 = vand.u32 2147483648, %v4684_v7  ;;  %v4709_v14 = vand.u32 2147483647, %v4684_v7  ;;  %vm4705_vm10 = vweird.f32 %v4684_v7 }
0x15c5   : > { %v4687_v13 = vsub.f32 1.0, %v4686_v27 }
0x15c6   : > { %v4712_v62 = vor.u32 1.1754944e-38, %v4711_v38  ;;  %vm4710_vm12 = vcmp.eq.f32.partialorder %v4709_v14, 8.507059e+37  ;;  %v5110_v38 = vld [vmem:[#allocation4 + $0x10] sm:$0xff] }
0x15c7   : > { %v4688_v31 = vmul.f32 %v8032_v4, %v4687_v13 }
0x15c9   : > { %v4689_v22 = vadd.f32 %v8032_v4, %v4688_v31 }
0x15ca   : > { %v8034_v5 = vpop.eup %8033 }
0x15cb   : > { %v4701_v51 = vmul.f32 %v8034_v5, %v4684_v7  ;;  %v4693_v56 = vsel %vm10386_vm7, %v8032_v4, %v4689_v22  ;;  %vm4706_vm8 = vweird.f32 %v8034_v5  ;;  %v4949_v50 = vpop.xlane.xlu2 %4948 }
0x15cc   : > { %vm4707_vm11 = vmor %vm4705_vm10, %vm4706_vm8  ;;  %v4698_v37 = vsel %vm4695_vm9, %v4697_v58, %v4693_v56  ;;  %8035 = vrcp.f32 %v4949_v50  ;;  %v4964_v29 = vand.u32 2147483648, %v4949_v50  ;;  %vm4958_vm0 = vweird.f32 %v4949_v50 }
0x15cd   : > { %v4702_v8 = vsub.f32 1.0, %v4701_v51  ;;  %v4699_v42 = vmul.f32 %v10313_v23, %v4698_v37  ;;  %v4962_v21 = vand.u32 2147483647, %v4949_v50  ;;  %v5115_v58 = vmul.f32 %v10400_v24, %v5110_v38 }
0x15ce   : > { %v4965_v27 = vor.u32 1.1754944e-38, %v4964_v29  ;;  %v7526_v29 = vld [vmem:[%s8921_s2 + $0x68] sm:$0xff] }
0x15cf   : > { %v4703_v30 = vmul.f32 %v8034_v5, %v4702_v8  ;;  %vm4963_vm6 = vcmp.eq.f32.partialorder %v4962_v21, 8.507059e+37  ;;  %v7525_v21 = vld [vmem:[%s8921_s2 + $0x60] sm:$0xff] }
0x15d1   : > { %v4704_v60 = vadd.f32 %v8034_v5, %v4703_v30 }
0x15d2   : > { %v8036_v9 = vpop.eup %8035 }
0x15d3   : > { %v4708_v12 = vsel %vm4707_vm11, %v8034_v5, %v4704_v60  ;;  %v4460_v0 = vpop.permute.xlu1 %4459  ;;  %v4954_v1 = vmul.f32 %v8036_v9, %v4949_v50  ;;  %vm4959_vm15 = vweird.f32 %v8036_v9 }
0x15d4   : > { %4465 = vst.msk [vmem:[#allocation6] sm:$0xff] %vm1798_vm1, %v4460_v0  ;;  %v4713_v43 = vsel %vm4710_vm12, %v4712_v62, %v4708_v12  ;;  %vm4960_vm4 = vmor %vm4958_vm0, %vm4959_vm15  ;;  %v5111_v62 = vld [vmem:[#allocation4 + $0x18] sm:$0xff] }
0x15d5   : > { %v4714_v39 = vmul.f32 %v10319_v26, %v4713_v43  ;;  %v4955_v26 = vsub.f32 1.0, %v4954_v1 }
0x15d7   : > { %v4715_v45 = vpack.c.bf16 %v4714_v39, %v4699_v42  ;;  %v4956_v44 = vmul.f32 %v8036_v9, %v4955_v26  ;;  %v5116_v39 = vmul.f32 %v10400_v24, %v5111_v62 }
0x15d9   : > { %v10397_v35 = vpop.xlane.xlu2 %4859  ;;  %7078 = vmatmul.msk.bf16.vlgmr.msra.gmra.mxu1 %vm1620_vm14, %v4715_v45  ;;  %v4957_v55 = vadd.f32 %v8036_v9, %v4956_v44 }
0x15da   : > { %vm4881_vm11 = vweird.f32 %v10397_v35  ;;  %v4887_v45 = vand.u32 2147483648, %v10397_v35  ;;  %v4885_v19 = vand.u32 2147483647, %v10397_v35 }
0x15db   : > { %v4281_v53 = vpop.f32.mrf.mxu1  ;;  %v4554_v11 = vpop.permute.xlu1 %4553  ;;  %v4961_v25 = vsel %vm4960_vm4, %v8036_v9, %v4957_v55 }
0x15dc   : > { %v4282_v61 = vadd.f32 %v4281_v53, %v9827_v15  ;;  %v4966_v31 = vsel %vm4963_vm6, %v4965_v27, %v4961_v25  ;;  %v4888_v26 = vor.u32 1.1754944e-38, %v4887_v45  ;;  %vm4886_vm0 = vcmp.eq.f32.partialorder %v4885_v19, 8.507059e+37 }
0x15dd   : > { %v4967_v51 = vmul.f32 %v10325_v20, %v4966_v31 }
0x15de   : > { %v5118_v23 = vmul.f32 %v10402_v16, %v4282_v61 }
0x15e0   : > { %v5122_v18 = vadd.f32 %v5118_v23, %v5113_v49 }
0x15e1   : > { %v4952_v33 = vpop.xlane.xlu2 %4951 }
0x15e2   : > { %8037 = vrcp.f32 %v4952_v33  ;;  %5126 = vst [vmem:[#allocation4] sm:$0xff] %v5122_v18  ;;  %v4979_v36 = vand.u32 2147483648, %v4952_v33  ;;  %v4977_v4 = vand.u32 2147483647, %v4952_v33  ;;  %vm4973_vm7 = vweird.f32 %v4952_v33 }
0x15e3   : > { %v4283_v2 = vpop.f32.mrf.mxu1  ;;  %8039 = vrcp.f32 %v10397_v35 }
0x15e4   : > { %v4284_v48 = vadd.f32 %v4283_v2, %v9827_v15  ;;  %v4980_v13 = vor.u32 1.1754944e-38, %v4979_v36  ;;  %vm4978_vm9 = vcmp.eq.f32.partialorder %v4977_v4, 8.507059e+37  ;;  %v7523_v36 = vld [vmem:[%s8921_s2 + $0x50] sm:$0xff]  ;;  %v7521_v4 = vld [vmem:[%s8921_s2 + $0x40] sm:$0xff] }
0x15e6   : > { %v5119_v41 = vmul.f32 %v10402_v16, %v4284_v48 }
0x15e8   : > { %v8038_v6 = vpop.eup %8037  ;;  %v5123_v47 = vadd.f32 %v5119_v41, %v5114_v59 }
0x15e9   : > { %v4969_v17 = vmul.f32 %v8038_v6, %v4952_v33  ;;  %v4462_v46 = vpop.permute.xlu2 %4461  ;;  %vm4974_vm5 = vweird.f32 %v8038_v6  ;;  %v8040_v8 = vpop.eup %8039 }
0x15ea   : > { %4466 = vst.msk [vmem:[#allocation6 + $0x8] sm:$0xff] %vm1798_vm1, %v4462_v46  ;;  %vm4975_vm8 = vmor %vm4973_vm7, %vm4974_vm5  ;;  %v4877_v32 = vmul.f32 %v8040_v8, %v10397_v35  ;;  %vm4882_vm10 = vweird.f32 %v8040_v8  ;;  %v7527_v46 = vld [vmem:[%s8921_s2 + $0x70] sm:$0xff] }
0x15eb   : > { %v4970_v52 = vsub.f32 1.0, %v4969_v17  ;;  %5127 = vst [vmem:[#allocation4 + $0x8] sm:$0xff] %v5123_v47  ;;  %vm10424_vm12 = vmor %vm4881_vm11, %vm4882_vm10  ;;  %v7528_v17 = vld [vmem:[%s8921_s2 + $0x78] sm:$0xff] }
0x15ec   : > { %4558 = vst.msk [vmem:[#allocation6 + $0x8] sm:$0xff] %vm1904_vm2, %v4554_v11  ;;  %v4878_v56 = vsub.f32 1.0, %v4877_v32  ;;  %5081 = vmatpush.bf16.msrb.mxu2 %v7528_v17 }
0x15ed   : > { %v4971_v28 = vmul.f32 %v8038_v6, %v4970_v52  ;;  %v7524_v52 = vld [vmem:[%s8921_s2 + $0x58] sm:$0xff] }
0x15ef   : > { %v4972_v7 = vadd.f32 %v8038_v6, %v4971_v28  ;;  %v7522_v28 = vld [vmem:[%s8921_s2 + $0x48] sm:$0xff]  ;;  %s5104_s2 = sadd.s32 2, %s10384_s17 }
0x15f0   : > { %5082 = vmatpush.bf16.msrb.mxu2 %v7527_v46  ;;  %s5105_s16 = sld [smem:[#allocation12 + %s5104_s2]] }
0x15f1   : > { %v4976_v5 = vsel %vm4975_vm8, %v8038_v6, %v4972_v7 }
0x15f2   : > { %v4981_v22 = vsel %vm4978_vm9, %v4980_v13, %v4976_v5 }
0x15f3   : > { %v4982_v34 = vmul.f32 %v10346_v40, %v4981_v22  ;;  %v4879_v40 = vmul.f32 %v8040_v8, %v4878_v56 }
0x15f4   : > { %5083 = vmatpush.bf16.msrb.mxu2 %v7526_v29 }
0x15f5   : > { %v4983_v63 = vpack.c.bf16 %v4982_v34, %v4967_v51  ;;  %v4880_v12 = vadd.f32 %v8040_v8, %v4879_v40 }
0x15f7   : > { %7084 = vmatmul.msk.bf16.vlgmr.msra.gmra.mxu0 %vm1620_vm14, %v4983_v63  ;;  %v4884_v61 = vsel %vm10424_vm12, %v8040_v8, %v4880_v12 }
0x15f8   : > { %v4889_v10 = vsel %vm4886_vm0, %v4888_v26, %v4884_v61  ;;  %5084 = vmatpush.bf16.msrb.mxu2 %v7525_v21 }
0x15f9   : > { %v4890_v44 = vmul.f32 %v10341_v57, %v4889_v10 }
0x15fc   : > { %5085 = vmatpush.bf16.msrb.mxu2 %v7524_v52 }
0x1600   : > { %5086 = vmatpush.bf16.msrb.mxu2 %v7523_v36 }
0x1603   : > { %v4286_v30 = vpop.f32.mrf.mxu1 }
0x1604   : > { %v4287_v14 = vadd.f32 %v4286_v30, %v9827_v15  ;;  %v4857_v50 = vpop.xlane.xlu0 %4856  ;;  %5087 = vmatpush.bf16.msrb.mxu2 %v7522_v28 }
0x1605   : > { %8041 = vrcp.f32 %v4857_v50  ;;  %v4872_v49 = vand.u32 2147483648, %v4857_v50  ;;  %v4870_v24 = vand.u32 2147483647, %v4857_v50  ;;  %vm4866_vm4 = vweird.f32 %v4857_v50 }
0x1606   : > { %v5120_v20 = vmul.f32 %v10402_v16, %v4287_v14 }
0x1607   : > { %v4873_v33 = vor.u32 1.1754944e-38, %v4872_v49  ;;  %vm4871_vm6 = vcmp.eq.f32.partialorder %v4870_v24, 8.507059e+37 }
0x1608   : > { %v5124_v60 = vadd.f32 %v5120_v20, %v5115_v58  ;;  %5088 = vmatpush.bf16.msrb.mxu2 %v7521_v4  ;;  %v5134_v20 = vstv %s5105_s16 }
0x160a   : > { %5128 = vst [vmem:[#allocation4 + $0x10] sm:$0xff] %v5124_v60  ;;  %v5139_v60 = vstv %s5107_s14 }
0x160b   : > { %v8042_v37 = vpop.eup %8041  ;;  %v4288_v0 = vpop.f32.mrf.mxu1 }
0x160c   : > { %v4862_v43 = vmul.f32 %v8042_v37, %v4857_v50  ;;  %v4289_v42 = vadd.f32 %v4288_v0, %v9827_v15  ;;  %vm4867_vm15 = vweird.f32 %v8042_v37  ;;  %v5130_v50 = vld [vmem:[#allocation5] sm:$0xff] }
0x160d   : > { %vm4868_vm5 = vmor %vm4866_vm4, %vm4867_vm15 }
0x160e   : > { %v4863_v53 = vsub.f32 1.0, %v4862_v43  ;;  %v5121_v1 = vmul.f32 %v10402_v16, %v4289_v42  ;;  %v5131_v43 = vld [vmem:[#allocation5 + $0x10] sm:$0xff] }
0x160f   : > { %v5136_v45 = vmul.f32 %v5134_v20, %v5131_v43 }
0x1610   : > { %v4864_v15 = vmul.f32 %v8042_v37, %v4863_v53  ;;  %v5125_v23 = vadd.f32 %v5121_v1, %v5116_v39  ;;  %v5132_v53 = vld [vmem:[#allocation5 + $0x18] sm:$0xff] }
0x1611   : > { %v5137_v49 = vmul.f32 %v5134_v20, %v5132_v53 }
0x1612   : > { %v4865_v18 = vadd.f32 %v8042_v37, %v4864_v15  ;;  %5129 = vst [vmem:[#allocation4 + $0x18] sm:$0xff] %v5125_v23  ;;  %v5133_v23 = vld [vmem:[#allocation5 + $0x8] sm:$0xff] }
0x1614   : > { %v4869_v35 = vsel %vm4868_vm5, %v8042_v37, %v4865_v18  ;;  %v5135_v37 = vmul.f32 %v5134_v20, %v5130_v50 }
0x1615   : > { %v4874_v2 = vsel %vm4871_vm6, %v4873_v33, %v4869_v35  ;;  %v5138_v33 = vmul.f32 %v5134_v20, %v5133_v23 }
0x1616   : > { %v4875_v16 = vmul.f32 %v10361_v3, %v4874_v2 }
0x1617   : > { %v4552_v48 = vpop.permute.xlu0 %4551 }
0x1618   : > { %4557 = vst.msk [vmem:[#allocation6] sm:$0xff] %vm1904_vm2, %v4552_v48  ;;  %v4891_v59 = vpack.c.bf16 %v4890_v44, %v4875_v16 }
0x161a   : > { %7082 = vmatmul.msk.bf16.vlgmr.msrb.gmra.mxu1 %vm1620_vm14, %v4891_v59 }
0x161f   : > { %v4636_v41 = vpop.f32.mrf.mxu0 }
0x1620   : > { %4643 = vrot.lane.b32.xlu2 %v4636_v41, %s8620_s29 }
0x1627   : > { %v4638_v6 = vpop.f32.mrf.mxu0 }
0x1628   : > { %4645 = vrot.lane.b32.xlu1 %v4638_v6, %s8620_s29 }
0x162f   : > { %v4812_v55 = vpop.f32.mrf.mxu0 }
0x1630   : > { %4819 = vrot.lane.b32.xlu0 %v4812_v55, %s8618_s21 }
0x1637   : > { %v4814_v3 = vpop.f32.mrf.mxu0 }
0x1638   : > { %4821 = vrot.lane.b32.xlu2 %v4814_v3, %s8618_s21 }
0x1656   : > { %v4728_v57 = vpop.f32.mrf.mxu1 }
0x1657   : > { %4733 = vst.msk [vmem:[#allocation6 + $0x10] sm:$0xff] %vm1597_vm13, %v4728_v57 }
0x165e   : > { %v4730_v47 = vpop.f32.mrf.mxu1 }
0x165f   : > { %4734 = vst.msk [vmem:[#allocation6 + $0x18] sm:$0xff] %vm1597_vm13, %v4730_v47 }
0x1674   : > { %v4996_v11 = vpop.f32.mrf.mxu0 }
0x1675   : > { %5003 = vrot.lane.b32.xlu2 %v4996_v11, %s8620_s29 }
0x167a   : > { %v4644_v25 = vpop.permute.xlu2 %4643 }
0x167b   : > { %4649 = vst.msk [vmem:[#allocation6] sm:$0xff] %vm2010_vm3, %v4644_v25 }
0x167c   : > { %v4998_v31 = vpop.f32.mrf.mxu0 }
0x1682   : > { %v5011_v51 = vld [vmem:[#allocation6] sm:$0xff] }
0x1692   : > { %v4822_v27 = vpop.permute.xlu2 %4821 }
0x1693   : > { %4826 = vst.msk [vmem:[#allocation6 + $0x18] sm:$0xff] %vm1798_vm1, %v4822_v27 }
0x1697   : > { %v4904_v7 = vpop.f32.mrf.mxu1 }
0x1698   : > { %4911 = vrot.lane.b32.xlu1 %v4904_v7, %s8619_s24 }
0x169a   : > { %v4646_v13 = vpop.permute.xlu1 %4645 }
0x169b   : > { %4650 = vst.msk [vmem:[#allocation6 + $0x8] sm:$0xff] %vm2010_vm3, %v4646_v13 }
0x169f   : > { %v4906_v5 = vpop.f32.mrf.mxu1 }
0x16a0   : > { %5005 = vrot.lane.b32.xlu1 %v4998_v31, %s8620_s29  ;;  %4913 = vrot.lane.b32.xlu0 %v4906_v5, %s8619_s24 }
0x16a2   : > { %v4820_v22 = vpop.permute.xlu0 %4819  ;;  %v5012_v34 = vld [vmem:[#allocation6 + $0x8] sm:$0xff] }
0x16a3   : > { %4825 = vst.msk [vmem:[#allocation6 + $0x10] sm:$0xff] %vm1798_vm1, %v4820_v22  ;;  %v5031_v63 = vpack.c.bf16 %v5012_v34, %v5011_v51 }
0x16a5   : > { %5089 = vmatmul.bf16.vlgmr.msrb.gmra.mxu2 %v5031_v63 }
0x16cf   : > { %v5004_v32 = vpop.permute.xlu2 %5003 }
0x170a   : > { %v4912_v8 = vpop.permute.xlu1 %4911 }
0x170b   : > { %4917 = vst.msk [vmem:[#allocation6 + $0x10] sm:$0xff] %vm1904_vm2, %v4912_v8 }
0x170c   : > { %5009 = vst.msk [vmem:[#allocation6 + $0x10] sm:$0xff] %vm2010_vm3, %v5004_v32 }
0x1712   : > { %v5006_v38 = vpop.permute.xlu1 %5005  ;;  %v4914_v56 = vpop.permute.xlu0 %4913 }
0x1713   : > { %4918 = vst.msk [vmem:[#allocation6 + $0x18] sm:$0xff] %vm1904_vm2, %v4914_v56  ;;  %v5013_v30 = vld [vmem:[#allocation6 + $0x10] sm:$0xff] }
0x1714   : > { %5010 = vst.msk [vmem:[#allocation6 + $0x18] sm:$0xff] %vm2010_vm3, %v5006_v38 }
0x171b   : > { %v5014_v14 = vld [vmem:[#allocation6 + $0x18] sm:$0xff] }
0x171c   : > { %v5032_v58 = vpack.c.bf16 %v5014_v14, %v5013_v30 }
0x171e   : > { %5094 = vmatmul.bf16.gmra.mxu2 %v5032_v58 }
0x1728   : > { %v5090_v40 = vpop.f32.mrf.mxu2 }
0x1729   : > { %v5091_v62 = vadd.f32 %v5090_v40, %v9913_v54 }
0x172b   : > { %v5140_v12 = vmul.f32 %v5139_v60, %v5091_v62 }
0x172d   : > { %v5144_v0 = vadd.f32 %v5140_v12, %v5135_v37 }
0x172f   : > { %5148 = vst [vmem:[#allocation5] sm:$0xff] %v5144_v0 }
0x1730   : > { %v5092_v42 = vpop.f32.mrf.mxu2 }
0x1731   : > { %v5093_v39 = vadd.f32 %v5092_v42, %v9913_v54 }
0x1733   : > { %v5141_v9 = vmul.f32 %v5139_v60, %v5093_v39 }
0x1735   : > { %v5145_v19 = vadd.f32 %v5141_v9, %v5136_v45 }
0x1737   : > { %5149 = vst [vmem:[#allocation5 + $0x10] sm:$0xff] %v5145_v19 }
0x17a1   : > { %v5095_v1 = vpop.f32.mrf.mxu2 }
0x17a2   : > { %v5096_v61 = vadd.f32 %v5095_v1, %v9913_v54 }
0x17a4   : > { %v5142_v15 = vmul.f32 %v5139_v60, %v5096_v61 }
0x17a6   : > { %v5146_v24 = vadd.f32 %v5142_v15, %v5137_v49 }
0x17a8   : > { %5150 = vst [vmem:[#allocation5 + $0x18] sm:$0xff] %v5146_v24 }
0x17a9   : > { %v5097_v26 = vpop.f32.mrf.mxu2 }
0x17aa   : > { %v5098_v18 = vadd.f32 %v5097_v26, %v9913_v54 }
0x17ac   : > { %v5143_v10 = vmul.f32 %v5139_v60, %v5098_v18 }
0x17ae   : > { %v5147_v35 = vadd.f32 %v5143_v10, %v5138_v33 }
0x17b0   : > { %5151 = vst [vmem:[#allocation5 + $0x8] sm:$0xff] %v5147_v35 }
0x17b1 PF: > { %v5160_v2 = vld [vmem:[#allocation5] sm:$0xff]  ;;  %v5154_v16 = vld [vmem:[#allocation4 + $0x10] sm:$0xff]  ;;  %v5155_v57 = vld [vmem:[#allocation4 + $0x18] sm:$0xff] }
0x17b2   : > { %v5152_v44 = vld [vmem:[#allocation4] sm:$0xff]  ;;  %v11171_v48 = vld [vmem:[#allocation53_spill] sm:$0xff]  ;;  %v11176_v11 = vld [vmem:[#allocation50_spill] sm:$0xff] }
0x17b3   : > { %v10469_v59 = vadd.f32 %v5160_v2, %v11171_v48  ;;  %v11172_v41 = vld [vmem:[#allocation49_spill] sm:$0xff]  ;;  %v11173_v55 = vld [vmem:[#allocation48_spill] sm:$0xff]  ;;  %v11174_v47 = vld [vmem:[#allocation55_spill] sm:$0xff] }
0x17b4   : > { %v10472_v6 = vadd.f32 %v5154_v16, %v11172_v41  ;;  %v10475_v3 = vadd.f32 %v5152_v44, %v11173_v55  ;;  %v5161_v54 = vld [vmem:[#allocation5 + $0x10] sm:$0xff]  ;;  %v5153_v17 = vld [vmem:[#allocation4 + $0x8] sm:$0xff]  ;;  %v11175_v29 = vld [vmem:[#allocation51_spill] sm:$0xff] }
0x17b5   : > { %5648 = vadd.xlane.f32.xlu2 %v10469_v59  ;;  %v10481_v46 = vadd.f32 %v5161_v54, %v11174_v47  ;;  %v10484_v21 = vadd.f32 %v5155_v57, %v11175_v29  ;;  %v10487_v52 = vadd.f32 %v5153_v17, %v11176_v11  ;;  %v5162_v36 = vld [vmem:[#allocation5 + $0x18] sm:$0xff]  ;;  %v11177_v25 = vld [vmem:[#allocation56_spill] sm:$0xff]  ;;  %v7192_v1 = vld [vmem:[%s8923_s5 + $0x70] sm:$0xf] }
0x17b6   : > { %5172 = vadd.xlane.f32.xlu1 %v10472_v6  ;;  %5168 = vadd.xlane.f32.xlu0 %v10475_v3  ;;  %v10493_v28 = vadd.f32 %v5162_v36, %v11177_v25  ;;  %v11178_v13 = vld [vmem:[#allocation52_spill] sm:$0xff]  ;;  %v11179_v50 = vld [vmem:[#allocation54_spill] sm:$0xff]  ;;  %v7543_v49 = vld [vmem:[%s8923_s5 + $0x74] sm:$0xf] }
0x17b7   : > { %v5163_v32 = vld [vmem:[#allocation5 + $0x8] sm:$0xff]  ;;  %v7544_v61 = vld [vmem:[%s8923_s5 + $0x74] sm:$0xf0]  ;;  %v7194_v24 = vld [vmem:[%s8923_s5 + $0x78] sm:$0xf0] }
0x17b8   : > { %v10513_v20 = vadd.f32 %v5163_v32, %v11179_v50  ;;  %v7193_v15 = vor.u32 %v7544_v61, %v7192_v1  ;;  %v7197_v23 = vor.u32 %v7543_v49, %v7194_v24  ;;  %v7184_v26 = vld [vmem:[%s8923_s5 + $0x60] sm:$0xf]  ;;  %v7542_v18 = vld [vmem:[%s8923_s5 + $0x64] sm:$0xf0]  ;;  %v7541_v33 = vld [vmem:[%s8923_s5 + $0x64] sm:$0xf] }
0x17b9   : > { %v7185_v10 = vor.u32 %v7542_v18, %v7184_v26  ;;  %v7186_v35 = vld [vmem:[%s8923_s5 + $0x68] sm:$0xf0]  ;;  %v7176_v16 = vld [vmem:[%s8923_s5 + $0x50] sm:$0xf]  ;;  %v7540_v44 = vld [vmem:[%s8923_s5 + $0x54] sm:$0xf0] }
0x17ba   : > { %5363 = vmatpush.bf16.msra.mxu0 %v7193_v15  ;;  %5382 = vmatpush.bf16.msra.mxu1 %v7197_v23  ;;  %v7189_v2 = vor.u32 %v7541_v33, %v7186_v35  ;;  %v7539_v48 = vld [vmem:[%s8923_s5 + $0x54] sm:$0xf]  ;;  %v7177_v41 = vor.u32 %v7540_v44, %v7176_v16  ;;  %v7178_v55 = vld [vmem:[%s8923_s5 + $0x58] sm:$0xf0]  ;;  %v7168_v57 = vld [vmem:[%s8923_s5 + $0x40] sm:$0xf] }
0x17bb   : > { %v7181_v54 = vor.u32 %v7539_v48, %v7178_v55  ;;  %v7538_v17 = vld [vmem:[%s8923_s5 + $0x44] sm:$0xf0]  ;;  %v7537_v47 = vld [vmem:[%s8923_s5 + $0x44] sm:$0xf]  ;;  %v7170_v11 = vld [vmem:[%s8923_s5 + $0x48] sm:$0xf0] }
0x17bc   : > { %v7169_v29 = vor.u32 %v7538_v17, %v7168_v57  ;;  %v7173_v36 = vor.u32 %v7537_v47, %v7170_v11  ;;  %v7160_v25 = vld [vmem:[%s8923_s5 + $0x30] sm:$0xf]  ;;  %v7154_v32 = vld [vmem:[%s8923_s5 + $0x28] sm:$0xf0]  ;;  %v7531_v50 = vld [vmem:[%s8923_s5 + $0x14] sm:$0xf] }
0x17bd   : > { %5650 = vadd.xlane.f32.xlu2 %v10481_v46  ;;  %v7138_v61 = vld [vmem:[%s8923_s5 + $0x8] sm:$0xf0]  ;;  %v7336_v15 = vld [vmem:[%s8923_s5 + $0xf0] sm:$0xf]  ;;  %v7576_v24 = vld [vmem:[%s8923_s5 + $0xf4] sm:$0xf0] }
0x17be   : > { %5174 = vadd.xlane.f32.xlu1 %v10484_v21  ;;  %5170 = vadd.xlane.f32.xlu0 %v10487_v52  ;;  %v7575_v23 = vld [vmem:[%s8923_s5 + $0xf4] sm:$0xf]  ;;  %v7337_v18 = vor.u32 %v7576_v24, %v7336_v15  ;;  %v7338_v33 = vld [vmem:[%s8923_s5 + $0xf8] sm:$0xf0]  ;;  %v7328_v55 = vld [vmem:[%s8923_s5 + $0xe0] sm:$0xf] }
0x17bf   : > { %5364 = vmatpush.bf16.msra.mxu0 %v7185_v10  ;;  %5383 = vmatpush.bf16.msra.mxu1 %v7189_v2  ;;  %v7341_v16 = vor.u32 %v7575_v23, %v7338_v33  ;;  %v7573_v11 = vld [vmem:[%s8923_s5 + $0xe4] sm:$0xf]  ;;  %v7568_v33 = vld [vmem:[%s8923_s5 + $0xb4] sm:$0xf0] }
0x17c3   : > { %5365 = vmatpush.bf16.msra.mxu0 %v7177_v41  ;;  %5384 = vmatpush.bf16.msra.mxu1 %v7181_v54  ;;  %v7574_v54 = vld [vmem:[%s8923_s5 + $0xe4] sm:$0xf0] }
0x17c5   : > { %5652 = vadd.xlane.f32.xlu2 %v10493_v28 }
0x17c7   : > { %5366 = vmatpush.bf16.msra.mxu0 %v7169_v29  ;;  %5385 = vmatpush.bf16.msra.mxu1 %v7173_v36  ;;  %v7329_v29 = vor.u32 %v7574_v54, %v7328_v55  ;;  %v7330_v36 = vld [vmem:[%s8923_s5 + $0xe8] sm:$0xf0] }
0x1828   : > { %v5649_v4 = vpop.xlane.xlu2 %5648 }
0x1829   : > { %v5173_v27 = vpop.xlane.xlu1 %5172  ;;  %v5169_v7 = vpop.xlane.xlu0 %5168  ;;  %v5656_v30 = vmul.f32 %v5649_v4, %v11178_v13  ;;  %v7536_v4 = vld [vmem:[%s8923_s5 + $0x34] sm:$0xf0] }
0x182a   : > { %v5176_v31 = vmul.f32 %v5169_v7, %v11178_v13  ;;  %v5178_v14 = vmul.f32 %v5173_v27, %v11178_v13  ;;  %v7535_v27 = vld [vmem:[%s8923_s5 + $0x34] sm:$0xf]  ;;  %v7161_v7 = vor.u32 %v7536_v4, %v7160_v25 }
0x182b   : > { %v10520_v62 = vsub.f32 %v10469_v59, %v5656_v30  ;;  %v7144_v30 = vld [vmem:[%s8923_s5 + $0x10] sm:$0xf] }
0x182c   : > { %v10498_v5 = vsub.f32 %v10475_v3, %v5176_v31  ;;  %v10523_v37 = vsub.f32 %v10472_v6, %v5178_v14  ;;  %v7162_v31 = vld [vmem:[%s8923_s5 + $0x38] sm:$0xf0]  ;;  %5367 = vmatpush.bf16.msra.mxu0 %v7161_v7  ;;  %v7532_v14 = vld [vmem:[%s8923_s5 + $0x14] sm:$0xf0] }
0x182d   : > { %v5664_v39 = vmul.f32 %v10520_v62, %v10520_v62 }
0x182e   : > { %v5184_v22 = vmul.f32 %v10498_v5, %v10498_v5  ;;  %v5186_v45 = vmul.f32 %v10523_v37, %v10523_v37 }
0x1830   : > { %5188 = vadd.xlane.f32.xlu0 %v5184_v22  ;;  %v5651_v51 = vpop.xlane.xlu2 %5650  ;;  %v7165_v22 = vor.u32 %v7535_v27, %v7162_v31  ;;  %v7333_v27 = vor.u32 %v7573_v11, %v7330_v36  ;;  %v7320_v31 = vld [vmem:[%s8923_s5 + $0xd0] sm:$0xf]  ;;  %v7566_v11 = vld [vmem:[%s8923_s5 + $0xa4] sm:$0xf0]  ;;  %v7565_v36 = vld [vmem:[%s8923_s5 + $0xa4] sm:$0xf] }
0x1831   : > { %v5175_v34 = vpop.xlane.xlu1 %5174  ;;  %v5171_v8 = vpop.xlane.xlu0 %5170  ;;  %v5657_v42 = vmul.f32 %v5651_v51, %v11178_v13  ;;  %v7152_v51 = vld [vmem:[%s8923_s5 + $0x20] sm:$0xf] }
0x1832   : > { %v5179_v63 = vmul.f32 %v5175_v34, %v11178_v13  ;;  %v5177_v38 = vmul.f32 %v5171_v8, %v11178_v13  ;;  %5386 = vmatpush.bf16.msra.mxu1 %v7165_v22  ;;  %v7534_v34 = vld [vmem:[%s8923_s5 + $0x24] sm:$0xf0]  ;;  %v7572_v22 = vld [vmem:[%s8923_s5 + $0xd4] sm:$0xf0] }
0x1833   : > { %v10538_v19 = vsub.f32 %v10481_v46, %v5657_v42  ;;  %v7153_v8 = vor.u32 %v7534_v34, %v7152_v51  ;;  %v7571_v51 = vld [vmem:[%s8923_s5 + $0xd4] sm:$0xf]  ;;  %v7321_v34 = vor.u32 %v7572_v22, %v7320_v31 }
0x1834   : > { %v10505_v56 = vsub.f32 %v10484_v21, %v5179_v63  ;;  %v10510_v58 = vsub.f32 %v10487_v52, %v5177_v38  ;;  %v7533_v63 = vld [vmem:[%s8923_s5 + $0x24] sm:$0xf]  ;;  %v11182_v31 = vld [vmem:[#allocation45_spill] sm:$0xff] }
0x1835   : > { %v5665_v53 = vmul.f32 %v10538_v19, %v10538_v19  ;;  %v7157_v38 = vor.u32 %v7533_v63, %v7154_v32  ;;  %5368 = vmatpush.bf16.msra.mxu0 %v7153_v8  ;;  %v7322_v63 = vld [vmem:[%s8923_s5 + $0xd8] sm:$0xf0]  ;;  %v7312_v8 = vld [vmem:[%s8923_s5 + $0xc0] sm:$0xf]  ;;  %v7570_v32 = vld [vmem:[%s8923_s5 + $0xc4] sm:$0xf0] }
0x1836   : > { %v5187_v40 = vmul.f32 %v10505_v56, %v10505_v56  ;;  %v5185_v60 = vmul.f32 %v10510_v58, %v10510_v58  ;;  %v10648_v22 = vperm.slane %v11182_v31, 4 }
0x1837   : > { %5387 = vmatpush.bf16.msra.mxu1 %v7157_v38 }
0x1838   : > { %5194 = vadd.xlane.f32.xlu2 %v5187_v40  ;;  %5654 = vadd.xlane.f32.xlu0 %v10513_v20  ;;  %v5653_v12 = vpop.xlane.xlu2 %5652  ;;  %v7145_v40 = vor.u32 %v7532_v14, %v7144_v30 }
0x1839   : > { %5190 = vadd.xlane.f32.xlu1 %v5185_v60  ;;  %v5658_v0 = vmul.f32 %v5653_v12, %v11178_v13  ;;  %v7146_v60 = vld [vmem:[%s8923_s5 + $0x18] sm:$0xf0] }
0x183a   : > { %5369 = vmatpush.bf16.msra.mxu0 %v7145_v40  ;;  %v7569_v40 = vld [vmem:[%s8923_s5 + $0xc4] sm:$0xf] }
0x183b   : > { %v10528_v43 = vsub.f32 %v10493_v28, %v5658_v0  ;;  %v7149_v0 = vor.u32 %v7531_v50, %v7146_v60  ;;  %v7325_v50 = vor.u32 %v7571_v51, %v7322_v63  ;;  %v7314_v60 = vld [vmem:[%s8923_s5 + $0xc8] sm:$0xf0] }
0x183d   : > { %v5666_v9 = vmul.f32 %v10528_v43, %v10528_v43  ;;  %5388 = vmatpush.bf16.msra.mxu1 %v7149_v0 }
0x1840   : > { %5672 = vadd.xlane.f32.xlu2 %v5666_v9  ;;  %5668 = vadd.xlane.f32.xlu0 %v5664_v39  ;;  %v7136_v39 = vld [vmem:[%s8923_s5] sm:$0xf]  ;;  %v7529_v9 = vld [vmem:[%s8923_s5 + $0x4] sm:$0xf] }
0x1841   : > { %5192 = vadd.xlane.f32.xlu1 %v5186_v45  ;;  %v7530_v45 = vld [vmem:[%s8923_s5 + $0x4] sm:$0xf0]  ;;  %v7141_v49 = vor.u32 %v7529_v9, %v7138_v61 }
0x1842   : > { %v7137_v1 = vor.u32 %v7530_v45, %v7136_v39 }
0x1843   : > { %5389 = vmatpush.bf16.msra.mxu1 %v7141_v49  ;;  %v7317_v49 = vor.u32 %v7569_v40, %v7314_v60  ;;  %v7290_v40 = vld [vmem:[%s8923_s5 + $0x98] sm:$0xf0] }
0x1844   : > { %5370 = vmatpush.bf16.msra.mxu0 %v7137_v1 }
0x1847   : > { %5862 = vmatpush.bf16.msrb.mxu1 %v7341_v16 }
0x1848   : > { %5843 = vmatpush.bf16.msrb.mxu0 %v7337_v18  ;;  %v7304_v18 = vld [vmem:[%s8923_s5 + $0xb0] sm:$0xf] }
0x1849   : > { %5670 = vadd.xlane.f32.xlu1 %v5665_v53  ;;  %v7305_v16 = vor.u32 %v7568_v33, %v7304_v18  ;;  %v7561_v33 = vld [vmem:[%s8923_s5 + $0x84] sm:$0xf] }
0x184b   : > { %5863 = vmatpush.bf16.msrb.mxu1 %v7333_v27  ;;  %v7298_v27 = vld [vmem:[%s8923_s5 + $0xa8] sm:$0xf0] }
0x184c   : > { %5844 = vmatpush.bf16.msrb.mxu0 %v7329_v29 }
0x184f   : > { %5864 = vmatpush.bf16.msrb.mxu1 %v7325_v50  ;;  %v7563_v50 = vld [vmem:[%s8923_s5 + $0x94] sm:$0xf] }
0x1850   : > { %5845 = vmatpush.bf16.msrb.mxu0 %v7321_v34  ;;  %v7293_v18 = vor.u32 %v7563_v50, %v7290_v40 }
0x1853   : > { %5865 = vmatpush.bf16.msrb.mxu1 %v7317_v49  ;;  %v7562_v49 = vld [vmem:[%s8923_s5 + $0x84] sm:$0xf0] }
0x18a3   : > { %v5189_v12 = vpop.xlane.xlu0 %5188 }
0x18a4   : > { %v5196_v42 = vmul.f32 %v5189_v12, %v11178_v13 }
0x18a6   : > { %v10574_v53 = vadd.f32 1e-06, %v5196_v42  ;;  %v7313_v42 = vor.u32 %v7570_v32, %v7312_v8  ;;  %v7301_v32 = vor.u32 %v7565_v36, %v7298_v27 }
0x18a8   : > { %8043 = vrsqrt.f32 %v10574_v53  ;;  %5846 = vmatpush.bf16.msrb.mxu0 %v7313_v42  ;;  %vm5210_vm14 = vweird.f32 %v10574_v53 }
0x18ab   : > { %v5195_v26 = vpop.xlane.xlu2 %5194  ;;  %v5655_v2 = vpop.xlane.xlu0 %5654 }
0x18ac   : > { %v5199_v10 = vmul.f32 %v5195_v26, %v11178_v13  ;;  %v5191_v35 = vpop.xlane.xlu1 %5190  ;;  %v5659_v48 = vmul.f32 %v5655_v2, %v11178_v13  ;;  %5847 = vmatpush.bf16.msrb.mxu0 %v7305_v16 }
0x18ad   : > { %v5197_v44 = vmul.f32 %v5191_v35, %v11178_v13 }
0x18ae   : > { %v10585_v41 = vadd.f32 1e-06, %v5199_v10  ;;  %v10589_v57 = vpop.eup %8043  ;;  %v10594_v47 = vsub.f32 %v10513_v20, %v5659_v48  ;;  %v7567_v10 = vld [vmem:[%s8923_s5 + $0xb4] sm:$0xf]  ;;  %v7296_v48 = vld [vmem:[%s8923_s5 + $0xa0] sm:$0xf] }
0x18af   : > { %v10591_v17 = vadd.f32 1e-06, %v5197_v44  ;;  %v5205_v25 = vmul.f32 %v10589_v57, %v10574_v53  ;;  %vm5211_vm13 = vweird.f32 %v10589_v57  ;;  %v7306_v44 = vld [vmem:[%s8923_s5 + $0xb8] sm:$0xf0] }
0x18b0   : > { %8045 = vrsqrt.f32 %v10585_v41  ;;  %v5667_v4 = vmul.f32 %v10594_v47, %v10594_v47  ;;  %vm10631_vm1 = vmor %vm5210_vm14, %vm5211_vm13  ;;  %v7309_v29 = vor.u32 %v7567_v10, %v7306_v44  ;;  %v7282_v10 = vld [vmem:[%s8923_s5 + $0x88] sm:$0xf0]  ;;  %vm5240_vm10 = vweird.f32 %v10585_v41 }
0x18b1   : > { %8047 = vrsqrt.f32 %v10591_v17  ;;  %v5206_v7 = vmul.f32 %v10589_v57, %v5205_v25  ;;  %vm5220_vm2 = vweird.f32 %v10591_v17 }
0x18b2   : > { %5674 = vadd.xlane.f32.xlu0 %v5667_v4  ;;  %v7297_v4 = vor.u32 %v7566_v11, %v7296_v48  ;;  %5866 = vmatpush.bf16.msrb.mxu1 %v7309_v29  ;;  %v7285_v11 = vor.u32 %v7561_v33, %v7282_v10  ;;  %v7560_v33 = vld [vmem:[%s8925_s26 + $0x78] sm:$0xff] }
0x18b3   : > { %v5207_v38 = vmul.f32 0.5, %v5206_v7  ;;  %v5669_v14 = vpop.xlane.xlu0 %5668  ;;  %5625 = vmatpush.bf16.msra.mxu3 %v7560_v33  ;;  %v7591_v33 = vld [vmem:[%s8925_s26 + $0xf0] sm:$0xff] }
0x18b4   : > { %v5193_v30 = vpop.xlane.xlu1 %5192  ;;  %v5676_v0 = vmul.f32 %v5669_v14, %v11178_v13  ;;  %v7288_v14 = vld [vmem:[%s8923_s5 + $0x90] sm:$0xf]  ;;  %5848 = vmatpush.bf16.msrb.mxu0 %v7297_v4 }
0x18b5   : > { %v5198_v12 = vmul.f32 %v5193_v30, %v11178_v13  ;;  %v5208_v45 = vsub.f32 1.5, %v5207_v38 }
0x18b6   : > { %v10615_v39 = vpop.eup %8045  ;;  %v10625_v23 = vadd.f32 1e-06, %v5676_v0  ;;  %5867 = vmatpush.bf16.msrb.mxu1 %v7301_v32 }
0x18b7   : > { %v8048_v9 = vpop.eup %8047  ;;  %v5235_v1 = vmul.f32 %v10615_v39, %v10585_v41  ;;  %v10619_v61 = vadd.f32 1e-06, %v5198_v12  ;;  %v5209_v15 = vmul.f32 %v10589_v57, %v5208_v45  ;;  %vm5241_vm11 = vweird.f32 %v10615_v39 }
0x18b8   : > { %v5215_v24 = vmul.f32 %v8048_v9, %v10591_v17  ;;  %vm5221_vm3 = vweird.f32 %v8048_v9  ;;  %v7564_v17 = vld [vmem:[%s8923_s5 + $0x94] sm:$0xf0]  ;;  %vm5242_vm15 = vmor %vm5240_vm10, %vm5241_vm11  ;;  %vm5690_vm5 = vweird.f32 %v10625_v23 }
0x18b9   : > { %8049 = vrsqrt.f32 %v10619_v61  ;;  %v5236_v2 = vmul.f32 %v10615_v39, %v5235_v1  ;;  %v5213_v54 = vsel %vm10631_vm1, %v10589_v57, %v5209_v15  ;;  %vm10653_vm7 = vmor %vm5220_vm2, %vm5221_vm3  ;;  %vm5230_vm8 = vweird.f32 %v10619_v61  ;;  %v7280_v1 = vld [vmem:[%s8923_s5 + $0x80] sm:$0xf]  ;;  %s11189_s5 = sld [smem:[#allocation38_spill]] }
0x18ba   : > { %v5216_v26 = vmul.f32 %v8048_v9, %v5215_v24  ;;  %8051 = vrsqrt.f32 %v10625_v23  ;;  %v5244_v8 = vmul.f32 %v5213_v54, %v10498_v5  ;;  %v5253_v5 = vperm.slane %v11182_v31, 5  ;;  %5868 = vmatpush.bf16.msrb.mxu1 %v7293_v18 }
0x18bb   : > { %v5237_v57 = vmul.f32 0.5, %v5236_v2 }
0x18bc   : > { %v5217_v53 = vmul.f32 0.5, %v5216_v26  ;;  %v5671_v55 = vpop.xlane.xlu1 %5670  ;;  %v5249_v45 = vmul.f32 %v10648_v22, %v5244_v8  ;;  %v7289_v26 = vor.u32 %v7564_v17, %v7288_v14 }
0x18bd   : > { %v5677_v25 = vmul.f32 %v5671_v55, %v11178_v13  ;;  %v5238_v0 = vsub.f32 1.5, %v5237_v57 }
0x18be   : > { %v5218_v7 = vsub.f32 1.5, %v5217_v53  ;;  %5849 = vmatpush.bf16.msrb.mxu0 %v7289_v26  ;;  %v5254_v48 = vadd.f32 %v5253_v5, %v5249_v45  ;;  %5869 = vmatpush.bf16.msrb.mxu1 %v7285_v11  ;;  %v5673_v45 = vpop.xlane.xlu2 %5672  ;;  %v7549_v11 = vld [vmem:[%s8925_s26 + $0x20] sm:$0xff] }
0x18bf   : > { %v8050_v51 = vpop.eup %8049  ;;  %v10657_v63 = vadd.f32 1e-06, %v5677_v25  ;;  %v5239_v16 = vmul.f32 %v10615_v39, %v5238_v0  ;;  %p7438_p4 = scmp.ne.s32.totalorder %s11189_s5, 3 }
0x18c0   : > { %v5219_v38 = vmul.f32 %v8048_v9, %v5218_v7  ;;  %v5225_v30 = vmul.f32 %v8050_v51, %v10619_v61  ;;  %v8052_v15 = vpop.eup %8051  ;;  %vm5231_vm9 = vweird.f32 %v8050_v51 }
0x18c1   : > { %8053 = vrsqrt.f32 %v10657_v63  ;;  %vm10682_vm12 = vmor %vm5230_vm8, %vm5231_vm9  ;;  %v5685_v54 = vmul.f32 %v8052_v15, %v10625_v23  ;;  %v5243_v27 = vsel %vm5242_vm15, %v10615_v39, %v5239_v16  ;;  %vm5700_vm0 = vweird.f32 %v10657_v63 }
0x18c2   : > { %v5226_v60 = vmul.f32 %v8050_v51, %v5225_v30  ;;  %v5223_v12 = vsel %vm10653_vm7, %v8048_v9, %v5219_v38  ;;  %v5247_v34 = vmul.f32 %v5243_v27, %v10505_v56  ;;  %vm5691_vm6 = vweird.f32 %v8052_v15  ;;  %v7548_v27 = vld [vmem:[%s8925_s26 + $0x18] sm:$0xff] }
0x18c3   : > { %v5245_v42 = vmul.f32 %v5223_v12, %v10510_v58  ;;  %v7281_v58 = vor.u32 %v7562_v49, %v7280_v1  ;;  %v5686_v4 = vmul.f32 %v8052_v15, %v5685_v54  ;;  %vm5692_vm14 = vmor %vm5690_vm5, %vm5691_vm6  ;;  %v5733_v23 = vperm.slane %v11182_v31, 7 }
0x18c4   : > { %v5227_v24 = vmul.f32 0.5, %v5226_v60  ;;  %v5252_v38 = vmul.f32 %v10648_v22, %v5247_v34  ;;  %v5678_v1 = vmul.f32 %v5673_v45, %v11178_v13  ;;  %v7584_v45 = vld [vmem:[%s8925_s26 + $0xb8] sm:$0xff] }
0x18c5   : > { %v5250_v9 = vmul.f32 %v10648_v22, %v5245_v42  ;;  %5850 = vmatpush.bf16.msrb.mxu0 %v7281_v58  ;;  %v5687_v8 = vmul.f32 0.5, %v5686_v4  ;;  %v7559_v58 = vld [vmem:[%s8925_s26 + $0x70] sm:$0xff] }
0x18c6   : > { %v5228_v35 = vsub.f32 1.5, %v5227_v24  ;;  %v5682_v49 = vadd.f32 1e-06, %v5678_v1  ;;  %5626 = vmatpush.bf16.msra.mxu3 %v7559_v58  ;;  %v7592_v1 = vld [vmem:[%s8925_s26 + $0xf8] sm:$0xff] }
0x18c7   : > { %v8054_v2 = vpop.eup %8053  ;;  %v5255_v53 = vadd.f32 %v5253_v5, %v5250_v9  ;;  %v5688_v30 = vsub.f32 1.5, %v5687_v8  ;;  %v7552_v9 = vld [vmem:[%s8925_s26 + $0x38] sm:$0xff] }
0x18c8   : > { %v5229_v55 = vmul.f32 %v8050_v51, %v5228_v35  ;;  %v5695_v29 = vmul.f32 %v8054_v2, %v10657_v63  ;;  %vm5701_vm4 = vweird.f32 %v8054_v2  ;;  %v5728_v63 = vperm.slane %v11182_v31, 6  ;;  %5606 = vmatpush.bf16.msra.mxu2 %v7552_v9  ;;  %v7551_v35 = vld [vmem:[%s8925_s26 + $0x30] sm:$0xff] }
0x18c9   : > { %v5274_v36 = vpack.c.bf16 %v5255_v53, %v5254_v48  ;;  %vm5702_vm13 = vmor %vm5700_vm0, %vm5701_vm4  ;;  %v5689_v14 = vmul.f32 %v8052_v15, %v5688_v30  ;;  %8055 = vrsqrt.f32 %v5682_v49  ;;  %vm5710_vm1 = vweird.f32 %v5682_v49  ;;  %v7550_v48 = vld [vmem:[%s8925_s26 + $0x28] sm:$0xff]  ;;  %v11187_v30 = vld [vmem:[#allocation46_spill] sm:$0xff] }
0x18ca   : > { %v5696_v25 = vmul.f32 %v8054_v2, %v5695_v29  ;;  %v5233_v61 = vsel %vm10682_vm12, %v8050_v51, %v5229_v55  ;;  %v7558_v53 = vld [vmem:[%s8925_s26 + $0x68] sm:$0xff]  ;;  %v7583_v9 = vld [vmem:[%s8925_s26 + $0xb0] sm:$0xff] }
0x18cb   : > { %5371 = vmatmul.bf16.vlgmr.msra.gmra.mxu0 %v5274_v36  ;;  %5390 = vmatmul.bf16.vlgmr.msra.gmra.mxu1 %v5274_v36  ;;  %v5246_v7 = vmul.f32 %v5233_v61, %v10523_v37  ;;  %v5257_v37 = vadd.f32 %v5253_v5, %v5252_v38  ;;  %v5693_v50 = vsel %vm5692_vm14, %v8052_v15, %v5689_v14  ;;  %v7557_v36 = vld [vmem:[%s8925_s26 + $0x60] sm:$0xff]  ;;  %v7546_v14 = vld [vmem:[%s8925_s26 + $0x8] sm:$0xff] }
0x18cc   : > { %v5697_v57 = vmul.f32 0.5, %v5696_v25  ;;  %v5724_v40 = vmul.f32 %v5693_v50, %v10520_v62  ;;  %5607 = vmatpush.bf16.msra.mxu2 %v7551_v35  ;;  %5627 = vmatpush.bf16.msra.mxu3 %v7558_v53 }
0x18cd   : > { %v5251_v41 = vmul.f32 %v10648_v22, %v5246_v7  ;;  %v7556_v7 = vld [vmem:[%s8925_s26 + $0x58] sm:$0xff] }
0x18ce   : > { %v5698_v32 = vsub.f32 1.5, %v5697_v57  ;;  %v5729_v12 = vmul.f32 %v5728_v63, %v5724_v40  ;;  %v7545_v40 = vld [vmem:[%s8925_s26] sm:$0xff] }
0x18cf   : > { %v5256_v51 = vadd.f32 %v5253_v5, %v5251_v41  ;;  %v8056_v62 = vpop.eup %8055  ;;  %v7547_v41 = vld [vmem:[%s8925_s26 + $0x10] sm:$0xff] }
0x18d0   : > { %v5699_v39 = vmul.f32 %v8054_v2, %v5698_v32  ;;  %v5734_v42 = vadd.f32 %v5733_v23, %v5729_v12  ;;  %vm5711_vm2 = vweird.f32 %v8056_v62  ;;  %5608 = vmatpush.bf16.msra.mxu2 %v7550_v48  ;;  %5628 = vmatpush.bf16.msra.mxu3 %v7557_v36  ;;  %v7555_v32 = vld [vmem:[%s8925_s26 + $0x50] sm:$0xff]  ;;  %v7590_v48 = vld [vmem:[%s8925_s26 + $0xe8] sm:$0xff] }
0x18d1   : > { %v5275_v56 = vpack.c.bf16 %v5257_v37, %v5256_v51  ;;  %vm5712_vm3 = vmor %vm5710_vm1, %vm5711_vm2  ;;  %v5277_v51 = vperm.slane %v11187_v30, 0 }
0x18d2   : > { %v5703_v17 = vsel %vm5702_vm13, %v8054_v2, %v5699_v39  ;;  %v5278_v39 = vperm.slane %v11187_v30, 2 }
0x18d3   : > { %v5725_v22 = vmul.f32 %v5703_v17, %v10538_v19  ;;  %v5705_v19 = vmul.f32 %v8056_v62, %v5682_v49 }
0x18d4   : > { %5609 = vmatpush.bf16.msra.mxu2 %v7549_v11  ;;  %5629 = vmatpush.bf16.msra.mxu3 %v7556_v7  ;;  %v10725_v17 = vperm.slane %v5278_v39, 0 }
0x18d5   : > { %v5730_v60 = vmul.f32 %v5728_v63, %v5725_v22  ;;  %v5706_v15 = vmul.f32 %v8056_v62, %v5705_v19 }
0x18d7   : > { %v5735_v0 = vadd.f32 %v5733_v23, %v5730_v60  ;;  %v5707_v18 = vmul.f32 0.5, %v5706_v15 }
0x18d8   : > { %5610 = vmatpush.bf16.msra.mxu2 %v7548_v27  ;;  %5630 = vmatpush.bf16.msra.mxu3 %v7555_v32  ;;  %v7589_v27 = vld [vmem:[%s8925_s26 + $0xe0] sm:$0xff] }
0x18d9   : > { %v5755_v5 = vpack.c.bf16 %v5735_v0, %v5734_v42  ;;  %v5708_v10 = vsub.f32 1.5, %v5707_v18 }
0x18db   : > { %5376 = vmatmul.bf16.gmra.mxu0 %v5275_v56  ;;  %5395 = vmatmul.bf16.gmra.mxu1 %v5275_v56  ;;  %v5709_v16 = vmul.f32 %v8056_v62, %v5708_v10  ;;  %v7554_v56 = vld [vmem:[%s8925_s26 + $0x48] sm:$0xff] }
0x18dc   : > { %5611 = vmatpush.bf16.msra.mxu2 %v7547_v41  ;;  %5631 = vmatpush.bf16.msra.mxu3 %v7554_v56  ;;  %v7579_v56 = vld [vmem:[%s8925_s26 + $0x90] sm:$0xff] }
0x18dd   : > { %v5713_v55 = vsel %vm5712_vm3, %v8056_v62, %v5709_v16 }
0x18de   : > { %v5726_v25 = vmul.f32 %v5713_v55, %v10528_v43 }
0x18e0   : > { %v5731_v34 = vmul.f32 %v5728_v63, %v5726_v25  ;;  %5612 = vmatpush.bf16.msra.mxu2 %v7546_v14 }
0x18e2   : > { %v5736_v38 = vadd.f32 %v5733_v23, %v5731_v34 }
0x18e4   : > { %5613 = vmatpush.bf16.msra.mxu2 %v7545_v40 }
0x18e8   : > { %6087 = vmatpush.bf16.msrb.mxu2 %v7584_v45 }
0x18eb   : > { %5851 = vmatmul.bf16.vlgmr.msrb.gmra.mxu0 %v5755_v5  ;;  %5870 = vmatmul.bf16.vlgmr.msrb.gmra.mxu1 %v5755_v5 }
0x18ec   : > { %6088 = vmatpush.bf16.msrb.mxu2 %v7583_v9  ;;  %v7586_v9 = vld [vmem:[%s8925_s26 + $0xc8] sm:$0xff] }
0x1925   : > { %v5675_v24 = vpop.xlane.xlu0 %5674 }
0x1926   : > { %v5679_v31 = vmul.f32 %v5675_v24, %v11178_v13 }
0x1928   : > { %v5683_v26 = vadd.f32 1e-06, %v5679_v31 }
0x192a   : > { %8057 = vrsqrt.f32 %v5683_v26  ;;  %vm5720_vm8 = vweird.f32 %v5683_v26 }
0x1930   : > { %v8058_v2 = vpop.eup %8057 }
0x1931   : > { %v5715_v44 = vmul.f32 %v8058_v2, %v5683_v26  ;;  %vm5721_vm7 = vweird.f32 %v8058_v2 }
0x1932   : > { %vm5722_vm9 = vmor %vm5720_vm8, %vm5721_vm7 }
0x1933   : > { %v5716_v13 = vmul.f32 %v8058_v2, %v5715_v44 }
0x1935   : > { %v5717_v54 = vmul.f32 0.5, %v5716_v13  ;;  %v7582_v13 = vld [vmem:[%s8925_s26 + $0xa8] sm:$0xff] }
0x1936   : > { %6089 = vmatpush.bf16.msrb.mxu2 %v7582_v13 }
0x1937   : > { %v5718_v29 = vsub.f32 1.5, %v5717_v54 }
0x1939   : > { %v5719_v61 = vmul.f32 %v8058_v2, %v5718_v29 }
0x193b   : > { %v5723_v4 = vsel %vm5722_vm9, %v8058_v2, %v5719_v61 }
0x193c   : > { %v5727_v57 = vmul.f32 %v5723_v4, %v10594_v47  ;;  %v10723_v47 = vperm.slane %v5277_v51, 0  ;;  %v7581_v4 = vld [vmem:[%s8925_s26 + $0xa0] sm:$0xff]  ;;  %v7588_v51 = vld [vmem:[%s8925_s26 + $0xd8] sm:$0xff] }
0x193d   : > { %6090 = vmatpush.bf16.msrb.mxu2 %v7581_v4 }
0x193e   : > { %v5732_v8 = vmul.f32 %v5728_v63, %v5727_v57  ;;  %v7553_v63 = vld [vmem:[%s8925_s26 + $0x40] sm:$0xff] }
0x193f   : > { %5632 = vmatpush.bf16.msra.mxu3 %v7553_v63  ;;  %v5757_v63 = vperm.slane %v11187_v30, 1 }
0x1940   : > { %v5737_v43 = vadd.f32 %v5733_v23, %v5732_v8 }
0x1942   : > { %v5756_v37 = vpack.c.bf16 %v5737_v43, %v5736_v38  ;;  %v7580_v43 = vld [vmem:[%s8925_s26 + $0x98] sm:$0xff] }
0x1943   : > { %6106 = vmatpush.bf16.msrb.mxu3 %v7592_v1  ;;  %6091 = vmatpush.bf16.msrb.mxu2 %v7580_v43 }
0x1944   : > { %5856 = vmatmul.bf16.gmra.mxu0 %v5756_v37  ;;  %5875 = vmatmul.bf16.gmra.mxu1 %v5756_v37 }
0x1947   : > { %6107 = vmatpush.bf16.msrb.mxu3 %v7591_v33  ;;  %6092 = vmatpush.bf16.msrb.mxu2 %v7579_v56  ;;  %v10797_v33 = vperm.slane %v5757_v63, 1 }
0x1948   : > { %v5372_v50 = vpop.f32.mrf.mxu0  ;;  %v5391_v22 = vpop.f32.mrf.mxu1 }
0x1949   : > { %v10730_v60 = vadd.f32 %v5372_v50, %v10723_v47  ;;  %v10733_v12 = vadd.f32 %v5391_v22, %v10725_v17  ;;  %v7587_v50 = vld [vmem:[%s8925_s26 + $0xd0] sm:$0xff] }
0x194b   : > { %v5401_v23 = vmul.f32 %v10730_v60, %v10730_v60  ;;  %v5402_v0 = vmul.f32 %v10733_v12, %v10733_v12  ;;  %6108 = vmatpush.bf16.msrb.mxu3 %v7590_v48  ;;  %v7577_v48 = vld [vmem:[%s8925_s26 + $0x80] sm:$0xff] }
0x194d   : > { %v5409_v42 = vmul.f32 %v5401_v23, %v10730_v60  ;;  %v5410_v5 = vmul.f32 %v5402_v0, %v10733_v12  ;;  %v5758_v23 = vperm.slane %v11187_v30, 3 }
0x194f   : > { %v5417_v49 = vmul.f32 0.044715, %v5409_v42  ;;  %v5418_v62 = vmul.f32 0.044715, %v5410_v5  ;;  %6109 = vmatpush.bf16.msrb.mxu3 %v7589_v27 }
0x1950   : > { %v5374_v19 = vpop.f32.mrf.mxu0  ;;  %v5393_v15 = vpop.f32.mrf.mxu1 }
0x1951   : > { %v5425_v24 = vadd.f32 %v5417_v49, %v10730_v60  ;;  %v5426_v31 = vadd.f32 %v5418_v62, %v10733_v12  ;;  %v10746_v26 = vadd.f32 %v5374_v19, %v10723_v47  ;;  %v10749_v18 = vadd.f32 %v5393_v15, %v10725_v17 }
0x1953   : > { %v5403_v10 = vmul.f32 %v10746_v26, %v10746_v26  ;;  %v5404_v35 = vmul.f32 %v10749_v18, %v10749_v18  ;;  %v5433_v58 = vmul.f32 0.7978846, %v5425_v24  ;;  %v5434_v2 = vmul.f32 0.7978846, %v5426_v31  ;;  %6110 = vmatpush.bf16.msrb.mxu3 %v7588_v51  ;;  %v7578_v31 = vld [vmem:[%s8925_s26 + $0x88] sm:$0xff] }
0x1954   : > { %6093 = vmatpush.bf16.msrb.mxu2 %v7578_v31 }
0x1955   : > { %v5411_v16 = vmul.f32 %v5403_v10, %v10746_v26  ;;  %v5412_v44 = vmul.f32 %v5404_v35, %v10749_v18  ;;  %8059 = vtanh.f32 %v5433_v58 }
0x1956   : > { %8061 = vtanh.f32 %v5434_v2  ;;  %v10801_v2 = vperm.slane %v5758_v23, 1 }
0x1957   : > { %v5419_v53 = vmul.f32 0.044715, %v5411_v16  ;;  %v5420_v55 = vmul.f32 0.044715, %v5412_v44  ;;  %6111 = vmatpush.bf16.msrb.mxu3 %v7587_v50 }
0x1958   : > { %v5377_v54 = vpop.f32.mrf.mxu0  ;;  %v5396_v29 = vpop.f32.mrf.mxu1  ;;  %6094 = vmatpush.bf16.msrb.mxu2 %v7577_v48 }
0x1959   : > { %v5427_v11 = vadd.f32 %v5419_v53, %v10746_v26  ;;  %v5428_v36 = vadd.f32 %v5420_v55, %v10749_v18  ;;  %v10764_v25 = vadd.f32 %v5377_v54, %v10723_v47  ;;  %v10767_v61 = vadd.f32 %v5396_v29, %v10725_v17  ;;  %v7585_v29 = vld [vmem:[%s8925_s26 + $0xc0] sm:$0xff] }
0x195b   : > { %v5405_v7 = vmul.f32 %v10764_v25, %v10764_v25  ;;  %v5406_v57 = vmul.f32 %v10767_v61, %v10767_v61  ;;  %v5435_v34 = vmul.f32 0.7978846, %v5427_v11  ;;  %v5436_v8 = vmul.f32 0.7978846, %v5428_v36  ;;  %v8060_v41 = vpop.eup %8059  ;;  %6112 = vmatpush.bf16.msrb.mxu3 %v7586_v9 }
0x195c   : > { %v8062_v39 = vpop.eup %8061  ;;  %v5449_v0 = vadd.f32 1.0, %v8060_v41 }
0x195d   : > { %v5413_v32 = vmul.f32 %v5405_v7, %v10764_v25  ;;  %v5414_v38 = vmul.f32 %v5406_v57, %v10767_v61  ;;  %8063 = vtanh.f32 %v5435_v34  ;;  %v5450_v49 = vadd.f32 1.0, %v8062_v39 }
0x195e   : > { %8065 = vtanh.f32 %v5436_v8  ;;  %v5457_v10 = vmul.f32 0.5, %v5449_v0 }
0x195f   : > { %v5421_v37 = vmul.f32 0.044715, %v5413_v32  ;;  %v5422_v14 = vmul.f32 0.044715, %v5414_v38  ;;  %v5458_v13 = vmul.f32 0.5, %v5450_v49  ;;  %6113 = vmatpush.bf16.msrb.mxu3 %v7585_v29 }
0x1960   : > { %v5379_v22 = vpop.f32.mrf.mxu0  ;;  %v5398_v40 = vpop.f32.mrf.mxu1  ;;  %v5465_v4 = vmul.f32 %v5457_v10, %v10730_v60 }
0x1961   : > { %v5429_v42 = vadd.f32 %v5421_v37, %v10764_v25  ;;  %v5430_v5 = vadd.f32 %v5422_v14, %v10767_v61  ;;  %v10786_v45 = vadd.f32 %v5379_v22, %v10723_v47  ;;  %v10789_v1 = vadd.f32 %v5398_v40, %v10725_v17 }
0x1962   : > { %v5466_v32 = vmul.f32 %v5458_v13, %v10733_v12 }
0x1963   : > { %v8064_v62 = vpop.eup %8063  ;;  %v5407_v19 = vmul.f32 %v10786_v45, %v10786_v45  ;;  %v5408_v15 = vmul.f32 %v10789_v1, %v10789_v1  ;;  %v5437_v30 = vmul.f32 0.7978846, %v5429_v42  ;;  %v5438_v24 = vmul.f32 0.7978846, %v5430_v5 }
0x1964   : > { %v8066_v47 = vpop.eup %8065  ;;  %v5451_v17 = vadd.f32 1.0, %v8064_v62 }
0x1965   : > { %v5415_v35 = vmul.f32 %v5407_v19, %v10786_v45  ;;  %v5416_v58 = vmul.f32 %v5408_v15, %v10789_v1  ;;  %v5452_v16 = vadd.f32 1.0, %v8066_v47  ;;  %8067 = vtanh.f32 %v5437_v30 }
0x1966   : > { %v5459_v44 = vmul.f32 0.5, %v5451_v17  ;;  %8069 = vtanh.f32 %v5438_v24 }
0x1967   : > { %v5423_v53 = vmul.f32 0.044715, %v5415_v35  ;;  %v5424_v55 = vmul.f32 0.044715, %v5416_v58  ;;  %v5460_v54 = vmul.f32 0.5, %v5452_v16 }
0x1968   : > { %v5852_v11 = vpop.f32.mrf.mxu0  ;;  %v5871_v36 = vpop.f32.mrf.mxu1  ;;  %v5467_v27 = vmul.f32 %v5459_v44, %v10746_v26 }
0x1969   : > { %v5431_v7 = vadd.f32 %v5423_v53, %v10786_v45  ;;  %v5432_v57 = vadd.f32 %v5424_v55, %v10789_v1  ;;  %v10810_v34 = vadd.f32 %v5852_v11, %v10797_v33  ;;  %v10813_v8 = vadd.f32 %v5871_v36, %v10801_v2 }
0x196a   : > { %v5505_v41 = vpack.c.bf16 %v5467_v27, %v5465_v4  ;;  %v5468_v38 = vmul.f32 %v5460_v54, %v10749_v18 }
0x196b   : > { %v5881_v60 = vmul.f32 %v10810_v34, %v10810_v34  ;;  %v5882_v26 = vmul.f32 %v10813_v8, %v10813_v8  ;;  %v5439_v43 = vmul.f32 0.7978846, %v5431_v7  ;;  %v5440_v51 = vmul.f32 0.7978846, %v5432_v57  ;;  %v8068_v39 = vpop.eup %8067 }
0x196c   : > { %5614 = vmatmul.bf16.vlgmr.msra.gmra.mxu2 %v5505_v41  ;;  %v5506_v37 = vpack.c.bf16 %v5468_v38, %v5466_v32  ;;  %v8070_v14 = vpop.eup %8069  ;;  %v5453_v63 = vadd.f32 1.0, %v8068_v39 }
0x196d   : > { %v5889_v56 = vmul.f32 %v5881_v60, %v10810_v34  ;;  %v5890_v12 = vmul.f32 %v5882_v26, %v10813_v8  ;;  %8071 = vtanh.f32 %v5439_v43  ;;  %v5454_v23 = vadd.f32 1.0, %v8070_v14 }
0x196e   : > { %5633 = vmatmul.bf16.vlgmr.msra.gmra.mxu3 %v5506_v37  ;;  %8073 = vtanh.f32 %v5440_v51  ;;  %v5461_v47 = vmul.f32 0.5, %v5453_v63 }
0x196f   : > { %v5897_v18 = vmul.f32 0.044715, %v5889_v56  ;;  %v5898_v50 = vmul.f32 0.044715, %v5890_v12  ;;  %v5462_v58 = vmul.f32 0.5, %v5454_v23 }
0x1970   : > { %v5854_v22 = vpop.f32.mrf.mxu0  ;;  %v5873_v40 = vpop.f32.mrf.mxu1  ;;  %v5469_v53 = vmul.f32 %v5461_v47, %v10764_v25 }
0x1971   : > { %v5905_v0 = vadd.f32 %v5897_v18, %v10810_v34  ;;  %v5906_v42 = vadd.f32 %v5898_v50, %v10813_v8  ;;  %v5855_v5 = vadd.f32 %v5854_v22, %v10797_v33  ;;  %v5874_v49 = vadd.f32 %v5873_v40, %v10801_v2 }
0x1972   : > { %v5470_v11 = vmul.f32 %v5462_v58, %v10767_v61 }
0x1973   : > { %v8072_v62 = vpop.eup %8071  ;;  %v5913_v19 = vmul.f32 0.7978846, %v5905_v0  ;;  %v5883_v15 = vmul.f32 %v5855_v5, %v5855_v5  ;;  %v5884_v30 = vmul.f32 %v5874_v49, %v5874_v49  ;;  %v5914_v31 = vmul.f32 0.7978846, %v5906_v42 }
0x1974   : > { %v8074_v24 = vpop.eup %8073  ;;  %v5455_v9 = vadd.f32 1.0, %v8072_v62 }
0x1975   : > { %v5891_v17 = vmul.f32 %v5883_v15, %v5855_v5  ;;  %v5892_v10 = vmul.f32 %v5884_v30, %v5874_v49  ;;  %v5456_v35 = vadd.f32 1.0, %v8074_v24  ;;  %8075 = vtanh.f32 %v5913_v19 }
0x1976   : > { %v5463_v16 = vmul.f32 0.5, %v5455_v9  ;;  %8077 = vtanh.f32 %v5914_v31 }
0x1977   : > { %v5899_v44 = vmul.f32 0.044715, %v5891_v17  ;;  %v5900_v13 = vmul.f32 0.044715, %v5892_v10  ;;  %v5464_v48 = vmul.f32 0.5, %v5456_v35 }
0x1978   : > { %v5471_v55 = vmul.f32 %v5463_v16, %v10786_v45 }
0x1979   : > { %v5907_v54 = vadd.f32 %v5899_v44, %v5855_v5  ;;  %v5908_v29 = vadd.f32 %v5900_v13, %v5874_v49  ;;  %v5472_v36 = vmul.f32 %v5464_v48, %v10789_v1 }
0x197a   : > { %v5507_v4 = vpack.c.bf16 %v5471_v55, %v5469_v53 }
0x197b   : > { %v5915_v27 = vmul.f32 0.7978846, %v5907_v54  ;;  %v5916_v7 = vmul.f32 0.7978846, %v5908_v29  ;;  %v5508_v57 = vpack.c.bf16 %v5472_v36, %v5470_v11  ;;  %v8076_v41 = vpop.eup %8075 }
0x197c   : > { %5619 = vmatmul.bf16.gmra.mxu2 %v5507_v4  ;;  %v8078_v32 = vpop.eup %8077  ;;  %v5929_v38 = vadd.f32 1.0, %v8076_v41 }
0x197d   : > { %8079 = vtanh.f32 %v5915_v27  ;;  %v5930_v25 = vadd.f32 1.0, %v8078_v32 }
0x197e   : > { %8081 = vtanh.f32 %v5916_v7  ;;  %5638 = vmatmul.bf16.gmra.mxu3 %v5508_v57  ;;  %v5937_v43 = vmul.f32 0.5, %v5929_v38 }
0x197f   : > { %v5938_v61 = vmul.f32 0.5, %v5930_v25 }
0x1980   : > { %v5945_v37 = vmul.f32 %v5937_v43, %v10810_v34 }
0x1981   : > { %v5946_v56 = vmul.f32 %v5938_v61, %v10813_v8 }
0x1983   : > { %v8080_v60 = vpop.eup %8079 }
0x1984   : > { %v8082_v45 = vpop.eup %8081  ;;  %v5931_v26 = vadd.f32 1.0, %v8080_v60 }
0x1985   : > { %v5932_v51 = vadd.f32 1.0, %v8082_v45 }
0x1986   : > { %v5939_v39 = vmul.f32 0.5, %v5931_v26 }
0x1987   : > { %v5940_v1 = vmul.f32 0.5, %v5932_v51  ;;  %v11188_v51 = vld [vmem:[#allocation47_spill] sm:$0xff] }
0x1988   : > { %v5947_v14 = vmul.f32 %v5939_v39, %v5855_v5  ;;  %v5509_v61 = vperm.slane %v11188_v51, 0 }
0x1989   : > { %v5948_v12 = vmul.f32 %v5940_v1, %v5874_v49 }
0x198a   : > { %v5986_v18 = vpack.c.bf16 %v5947_v14, %v5945_v37 }
0x198b   : > { %v5987_v50 = vpack.c.bf16 %v5948_v12, %v5946_v56 }
0x198c   : > { %6095 = vmatmul.bf16.vlgmr.msrb.gmra.mxu2 %v5986_v18 }
0x198e   : > { %6114 = vmatmul.bf16.vlgmr.msrb.gmra.mxu3 %v5987_v50 }
0x19c1   : > { %v5857_v22 = vpop.f32.mrf.mxu0  ;;  %v5876_v40 = vpop.f32.mrf.mxu1 }
0x19c2   : > { %v5858_v63 = vadd.f32 %v5857_v22, %v10797_v33  ;;  %v5877_v23 = vadd.f32 %v5876_v40, %v10801_v2 }
0x19c4   : > { %v5885_v0 = vmul.f32 %v5858_v63, %v5858_v63  ;;  %v5886_v42 = vmul.f32 %v5877_v23, %v5877_v23 }
0x19c6   : > { %v5893_v62 = vmul.f32 %v5885_v0, %v5858_v63  ;;  %v5894_v19 = vmul.f32 %v5886_v42, %v5877_v23 }
0x19c8   : > { %v5901_v15 = vmul.f32 0.044715, %v5893_v62  ;;  %v5902_v34 = vmul.f32 0.044715, %v5894_v19 }
0x19c9   : > { %v5859_v5 = vpop.f32.mrf.mxu0  ;;  %v5878_v30 = vpop.f32.mrf.mxu1 }
0x19ca   : > { %v5909_v8 = vadd.f32 %v5901_v15, %v5858_v63  ;;  %v5910_v49 = vadd.f32 %v5902_v34, %v5877_v23  ;;  %v5860_v24 = vadd.f32 %v5859_v5, %v10797_v33  ;;  %v5879_v31 = vadd.f32 %v5878_v30, %v10801_v2 }
0x19cb   : > { %v5990_v30 = vperm.slane %v11188_v51, 1 }
0x19cc   : > { %v5887_v9 = vmul.f32 %v5860_v24, %v5860_v24  ;;  %v5888_v47 = vmul.f32 %v5879_v31, %v5879_v31  ;;  %v5917_v17 = vmul.f32 0.7978846, %v5909_v8  ;;  %v5918_v10 = vmul.f32 0.7978846, %v5910_v49 }
0x19ce   : > { %v5895_v35 = vmul.f32 %v5887_v9, %v5860_v24  ;;  %v5896_v58 = vmul.f32 %v5888_v47, %v5879_v31  ;;  %8083 = vtanh.f32 %v5917_v17 }
0x19cf   : > { %8085 = vtanh.f32 %v5918_v10 }
0x19d0   : > { %v5903_v16 = vmul.f32 0.044715, %v5895_v35  ;;  %v5904_v44 = vmul.f32 0.044715, %v5896_v58 }
0x19d2   : > { %v5911_v13 = vadd.f32 %v5903_v16, %v5860_v24  ;;  %v5912_v48 = vadd.f32 %v5904_v44, %v5879_v31 }
0x19d4   : > { %v5919_v53 = vmul.f32 0.7978846, %v5911_v13  ;;  %v5920_v55 = vmul.f32 0.7978846, %v5912_v48  ;;  %v8084_v54 = vpop.eup %8083 }
0x19d5   : > { %v8086_v29 = vpop.eup %8085  ;;  %v5933_v33 = vadd.f32 1.0, %v8084_v54 }
0x19d6   : > { %8087 = vtanh.f32 %v5919_v53  ;;  %v5934_v2 = vadd.f32 1.0, %v8086_v29 }
0x19d7   : > { %8089 = vtanh.f32 %v5920_v55  ;;  %v5941_v27 = vmul.f32 0.5, %v5933_v33 }
0x19d8   : > { %v5942_v57 = vmul.f32 0.5, %v5934_v2 }
0x19d9   : > { %v5949_v38 = vmul.f32 %v5941_v27, %v5858_v63 }
0x19da   : > { %v5950_v60 = vmul.f32 %v5942_v57, %v5877_v23 }
0x19dc   : > { %v8088_v11 = vpop.eup %8087 }
0x19dd   : > { %v8090_v36 = vpop.eup %8089  ;;  %v5935_v4 = vadd.f32 1.0, %v8088_v11 }
0x19de   : > { %v5936_v7 = vadd.f32 1.0, %v8090_v36 }
0x19df   : > { %v5943_v41 = vmul.f32 0.5, %v5935_v4 }
0x19e0   : > { %v5944_v32 = vmul.f32 0.5, %v5936_v7 }
0x19e1   : > { %v5951_v25 = vmul.f32 %v5943_v41, %v5860_v24 }
0x19e2   : > { %v5952_v45 = vmul.f32 %v5944_v32, %v5879_v31 }
0x19e3   : > { %v5988_v26 = vpack.c.bf16 %v5951_v25, %v5949_v38 }
0x19e4   : > { %v5989_v43 = vpack.c.bf16 %v5952_v45, %v5950_v60 }
0x19e5   : > { %6100 = vmatmul.bf16.gmra.mxu2 %v5988_v26 }
0x19e6   : > { %6119 = vmatmul.bf16.gmra.mxu3 %v5989_v43 }
0x19ef   : > { %v5615_v39 = vpop.f32.mrf.mxu2 }
0x19f0   : > { %v5616_v1 = vadd.f32 %v5615_v39, %v5509_v61 }
0x19f1   : > { %v5634_v37 = vpop.f32.mrf.mxu3 }
0x19f2   : > { %v5635_v14 = vadd.f32 %v5634_v37, %v5616_v1 }
0x19f4   : > { %v5644_v56 = vadd.f32 %v5635_v14, %v10475_v3 }
0x19f6   : > { %6129 = vst [vmem:[#allocation2 + $0x10] sm:$0xff] %v5644_v56 }
0x19f7   : > { %v5617_v12 = vpop.f32.mrf.mxu2 }
0x19f8   : > { %v5618_v18 = vadd.f32 %v5617_v12, %v5509_v61 }
0x19f9   : > { %v5636_v50 = vpop.f32.mrf.mxu3 }
0x19fa   : > { %v5637_v22 = vadd.f32 %v5636_v50, %v5618_v18 }
0x19fc   : > { %v10840_v40 = vadd.f32 %v5637_v22, %v10487_v52 }
0x19fe   : > { %6130 = vst [vmem:[#allocation2] sm:$0xff] %v10840_v40 }
0x19ff   : > { %v5620_v63 = vpop.f32.mrf.mxu2 }
0x1a00   : > { %v5621_v23 = vadd.f32 %v5620_v63, %v5509_v61 }
0x1a01   : > { %v5639_v0 = vpop.f32.mrf.mxu3 }
0x1a02   : > { %v5640_v42 = vadd.f32 %v5639_v0, %v5621_v23 }
0x1a04   : > { %v5646_v62 = vadd.f32 %v5640_v42, %v10472_v6 }
0x1a06   : > { %6131 = vst [vmem:[#allocation2 + $0x18] sm:$0xff] %v5646_v62 }
0x1a07   : > { %v5622_v19 = vpop.f32.mrf.mxu2 }
0x1a08   : > { %v5623_v15 = vadd.f32 %v5622_v19, %v5509_v61 }
0x1a09   : > { %v5641_v3 = vpop.f32.mrf.mxu3 }
0x1a0a   : > { %v5642_v34 = vadd.f32 %v5641_v3, %v5623_v15 }
0x1a0c   : > { %v5647_v5 = vadd.f32 %v5642_v34, %v10484_v21 }
0x1a0e   : > { %6132 = vst [vmem:[#allocation2 + $0x8] sm:$0xff] %v5647_v5 }
0x1a0f   : > { %v6096_v52 = vpop.f32.mrf.mxu2 }
0x1a10   : > { %v6097_v8 = vadd.f32 %v6096_v52, %v5990_v30 }
0x1a11   : > { %v6115_v49 = vpop.f32.mrf.mxu3 }
0x1a12   : > { %v6116_v24 = vadd.f32 %v6115_v49, %v6097_v8 }
0x1a14   : > { %v6125_v31 = vadd.f32 %v6116_v24, %v10469_v59 }
0x1a16   : > { %6133 = vst [vmem:[#allocation3] sm:$0xff] %v6125_v31 }
0x1a17   : > { %v6098_v9 = vpop.f32.mrf.mxu2 }
0x1a18   : > { %v6099_v47 = vadd.f32 %v6098_v9, %v5990_v30 }
0x1a19   : > { %v6117_v6 = vpop.f32.mrf.mxu3 }
0x1a1a   : > { %v6118_v17 = vadd.f32 %v6117_v6, %v6099_v47 }
0x1a1c   : > { %v6126_v10 = vadd.f32 %v6118_v17, %v10481_v46 }
0x1a1e   : > { %6134 = vst [vmem:[#allocation3 + $0x18] sm:$0xff] %v6126_v10 }
0x1a68   : > { %v6101_v35 = vpop.f32.mrf.mxu2 }
0x1a69   : > { %v6102_v58 = vadd.f32 %v6101_v35, %v5990_v30  ;;  %v6120_v21 = vpop.f32.mrf.mxu3 }
0x1a6b   : > { %v6121_v16 = vadd.f32 %v6120_v21, %v6102_v58 }
0x1a6d   : > { %v6127_v44 = vadd.f32 %v6121_v16, %v10493_v28 }
0x1a6f   : > { %6135 = vst [vmem:[#allocation3 + $0x8] sm:$0xff] %v6127_v44 }
0x1a70   : > { %v6103_v13 = vpop.f32.mrf.mxu2 }
0x1a71   : > { %v6104_v48 = vadd.f32 %v6103_v13, %v5990_v30  ;;  %v6122_v53 = vpop.f32.mrf.mxu3 }
0x1a73   : > { %v6123_v55 = vadd.f32 %v6122_v53, %v6104_v48  ;;  %6140 = sbr.rel (%p7438_p4) target bundleno = 7068 (0x1b9c), region = 140 }
0x1a75   : > { %v6128_v59 = vadd.f32 %v6123_v55, %v10513_v20 }
0x1a77   : > { %6136 = vst [vmem:[#allocation3 + $0x10] sm:$0xff] %v6128_v59 }
0x1a78   : > { %6236 = vadd.xlane.f32.xlu2 %v6125_v31  ;;  %6146 = vadd.xlane.f32.xlu1 %v5646_v62  ;;  %v11190_v54 = vld [vmem:[#allocation52_spill] sm:$0xff] }
0x1a79   : > { %6142 = vadd.xlane.f32.xlu0 %v5644_v56  ;;  %v10904_v35 = vld [vmem:[#allocation24] sm:$0xf] }
0x1a80   : > { %6238 = vadd.xlane.f32.xlu2 %v6126_v10  ;;  %6148 = vadd.xlane.f32.xlu1 %v5647_v5 }
0x1a81   : > { %6144 = vadd.xlane.f32.xlu0 %v10840_v40 }
0x1a88   : > { %6242 = vadd.xlane.f32.xlu1 %v6128_v59 }
0x1a89   : > { %6240 = vadd.xlane.f32.xlu0 %v6127_v44 }
0x1aeb   : > { %v6237_v46 = vpop.xlane.xlu2 %6236  ;;  %v6147_v28 = vpop.xlane.xlu1 %6146 }
0x1aec   : > { %v6152_v29 = vmul.f32 %v6147_v28, %v11190_v54  ;;  %v6143_v33 = vpop.xlane.xlu0 %6142  ;;  %v6244_v45 = vmul.f32 %v6237_v46, %v11190_v54 }
0x1aed   : > { %v6150_v20 = vmul.f32 %v6143_v33, %v11190_v54  ;;  %v10912_v33 = vperm.slane %v10904_v35, 1 }
0x1aee   : > { %v10854_v2 = vsub.f32 %v5646_v62, %v6152_v29  ;;  %v10879_v39 = vsub.f32 %v6125_v31, %v6244_v45 }
0x1aef   : > { %v10856_v11 = vsub.f32 %v5644_v56, %v6150_v20 }
0x1af0   : > { %v6160_v36 = vmul.f32 %v10854_v2, %v10854_v2  ;;  %v6252_v12 = vmul.f32 %v10879_v39, %v10879_v39 }
0x1af1   : > { %v6158_v4 = vmul.f32 %v10856_v11, %v10856_v11 }
0x1af2   : > { %6166 = vadd.xlane.f32.xlu1 %v6160_v36 }
0x1af3   : > { %6162 = vadd.xlane.f32.xlu2 %v6158_v4  ;;  %v6239_v27 = vpop.xlane.xlu2 %6238  ;;  %v6149_v7 = vpop.xlane.xlu1 %6148 }
0x1af4   : > { %v6245_v57 = vmul.f32 %v6239_v27, %v11190_v54  ;;  %v6153_v41 = vmul.f32 %v6149_v7, %v11190_v54  ;;  %v6145_v32 = vpop.xlane.xlu0 %6144 }
0x1af5   : > { %v6151_v38 = vmul.f32 %v6145_v32, %v11190_v54 }
0x1af6   : > { %v10865_v25 = vsub.f32 %v6126_v10, %v6245_v57  ;;  %v10867_v60 = vsub.f32 %v5647_v5, %v6153_v41 }
0x1af7   : > { %v10871_v26 = vsub.f32 %v10840_v40, %v6151_v38 }
0x1af8   : > { %v6253_v43 = vmul.f32 %v10865_v25, %v10865_v25  ;;  %v6161_v51 = vmul.f32 %v10867_v60, %v10867_v60 }
0x1af9   : > { %v6159_v61 = vmul.f32 %v10871_v26, %v10871_v26 }
0x1afa   : > { %6258 = vadd.xlane.f32.xlu1 %v6253_v43 }
0x1afb   : > { %6168 = vadd.xlane.f32.xlu2 %v6161_v51  ;;  %6164 = vadd.xlane.f32.xlu0 %v6159_v61  ;;  %v6243_v37 = vpop.xlane.xlu1 %6242 }
0x1afc   : > { %v6241_v1 = vpop.xlane.xlu0 %6240  ;;  %v6247_v18 = vmul.f32 %v6243_v37, %v11190_v54 }
0x1afd   : > { %v6246_v14 = vmul.f32 %v6241_v1, %v11190_v54 }
0x1afe   : > { %v10889_v22 = vsub.f32 %v6128_v59, %v6247_v18  ;;  %v10909_v59 = vperm.slane %v10904_v35, 0 }
0x1aff   : > { %v10882_v56 = vsub.f32 %v6127_v44, %v6246_v14 }
0x1b00   : > { %v6255_v40 = vmul.f32 %v10889_v22, %v10889_v22 }
0x1b01   : > { %v6254_v50 = vmul.f32 %v10882_v56, %v10882_v56 }
0x1b03   : > { %6256 = vadd.xlane.f32.xlu0 %v6252_v12  ;;  %6260 = vadd.xlane.f32.xlu2 %v6254_v50 }
0x1b0b   : > { %6262 = vadd.xlane.f32.xlu0 %v6255_v40 }
0x1b65   : > { %v6167_v63 = vpop.xlane.xlu1 %6166 }
0x1b66   : > { %v6172_v23 = vmul.f32 %v6167_v63, %v11190_v54  ;;  %v6163_v0 = vpop.xlane.xlu2 %6162 }
0x1b67   : > { %v6170_v42 = vmul.f32 %v6163_v0, %v11190_v54 }
0x1b68   : > { %v6176_v62 = vadd.f32 1e-06, %v6172_v23 }
0x1b69   : > { %v6174_v19 = vadd.f32 1e-06, %v6170_v42 }
0x1b6a   : > { %8091 = vrsqrt.f32 %v6176_v62  ;;  %vm6204_vm10 = vweird.f32 %v6176_v62 }
0x1b6b   : > { %8093 = vrsqrt.f32 %v6174_v19  ;;  %vm6184_vm0 = vweird.f32 %v6174_v19 }
0x1b6d   : > { %v6259_v15 = vpop.xlane.xlu1 %6258 }
0x1b6e   : > { %v6265_v3 = vmul.f32 %v6259_v15, %v11190_v54  ;;  %v6169_v34 = vpop.xlane.xlu2 %6168  ;;  %v6165_v5 = vpop.xlane.xlu0 %6164 }
0x1b6f   : > { %v6173_v30 = vmul.f32 %v6169_v34, %v11190_v54  ;;  %v6171_v52 = vmul.f32 %v6165_v5, %v11190_v54  ;;  %v6316_v34 = vperm.slane %v10904_v35, 2 }
0x1b70   : > { %v8092_v8 = vpop.eup %8091  ;;  %v6269_v49 = vadd.f32 1e-06, %v6265_v3 }
0x1b71   : > { %v8094_v24 = vpop.eup %8093  ;;  %v6199_v31 = vmul.f32 %v8092_v8, %v6176_v62  ;;  %v10898_v9 = vadd.f32 1e-06, %v6173_v30  ;;  %v10900_v47 = vadd.f32 1e-06, %v6171_v52  ;;  %vm6205_vm11 = vweird.f32 %v8092_v8 }
0x1b72   : > { %v6179_v6 = vmul.f32 %v8094_v24, %v6174_v19  ;;  %8095 = vrsqrt.f32 %v6269_v49  ;;  %vm6185_vm12 = vweird.f32 %v8094_v24  ;;  %vm6206_vm15 = vmor %vm6204_vm10, %vm6205_vm11  ;;  %vm6288_vm5 = vweird.f32 %v6269_v49 }
0x1b73   : > { %v6200_v17 = vmul.f32 %v8092_v8, %v6199_v31  ;;  %8097 = vrsqrt.f32 %v10898_v9  ;;  %vm6186_vm4 = vmor %vm6184_vm0, %vm6185_vm12  ;;  %vm6214_vm13 = vweird.f32 %v10898_v9  ;;  %vm6194_vm7 = vweird.f32 %v10900_v47 }
0x1b74   : > { %v6180_v10 = vmul.f32 %v8094_v24, %v6179_v6  ;;  %8099 = vrsqrt.f32 %v10900_v47 }
0x1b75   : > { %v6201_v58 = vmul.f32 0.5, %v6200_v17 }
0x1b76   : > { %v6181_v21 = vmul.f32 0.5, %v6180_v10  ;;  %v6261_v16 = vpop.xlane.xlu2 %6260  ;;  %v6257_v44 = vpop.xlane.xlu0 %6256 }
0x1b77   : > { %v6202_v13 = vsub.f32 1.5, %v6201_v58  ;;  %v6266_v48 = vmul.f32 %v6261_v16, %v11190_v54  ;;  %v6264_v53 = vmul.f32 %v6257_v44, %v11190_v54 }
0x1b78   : > { %v8096_v55 = vpop.eup %8095  ;;  %v6182_v46 = vsub.f32 1.5, %v6181_v21 }
0x1b79   : > { %v8098_v28 = vpop.eup %8097  ;;  %v6203_v29 = vmul.f32 %v8092_v8, %v6202_v13  ;;  %v6283_v20 = vmul.f32 %v8096_v55, %v6269_v49  ;;  %v10914_v36 = vadd.f32 1e-06, %v6266_v48  ;;  %v10918_v57 = vadd.f32 1e-06, %v6264_v53 }
0x1b7a   : > { %v8100_v4 = vpop.eup %8099  ;;  %v6183_v27 = vmul.f32 %v8094_v24, %v6182_v46  ;;  %v6209_v7 = vmul.f32 %v8098_v28, %v10898_v9  ;;  %vm6289_vm6 = vweird.f32 %v8096_v55  ;;  %vm6215_vm1 = vweird.f32 %v8098_v28 }
0x1b7b   : > { %v6207_v41 = vsel %vm6206_vm15, %v8092_v8, %v6203_v29  ;;  %v6284_v32 = vmul.f32 %v8096_v55, %v6283_v20  ;;  %v6189_v38 = vmul.f32 %v8100_v4, %v10900_v47  ;;  %8101 = vrsqrt.f32 %v10914_v36  ;;  %vm10931_vm14 = vmor %vm6288_vm5, %vm6289_vm6 }
0x1b7c   : > { %v6220_v45 = vmul.f32 %v6207_v41, %v10854_v2  ;;  %v6187_v43 = vsel %vm6186_vm4, %v8094_v24, %v6183_v27  ;;  %v6210_v51 = vmul.f32 %v8098_v28, %v6209_v7  ;;  %8103 = vrsqrt.f32 %v10918_v57  ;;  %vm6216_vm3 = vmor %vm6214_vm13, %vm6215_vm1 }
0x1b7d   : > { %v6218_v61 = vmul.f32 %v6187_v43, %v10856_v11  ;;  %v6285_v1 = vmul.f32 0.5, %v6284_v32  ;;  %v6190_v37 = vmul.f32 %v8100_v4, %v6189_v38  ;;  %vm6195_vm2 = vweird.f32 %v8100_v4 }
0x1b7e   : > { %v6225_v14 = vmul.f32 %v10909_v59, %v6220_v45  ;;  %v6211_v12 = vmul.f32 0.5, %v6210_v51  ;;  %v6263_v18 = vpop.xlane.xlu0 %6262  ;;  %v6321_v24 = vperm.slane %v10904_v35, 3  ;;  %vm6196_vm8 = vmor %vm6194_vm7, %vm6195_vm2  ;;  %vm6298_vm9 = vweird.f32 %v10914_v36 }
0x1b7f   : > { %v6223_v50 = vmul.f32 %v10909_v59, %v6218_v61  ;;  %v6286_v2 = vsub.f32 1.5, %v6285_v1  ;;  %v6191_v40 = vmul.f32 0.5, %v6190_v37  ;;  %v6267_v63 = vmul.f32 %v6263_v18, %v11190_v54 }
0x1b80   : > { %v6230_v23 = vadd.f32 %v10912_v33, %v6225_v14  ;;  %v6212_v0 = vsub.f32 1.5, %v6211_v12  ;;  %vm6278_vm15 = vweird.f32 %v10918_v57 }
0x1b81   : > { %v6228_v42 = vadd.f32 %v10912_v33, %v6223_v50  ;;  %v6287_v62 = vmul.f32 %v8096_v55, %v6286_v2  ;;  %v6192_v19 = vsub.f32 1.5, %v6191_v40  ;;  %v6271_v15 = vadd.f32 1e-06, %v6267_v63  ;;  %v8102_v3 = vpop.eup %8101 }
0x1b82   : > { %6234 = vst [vmem:[#allocation25 + $0x10] sm:$0xff] %v6230_v23  ;;  %v6213_v54 = vmul.f32 %v8098_v28, %v6212_v0  ;;  %v6293_v52 = vmul.f32 %v8102_v3, %v10914_v36  ;;  %v8104_v8 = vpop.eup %8103  ;;  %vm6299_vm10 = vweird.f32 %v8102_v3 }
0x1b83   : > { %6232 = vst [vmem:[#allocation25] sm:$0xff] %v6228_v42  ;;  %v6291_v5 = vsel %vm10931_vm14, %v8096_v55, %v6287_v62  ;;  %v6193_v30 = vmul.f32 %v8100_v4, %v6192_v19  ;;  %8105 = vrsqrt.f32 %v6271_v15  ;;  %v6273_v9 = vmul.f32 %v8104_v8, %v10918_v57  ;;  %vm6300_vm12 = vmor %vm6298_vm9, %vm6299_vm10 }
0x1b84   : > { %v6313_v49 = vmul.f32 %v6291_v5, %v10865_v25  ;;  %v6217_v31 = vsel %vm6216_vm3, %v8098_v28, %v6213_v54  ;;  %v6294_v10 = vmul.f32 %v8102_v3, %v6293_v52  ;;  %vm6279_vm11 = vweird.f32 %v8104_v8 }
0x1b85   : > { %v6221_v6 = vmul.f32 %v6217_v31, %v10867_v60  ;;  %v6197_v17 = vsel %vm6196_vm8, %v8100_v4, %v6193_v30  ;;  %v6274_v44 = vmul.f32 %v8104_v8, %v6273_v9  ;;  %vm6280_vm0 = vmor %vm6278_vm15, %vm6279_vm11  ;;  %vm6308_vm5 = vweird.f32 %v6271_v15 }
0x1b86   : > { %v6318_v58 = vmul.f32 %v6316_v34, %v6313_v49  ;;  %v6219_v47 = vmul.f32 %v6197_v17, %v10871_v26  ;;  %v6295_v16 = vmul.f32 0.5, %v6294_v10 }
0x1b87   : > { %v6226_v21 = vmul.f32 %v10909_v59, %v6221_v6  ;;  %v6275_v60 = vmul.f32 0.5, %v6274_v44 }
0x1b88   : > { %v6323_v25 = vadd.f32 %v6321_v24, %v6318_v58  ;;  %v6224_v35 = vmul.f32 %v10909_v59, %v6219_v47  ;;  %v6296_v48 = vsub.f32 1.5, %v6295_v16 }
0x1b89   : > { %v6231_v13 = vadd.f32 %v10912_v33, %v6226_v21  ;;  %v8106_v53 = vpop.eup %8105  ;;  %v6276_v46 = vsub.f32 1.5, %v6275_v60 }
0x1b8a   : > { %6327 = vst [vmem:[#allocation26 + $0x8] sm:$0xff] %v6323_v25  ;;  %v6229_v55 = vadd.f32 %v10912_v33, %v6224_v35  ;;  %v6297_v26 = vmul.f32 %v8102_v3, %v6296_v48  ;;  %v6303_v28 = vmul.f32 %v8106_v53, %v6271_v15  ;;  %vm6309_vm4 = vweird.f32 %v8106_v53 }
0x1b8b   : > { %6235 = vst [vmem:[#allocation25 + $0x18] sm:$0xff] %v6231_v13  ;;  %v6277_v59 = vmul.f32 %v8104_v8, %v6276_v46  ;;  %vm6310_vm6 = vmor %vm6308_vm5, %vm6309_vm4 }
0x1b8c   : > { %6233 = vst [vmem:[#allocation25 + $0x8] sm:$0xff] %v6229_v55  ;;  %v6301_v29 = vsel %vm6300_vm12, %v8102_v3, %v6297_v26  ;;  %v6304_v20 = vmul.f32 %v8106_v53, %v6303_v28 }
0x1b8d   : > { %v6314_v36 = vmul.f32 %v6301_v29, %v10882_v56  ;;  %v6281_v4 = vsel %vm6280_vm0, %v8104_v8, %v6277_v59 }
0x1b8e   : > { %v6305_v27 = vmul.f32 0.5, %v6304_v20  ;;  %v6312_v33 = vmul.f32 %v6281_v4, %v10879_v39 }
0x1b8f   : > { %v6319_v7 = vmul.f32 %v6316_v34, %v6314_v36 }
0x1b90   : > { %v6306_v41 = vsub.f32 1.5, %v6305_v27  ;;  %v6317_v38 = vmul.f32 %v6316_v34, %v6312_v33 }
0x1b91   : > { %v6324_v32 = vadd.f32 %v6321_v24, %v6319_v7 }
0x1b92   : > { %v6307_v45 = vmul.f32 %v8106_v53, %v6306_v41  ;;  %v6322_v43 = vadd.f32 %v6321_v24, %v6317_v38 }
0x1b93   : > { %6328 = vst [vmem:[#allocation26 + $0x10] sm:$0xff] %v6324_v32 }
0x1b94   : > { %v6311_v51 = vsel %vm6310_vm6, %v8106_v53, %v6307_v45  ;;  %6326 = vst [vmem:[#allocation26] sm:$0xff] %v6322_v43 }
0x1b95   : > { %v6315_v57 = vmul.f32 %v6311_v51, %v10889_v22 }
0x1b97   : > { %v6320_v56 = vmul.f32 %v6316_v34, %v6315_v57 }
0x1b99   : > { %v6325_v61 = vadd.f32 %v6321_v24, %v6320_v56 }
0x1b9b   : > { %6329 = vst [vmem:[#allocation26 + $0x18] sm:$0xff] %v6325_v61 }
0x1b9c PF: > { %s11193_s26 = sld [smem:[#allocation40_spill]]  ;;  %s8621_s23 = smov [#allocation25]  }
0x1b9d   : > { %s11194_s25 = sld [smem:[#allocation80_spill]]  ;;  %s6338_s20 = sshll.u32 %s8621_s23, 4  ;;  %s6339_s20 = int_to_ptr.vmem [resolvable:$true] %s6338_s20 }
0x1b9e   : > { %s8622_s21 = smov 128   ;;  %s8623_s24 = smov 8  }
0x1b9f   : > { %s8624_s29 = smov [#allocation26]   ;;  %s11195_s15 = sld [smem:[#allocation81_spill]] }
0x1ba0   : > { %s6355_s4 = sshll.u32 %s8624_s29, 4  ;;  %s6356_s4 = int_to_ptr.vmem [resolvable:$true] %s6355_s4 }
0x1ba2   : > { %p7695_p5 = scmp.eq.s32.totalorder %s11193_s26, 3 }
0x1ba3   : > { %s6340_s30 = sshll.u32 %s11194_s25, 4  ;;  %s6341_s30 = int_to_ptr.hbm [resolvable:$true] %s6340_s30 }
0x1ba4   : > { %7636 = dma.vmem_to_hbm [thread:$0]  (%p7695_p5), %s6339_s20, 512, %s6341_s30, [#allocation9], %s8622_s21, %s8622_s21, %s8623_s24  }
0x1ba5   : > { %s6357_s8 = sshll.u32 %s11195_s15, 4  ;;  %s6358_s8 = int_to_ptr.hbm [resolvable:$true] %s6357_s8 }
0x1ba6   : > { %7638 = dma.vmem_to_hbm [thread:$0]  (%p7695_p5), %s6356_s4, 512, %s6358_s8, [#allocation27], %s8622_s21, %s8622_s21, %s8623_s24  }
0x1ba7   : > { %8572 = dma.done.wait (%p7695_p5), [#allocation9], 512  }
0x1ba8   : > { %8574 = vsyncadd (%p7695_p5), [#allocation9], 4294966784 }
0x1ba9   : > { %8576 = dma.done.wait (%p7695_p5), [#allocation27], 512  }
0x1baa   : > { %8578 = vsyncadd (%p7695_p5), [#allocation27], 4294966784 }
0x1bab PF: > { %s11196_s2 = sld [smem:[#allocation39_spill]]  ;;  %s11201_s21 = smov %s8597_s22 }
0x1bac   : > { %s11197_s18 = sld [smem:[#allocation36_spill]] }
0x1bad   : > { %s11198_s19 = sld [smem:[#allocation37_spill]] }
0x1bae   : > { %s11199_s20 = sld [smem:[#allocation44_spill]] }
0x1baf   : > { %s11200_s16 = sld [smem:[#allocation43_spill]] }
0x1bb1   : > { %s32_s23 = sadd.s32 1, %s11196_s2  }
0x1bb2   : > { %p29_p6 = scmp.ge.s32.totalorder %s32_s23, 6  }
0x1bb4   :  { %31 = sbr.rel (!%p29_p6) target bundleno = 15 (0xf), region = 242 }
0x1bb5   : > { %s11202_s22 = smov %s11200_s16 }
0x1bb9   :  { %6379 = vsyncpa [#allocation8], 1 }
0x1bba   :  { %6381 = vsyncpa [#allocation8 + $0x1], 1 }
0x1bbb   :  { %6382 = vsyncpa [#allocation15], 1 }
0x1bbc   :  { %6383 = vsyncpa [#allocation9], 1 }
0x1bbd   :  { %6385 = vsyncpa [#allocation9 + $0x1], 1 }
0x1bbe   :  { %6386 = vsyncpa [#allocation27], 1 }
0x1bbf   :  { %6387 = vsyncpa [#allocation10], 1 }
0x1bc0   :  { %6389 = vsyncpa [#allocation10 + $0x1], 1 }
0x1bc1   :  { %6390 = vsyncpa [#allocation11], 1 }
0x1bc2   :  { %6392 = vsyncpa [#allocation11 + $0x1], 1 }

</bundles_post_ra>
